<compile_context>
chip_gen: v6e
topology: v6e:2x2x1
jax: 0.10.0
libtpu: 0.0.40
codegen_flags: <defaults>
</compile_context>

<pallas_src>
import jax
import jax.numpy as jnp
from jax.experimental import pallas as pl
from jax.experimental.pallas import tpu as pltpu

# ----- static config (in_channel == 3 branch of CellCNN) -----
IN_CH = 3
C1, C2, C3 = 8, 16, 32          # conv out_channels
K = 16                          # every conv kernel_size
POOLS = (2, 2, 6)               # MaxPool1d sizes
FEAT = 16                       # feat_dim of the final Linear


def _conv_out(l):
    return l - K + 1


def _pool_out(l, p):
    return l // p


def _make_kernel(bb, L):
    """Build the kernel body for a (bb, L, IN_CH) input block."""
    L1 = _conv_out(L)
    P1 = _pool_out(L1, POOLS[0])
    L2 = _conv_out(P1)
    P2 = _pool_out(L2, POOLS[1])
    L3 = _conv_out(P2)
    P3 = _pool_out(L3, POOLS[2])

    def kernel(x_ref, w1_ref, b1_ref, w2_ref, b2_ref, w3_ref, b3_ref,
               wl_ref, bl_ref, o_ref, s1_ref, s2_ref, s3_ref):
        # Activations live as (length, channels): sequence on sublanes,
        # channels on lanes.  Each conv layer:
        #   im2col  : concat K shifted slices along lanes -> (L_out, K*Cin)
        #   matmul  : one (L_out, K*Cin) @ (K*Cin, Cout) MXU push
        #   bias+ReLU, store to VMEM scratch, then MaxPool via strided reads.
        def conv_relu(h, l_out, w_ref, b_ref, s_ref):
            cols = jnp.concatenate(
                [h[k:k + l_out, :] for k in range(K)], axis=-1)
            acc = jnp.dot(cols, w_ref[...],
                          preferred_element_type=jnp.float32)
            s_ref[...] = jnp.maximum(acc + b_ref[...], 0.0)

        def max_pool(s_ref, p_out, p):
            m = s_ref[pl.ds(0, p_out, p), :]
            for j in range(1, p):
                m = jnp.maximum(m, s_ref[pl.ds(j, p_out, p), :])
            return m

        for b in range(bb):                       # static unroll over block
            x = x_ref[b]                          # (L, IN_CH) float32
            conv_relu(x, L1, w1_ref, b1_ref, s1_ref)   # conv1 + ReLU
            p1 = max_pool(s1_ref, P1, POOLS[0])        # MaxPool1d(2)
            conv_relu(p1, L2, w2_ref, b2_ref, s2_ref)  # conv2 + ReLU
            p2 = max_pool(s2_ref, P2, POOLS[1])        # MaxPool1d(2)
            conv_relu(p2, L3, w3_ref, b3_ref, s3_ref)  # conv3 + ReLU
            p3 = max_pool(s3_ref, P3, POOLS[2])        # MaxPool1d(6)
            out = jnp.dot(p3, wl_ref[...],
                          preferred_element_type=jnp.float32) + bl_ref[...]
            o_ref[b] = out.astype(o_ref.dtype)         # Linear(32 -> FEAT)

    return kernel, (L1, P1, L2, P2, L3, P3)


def cellcnn_forward(x, params, *, batch_block=8):
    B, L, in_ch = x.shape
    assert in_ch == IN_CH
    w1, b1, w2, b2, w3, b3, wl, bl = params

    # Host-side weight packing (free layout plumbing): (K, Cin, Cout) ->
    # (K*Cin, Cout), matching the (k, cin) ordering of the in-kernel im2col.
    w1p = w1.reshape(K * IN_CH, C1)
    w2p = w2.reshape(K * C1, C2)
    w3p = w3.reshape(K * C2, C3)

    bb = min(batch_block, B)
    b_pad = ((B + bb - 1) // bb) * bb
    if b_pad != B:
        x = jnp.concatenate(
            [x, jnp.zeros((b_pad - B, L, IN_CH), x.dtype)], axis=0)

    kernel, (L1, P1, L2, P2, L3, P3) = _make_kernel(bb, L)
    assert P3 >= 1, "sequence too short for the conv/pool stack"

    def full(shape):
        return pl.BlockSpec(shape, lambda b, _s=shape: (0,) * len(_s))

    out = pl.pallas_call(
        kernel,
        out_shape=jax.ShapeDtypeStruct((b_pad, P3, FEAT), jnp.float32),
        grid=(b_pad // bb,),
        in_specs=[
            pl.BlockSpec((bb, L, IN_CH), lambda b: (b, 0, 0)),
            full((K * IN_CH, C1)), full((1, C1)),
            full((K * C1, C2)),    full((1, C2)),
            full((K * C2, C3)),    full((1, C3)),
            full((C3, FEAT)),      full((1, FEAT)),
        ],
        out_specs=pl.BlockSpec((bb, P3, FEAT), lambda b: (b, 0, 0)),
        scratch_shapes=[
            pltpu.VMEM((L1, C1), jnp.float32),
            pltpu.VMEM((L2, C2), jnp.float32),
            pltpu.VMEM((L3, C3), jnp.float32),
        ],
        compiler_params=pltpu.CompilerParams(
            dimension_semantics=("parallel",)),   # batch axis independent
    )(x, w1p, b1, w2p, b2, w3p, b3, wl, bl)
    return out[:B]


def reference_forward(x, params):
    """Pure-JAX reference mirroring the PyTorch forward (eval mode)."""
    w1, b1, w2, b2, w3, b3, wl, bl = params

    def conv_relu(h, w, bias):            # h: (B, L, Cin), w: (K, Cin, Cout)
        lo = h.shape[1] - w.shape[0] + 1
        acc = jnp.zeros((h.shape[0], lo, w.shape[2]), jnp.float32)
        for k in range(w.shape[0]):
            acc += jnp.einsum("blc,cd->bld", h[:, k:k + lo, :], w[k])
        return jnp.maximum(acc + bias, 0.0)

    def pool(h, p):
        lp = h.shape[1] // p
        return jnp.max(
            h[:, :lp * p, :].reshape(h.shape[0], lp, p, h.shape[2]), axis=2)

    h = conv_relu(x, w1, b1)
    h = pool(h, POOLS[0])
    h = conv_relu(h, w2, b2)
    h = pool(h, POOLS[1])
    h = conv_relu(h, w3, b3)
    h = pool(h, POOLS[2])
    return h @ wl + bl


def make_params(key):
    ks = jax.random.split(key, 8)

    def xavier(k, shape, fan_in, fan_out):
        std = (2.0 / (fan_in + fan_out)) ** 0.5
        return std * jax.random.normal(k, shape, jnp.float32)

    w1 = xavier(ks[0], (K, IN_CH, C1), IN_CH * K, C1 * K)
    b1 = 0.01 * jax.random.normal(ks[1], (1, C1), jnp.float32)
    w2 = xavier(ks[2], (K, C1, C2), C1 * K, C2 * K)
    b2 = 0.01 * jax.random.normal(ks[3], (1, C2), jnp.float32)
    w3 = xavier(ks[4], (K, C2, C3), C2 * K, C3 * K)
    b3 = 0.01 * jax.random.normal(ks[5], (1, C3), jnp.float32)
    wl = xavier(ks[6], (C3, FEAT), C3, FEAT)
    bl = 0.01 * jax.random.normal(ks[7], (1, FEAT), jnp.float32)
    return (w1, b1, w2, b2, w3, b3, wl, bl)


if __name__ == "__main__":
    key = jax.random.PRNGKey(0)
    k_params, k_x = jax.random.split(key)

    B, L = 2, 200                       # -> L_out = 3 after the conv/pool stack
    params = make_params(k_params)
    x = jax.random.normal(k_x, (B, L, IN_CH), jnp.float32)

    out = jax.block_until_ready(cellcnn_forward(x, params))
    ref = jax.block_until_ready(reference_forward(x, params))

    assert out.shape == ref.shape == (B, 3, FEAT), (out.shape, ref.shape)
    assert jnp.allclose(out, ref, atol=5e-3, rtol=5e-3), (
        float(jnp.max(jnp.abs(out - ref))))

    print("KERNEL_OK")
</pallas_src>

<mosaic_0001>
module attributes {stable_mosaic.version = 11 : i64} {
  func.func @kernel(%arg0: i32, %arg1: memref<2x200x3xf32, #tpu.memory_space<vmem>>, %arg2: memref<48x8xf32, #tpu.memory_space<vmem>>, %arg3: memref<1x8xf32, #tpu.memory_space<vmem>>, %arg4: memref<128x16xf32, #tpu.memory_space<vmem>>, %arg5: memref<1x16xf32, #tpu.memory_space<vmem>>, %arg6: memref<256x32xf32, #tpu.memory_space<vmem>>, %arg7: memref<1x32xf32, #tpu.memory_space<vmem>>, %arg8: memref<32x16xf32, #tpu.memory_space<vmem>>, %arg9: memref<1x16xf32, #tpu.memory_space<vmem>>, %arg10: memref<2x3x16xf32, #tpu.memory_space<vmem>>, %arg11: memref<185x8xf32, #tpu.memory_space<vmem>>, %arg12: memref<77x16xf32, #tpu.memory_space<vmem>>, %arg13: memref<23x32xf32, #tpu.memory_space<vmem>>) attributes {dimension_semantics = [#tpu.dimension_semantics<parallel>], iteration_bounds = array<i64: 1>, scalar_prefetch = 0 : i64, scratch_operands = 3 : i64, tpu.core_type = #tpu.core_type<tc>, window_params = [{transform_indices = @transform_0, window_bounds = array<i64: 2, 200, 3>}, {pipeline_mode = #tpu.pipeline_mode<synchronous>, transform_indices = @transform_1, window_bounds = array<i64: 48, 8>}, {pipeline_mode = #tpu.pipeline_mode<synchronous>, transform_indices = @transform_2, window_bounds = array<i64: 1, 8>}, {pipeline_mode = #tpu.pipeline_mode<synchronous>, transform_indices = @transform_3, window_bounds = array<i64: 128, 16>}, {pipeline_mode = #tpu.pipeline_mode<synchronous>, transform_indices = @transform_4, window_bounds = array<i64: 1, 16>}, {pipeline_mode = #tpu.pipeline_mode<synchronous>, transform_indices = @transform_5, window_bounds = array<i64: 256, 32>}, {pipeline_mode = #tpu.pipeline_mode<synchronous>, transform_indices = @transform_6, window_bounds = array<i64: 1, 32>}, {pipeline_mode = #tpu.pipeline_mode<synchronous>, transform_indices = @transform_7, window_bounds = array<i64: 32, 16>}, {pipeline_mode = #tpu.pipeline_mode<synchronous>, transform_indices = @transform_8, window_bounds = array<i64: 1, 16>}, {transform_indices = @transform_9, window_bounds = array<i64: 2, 3, 16>}]} {
    %c0 = arith.constant 0 : index
    %c0_0 = arith.constant 0 : index
    %c0_1 = arith.constant 0 : index
    %0 = vector.load %arg1[%c0, %c0_0, %c0_1] : memref<2x200x3xf32, #tpu.memory_space<vmem>>, vector<1x200x3xf32>
    %1 = vector.shape_cast %0 : vector<1x200x3xf32> to vector<200x3xf32>
    %2 = vector.extract_strided_slice %1 {offsets = [0, 0], sizes = [185, 3], strides = [1, 1]} : vector<200x3xf32> to vector<185x3xf32>
    %3 = vector.extract_strided_slice %1 {offsets = [1, 0], sizes = [185, 3], strides = [1, 1]} : vector<200x3xf32> to vector<185x3xf32>
    %4 = vector.extract_strided_slice %1 {offsets = [2, 0], sizes = [185, 3], strides = [1, 1]} : vector<200x3xf32> to vector<185x3xf32>
    %5 = vector.extract_strided_slice %1 {offsets = [3, 0], sizes = [185, 3], strides = [1, 1]} : vector<200x3xf32> to vector<185x3xf32>
    %6 = vector.extract_strided_slice %1 {offsets = [4, 0], sizes = [185, 3], strides = [1, 1]} : vector<200x3xf32> to vector<185x3xf32>
    %7 = vector.extract_strided_slice %1 {offsets = [5, 0], sizes = [185, 3], strides = [1, 1]} : vector<200x3xf32> to vector<185x3xf32>
    %8 = vector.extract_strided_slice %1 {offsets = [6, 0], sizes = [185, 3], strides = [1, 1]} : vector<200x3xf32> to vector<185x3xf32>
    %9 = vector.extract_strided_slice %1 {offsets = [7, 0], sizes = [185, 3], strides = [1, 1]} : vector<200x3xf32> to vector<185x3xf32>
    %10 = vector.extract_strided_slice %1 {offsets = [8, 0], sizes = [185, 3], strides = [1, 1]} : vector<200x3xf32> to vector<185x3xf32>
    %11 = vector.extract_strided_slice %1 {offsets = [9, 0], sizes = [185, 3], strides = [1, 1]} : vector<200x3xf32> to vector<185x3xf32>
    %12 = vector.extract_strided_slice %1 {offsets = [10, 0], sizes = [185, 3], strides = [1, 1]} : vector<200x3xf32> to vector<185x3xf32>
    %13 = vector.extract_strided_slice %1 {offsets = [11, 0], sizes = [185, 3], strides = [1, 1]} : vector<200x3xf32> to vector<185x3xf32>
    %14 = vector.extract_strided_slice %1 {offsets = [12, 0], sizes = [185, 3], strides = [1, 1]} : vector<200x3xf32> to vector<185x3xf32>
    %15 = vector.extract_strided_slice %1 {offsets = [13, 0], sizes = [185, 3], strides = [1, 1]} : vector<200x3xf32> to vector<185x3xf32>
    %16 = vector.extract_strided_slice %1 {offsets = [14, 0], sizes = [185, 3], strides = [1, 1]} : vector<200x3xf32> to vector<185x3xf32>
    %17 = vector.extract_strided_slice %1 {offsets = [15, 0], sizes = [185, 3], strides = [1, 1]} : vector<200x3xf32> to vector<185x3xf32>
    %18 = tpu.concatenate %2, %3, %4, %5, %6, %7, %8, %9, %10, %11, %12, %13, %14, %15, %16, %17 in 1 : vector<185x3xf32>, vector<185x3xf32>, vector<185x3xf32>, vector<185x3xf32>, vector<185x3xf32>, vector<185x3xf32>, vector<185x3xf32>, vector<185x3xf32>, vector<185x3xf32>, vector<185x3xf32>, vector<185x3xf32>, vector<185x3xf32>, vector<185x3xf32>, vector<185x3xf32>, vector<185x3xf32>, vector<185x3xf32> -> vector<185x48xf32>
    %c0_2 = arith.constant 0 : index
    %c0_3 = arith.constant 0 : index
    %19 = vector.load %arg2[%c0_2, %c0_3] : memref<48x8xf32, #tpu.memory_space<vmem>>, vector<48x8xf32>
    %cst = arith.constant dense<0.000000e+00> : vector<185x8xf32>
    %20 = tpu.matmul %18, %19, %cst {dimension_numbers = #tpu.dot_dimension_numbers<[1], [0], [0], [1], [0, 0, 1, 1], [], []>} : vector<185x48xf32>, vector<48x8xf32>, vector<185x8xf32> -> vector<185x8xf32>
    %c0_4 = arith.constant 0 : index
    %c0_5 = arith.constant 0 : index
    %21 = vector.load %arg3[%c0_4, %c0_5] : memref<1x8xf32, #tpu.memory_space<vmem>>, vector<1x8xf32>
    %22 = vector.broadcast %21 : vector<1x8xf32> to vector<185x8xf32>
    %23 = arith.addf %20, %22 : vector<185x8xf32>
    %cst_6 = arith.constant 0.000000e+00 : f32
    %24 = vector.broadcast %cst_6 : f32 to vector<185x8xf32>
    %25 = arith.maximumf %23, %24 : vector<185x8xf32>
    %c0_7 = arith.constant 0 : index
    %c0_8 = arith.constant 0 : index
    %26 = vector.load %arg11[%c0_7, %c0_8] : memref<185x8xf32, #tpu.memory_space<vmem>>, vector<185x8xf32>
    tpu.vector_store %arg11[%c0_7, %c0_8], %25 {strides = array<i32>} : memref<185x8xf32, #tpu.memory_space<vmem>>, vector<185x8xf32>,
    %c0_9 = arith.constant 0 : index
    %c0_10 = arith.constant 0 : index
    %27 = tpu.strided_load %arg11[%c0_9, %c0_10] {strides = array<i32: 2, 1>} : memref<185x8xf32, #tpu.memory_space<vmem>>, vector<92x8xf32>
    %c1 = arith.constant 1 : index
    %c0_11 = arith.constant 0 : index
    %28 = tpu.strided_load %arg11[%c1, %c0_11] {strides = array<i32: 2, 1>} : memref<185x8xf32, #tpu.memory_space<vmem>>, vector<92x8xf32>
    %29 = arith.maximumf %27, %28 : vector<92x8xf32>
    %30 = vector.extract_strided_slice %29 {offsets = [0, 0], sizes = [77, 8], strides = [1, 1]} : vector<92x8xf32> to vector<77x8xf32>
    %31 = vector.extract_strided_slice %29 {offsets = [1, 0], sizes = [77, 8], strides = [1, 1]} : vector<92x8xf32> to vector<77x8xf32>
    %32 = vector.extract_strided_slice %29 {offsets = [2, 0], sizes = [77, 8], strides = [1, 1]} : vector<92x8xf32> to vector<77x8xf32>
    %33 = vector.extract_strided_slice %29 {offsets = [3, 0], sizes = [77, 8], strides = [1, 1]} : vector<92x8xf32> to vector<77x8xf32>
    %34 = vector.extract_strided_slice %29 {offsets = [4, 0], sizes = [77, 8], strides = [1, 1]} : vector<92x8xf32> to vector<77x8xf32>
    %35 = vector.extract_strided_slice %29 {offsets = [5, 0], sizes = [77, 8], strides = [1, 1]} : vector<92x8xf32> to vector<77x8xf32>
    %36 = vector.extract_strided_slice %29 {offsets = [6, 0], sizes = [77, 8], strides = [1, 1]} : vector<92x8xf32> to vector<77x8xf32>
    %37 = vector.extract_strided_slice %29 {offsets = [7, 0], sizes = [77, 8], strides = [1, 1]} : vector<92x8xf32> to vector<77x8xf32>
    %38 = vector.extract_strided_slice %29 {offsets = [8, 0], sizes = [77, 8], strides = [1, 1]} : vector<92x8xf32> to vector<77x8xf32>
    %39 = vector.extract_strided_slice %29 {offsets = [9, 0], sizes = [77, 8], strides = [1, 1]} : vector<92x8xf32> to vector<77x8xf32>
    %40 = vector.extract_strided_slice %29 {offsets = [10, 0], sizes = [77, 8], strides = [1, 1]} : vector<92x8xf32> to vector<77x8xf32>
    %41 = vector.extract_strided_slice %29 {offsets = [11, 0], sizes = [77, 8], strides = [1, 1]} : vector<92x8xf32> to vector<77x8xf32>
    %42 = vector.extract_strided_slice %29 {offsets = [12, 0], sizes = [77, 8], strides = [1, 1]} : vector<92x8xf32> to vector<77x8xf32>
    %43 = vector.extract_strided_slice %29 {offsets = [13, 0], sizes = [77, 8], strides = [1, 1]} : vector<92x8xf32> to vector<77x8xf32>
    %44 = vector.extract_strided_slice %29 {offsets = [14, 0], sizes = [77, 8], strides = [1, 1]} : vector<92x8xf32> to vector<77x8xf32>
    %45 = vector.extract_strided_slice %29 {offsets = [15, 0], sizes = [77, 8], strides = [1, 1]} : vector<92x8xf32> to vector<77x8xf32>
    %46 = tpu.concatenate %30, %31, %32, %33, %34, %35, %36, %37, %38, %39, %40, %41, %42, %43, %44, %45 in 1 : vector<77x8xf32>, vector<77x8xf32>, vector<77x8xf32>, vector<77x8xf32>, vector<77x8xf32>, vector<77x8xf32>, vector<77x8xf32>, vector<77x8xf32>, vector<77x8xf32>, vector<77x8xf32>, vector<77x8xf32>, vector<77x8xf32>, vector<77x8xf32>, vector<77x8xf32>, vector<77x8xf32>, vector<77x8xf32> -> vector<77x128xf32>
    %c0_12 = arith.constant 0 : index
    %c0_13 = arith.constant 0 : index
    %47 = vector.load %arg4[%c0_12, %c0_13] : memref<128x16xf32, #tpu.memory_space<vmem>>, vector<128x16xf32>
    %cst_14 = arith.constant dense<0.000000e+00> : vector<77x16xf32>
    %48 = tpu.matmul %46, %47, %cst_14 {dimension_numbers = #tpu.dot_dimension_numbers<[1], [0], [0], [1], [0, 0, 1, 1], [], []>} : vector<77x128xf32>, vector<128x16xf32>, vector<77x16xf32> -> vector<77x16xf32>
    %c0_15 = arith.constant 0 : index
    %c0_16 = arith.constant 0 : index
    %49 = vector.load %arg5[%c0_15, %c0_16] : memref<1x16xf32, #tpu.memory_space<vmem>>, vector<1x16xf32>
    %50 = vector.broadcast %49 : vector<1x16xf32> to vector<77x16xf32>
    %51 = arith.addf %48, %50 : vector<77x16xf32>
    %cst_17 = arith.constant 0.000000e+00 : f32
    %52 = vector.broadcast %cst_17 : f32 to vector<77x16xf32>
    %53 = arith.maximumf %51, %52 : vector<77x16xf32>
    %c0_18 = arith.constant 0 : index
    %c0_19 = arith.constant 0 : index
    %54 = vector.load %arg12[%c0_18, %c0_19] : memref<77x16xf32, #tpu.memory_space<vmem>>, vector<77x16xf32>
    tpu.vector_store %arg12[%c0_18, %c0_19], %53 {strides = array<i32>} : memref<77x16xf32, #tpu.memory_space<vmem>>, vector<77x16xf32>,
    %c0_20 = arith.constant 0 : index
    %c0_21 = arith.constant 0 : index
    %55 = tpu.strided_load %arg12[%c0_20, %c0_21] {strides = array<i32: 2, 1>} : memref<77x16xf32, #tpu.memory_space<vmem>>, vector<38x16xf32>
    %c1_22 = arith.constant 1 : index
    %c0_23 = arith.constant 0 : index
    %56 = tpu.strided_load %arg12[%c1_22, %c0_23] {strides = array<i32: 2, 1>} : memref<77x16xf32, #tpu.memory_space<vmem>>, vector<38x16xf32>
    %57 = arith.maximumf %55, %56 : vector<38x16xf32>
    %58 = vector.extract_strided_slice %57 {offsets = [0, 0], sizes = [23, 16], strides = [1, 1]} : vector<38x16xf32> to vector<23x16xf32>
    %59 = vector.extract_strided_slice %57 {offsets = [1, 0], sizes = [23, 16], strides = [1, 1]} : vector<38x16xf32> to vector<23x16xf32>
    %60 = vector.extract_strided_slice %57 {offsets = [2, 0], sizes = [23, 16], strides = [1, 1]} : vector<38x16xf32> to vector<23x16xf32>
    %61 = vector.extract_strided_slice %57 {offsets = [3, 0], sizes = [23, 16], strides = [1, 1]} : vector<38x16xf32> to vector<23x16xf32>
    %62 = vector.extract_strided_slice %57 {offsets = [4, 0], sizes = [23, 16], strides = [1, 1]} : vector<38x16xf32> to vector<23x16xf32>
    %63 = vector.extract_strided_slice %57 {offsets = [5, 0], sizes = [23, 16], strides = [1, 1]} : vector<38x16xf32> to vector<23x16xf32>
    %64 = vector.extract_strided_slice %57 {offsets = [6, 0], sizes = [23, 16], strides = [1, 1]} : vector<38x16xf32> to vector<23x16xf32>
    %65 = vector.extract_strided_slice %57 {offsets = [7, 0], sizes = [23, 16], strides = [1, 1]} : vector<38x16xf32> to vector<23x16xf32>
    %66 = vector.extract_strided_slice %57 {offsets = [8, 0], sizes = [23, 16], strides = [1, 1]} : vector<38x16xf32> to vector<23x16xf32>
    %67 = vector.extract_strided_slice %57 {offsets = [9, 0], sizes = [23, 16], strides = [1, 1]} : vector<38x16xf32> to vector<23x16xf32>
    %68 = vector.extract_strided_slice %57 {offsets = [10, 0], sizes = [23, 16], strides = [1, 1]} : vector<38x16xf32> to vector<23x16xf32>
    %69 = vector.extract_strided_slice %57 {offsets = [11, 0], sizes = [23, 16], strides = [1, 1]} : vector<38x16xf32> to vector<23x16xf32>
    %70 = vector.extract_strided_slice %57 {offsets = [12, 0], sizes = [23, 16], strides = [1, 1]} : vector<38x16xf32> to vector<23x16xf32>
    %71 = vector.extract_strided_slice %57 {offsets = [13, 0], sizes = [23, 16], strides = [1, 1]} : vector<38x16xf32> to vector<23x16xf32>
    %72 = vector.extract_strided_slice %57 {offsets = [14, 0], sizes = [23, 16], strides = [1, 1]} : vector<38x16xf32> to vector<23x16xf32>
    %73 = vector.extract_strided_slice %57 {offsets = [15, 0], sizes = [23, 16], strides = [1, 1]} : vector<38x16xf32> to vector<23x16xf32>
    %74 = tpu.concatenate %58, %59, %60, %61, %62, %63, %64, %65, %66, %67, %68, %69, %70, %71, %72, %73 in 1 : vector<23x16xf32>, vector<23x16xf32>, vector<23x16xf32>, vector<23x16xf32>, vector<23x16xf32>, vector<23x16xf32>, vector<23x16xf32>, vector<23x16xf32>, vector<23x16xf32>, vector<23x16xf32>, vector<23x16xf32>, vector<23x16xf32>, vector<23x16xf32>, vector<23x16xf32>, vector<23x16xf32>, vector<23x16xf32> -> vector<23x256xf32>
    %c0_24 = arith.constant 0 : index
    %c0_25 = arith.constant 0 : index
    %75 = vector.load %arg6[%c0_24, %c0_25] : memref<256x32xf32, #tpu.memory_space<vmem>>, vector<256x32xf32>
    %cst_26 = arith.constant dense<0.000000e+00> : vector<23x32xf32>
    %76 = tpu.matmul %74, %75, %cst_26 {dimension_numbers = #tpu.dot_dimension_numbers<[1], [0], [0], [1], [0, 0, 1, 1], [], []>} : vector<23x256xf32>, vector<256x32xf32>, vector<23x32xf32> -> vector<23x32xf32>
    %c0_27 = arith.constant 0 : index
    %c0_28 = arith.constant 0 : index
    %77 = vector.load %arg7[%c0_27, %c0_28] : memref<1x32xf32, #tpu.memory_space<vmem>>, vector<1x32xf32>
    %78 = vector.broadcast %77 : vector<1x32xf32> to vector<23x32xf32>
    %79 = arith.addf %76, %78 : vector<23x32xf32>
    %cst_29 = arith.constant 0.000000e+00 : f32
    %80 = vector.broadcast %cst_29 : f32 to vector<23x32xf32>
    %81 = arith.maximumf %79, %80 : vector<23x32xf32>
    %c0_30 = arith.constant 0 : index
    %c0_31 = arith.constant 0 : index
    %82 = vector.load %arg13[%c0_30, %c0_31] : memref<23x32xf32, #tpu.memory_space<vmem>>, vector<23x32xf32>
    tpu.vector_store %arg13[%c0_30, %c0_31], %81 {strides = array<i32>} : memref<23x32xf32, #tpu.memory_space<vmem>>, vector<23x32xf32>,
    %c0_32 = arith.constant 0 : index
    %c0_33 = arith.constant 0 : index
    %83 = tpu.strided_load %arg13[%c0_32, %c0_33] {strides = array<i32: 6, 1>} : memref<23x32xf32, #tpu.memory_space<vmem>>, vector<3x32xf32>
    %c1_34 = arith.constant 1 : index
    %c0_35 = arith.constant 0 : index
    %84 = tpu.strided_load %arg13[%c1_34, %c0_35] {strides = array<i32: 6, 1>} : memref<23x32xf32, #tpu.memory_space<vmem>>, vector<3x32xf32>
    %85 = arith.maximumf %83, %84 : vector<3x32xf32>
    %c2 = arith.constant 2 : index
    %c0_36 = arith.constant 0 : index
    %86 = tpu.strided_load %arg13[%c2, %c0_36] {strides = array<i32: 6, 1>} : memref<23x32xf32, #tpu.memory_space<vmem>>, vector<3x32xf32>
    %87 = arith.maximumf %85, %86 : vector<3x32xf32>
    %c3 = arith.constant 3 : index
    %c0_37 = arith.constant 0 : index
    %88 = tpu.strided_load %arg13[%c3, %c0_37] {strides = array<i32: 6, 1>} : memref<23x32xf32, #tpu.memory_space<vmem>>, vector<3x32xf32>
    %89 = arith.maximumf %87, %88 : vector<3x32xf32>
    %c4 = arith.constant 4 : index
    %c0_38 = arith.constant 0 : index
    %90 = tpu.strided_load %arg13[%c4, %c0_38] {strides = array<i32: 6, 1>} : memref<23x32xf32, #tpu.memory_space<vmem>>, vector<3x32xf32>
    %91 = arith.maximumf %89, %90 : vector<3x32xf32>
    %c5 = arith.constant 5 : index
    %c0_39 = arith.constant 0 : index
    %92 = tpu.strided_load %arg13[%c5, %c0_39] {strides = array<i32: 6, 1>} : memref<23x32xf32, #tpu.memory_space<vmem>>, vector<3x32xf32>
    %93 = arith.maximumf %91, %92 : vector<3x32xf32>
    %c0_40 = arith.constant 0 : index
    %c0_41 = arith.constant 0 : index
    %94 = vector.load %arg8[%c0_40, %c0_41] : memref<32x16xf32, #tpu.memory_space<vmem>>, vector<32x16xf32>
    %cst_42 = arith.constant dense<0.000000e+00> : vector<3x16xf32>
    %95 = tpu.matmul %93, %94, %cst_42 {dimension_numbers = #tpu.dot_dimension_numbers<[1], [0], [0], [1], [0, 0, 1, 1], [], []>} : vector<3x32xf32>, vector<32x16xf32>, vector<3x16xf32> -> vector<3x16xf32>
    %c0_43 = arith.constant 0 : index
    %c0_44 = arith.constant 0 : index
    %96 = vector.load %arg9[%c0_43, %c0_44] : memref<1x16xf32, #tpu.memory_space<vmem>>, vector<1x16xf32>
    %97 = vector.broadcast %96 : vector<1x16xf32> to vector<3x16xf32>
    %98 = arith.addf %95, %97 : vector<3x16xf32>
    %c0_45 = arith.constant 0 : index
    %c0_46 = arith.constant 0 : index
    %c0_47 = arith.constant 0 : index
    %99 = vector.load %arg10[%c0_45, %c0_46, %c0_47] : memref<2x3x16xf32, #tpu.memory_space<vmem>>, vector<1x3x16xf32>
    %100 = vector.shape_cast %99 : vector<1x3x16xf32> to vector<3x16xf32>
    %101 = vector.shape_cast %98 : vector<3x16xf32> to vector<1x3x16xf32>
    tpu.vector_store %arg10[%c0_45, %c0_46, %c0_47], %101 {strides = array<i32>} : memref<2x3x16xf32, #tpu.memory_space<vmem>>, vector<1x3x16xf32>,
    %c1_48 = arith.constant 1 : index
    %c0_49 = arith.constant 0 : index
    %c0_50 = arith.constant 0 : index
    %102 = vector.load %arg1[%c1_48, %c0_49, %c0_50] : memref<2x200x3xf32, #tpu.memory_space<vmem>>, vector<1x200x3xf32>
    %103 = vector.shape_cast %102 : vector<1x200x3xf32> to vector<200x3xf32>
    %104 = vector.extract_strided_slice %103 {offsets = [0, 0], sizes = [185, 3], strides = [1, 1]} : vector<200x3xf32> to vector<185x3xf32>
    %105 = vector.extract_strided_slice %103 {offsets = [1, 0], sizes = [185, 3], strides = [1, 1]} : vector<200x3xf32> to vector<185x3xf32>
    %106 = vector.extract_strided_slice %103 {offsets = [2, 0], sizes = [185, 3], strides = [1, 1]} : vector<200x3xf32> to vector<185x3xf32>
    %107 = vector.extract_strided_slice %103 {offsets = [3, 0], sizes = [185, 3], strides = [1, 1]} : vector<200x3xf32> to vector<185x3xf32>
    %108 = vector.extract_strided_slice %103 {offsets = [4, 0], sizes = [185, 3], strides = [1, 1]} : vector<200x3xf32> to vector<185x3xf32>
    %109 = vector.extract_strided_slice %103 {offsets = [5, 0], sizes = [185, 3], strides = [1, 1]} : vector<200x3xf32> to vector<185x3xf32>
    %110 = vector.extract_strided_slice %103 {offsets = [6, 0], sizes = [185, 3], strides = [1, 1]} : vector<200x3xf32> to vector<185x3xf32>
    %111 = vector.extract_strided_slice %103 {offsets = [7, 0], sizes = [185, 3], strides = [1, 1]} : vector<200x3xf32> to vector<185x3xf32>
    %112 = vector.extract_strided_slice %103 {offsets = [8, 0], sizes = [185, 3], strides = [1, 1]} : vector<200x3xf32> to vector<185x3xf32>
    %113 = vector.extract_strided_slice %103 {offsets = [9, 0], sizes = [185, 3], strides = [1, 1]} : vector<200x3xf32> to vector<185x3xf32>
    %114 = vector.extract_strided_slice %103 {offsets = [10, 0], sizes = [185, 3], strides = [1, 1]} : vector<200x3xf32> to vector<185x3xf32>
    %115 = vector.extract_strided_slice %103 {offsets = [11, 0], sizes = [185, 3], strides = [1, 1]} : vector<200x3xf32> to vector<185x3xf32>
    %116 = vector.extract_strided_slice %103 {offsets = [12, 0], sizes = [185, 3], strides = [1, 1]} : vector<200x3xf32> to vector<185x3xf32>
    %117 = vector.extract_strided_slice %103 {offsets = [13, 0], sizes = [185, 3], strides = [1, 1]} : vector<200x3xf32> to vector<185x3xf32>
    %118 = vector.extract_strided_slice %103 {offsets = [14, 0], sizes = [185, 3], strides = [1, 1]} : vector<200x3xf32> to vector<185x3xf32>
    %119 = vector.extract_strided_slice %103 {offsets = [15, 0], sizes = [185, 3], strides = [1, 1]} : vector<200x3xf32> to vector<185x3xf32>
    %120 = tpu.concatenate %104, %105, %106, %107, %108, %109, %110, %111, %112, %113, %114, %115, %116, %117, %118, %119 in 1 : vector<185x3xf32>, vector<185x3xf32>, vector<185x3xf32>, vector<185x3xf32>, vector<185x3xf32>, vector<185x3xf32>, vector<185x3xf32>, vector<185x3xf32>, vector<185x3xf32>, vector<185x3xf32>, vector<185x3xf32>, vector<185x3xf32>, vector<185x3xf32>, vector<185x3xf32>, vector<185x3xf32>, vector<185x3xf32> -> vector<185x48xf32>
    %c0_51 = arith.constant 0 : index
    %c0_52 = arith.constant 0 : index
    %121 = vector.load %arg2[%c0_51, %c0_52] : memref<48x8xf32, #tpu.memory_space<vmem>>, vector<48x8xf32>
    %cst_53 = arith.constant dense<0.000000e+00> : vector<185x8xf32>
    %122 = tpu.matmul %120, %121, %cst_53 {dimension_numbers = #tpu.dot_dimension_numbers<[1], [0], [0], [1], [0, 0, 1, 1], [], []>} : vector<185x48xf32>, vector<48x8xf32>, vector<185x8xf32> -> vector<185x8xf32>
    %c0_54 = arith.constant 0 : index
    %c0_55 = arith.constant 0 : index
    %123 = vector.load %arg3[%c0_54, %c0_55] : memref<1x8xf32, #tpu.memory_space<vmem>>, vector<1x8xf32>
    %124 = vector.broadcast %123 : vector<1x8xf32> to vector<185x8xf32>
    %125 = arith.addf %122, %124 : vector<185x8xf32>
    %cst_56 = arith.constant 0.000000e+00 : f32
    %126 = vector.broadcast %cst_56 : f32 to vector<185x8xf32>
    %127 = arith.maximumf %125, %126 : vector<185x8xf32>
    %c0_57 = arith.constant 0 : index
    %c0_58 = arith.constant 0 : index
    %128 = vector.load %arg11[%c0_57, %c0_58] : memref<185x8xf32, #tpu.memory_space<vmem>>, vector<185x8xf32>
    tpu.vector_store %arg11[%c0_57, %c0_58], %127 {strides = array<i32>} : memref<185x8xf32, #tpu.memory_space<vmem>>, vector<185x8xf32>,
    %c0_59 = arith.constant 0 : index
    %c0_60 = arith.constant 0 : index
    %129 = tpu.strided_load %arg11[%c0_59, %c0_60] {strides = array<i32: 2, 1>} : memref<185x8xf32, #tpu.memory_space<vmem>>, vector<92x8xf32>
    %c1_61 = arith.constant 1 : index
    %c0_62 = arith.constant 0 : index
    %130 = tpu.strided_load %arg11[%c1_61, %c0_62] {strides = array<i32: 2, 1>} : memref<185x8xf32, #tpu.memory_space<vmem>>, vector<92x8xf32>
    %131 = arith.maximumf %129, %130 : vector<92x8xf32>
    %132 = vector.extract_strided_slice %131 {offsets = [0, 0], sizes = [77, 8], strides = [1, 1]} : vector<92x8xf32> to vector<77x8xf32>
    %133 = vector.extract_strided_slice %131 {offsets = [1, 0], sizes = [77, 8], strides = [1, 1]} : vector<92x8xf32> to vector<77x8xf32>
    %134 = vector.extract_strided_slice %131 {offsets = [2, 0], sizes = [77, 8], strides = [1, 1]} : vector<92x8xf32> to vector<77x8xf32>
    %135 = vector.extract_strided_slice %131 {offsets = [3, 0], sizes = [77, 8], strides = [1, 1]} : vector<92x8xf32> to vector<77x8xf32>
    %136 = vector.extract_strided_slice %131 {offsets = [4, 0], sizes = [77, 8], strides = [1, 1]} : vector<92x8xf32> to vector<77x8xf32>
    %137 = vector.extract_strided_slice %131 {offsets = [5, 0], sizes = [77, 8], strides = [1, 1]} : vector<92x8xf32> to vector<77x8xf32>
    %138 = vector.extract_strided_slice %131 {offsets = [6, 0], sizes = [77, 8], strides = [1, 1]} : vector<92x8xf32> to vector<77x8xf32>
    %139 = vector.extract_strided_slice %131 {offsets = [7, 0], sizes = [77, 8], strides = [1, 1]} : vector<92x8xf32> to vector<77x8xf32>
    %140 = vector.extract_strided_slice %131 {offsets = [8, 0], sizes = [77, 8], strides = [1, 1]} : vector<92x8xf32> to vector<77x8xf32>
    %141 = vector.extract_strided_slice %131 {offsets = [9, 0], sizes = [77, 8], strides = [1, 1]} : vector<92x8xf32> to vector<77x8xf32>
    %142 = vector.extract_strided_slice %131 {offsets = [10, 0], sizes = [77, 8], strides = [1, 1]} : vector<92x8xf32> to vector<77x8xf32>
    %143 = vector.extract_strided_slice %131 {offsets = [11, 0], sizes = [77, 8], strides = [1, 1]} : vector<92x8xf32> to vector<77x8xf32>
    %144 = vector.extract_strided_slice %131 {offsets = [12, 0], sizes = [77, 8], strides = [1, 1]} : vector<92x8xf32> to vector<77x8xf32>
    %145 = vector.extract_strided_slice %131 {offsets = [13, 0], sizes = [77, 8], strides = [1, 1]} : vector<92x8xf32> to vector<77x8xf32>
    %146 = vector.extract_strided_slice %131 {offsets = [14, 0], sizes = [77, 8], strides = [1, 1]} : vector<92x8xf32> to vector<77x8xf32>
    %147 = vector.extract_strided_slice %131 {offsets = [15, 0], sizes = [77, 8], strides = [1, 1]} : vector<92x8xf32> to vector<77x8xf32>
    %148 = tpu.concatenate %132, %133, %134, %135, %136, %137, %138, %139, %140, %141, %142, %143, %144, %145, %146, %147 in 1 : vector<77x8xf32>, vector<77x8xf32>, vector<77x8xf32>, vector<77x8xf32>, vector<77x8xf32>, vector<77x8xf32>, vector<77x8xf32>, vector<77x8xf32>, vector<77x8xf32>, vector<77x8xf32>, vector<77x8xf32>, vector<77x8xf32>, vector<77x8xf32>, vector<77x8xf32>, vector<77x8xf32>, vector<77x8xf32> -> vector<77x128xf32>
    %c0_63 = arith.constant 0 : index
    %c0_64 = arith.constant 0 : index
    %149 = vector.load %arg4[%c0_63, %c0_64] : memref<128x16xf32, #tpu.memory_space<vmem>>, vector<128x16xf32>
    %cst_65 = arith.constant dense<0.000000e+00> : vector<77x16xf32>
    %150 = tpu.matmul %148, %149, %cst_65 {dimension_numbers = #tpu.dot_dimension_numbers<[1], [0], [0], [1], [0, 0, 1, 1], [], []>} : vector<77x128xf32>, vector<128x16xf32>, vector<77x16xf32> -> vector<77x16xf32>
    %c0_66 = arith.constant 0 : index
    %c0_67 = arith.constant 0 : index
    %151 = vector.load %arg5[%c0_66, %c0_67] : memref<1x16xf32, #tpu.memory_space<vmem>>, vector<1x16xf32>
    %152 = vector.broadcast %151 : vector<1x16xf32> to vector<77x16xf32>
    %153 = arith.addf %150, %152 : vector<77x16xf32>
    %cst_68 = arith.constant 0.000000e+00 : f32
    %154 = vector.broadcast %cst_68 : f32 to vector<77x16xf32>
    %155 = arith.maximumf %153, %154 : vector<77x16xf32>
    %c0_69 = arith.constant 0 : index
    %c0_70 = arith.constant 0 : index
    %156 = vector.load %arg12[%c0_69, %c0_70] : memref<77x16xf32, #tpu.memory_space<vmem>>, vector<77x16xf32>
    tpu.vector_store %arg12[%c0_69, %c0_70], %155 {strides = array<i32>} : memref<77x16xf32, #tpu.memory_space<vmem>>, vector<77x16xf32>,
    %c0_71 = arith.constant 0 : index
    %c0_72 = arith.constant 0 : index
    %157 = tpu.strided_load %arg12[%c0_71, %c0_72] {strides = array<i32: 2, 1>} : memref<77x16xf32, #tpu.memory_space<vmem>>, vector<38x16xf32>
    %c1_73 = arith.constant 1 : index
    %c0_74 = arith.constant 0 : index
    %158 = tpu.strided_load %arg12[%c1_73, %c0_74] {strides = array<i32: 2, 1>} : memref<77x16xf32, #tpu.memory_space<vmem>>, vector<38x16xf32>
    %159 = arith.maximumf %157, %158 : vector<38x16xf32>
    %160 = vector.extract_strided_slice %159 {offsets = [0, 0], sizes = [23, 16], strides = [1, 1]} : vector<38x16xf32> to vector<23x16xf32>
    %161 = vector.extract_strided_slice %159 {offsets = [1, 0], sizes = [23, 16], strides = [1, 1]} : vector<38x16xf32> to vector<23x16xf32>
    %162 = vector.extract_strided_slice %159 {offsets = [2, 0], sizes = [23, 16], strides = [1, 1]} : vector<38x16xf32> to vector<23x16xf32>
    %163 = vector.extract_strided_slice %159 {offsets = [3, 0], sizes = [23, 16], strides = [1, 1]} : vector<38x16xf32> to vector<23x16xf32>
    %164 = vector.extract_strided_slice %159 {offsets = [4, 0], sizes = [23, 16], strides = [1, 1]} : vector<38x16xf32> to vector<23x16xf32>
    %165 = vector.extract_strided_slice %159 {offsets = [5, 0], sizes = [23, 16], strides = [1, 1]} : vector<38x16xf32> to vector<23x16xf32>
    %166 = vector.extract_strided_slice %159 {offsets = [6, 0], sizes = [23, 16], strides = [1, 1]} : vector<38x16xf32> to vector<23x16xf32>
    %167 = vector.extract_strided_slice %159 {offsets = [7, 0], sizes = [23, 16], strides = [1, 1]} : vector<38x16xf32> to vector<23x16xf32>
    %168 = vector.extract_strided_slice %159 {offsets = [8, 0], sizes = [23, 16], strides = [1, 1]} : vector<38x16xf32> to vector<23x16xf32>
    %169 = vector.extract_strided_slice %159 {offsets = [9, 0], sizes = [23, 16], strides = [1, 1]} : vector<38x16xf32> to vector<23x16xf32>
    %170 = vector.extract_strided_slice %159 {offsets = [10, 0], sizes = [23, 16], strides = [1, 1]} : vector<38x16xf32> to vector<23x16xf32>
    %171 = vector.extract_strided_slice %159 {offsets = [11, 0], sizes = [23, 16], strides = [1, 1]} : vector<38x16xf32> to vector<23x16xf32>
    %172 = vector.extract_strided_slice %159 {offsets = [12, 0], sizes = [23, 16], strides = [1, 1]} : vector<38x16xf32> to vector<23x16xf32>
    %173 = vector.extract_strided_slice %159 {offsets = [13, 0], sizes = [23, 16], strides = [1, 1]} : vector<38x16xf32> to vector<23x16xf32>
    %174 = vector.extract_strided_slice %159 {offsets = [14, 0], sizes = [23, 16], strides = [1, 1]} : vector<38x16xf32> to vector<23x16xf32>
    %175 = vector.extract_strided_slice %159 {offsets = [15, 0], sizes = [23, 16], strides = [1, 1]} : vector<38x16xf32> to vector<23x16xf32>
    %176 = tpu.concatenate %160, %161, %162, %163, %164, %165, %166, %167, %168, %169, %170, %171, %172, %173, %174, %175 in 1 : vector<23x16xf32>, vector<23x16xf32>, vector<23x16xf32>, vector<23x16xf32>, vector<23x16xf32>, vector<23x16xf32>, vector<23x16xf32>, vector<23x16xf32>, vector<23x16xf32>, vector<23x16xf32>, vector<23x16xf32>, vector<23x16xf32>, vector<23x16xf32>, vector<23x16xf32>, vector<23x16xf32>, vector<23x16xf32> -> vector<23x256xf32>
    %c0_75 = arith.constant 0 : index
    %c0_76 = arith.constant 0 : index
    %177 = vector.load %arg6[%c0_75, %c0_76] : memref<256x32xf32, #tpu.memory_space<vmem>>, vector<256x32xf32>
    %cst_77 = arith.constant dense<0.000000e+00> : vector<23x32xf32>
    %178 = tpu.matmul %176, %177, %cst_77 {dimension_numbers = #tpu.dot_dimension_numbers<[1], [0], [0], [1], [0, 0, 1, 1], [], []>} : vector<23x256xf32>, vector<256x32xf32>, vector<23x32xf32> -> vector<23x32xf32>
    %c0_78 = arith.constant 0 : index
    %c0_79 = arith.constant 0 : index
    %179 = vector.load %arg7[%c0_78, %c0_79] : memref<1x32xf32, #tpu.memory_space<vmem>>, vector<1x32xf32>
    %180 = vector.broadcast %179 : vector<1x32xf32> to vector<23x32xf32>
    %181 = arith.addf %178, %180 : vector<23x32xf32>
    %cst_80 = arith.constant 0.000000e+00 : f32
    %182 = vector.broadcast %cst_80 : f32 to vector<23x32xf32>
    %183 = arith.maximumf %181, %182 : vector<23x32xf32>
    %c0_81 = arith.constant 0 : index
    %c0_82 = arith.constant 0 : index
    %184 = vector.load %arg13[%c0_81, %c0_82] : memref<23x32xf32, #tpu.memory_space<vmem>>, vector<23x32xf32>
    tpu.vector_store %arg13[%c0_81, %c0_82], %183 {strides = array<i32>} : memref<23x32xf32, #tpu.memory_space<vmem>>, vector<23x32xf32>,
    %c0_83 = arith.constant 0 : index
    %c0_84 = arith.constant 0 : index
    %185 = tpu.strided_load %arg13[%c0_83, %c0_84] {strides = array<i32: 6, 1>} : memref<23x32xf32, #tpu.memory_space<vmem>>, vector<3x32xf32>
    %c1_85 = arith.constant 1 : index
    %c0_86 = arith.constant 0 : index
    %186 = tpu.strided_load %arg13[%c1_85, %c0_86] {strides = array<i32: 6, 1>} : memref<23x32xf32, #tpu.memory_space<vmem>>, vector<3x32xf32>
    %187 = arith.maximumf %185, %186 : vector<3x32xf32>
    %c2_87 = arith.constant 2 : index
    %c0_88 = arith.constant 0 : index
    %188 = tpu.strided_load %arg13[%c2_87, %c0_88] {strides = array<i32: 6, 1>} : memref<23x32xf32, #tpu.memory_space<vmem>>, vector<3x32xf32>
    %189 = arith.maximumf %187, %188 : vector<3x32xf32>
    %c3_89 = arith.constant 3 : index
    %c0_90 = arith.constant 0 : index
    %190 = tpu.strided_load %arg13[%c3_89, %c0_90] {strides = array<i32: 6, 1>} : memref<23x32xf32, #tpu.memory_space<vmem>>, vector<3x32xf32>
    %191 = arith.maximumf %189, %190 : vector<3x32xf32>
    %c4_91 = arith.constant 4 : index
    %c0_92 = arith.constant 0 : index
    %192 = tpu.strided_load %arg13[%c4_91, %c0_92] {strides = array<i32: 6, 1>} : memref<23x32xf32, #tpu.memory_space<vmem>>, vector<3x32xf32>
    %193 = arith.maximumf %191, %192 : vector<3x32xf32>
    %c5_93 = arith.constant 5 : index
    %c0_94 = arith.constant 0 : index
    %194 = tpu.strided_load %arg13[%c5_93, %c0_94] {strides = array<i32: 6, 1>} : memref<23x32xf32, #tpu.memory_space<vmem>>, vector<3x32xf32>
    %195 = arith.maximumf %193, %194 : vector<3x32xf32>
    %c0_95 = arith.constant 0 : index
    %c0_96 = arith.constant 0 : index
    %196 = vector.load %arg8[%c0_95, %c0_96] : memref<32x16xf32, #tpu.memory_space<vmem>>, vector<32x16xf32>
    %cst_97 = arith.constant dense<0.000000e+00> : vector<3x16xf32>
    %197 = tpu.matmul %195, %196, %cst_97 {dimension_numbers = #tpu.dot_dimension_numbers<[1], [0], [0], [1], [0, 0, 1, 1], [], []>} : vector<3x32xf32>, vector<32x16xf32>, vector<3x16xf32> -> vector<3x16xf32>
    %c0_98 = arith.constant 0 : index
    %c0_99 = arith.constant 0 : index
    %198 = vector.load %arg9[%c0_98, %c0_99] : memref<1x16xf32, #tpu.memory_space<vmem>>, vector<1x16xf32>
    %199 = vector.broadcast %198 : vector<1x16xf32> to vector<3x16xf32>
    %200 = arith.addf %197, %199 : vector<3x16xf32>
    %c1_100 = arith.constant 1 : index
    %c0_101 = arith.constant 0 : index
    %c0_102 = arith.constant 0 : index
    %201 = vector.load %arg10[%c1_100, %c0_101, %c0_102] : memref<2x3x16xf32, #tpu.memory_space<vmem>>, vector<1x3x16xf32>
    %202 = vector.shape_cast %201 : vector<1x3x16xf32> to vector<3x16xf32>
    %203 = vector.shape_cast %200 : vector<3x16xf32> to vector<1x3x16xf32>
    tpu.vector_store %arg10[%c1_100, %c0_101, %c0_102], %203 {strides = array<i32>} : memref<2x3x16xf32, #tpu.memory_space<vmem>>, vector<1x3x16xf32>,
    return
  }
  func.func @transform_0(%arg0: i32) -> (i32, i32, i32) {
    %c0_i32 = arith.constant 0 : i32
    %c0_i32_0 = arith.constant 0 : i32
    %c0_i32_1 = arith.constant 0 : i32
    return %arg0, %c0_i32, %c0_i32_0 : i32, i32, i32
  }
  func.func @transform_1(%arg0: i32) -> (i32, i32) {
    %c0_i32 = arith.constant 0 : i32
    %c0_i32_0 = arith.constant 0 : i32
    %c0_i32_1 = arith.constant 0 : i32
    return %c0_i32, %c0_i32_0 : i32, i32
  }
  func.func @transform_2(%arg0: i32) -> (i32, i32) {
    %c0_i32 = arith.constant 0 : i32
    %c0_i32_0 = arith.constant 0 : i32
    %c0_i32_1 = arith.constant 0 : i32
    return %c0_i32, %c0_i32_0 : i32, i32
  }
  func.func @transform_3(%arg0: i32) -> (i32, i32) {
    %c0_i32 = arith.constant 0 : i32
    %c0_i32_0 = arith.constant 0 : i32
    %c0_i32_1 = arith.constant 0 : i32
    return %c0_i32, %c0_i32_0 : i32, i32
  }
  func.func @transform_4(%arg0: i32) -> (i32, i32) {
    %c0_i32 = arith.constant 0 : i32
    %c0_i32_0 = arith.constant 0 : i32
    %c0_i32_1 = arith.constant 0 : i32
    return %c0_i32, %c0_i32_0 : i32, i32
  }
  func.func @transform_5(%arg0: i32) -> (i32, i32) {
    %c0_i32 = arith.constant 0 : i32
    %c0_i32_0 = arith.constant 0 : i32
    %c0_i32_1 = arith.constant 0 : i32
    return %c0_i32, %c0_i32_0 : i32, i32
  }
  func.func @transform_6(%arg0: i32) -> (i32, i32) {
    %c0_i32 = arith.constant 0 : i32
    %c0_i32_0 = arith.constant 0 : i32
    %c0_i32_1 = arith.constant 0 : i32
    return %c0_i32, %c0_i32_0 : i32, i32
  }
  func.func @transform_7(%arg0: i32) -> (i32, i32) {
    %c0_i32 = arith.constant 0 : i32
    %c0_i32_0 = arith.constant 0 : i32
    %c0_i32_1 = arith.constant 0 : i32
    return %c0_i32, %c0_i32_0 : i32, i32
  }
  func.func @transform_8(%arg0: i32) -> (i32, i32) {
    %c0_i32 = arith.constant 0 : i32
    %c0_i32_0 = arith.constant 0 : i32
    %c0_i32_1 = arith.constant 0 : i32
    return %c0_i32, %c0_i32_0 : i32, i32
  }
  func.func @transform_9(%arg0: i32) -> (i32, i32, i32) {
    %c0_i32 = arith.constant 0 : i32
    %c0_i32_0 = arith.constant 0 : i32
    %c0_i32_1 = arith.constant 0 : i32
    return %arg0, %c0_i32, %c0_i32_0 : i32, i32, i32
  }
}

</mosaic_0001>

<bundles_post_ra>
// kernel: tpu_custom_call.1
= control target key start
LH: loop header
LB: loop body
LE: loop exit
PB: predicated region body
PF: predicated region fallthrough
CT: control target
= control target key end

     0   :  { %vm17742_vm0 = vcmask 1046528   ;;  %s8636_s23 = smov 3   ;;  %vm17741_vm1 = vcmask 1045504   ;;  %s17778_s17 = smov 6   ;;  %vm17740_vm2 = vcmask 1044480   ;;  %vm17739_vm3 = vcmask 1043456   ;;  %s17641_s0 = inlined_call_operand.vmem [shape: f32[2,200,3], index: 0, kind: input, shape index: {}]   ;;  %s17642_s1 = inlined_call_operand.vmem [shape: f32[48,8], index: 1, kind: input, shape index: {}]   ;;  %s17643_s2 = inlined_call_operand.vmem [shape: f32[1,8], index: 2, kind: input, shape index: {}]   ;;  %s17644_s3 = inlined_call_operand.vmem [shape: f32[128,16], index: 3, kind: input, shape index: {}]   ;;  %s17645_s4 = inlined_call_operand.vmem [shape: f32[1,16], index: 4, kind: input, shape index: {}]   ;;  %s17646_s5 = inlined_call_operand.vmem [shape: f32[256,32], index: 5, kind: input, shape index: {}]   ;;  %s17647_s7 = inlined_call_operand.vmem [shape: f32[32,16], index: 7, kind: input, shape index: {}]   ;;  %s17648_s6 = inlined_call_operand.vmem [shape: f32[1,32], index: 6, kind: input, shape index: {}]   ;;  %s17649_s8 = inlined_call_operand.vmem [shape: f32[1,16], index: 8, kind: input, shape index: {}]   ;;  %s17650_s9 = inlined_call_operand.vmem [shape: f32[2,3,16], index: 9, kind: output, shape index: {}]  }
   0x1   :  { %v8720_v0 = vld [vmem:[%s17641_s0 + $0x10] sm:$0xff]  ;;  %v8725_v1 = vld [vmem:[%s17641_s0 + $0x18] sm:$0xff]  ;;  %v8730_v2 = vld [vmem:[%s17641_s0] sm:$0xff]  ;;  %s17776_s18 = smov 9   ;;  %s17774_s19 = smov 12   ;;  %vm17738_vm4 = vcmask 1042432  }
   0x2   :  { %v85_v3 = vrot.slane %v8720_v0, 1  ;;  %v87_v4 = vrot.slane %v8725_v1, 1  ;;  %v8737_v5 = vld [vmem:[%s17641_s0 + $0x8] sm:$0xff]  ;;  %v82_v6 = vrot.slane %v8730_v2, 1  ;;  %v8743_v7 = vld [vmem:[%s17641_s0 + $0x20] sm:$0xff]  ;;  %v8755_v11 = vld [vmem:[%s17641_s0 + $0x30] sm:$0xff] }
   0x3   :  { %v83_v8 = vrot.slane %v8737_v5, 1  ;;  %v89_v9 = vrot.slane %v8743_v7, 1  ;;  %v8750_v10 = vld [vmem:[%s17641_s0 + $0x28] sm:$0xff]  ;;  %v93_v16 = vrot.slane %v8755_v11, 1  ;;  %v8775_v18 = vld [vmem:[%s17641_s0 + $0x38] sm:$0xff]  ;;  %v8780_v19 = vld [vmem:[%s17641_s0 + $0x40] sm:$0xff] }
   0x4   :  { %v8758_v12 = vsel %vm17742_vm0, %v85_v3, %v87_v4  ;;  %v91_v15 = vrot.slane %v8750_v10, 1  ;;  %v95_v21 = vrot.slane %v8775_v18, 1  ;;  %v97_v22 = vrot.slane %v8780_v19, 1  ;;  %v8797_v24 = vld [vmem:[%s17641_s0 + $0x48] sm:$0xff]  ;;  %v8802_v25 = vld [vmem:[%s17641_s0 + $0x50] sm:$0xff]  ;;  %v8819_v30 = vld [vmem:[%s17641_s0 + $0x58] sm:$0xff] }
   0x5   :  { %133 = vrot.lane.b32.xlu1 %v8758_v12, %s8636_s23  ;;  %v84_v13 = vsel %vm17742_vm0, %v82_v6, %v83_v8  ;;  %v8765_v14 = vsel %vm17742_vm0, %v87_v4, %v89_v9  ;;  %v8770_v17 = vsel %vm17742_vm0, %v83_v8, %v85_v3  ;;  %v99_v27 = vrot.slane %v8797_v24, 1  ;;  %v8824_v31 = vld [vmem:[%s17641_s0 + $0x60] sm:$0xff]  ;;  %v8841_v36 = vld [vmem:[%s17641_s0 + $0x68] sm:$0xff]  ;;  %v8846_v37 = vld [vmem:[%s17641_s0 + $0x70] sm:$0xff]  ;;  %s17772_s20 = smov 15   ;;  %s17770_s21 = smov 18  }
   0x6   :  { %129 = vrot.lane.b32.xlu0 %v84_v13, %s8636_s23  ;;  %v8787_v20 = vsel %vm17742_vm0, %v91_v15, %v93_v16  ;;  %v8792_v23 = vsel %vm17742_vm0, %v89_v9, %v91_v15  ;;  %v8809_v26 = vsel %vm17742_vm0, %v95_v21, %v97_v22  ;;  %v101_v28 = vrot.slane %v8802_v25, 1  ;;  %v8863_v42 = vld [vmem:[%s17641_s0 + $0x78] sm:$0xff]  ;;  %v8868_v43 = vld [vmem:[%s17641_s0 + $0x80] sm:$0xff]  ;;  %v8885_v48 = vld [vmem:[%s17641_s0 + $0x88] sm:$0xff]  ;;  %s17768_s22 = smov 21   ;;  %s8643_s24 = smov 24  }
   0x7   :  { %v8814_v29 = vsel %vm17742_vm0, %v93_v16, %v95_v21  ;;  %v103_v33 = vrot.slane %v8819_v30, 1  ;;  %v105_v34 = vrot.slane %v8824_v31, 1  ;;  %v8836_v35 = vsel %vm17742_vm0, %v97_v22, %v99_v27  ;;  %v8890_v49 = vld [vmem:[%s17641_s0 + $0x90] sm:$0xff]  ;;  %v8907_v54 = vld [vmem:[%s17641_s0 + $0x98] sm:$0xff]  ;;  %v8912_v55 = vld [vmem:[%s17641_s0 + $0xa0] sm:$0xff]  ;;  %s17766_s25 = smov 27  }
   0x8   :  { %v8831_v32 = vsel %vm17742_vm0, %v99_v27, %v101_v28  ;;  %17936 = vst [vmem:[#allocation6_spill] sm:$0xff] %v8836_v35  ;;  %v107_v39 = vrot.slane %v8841_v36, 1  ;;  %v109_v40 = vrot.slane %v8846_v37, 1  ;;  %v111_v45 = vrot.slane %v8863_v42, 1  ;;  %v8929_v60 = vld [vmem:[%s17641_s0 + $0xa8] sm:$0xff]  ;;  %v8934_v61 = vld [vmem:[%s17641_s0 + $0xb0] sm:$0xff] }
   0x9   :  { %135 = vrot.lane.b32.xlu1 %v8765_v14, %s8636_s23  ;;  %17935 = vst [vmem:[#allocation5_spill] sm:$0xff] %v8831_v32  ;;  %v8853_v38 = vsel %vm17742_vm0, %v103_v33, %v105_v34  ;;  %v8858_v41 = vsel %vm17742_vm0, %v101_v28, %v103_v33  ;;  %v113_v46 = vrot.slane %v8868_v43, 1  ;;  %v115_v51 = vrot.slane %v8885_v48, 1  ;;  %v8951_v6 = vld [vmem:[%s17641_s0 + $0xb8] sm:$0xff]  ;;  %s17764_s26 = smov 30   ;;  %s17762_s27 = smov 33  }
   0xa   :  { %131 = vrot.lane.b32.xlu0 %v8770_v17, %s8636_s23  ;;  %17937 = vst [vmem:[#allocation7_spill] sm:$0xff] %v8853_v38  ;;  %17938 = vst [vmem:[#allocation8_spill] sm:$0xff] %v8858_v41  ;;  %v8875_v44 = vsel %vm17742_vm0, %v107_v39, %v109_v40  ;;  %v8880_v47 = vsel %vm17742_vm0, %v105_v34, %v107_v39  ;;  %v117_v52 = vrot.slane %v8890_v49, 1  ;;  %v119_v57 = vrot.slane %v8907_v54, 1  ;;  %s17760_s11 = smov 36   ;;  %s17754_s12 = smov 39  }
   0xb   :  { %17939 = vst [vmem:[#allocation9_spill] sm:$0xff] %v8875_v44  ;;  %17940 = vst [vmem:[#allocation10_spill] sm:$0xff] %v8880_v47  ;;  %v8897_v50 = vsel %vm17742_vm0, %v111_v45, %v113_v46  ;;  %v8902_v53 = vsel %vm17742_vm0, %v109_v40, %v111_v45  ;;  %v121_v58 = vrot.slane %v8912_v55, 1  ;;  %v8924_v59 = vsel %vm17742_vm0, %v113_v46, %v115_v51  ;;  %s17752_s13 = smov 42   ;;  %s17750_s15 = smov 45  }
   0xc   :  { %17941 = vst [vmem:[#allocation11_spill] sm:$0xff] %v8897_v50  ;;  %17942 = vst [vmem:[#allocation12_spill] sm:$0xff] %v8902_v53  ;;  %v8919_v56 = vsel %vm17742_vm0, %v115_v51, %v117_v52  ;;  %v123_v63 = vrot.slane %v8929_v60, 1  ;;  %v125_v3 = vrot.slane %v8934_v61, 1  ;;  %v8946_v4 = vsel %vm17742_vm0, %v117_v52, %v119_v57  ;;  %s17829_s29 = smov 16   ;;  %s17831_s30 = smov 8  }
   0xd   :  { %139 = vrot.lane.b32.xlu1 %v8787_v20, %s8636_s23  ;;  %17943 = vst [vmem:[#allocation13_spill] sm:$0xff] %v8919_v56  ;;  %17944 = vst [vmem:[#allocation14_spill] sm:$0xff] %v8924_v59  ;;  %v8941_v62 = vsel %vm17742_vm0, %v119_v57, %v121_v58  ;;  %v8964_v13 = vrot.slane %v8951_v6, 1  ;;  %v203_v15 = vrot.slane %v8737_v5, 2  ;;  %v205_v16 = vrot.slane %v8720_v0, 2  ;;  %s17816_s10 = smov 32  }
   0xe   :  { %137 = vrot.lane.b32.xlu0 %v8792_v23, %s8636_s23  ;;  %17945 = vst [vmem:[#allocation15_spill] sm:$0xff] %v8941_v62  ;;  %17946 = vst [vmem:[#allocation16_spill] sm:$0xff] %v8946_v4  ;;  %v8958_v8 = vsel %vm17742_vm0, %v123_v63, %v125_v3  ;;  %v8961_v9 = vsel %vm17742_vm0, %v121_v58, %v123_v63  ;;  %v202_v22 = vrot.slane %v8730_v2, 2  ;;  %v207_v28 = vrot.slane %v8725_v1, 2  ;;  %s17814_s14 = smov 40   ;;  %s17812_s16 = smov 48  }
   0xf   :  { %17947 = vst [vmem:[#allocation17_spill] sm:$0xff] %v8958_v8  ;;  %17948 = vst [vmem:[#allocation18_spill] sm:$0xff] %v8961_v9  ;;  %v8974_v21 = vsel %vm17742_vm0, %v125_v3, %v8964_v13  ;;  %v8982_v27 = vsel %vm17741_vm1, %v203_v15, %v205_v16  ;;  %v209_v33 = vrot.slane %v8743_v7, 2  ;;  %v211_v40 = vrot.slane %v8750_v10, 2  ;;  %s17810_s28 = smov 56  }
  0x10   :  { %17949 = vst [vmem:[#allocation19_spill] sm:$0xff] %v8964_v13  ;;  %17950 = vst [vmem:[#allocation20_spill] sm:$0xff] %v8974_v21  ;;  %v204_v34 = vsel %vm17741_vm1, %v202_v22, %v203_v15  ;;  %v213_v45 = vrot.slane %v8755_v11, 2  ;;  %v8996_v46 = vsel %vm17741_vm1, %v205_v16, %v207_v28  ;;  %v215_v52 = vrot.slane %v8775_v18, 2 }
  0x11   :  { %143 = vrot.lane.b32.xlu1 %v8809_v26, %s8636_s23  ;;  %v8991_v39 = vsel %vm17741_vm1, %v207_v28, %v209_v33  ;;  %v217_v57 = vrot.slane %v8780_v19, 2  ;;  %v9008_v58 = vsel %vm17741_vm1, %v209_v33, %v211_v40  ;;  %v219_v3 = vrot.slane %v8797_v24, 2 }
  0x12   :  { %141 = vrot.lane.b32.xlu0 %v8814_v29, %s8636_s23  ;;  %v9003_v51 = vsel %vm17741_vm1, %v211_v40, %v213_v45  ;;  %v221_v15 = vrot.slane %v8802_v25, 2  ;;  %v9020_v16 = vsel %vm17741_vm1, %v213_v45, %v215_v52  ;;  %v223_v28 = vrot.slane %v8819_v30, 2 }
  0x13   :  { %v9015_v63 = vsel %vm17741_vm1, %v215_v52, %v217_v57  ;;  %v225_v33 = vrot.slane %v8824_v31, 2  ;;  %v227_v45 = vrot.slane %v8841_v36, 2  ;;  %v229_v52 = vrot.slane %v8846_v37, 2 }
  0x14   :  { %17951 = vst [vmem:[#allocation21_spill] sm:$0xff] %v9015_v63  ;;  %v9027_v22 = vsel %vm17741_vm1, %v219_v3, %v221_v15  ;;  %vm17743_vm5 = vcmask 1041408   ;;  %vm17745_vm6 = vcmask 1040384   ;;  %vm17746_vm7 = vcmask 23552  }
  0x15   :  { %147 = vrot.lane.b32.xlu1 %v8831_v32, %s8636_s23  ;;  %17952 = vst [vmem:[#allocation22_spill] sm:$0xff] %v9027_v22  ;;  %v9039_v40 = vsel %vm17741_vm1, %v223_v28, %v225_v33  ;;  %vm17791_vm8 = vcmask 48128   ;;  %vm17790_vm9 = vcmask 72704   ;;  %vm17789_vm10 = vcmask 97280  }
  0x16   :  { %145 = vrot.lane.b32.xlu0 %v8836_v35, %s8636_s23  ;;  %17954 = vst [vmem:[#allocation24_spill] sm:$0xff] %v9039_v40  ;;  %vm17788_vm11 = vcmask 121856   ;;  %vm17759_vm12 = vcmask 146432   ;;  %vm17758_vm13 = vcmask 171008   ;;  %vm1687_vm14 = vcmask 195584  }
  0x17   :  { %vm17787_vm15 = vcmask 220160   ;;  %vm17784_vm0 = vcmask 343040  }
  0x19   :  { %151 = vrot.lane.b32.xlu1 %v8853_v38, %s8636_s23  ;;  %v351_v38 = vrot.slane %v8863_v42, 3 }
  0x1a   :  { %149 = vrot.lane.b32.xlu0 %v8858_v41, %s8636_s23  ;;  %v461_v41 = vrot.slane %v8802_v25, 4 }
  0x1d   :  { %155 = vrot.lane.b32.xlu1 %v8875_v44, %s8636_s23 }
  0x1e   :  { %153 = vrot.lane.b32.xlu0 %v8880_v47, %s8636_s23 }
  0x21   :  { %159 = vrot.lane.b32.xlu1 %v8897_v50, %s8636_s23 }
  0x22   :  { %157 = vrot.lane.b32.xlu0 %v8902_v53, %s8636_s23  ;;  %v345_v53 = vrot.slane %v8824_v31, 3 }
  0x25   :  { %163 = vrot.lane.b32.xlu1 %v8919_v56, %s8636_s23 }
  0x26   :  { %161 = vrot.lane.b32.xlu0 %v8924_v59, %s8636_s23 }
  0x29   :  { %167 = vrot.lane.b32.xlu1 %v8941_v62, %s8636_s23 }
  0x2a   :  { %165 = vrot.lane.b32.xlu0 %v8946_v4, %s8636_s23  ;;  %v241_v4 = vrot.slane %v8912_v55, 2 }
  0x2d   :  { %171 = vrot.lane.b32.xlu1 %v8958_v8, %s8636_s23  ;;  %v9056_v8 = vsel %vm17741_vm1, %v225_v33, %v227_v45 }
  0x2e   :  { %169 = vrot.lane.b32.xlu0 %v8961_v9, %s8636_s23  ;;  %17957 = vst [vmem:[#allocation27_spill] sm:$0xff] %v9056_v8  ;;  %v237_v9 = vrot.slane %v8890_v49, 2 }
  0x31   :  { %175 = vrot.lane.b32.xlu1 %v8964_v13, %s8636_s23  ;;  %v9044_v13 = vsel %vm17741_vm1, %v221_v15, %v223_v28  ;;  %v235_v28 = vrot.slane %v8885_v48, 2 }
  0x32   :  { %173 = vrot.lane.b32.xlu0 %v8974_v21, %s8636_s23  ;;  %17955 = vst [vmem:[#allocation25_spill] sm:$0xff] %v9044_v13  ;;  %v233_v21 = vrot.slane %v8868_v43, 2 }
  0x33   :  { %v9075_v33 = vsel %vm17741_vm1, %v235_v28, %v237_v9 }
  0x34   :  { %17960 = vst [vmem:[#allocation30_spill] sm:$0xff] %v9075_v33  ;;  %v9080_v56 = vsel %vm17741_vm1, %v233_v21, %v235_v28 }
  0x35   :  { %251 = vrot.lane.b32.xlu1 %v8982_v27, %s17778_s17  ;;  %17961 = vst [vmem:[#allocation31_spill] sm:$0xff] %v9080_v56 }
  0x36   :  { %249 = vrot.lane.b32.xlu0 %v204_v34, %s17778_s17  ;;  %v9032_v34 = vsel %vm17741_vm1, %v217_v57, %v219_v3  ;;  %v9051_v57 = vsel %vm17741_vm1, %v227_v45, %v229_v52  ;;  %v231_v3 = vrot.slane %v8863_v42, 2  ;;  %v239_v45 = vrot.slane %v8907_v54, 2 }
  0x37   :  { %17953 = vst [vmem:[#allocation23_spill] sm:$0xff] %v9032_v34  ;;  %17956 = vst [vmem:[#allocation26_spill] sm:$0xff] %v9051_v57 }
  0x38   :  { %v9063_v15 = vsel %vm17741_vm1, %v231_v3, %v233_v21  ;;  %v9068_v62 = vsel %vm17741_vm1, %v229_v52, %v231_v3  ;;  %v9087_v52 = vsel %vm17741_vm1, %v239_v45, %v241_v4  ;;  %v243_v3 = vrot.slane %v8929_v60, 2 }
  0x39   :  { %255 = vrot.lane.b32.xlu1 %v8991_v39, %s17778_s17  ;;  %17958 = vst [vmem:[#allocation28_spill] sm:$0xff] %v9063_v15  ;;  %17959 = vst [vmem:[#allocation29_spill] sm:$0xff] %v9068_v62  ;;  %v9092_v59 = vsel %vm17741_vm1, %v237_v9, %v239_v45  ;;  %v323_v9 = vrot.slane %v8737_v5, 3  ;;  %v325_v45 = vrot.slane %v8720_v0, 3 }
  0x3a   :  { %253 = vrot.lane.b32.xlu0 %v8996_v46, %s17778_s17  ;;  %17962 = vst [vmem:[#allocation32_spill] sm:$0xff] %v9087_v52  ;;  %17963 = vst [vmem:[#allocation33_spill] sm:$0xff] %v9092_v59  ;;  %v9102_v28 = vsel %vm17741_vm1, %v241_v4, %v243_v3  ;;  %v322_v4 = vrot.slane %v8730_v2, 3 }
  0x3b   :  { %17965 = vst [vmem:[#allocation35_spill] sm:$0xff] %v9102_v28 }
  0x3d   :  { %259 = vrot.lane.b32.xlu1 %v9003_v51, %s17778_s17 }
  0x3e   :  { %257 = vrot.lane.b32.xlu0 %v9008_v58, %s17778_s17 }
  0x41   :  { %263 = vrot.lane.b32.xlu1 %v9015_v63, %s17778_s17 }
  0x42   :  { %261 = vrot.lane.b32.xlu0 %v9020_v16, %s17778_s17 }
  0x45   :  { %267 = vrot.lane.b32.xlu1 %v9027_v22, %s17778_s17 }
  0x46   :  { %265 = vrot.lane.b32.xlu0 %v9032_v34, %s17778_s17 }
  0x49   :  { %271 = vrot.lane.b32.xlu1 %v9039_v40, %s17778_s17 }
  0x4a   :  { %269 = vrot.lane.b32.xlu0 %v9044_v13, %s17778_s17 }
  0x4d   :  { %275 = vrot.lane.b32.xlu1 %v9051_v57, %s17778_s17 }
  0x4e   :  { %273 = vrot.lane.b32.xlu0 %v9056_v8, %s17778_s17  ;;  %v349_v8 = vrot.slane %v8846_v37, 3 }
  0x51   :  { %279 = vrot.lane.b32.xlu1 %v9063_v15, %s17778_s17  ;;  %v245_v15 = vrot.slane %v8934_v61, 2 }
  0x52   :  { %277 = vrot.lane.b32.xlu0 %v9068_v62, %s17778_s17  ;;  %v341_v62 = vrot.slane %v8802_v25, 3 }
  0x53   :  { %v9099_v21 = vsel %vm17741_vm1, %v243_v3, %v245_v15  ;;  %v9123_v3 = vsel %vm17740_vm2, %v323_v9, %v325_v45 }
  0x54   :  { %17964 = vst [vmem:[#allocation34_spill] sm:$0xff] %v9099_v21 }
  0x55   :  { %283 = vrot.lane.b32.xlu1 %v9075_v33, %s17778_s17  ;;  %v9105_v33 = vrot.slane %v8951_v6, 2 }
  0x56   :  { %281 = vrot.lane.b32.xlu0 %v9080_v56, %s17778_s17 }
  0x57   :  { %17966 = vst [vmem:[#allocation36_spill] sm:$0xff] %v9105_v33 }
  0x59   :  { %287 = vrot.lane.b32.xlu1 %v9087_v52, %s17778_s17  ;;  %v9115_v52 = vsel %vm17741_vm1, %v245_v15, %v9105_v33  ;;  %vm17785_vm1 = vcmask 318464  }
  0x5a   :  { %285 = vrot.lane.b32.xlu0 %v9092_v59, %s17778_s17  ;;  %17967 = vst [vmem:[#allocation37_spill] sm:$0xff] %v9115_v52  ;;  %v324_v59 = vsel %vm17740_vm2, %v322_v4, %v323_v9  ;;  %v337_v4 = vrot.slane %v8780_v19, 3 }
  0x5d   :  { %291 = vrot.lane.b32.xlu1 %v9099_v21, %s17778_s17  ;;  %v327_v21 = vrot.slane %v8725_v1, 3 }
  0x5e   :  { %289 = vrot.lane.b32.xlu0 %v9102_v28, %s17778_s17  ;;  %v329_v28 = vrot.slane %v8743_v7, 3 }
  0x5f   :  { %v9137_v56 = vsel %vm17740_vm2, %v325_v45, %v327_v21  ;;  %v339_v45 = vrot.slane %v8797_v24, 3 }
  0x60   :  { %v9132_v15 = vsel %vm17740_vm2, %v327_v21, %v329_v28 }
  0x61   :  { %295 = vrot.lane.b32.xlu1 %v9105_v33, %s17778_s17  ;;  %v331_v33 = vrot.slane %v8750_v10, 3  ;;  %v9173_v44 = vsel %vm17740_vm2, %v337_v4, %v339_v45 }
  0x62   :  { %293 = vrot.lane.b32.xlu0 %v9115_v52, %s17778_s17  ;;  %v333_v52 = vrot.slane %v8755_v11, 3  ;;  %17970 = vst [vmem:[#allocation40_spill] sm:$0xff] %v9173_v44  ;;  %s18559_s17 = smov 6  }
  0x63   :  { %v9149_v50 = vsel %vm17740_vm2, %v329_v28, %v331_v33  ;;  %v343_v28 = vrot.slane %v8819_v30, 3 }
  0x64   :  { %v9144_v9 = vsel %vm17740_vm2, %v331_v33, %v333_v52  ;;  %v9168_v33 = vsel %vm17740_vm2, %v339_v45, %v341_v62 }
  0x65   :  { %371 = vrot.lane.b32.xlu1 %v9123_v3, %s17776_s18  ;;  %17969 = vst [vmem:[#allocation39_spill] sm:$0xff] %v9168_v33  ;;  %v9187_v47 = vsel %vm17740_vm2, %v341_v62, %v343_v28 }
  0x66   :  { %369 = vrot.lane.b32.xlu0 %v324_v59, %s17776_s18  ;;  %v335_v59 = vrot.slane %v8775_v18, 3  ;;  %17973 = vst [vmem:[#allocation43_spill] sm:$0xff] %v9187_v47 }
  0x68   :  { %v9156_v21 = vsel %vm17740_vm2, %v335_v59, %v337_v4  ;;  %v9161_v57 = vsel %vm17740_vm2, %v333_v52, %v335_v59  ;;  %v9180_v52 = vsel %vm17740_vm2, %v343_v28, %v345_v53  ;;  %v347_v59 = vrot.slane %v8841_v36, 3 }
  0x69   :  { %375 = vrot.lane.b32.xlu1 %v9132_v15, %s17776_s18  ;;  %17968 = vst [vmem:[#allocation38_spill] sm:$0xff] %v9156_v21  ;;  %17971 = vst [vmem:[#allocation41_spill] sm:$0xff] %v9180_v52 }
  0x6a   :  { %373 = vrot.lane.b32.xlu0 %v9137_v56, %s17776_s18  ;;  %v9196_v45 = vsel %vm17740_vm2, %v347_v59, %v349_v8  ;;  %v9203_v62 = vsel %vm17740_vm2, %v345_v53, %v347_v59  ;;  %v9219_v53 = vsel %vm17740_vm2, %v349_v8, %v351_v38 }
  0x6b   :  { %17975 = vst [vmem:[#allocation45_spill] sm:$0xff] %v9196_v45  ;;  %17977 = vst [vmem:[#allocation47_spill] sm:$0xff] %v9203_v62 }
  0x6c   :  { %17981 = vst [vmem:[#allocation51_spill] sm:$0xff] %v9219_v53 }
  0x6d   :  { %379 = vrot.lane.b32.xlu1 %v9144_v9, %s17776_s18 }
  0x6e   :  { %377 = vrot.lane.b32.xlu0 %v9149_v50, %s17776_s18 }
  0x71   :  { %383 = vrot.lane.b32.xlu1 %v9156_v21, %s17776_s18 }
  0x72   :  { %381 = vrot.lane.b32.xlu0 %v9161_v57, %s17776_s18 }
  0x75   :  { %387 = vrot.lane.b32.xlu1 %v9168_v33, %s17776_s18  ;;  %v353_v33 = vrot.slane %v8868_v43, 3 }
  0x76   :  { %385 = vrot.lane.b32.xlu0 %v9173_v44, %s17776_s18  ;;  %v465_v44 = vrot.slane %v8824_v31, 4 }
  0x77   :  { %v9184_v40 = vpop.permute.xlu1 %133 }
  0x78   :  { %17972 = vst [vmem:[#allocation42_spill] sm:$0xff] %v9184_v40  ;;  %v9189_v4 = vpop.permute.xlu0 %129  ;;  %v355_v40 = vrot.slane %v8885_v48, 3 }
  0x79   :  { %17974 = vst [vmem:[#allocation44_spill] sm:$0xff] %v9189_v4  ;;  %391 = vrot.lane.b32.xlu1 %v9180_v52, %s17776_s18  ;;  %v9212_v52 = vsel %vm17740_vm2, %v351_v38, %v353_v33 }
  0x7a   :  { %389 = vrot.lane.b32.xlu0 %v9187_v47, %s17776_s18  ;;  %17979 = vst [vmem:[#allocation49_spill] sm:$0xff] %v9212_v52  ;;  %v357_v47 = vrot.slane %v8890_v49, 3  ;;  %v9235_v38 = vsel %vm17740_vm2, %v353_v33, %v355_v40 }
  0x7b   :  { %v9200_v13 = vpop.permute.xlu1 %135  ;;  %17985 = vst [vmem:[#allocation55_spill] sm:$0xff] %v9235_v38 }
  0x7c   :  { %17976 = vst [vmem:[#allocation46_spill] sm:$0xff] %v9200_v13  ;;  %v9205_v28 = vpop.permute.xlu0 %131  ;;  %v361_v13 = vrot.slane %v8912_v55, 3 }
  0x7d   :  { %17978 = vst [vmem:[#allocation48_spill] sm:$0xff] %v9205_v28  ;;  %395 = vrot.lane.b32.xlu1 %v9196_v45, %s17776_s18  ;;  %v9228_v45 = vsel %vm17740_vm2, %v355_v40, %v357_v47 }
  0x7e   :  { %393 = vrot.lane.b32.xlu0 %v9203_v62, %s17776_s18  ;;  %17983 = vst [vmem:[#allocation53_spill] sm:$0xff] %v9228_v45  ;;  %v359_v62 = vrot.slane %v8907_v54, 3 }
  0x7f   :  { %v9216_v22 = vpop.permute.xlu1 %139 }
  0x80   :  { %17980 = vst [vmem:[#allocation50_spill] sm:$0xff] %v9216_v22  ;;  %v9221_v59 = vpop.permute.xlu0 %137  ;;  %v365_v22 = vrot.slane %v8934_v61, 3  ;;  %v9251_v40 = vsel %vm17740_vm2, %v357_v47, %v359_v62 }
  0x81   :  { %17982 = vst [vmem:[#allocation52_spill] sm:$0xff] %v9221_v59  ;;  %399 = vrot.lane.b32.xlu1 %v9212_v52, %s17776_s18  ;;  %v9244_v52 = vsel %vm17740_vm2, %v359_v62, %v361_v13  ;;  %17989 = vst [vmem:[#allocation59_spill] sm:$0xff] %v9251_v40  ;;  %v443_v62 = vrot.slane %v8737_v5, 4 }
  0x82   :  { %397 = vrot.lane.b32.xlu0 %v9219_v53, %s17776_s18  ;;  %17987 = vst [vmem:[#allocation57_spill] sm:$0xff] %v9244_v52  ;;  %v363_v53 = vrot.slane %v8929_v60, 3 }
  0x83   :  { %v9232_v28 = vpop.permute.xlu1 %143 }
  0x84   :  { %17984 = vst [vmem:[#allocation54_spill] sm:$0xff] %v9232_v28  ;;  %v9237_v8 = vpop.permute.xlu0 %141  ;;  %v9265_v28 = vsel %vm17740_vm2, %v361_v13, %v363_v53 }
  0x85   :  { %17986 = vst [vmem:[#allocation56_spill] sm:$0xff] %v9237_v8  ;;  %403 = vrot.lane.b32.xlu1 %v9228_v45, %s17776_s18  ;;  %v9260_v45 = vsel %vm17740_vm2, %v363_v53, %v365_v22  ;;  %17993 = vst [vmem:[#allocation63_spill] sm:$0xff] %v9265_v28  ;;  %v442_v53 = vrot.slane %v8730_v2, 4 }
  0x86   :  { %401 = vrot.lane.b32.xlu0 %v9235_v38, %s17776_s18  ;;  %17991 = vst [vmem:[#allocation61_spill] sm:$0xff] %v9260_v45 }
  0x87   :  { %v9248_v59 = vpop.permute.xlu1 %147 }
  0x88   :  { %17988 = vst [vmem:[#allocation58_spill] sm:$0xff] %v9248_v59  ;;  %v9253_v33 = vpop.permute.xlu0 %145  ;;  %v9268_v59 = vrot.slane %v8951_v6, 3 }
  0x89   :  { %17990 = vst [vmem:[#allocation60_spill] sm:$0xff] %v9253_v33  ;;  %407 = vrot.lane.b32.xlu1 %v9244_v52, %s17776_s18  ;;  %v445_v52 = vrot.slane %v8720_v0, 4 }
  0x8a   :  { %405 = vrot.lane.b32.xlu0 %v9251_v40, %s17776_s18  ;;  %17994 = vst [vmem:[#allocation64_spill] sm:$0xff] %v9268_v59  ;;  %v9282_v13 = vsel %vm17740_vm2, %v365_v22, %v9268_v59  ;;  %vm17748_vm2 = vcmask 293888  }
  0x8b   :  { %v9262_v38 = vpop.permute.xlu1 %151  ;;  %17997 = vst [vmem:[#allocation67_spill] sm:$0xff] %v9282_v13 }
  0x8c   :  { %17992 = vst [vmem:[#allocation62_spill] sm:$0xff] %v9262_v38  ;;  %v9270_v47 = vpop.permute.xlu0 %149 }
  0x8d   :  { %17995 = vst [vmem:[#allocation65_spill] sm:$0xff] %v9270_v47  ;;  %411 = vrot.lane.b32.xlu1 %v9260_v45, %s17776_s18  ;;  %v9292_v45 = vsel %vm17739_vm3, %v443_v62, %v445_v52  ;;  %v444_v47 = vsel %vm17739_vm3, %v442_v53, %v443_v62  ;;  %v455_v53 = vrot.slane %v8775_v18, 4 }
  0x8e   :  { %409 = vrot.lane.b32.xlu0 %v9265_v28, %s17776_s18  ;;  %v449_v28 = vrot.slane %v8743_v7, 4 }
  0x8f   :  { %v9278_v40 = vpop.permute.xlu1 %155 }
  0x90   :  { %17996 = vst [vmem:[#allocation66_spill] sm:$0xff] %v9278_v40  ;;  %v9285_v38 = vpop.permute.xlu0 %153  ;;  %v447_v40 = vrot.slane %v8725_v1, 4 }
  0x91   :  { %17998 = vst [vmem:[#allocation68_spill] sm:$0xff] %v9285_v38  ;;  %415 = vrot.lane.b32.xlu1 %v9268_v59, %s17776_s18  ;;  %v453_v38 = vrot.slane %v8755_v11, 4 }
  0x92   :  { %413 = vrot.lane.b32.xlu0 %v9282_v13, %s17776_s18  ;;  %v9305_v59 = vsel %vm17739_vm3, %v447_v40, %v449_v28  ;;  %v451_v13 = vrot.slane %v8750_v10, 4  ;;  %s18561_s18 = smov 9  }
  0x93   :  { %v9296_v22 = vpop.permute.xlu1 %159 }
  0x94   :  { %17999 = vst [vmem:[#allocation69_spill] sm:$0xff] %v9296_v22  ;;  %v9299_v33 = vpop.permute.xlu0 %157  ;;  %v9312_v22 = vsel %vm17739_vm3, %v445_v52, %v447_v40  ;;  %v9328_v52 = vsel %vm17739_vm3, %v449_v28, %v451_v13  ;;  %v9344_v28 = vsel %vm17739_vm3, %v453_v38, %v455_v53 }
  0x95   :  { %18000 = vst [vmem:[#allocation70_spill] sm:$0xff] %v9299_v33  ;;  %491 = vrot.lane.b32.xlu1 %v9292_v45, %s17774_s19  ;;  %v457_v33 = vrot.slane %v8780_v19, 4 }
  0x96   :  { %489 = vrot.lane.b32.xlu0 %v444_v47, %s17774_s19  ;;  %v9321_v47 = vsel %vm17739_vm3, %v451_v13, %v453_v38 }
  0x97   :  { %v9309_v8 = vpop.permute.xlu1 %163 }
  0x98   :  { %18001 = vst [vmem:[#allocation71_spill] sm:$0xff] %v9309_v8  ;;  %v9314_v62 = vpop.permute.xlu0 %161  ;;  %v9337_v8 = vsel %vm17739_vm3, %v455_v53, %v457_v33 }
  0x99   :  { %18002 = vst [vmem:[#allocation72_spill] sm:$0xff] %v9314_v62  ;;  %495 = vrot.lane.b32.xlu1 %v9305_v59, %s17774_s19  ;;  %18005 = vst [vmem:[#allocation75_spill] sm:$0xff] %v9337_v8  ;;  %v459_v62 = vrot.slane %v8797_v24, 4 }
  0x9a   :  { %493 = vrot.lane.b32.xlu0 %v9312_v22, %s17774_s19 }
  0x9b   :  { %v9325_v4 = vpop.permute.xlu1 %167  ;;  %v9360_v38 = vsel %vm17739_vm3, %v457_v33, %v459_v62 }
  0x9c   :  { %18003 = vst [vmem:[#allocation73_spill] sm:$0xff] %v9325_v4  ;;  %v9330_v40 = vpop.permute.xlu0 %165  ;;  %v9353_v4 = vsel %vm17739_vm3, %v459_v62, %v461_v41  ;;  %18010 = vst [vmem:[#allocation80_spill] sm:$0xff] %v9360_v38 }
  0x9d   :  { %18004 = vst [vmem:[#allocation74_spill] sm:$0xff] %v9330_v40  ;;  %499 = vrot.lane.b32.xlu1 %v9321_v47, %s17774_s19  ;;  %18008 = vst [vmem:[#allocation78_spill] sm:$0xff] %v9353_v4  ;;  %v463_v40 = vrot.slane %v8819_v30, 4 }
  0x9e   :  { %497 = vrot.lane.b32.xlu0 %v9328_v52, %s17774_s19 }
  0x9f   :  { %v9341_v32 = vpop.permute.xlu1 %171  ;;  %v9376_v33 = vsel %vm17739_vm3, %v461_v41, %v463_v40 }
  0xa0   :  { %18006 = vst [vmem:[#allocation76_spill] sm:$0xff] %v9341_v32  ;;  %v9346_v13 = vpop.permute.xlu0 %169  ;;  %v9369_v32 = vsel %vm17739_vm3, %v463_v40, %v465_v44  ;;  %18014 = vst [vmem:[#allocation84_spill] sm:$0xff] %v9376_v33 }
  0xa1   :  { %18007 = vst [vmem:[#allocation77_spill] sm:$0xff] %v9346_v13  ;;  %503 = vrot.lane.b32.xlu1 %v9337_v8, %s17774_s19  ;;  %18012 = vst [vmem:[#allocation82_spill] sm:$0xff] %v9369_v32  ;;  %v467_v13 = vrot.slane %v8841_v36, 4  ;;  %v469_v8 = vrot.slane %v8846_v37, 4 }
  0xa2   :  { %501 = vrot.lane.b32.xlu0 %v9344_v28, %s17774_s19 }
  0xa3   :  { %v9357_v21 = vpop.permute.xlu1 %175  ;;  %v9392_v41 = vsel %vm17739_vm3, %v465_v44, %v467_v13 }
  0xa4   :  { %18009 = vst [vmem:[#allocation79_spill] sm:$0xff] %v9357_v21  ;;  %v9362_v53 = vpop.permute.xlu0 %173  ;;  %v471_v21 = vrot.slane %v8863_v42, 4  ;;  %18018 = vst [vmem:[#allocation88_spill] sm:$0xff] %v9392_v41 }
  0xa5   :  { %18011 = vst [vmem:[#allocation81_spill] sm:$0xff] %v9362_v53  ;;  %507 = vrot.lane.b32.xlu1 %v9353_v4, %s17774_s19  ;;  %v9385_v53 = vsel %vm17739_vm3, %v467_v13, %v469_v8  ;;  %v473_v4 = vrot.slane %v8868_v43, 4 }
  0xa6   :  { %505 = vrot.lane.b32.xlu0 %v9360_v38, %s17774_s19  ;;  %18016 = vst [vmem:[#allocation86_spill] sm:$0xff] %v9385_v53  ;;  %v9408_v44 = vsel %vm17739_vm3, %v469_v8, %v471_v21 }
  0xa7   :  { %v9373_v34 = vpop.permute.xlu1 %251  ;;  %18022 = vst [vmem:[#allocation92_spill] sm:$0xff] %v9408_v44 }
  0xa8   :  { %18013 = vst [vmem:[#allocation83_spill] sm:$0xff] %v9373_v34  ;;  %v9378_v62 = vpop.permute.xlu0 %249  ;;  %v477_v34 = vrot.slane %v8890_v49, 4 }
  0xa9   :  { %18015 = vst [vmem:[#allocation85_spill] sm:$0xff] %v9378_v62  ;;  %511 = vrot.lane.b32.xlu1 %v9369_v32, %s17774_s19  ;;  %v9401_v32 = vsel %vm17739_vm3, %v471_v21, %v473_v4 }
  0xaa   :  { %509 = vrot.lane.b32.xlu0 %v9376_v33, %s17774_s19  ;;  %18020 = vst [vmem:[#allocation90_spill] sm:$0xff] %v9401_v32  ;;  %v475_v33 = vrot.slane %v8885_v48, 4 }
  0xab   :  { %v9389_v38 = vpop.permute.xlu1 %255 }
  0xac   :  { %18017 = vst [vmem:[#allocation87_spill] sm:$0xff] %v9389_v38  ;;  %v9394_v40 = vpop.permute.xlu0 %253  ;;  %v481_v38 = vrot.slane %v8912_v55, 4  ;;  %v9424_v21 = vsel %vm17739_vm3, %v473_v4, %v475_v33 }
  0xad   :  { %18019 = vst [vmem:[#allocation89_spill] sm:$0xff] %v9394_v40  ;;  %515 = vrot.lane.b32.xlu1 %v9385_v53, %s17774_s19  ;;  %v9417_v53 = vsel %vm17739_vm3, %v475_v33, %v477_v34  ;;  %18026 = vst [vmem:[#allocation96_spill] sm:$0xff] %v9424_v21 }
  0xae   :  { %513 = vrot.lane.b32.xlu0 %v9392_v41, %s17774_s19  ;;  %18024 = vst [vmem:[#allocation94_spill] sm:$0xff] %v9417_v53  ;;  %v479_v41 = vrot.slane %v8907_v54, 4 }
  0xaf   :  { %v9405_v62 = vpop.permute.xlu1 %259 }
  0xb0   :  { %18021 = vst [vmem:[#allocation91_spill] sm:$0xff] %v9405_v62  ;;  %v9410_v13 = vpop.permute.xlu0 %257  ;;  %v485_v62 = vrot.slane %v8934_v61, 4  ;;  %v9440_v4 = vsel %vm17739_vm3, %v477_v34, %v479_v41 }
  0xb1   :  { %18023 = vst [vmem:[#allocation93_spill] sm:$0xff] %v9410_v13  ;;  %519 = vrot.lane.b32.xlu1 %v9401_v32, %s17774_s19  ;;  %v9433_v32 = vsel %vm17739_vm3, %v479_v41, %v481_v38  ;;  %18030 = vst [vmem:[#allocation100_spill] sm:$0xff] %v9440_v4  ;;  %v563_v41 = vrot.slane %v8737_v5, 5 }
  0xb2   :  { %517 = vrot.lane.b32.xlu0 %v9408_v44, %s17774_s19  ;;  %18028 = vst [vmem:[#allocation98_spill] sm:$0xff] %v9433_v32  ;;  %v483_v44 = vrot.slane %v8929_v60, 4 }
  0xb3   :  { %v9421_v40 = vpop.permute.xlu1 %263 }
  0xb4   :  { %18025 = vst [vmem:[#allocation95_spill] sm:$0xff] %v9421_v40  ;;  %v9426_v8 = vpop.permute.xlu0 %261  ;;  %v9454_v40 = vsel %vm17739_vm3, %v481_v38, %v483_v44 }
  0xb5   :  { %18027 = vst [vmem:[#allocation97_spill] sm:$0xff] %v9426_v8  ;;  %523 = vrot.lane.b32.xlu1 %v9417_v53, %s17774_s19  ;;  %v9449_v53 = vsel %vm17739_vm3, %v483_v44, %v485_v62  ;;  %18034 = vst [vmem:[#allocation104_spill] sm:$0xff] %v9454_v40  ;;  %v562_v44 = vrot.slane %v8730_v2, 5 }
  0xb6   :  { %521 = vrot.lane.b32.xlu0 %v9424_v21, %s17774_s19  ;;  %18032 = vst [vmem:[#allocation102_spill] sm:$0xff] %v9449_v53 }
  0xb7   :  { %v9437_v13 = vpop.permute.xlu1 %267 }
  0xb8   :  { %18029 = vst [vmem:[#allocation99_spill] sm:$0xff] %v9437_v13  ;;  %v9442_v33 = vpop.permute.xlu0 %265  ;;  %v9457_v13 = vrot.slane %v8951_v6, 4 }
  0xb9   :  { %18031 = vst [vmem:[#allocation101_spill] sm:$0xff] %v9442_v33  ;;  %527 = vrot.lane.b32.xlu1 %v9433_v32, %s17774_s19  ;;  %v565_v32 = vrot.slane %v8720_v0, 5 }
  0xba   :  { %525 = vrot.lane.b32.xlu0 %v9440_v4, %s17774_s19  ;;  %18035 = vst [vmem:[#allocation105_spill] sm:$0xff] %v9457_v13  ;;  %v9471_v38 = vsel %vm17739_vm3, %v485_v62, %v9457_v13  ;;  %vm17786_vm3 = vcmask 269312  }
  0xbb   :  { %v9451_v21 = vpop.permute.xlu1 %271  ;;  %18038 = vst [vmem:[#allocation108_spill] sm:$0xff] %v9471_v38 }
  0xbc   :  { %18033 = vst [vmem:[#allocation103_spill] sm:$0xff] %v9451_v21  ;;  %v9459_v34 = vpop.permute.xlu0 %269 }
  0xbd   :  { %18036 = vst [vmem:[#allocation106_spill] sm:$0xff] %v9459_v34  ;;  %531 = vrot.lane.b32.xlu1 %v9449_v53, %s17774_s19  ;;  %v9481_v53 = vsel %vm17738_vm4, %v563_v41, %v565_v32  ;;  %v564_v34 = vsel %vm17738_vm4, %v562_v44, %v563_v41  ;;  %v575_v44 = vrot.slane %v8775_v18, 5 }
  0xbe   :  { %529 = vrot.lane.b32.xlu0 %v9454_v40, %s17774_s19  ;;  %v569_v40 = vrot.slane %v8743_v7, 5 }
  0xbf   :  { %v9467_v4 = vpop.permute.xlu1 %275 }
  0xc0   :  { %18037 = vst [vmem:[#allocation107_spill] sm:$0xff] %v9467_v4  ;;  %v9474_v21 = vpop.permute.xlu0 %273  ;;  %v567_v4 = vrot.slane %v8725_v1, 5 }
  0xc1   :  { %18039 = vst [vmem:[#allocation109_spill] sm:$0xff] %v9474_v21  ;;  %535 = vrot.lane.b32.xlu1 %v9457_v13, %s17774_s19  ;;  %v573_v21 = vrot.slane %v8755_v11, 5 }
  0xc2   :  { %533 = vrot.lane.b32.xlu0 %v9471_v38, %s17774_s19  ;;  %v9494_v13 = vsel %vm17738_vm4, %v567_v4, %v569_v40  ;;  %v571_v38 = vrot.slane %v8750_v10, 5  ;;  %s18581_s19 = smov 21  }
  0xc3   :  { %v9485_v62 = vpop.permute.xlu1 %279 }
  0xc4   :  { %18040 = vst [vmem:[#allocation110_spill] sm:$0xff] %v9485_v62  ;;  %v9488_v33 = vpop.permute.xlu0 %277  ;;  %v9501_v62 = vsel %vm17738_vm4, %v565_v32, %v567_v4  ;;  %v9517_v32 = vsel %vm17738_vm4, %v569_v40, %v571_v38  ;;  %v9533_v40 = vsel %vm17738_vm4, %v573_v21, %v575_v44 }
  0xc5   :  { %18041 = vst [vmem:[#allocation111_spill] sm:$0xff] %v9488_v33  ;;  %611 = vrot.lane.b32.xlu1 %v9481_v53, %s17772_s20  ;;  %v577_v33 = vrot.slane %v8780_v19, 5  ;;  %v581_v19 = vrot.slane %v8802_v25, 5  ;;  %v585_v25 = vrot.slane %v8824_v31, 5  ;;  %v589_v31 = vrot.slane %v8846_v37, 5 }
  0xc6   :  { %609 = vrot.lane.b32.xlu0 %v564_v34, %s17772_s20  ;;  %v9510_v34 = vsel %vm17738_vm4, %v571_v38, %v573_v21  ;;  %v593_v37 = vrot.slane %v8868_v43, 5  ;;  %v597_v43 = vrot.slane %v8890_v49, 5  ;;  %v601_v49 = vrot.slane %v8912_v55, 5 }
  0xc7   :  { %v9498_v8 = vpop.permute.xlu1 %283  ;;  %v605_v55 = vrot.slane %v8934_v61, 5  ;;  %v9646_v61 = vrot.slane %v8951_v6, 5  ;;  %v682_v6 = vrot.slane %v8730_v2, 6 }
  0xc8   :  { %18042 = vst [vmem:[#allocation112_spill] sm:$0xff] %v9498_v8  ;;  %v9503_v41 = vpop.permute.xlu0 %281  ;;  %v9526_v8 = vsel %vm17738_vm4, %v575_v44, %v577_v33 }
  0xc9   :  { %18043 = vst [vmem:[#allocation113_spill] sm:$0xff] %v9503_v41  ;;  %615 = vrot.lane.b32.xlu1 %v9494_v13, %s17772_s20  ;;  %v579_v41 = vrot.slane %v8797_v24, 5  ;;  %v583_v24 = vrot.slane %v8819_v30, 5  ;;  %v587_v30 = vrot.slane %v8841_v36, 5  ;;  %v591_v36 = vrot.slane %v8863_v42, 5  ;;  %18067 = vst [vmem:[#allocation137_spill] sm:$0xff] %v9646_v61 }
  0xca   :  { %613 = vrot.lane.b32.xlu0 %v9501_v62, %s17772_s20  ;;  %v595_v42 = vrot.slane %v8885_v48, 5  ;;  %v599_v48 = vrot.slane %v8907_v54, 5  ;;  %v603_v54 = vrot.slane %v8929_v60, 5 }
  0xcb   :  { %v9514_v63 = vpop.permute.xlu1 %287  ;;  %v9549_v21 = vsel %vm17738_vm4, %v577_v33, %v579_v41  ;;  %v9565_v33 = vsel %vm17738_vm4, %v581_v19, %v583_v24 }
  0xcc   :  { %18044 = vst [vmem:[#allocation114_spill] sm:$0xff] %v9514_v63  ;;  %v9519_v4 = vpop.permute.xlu0 %285  ;;  %v9542_v63 = vsel %vm17738_vm4, %v579_v41, %v581_v19  ;;  %18051 = vst [vmem:[#allocation121_spill] sm:$0xff] %v9565_v33  ;;  %v9581_v19 = vsel %vm17738_vm4, %v585_v25, %v587_v30  ;;  %v9643_v60 = vsel %vm17738_vm4, %v601_v49, %v603_v54 }
  0xcd   :  { %18045 = vst [vmem:[#allocation115_spill] sm:$0xff] %v9519_v4  ;;  %619 = vrot.lane.b32.xlu1 %v9510_v34, %s17772_s20  ;;  %18053 = vst [vmem:[#allocation123_spill] sm:$0xff] %v9581_v19 }
  0xce   :  { %617 = vrot.lane.b32.xlu0 %v9517_v32, %s17772_s20  ;;  %18066 = vst [vmem:[#allocation136_spill] sm:$0xff] %v9643_v60 }
  0xcf   :  { %v9530_v35 = vpop.permute.xlu1 %291 }
  0xd0   :  { %18046 = vst [vmem:[#allocation116_spill] sm:$0xff] %v9530_v35  ;;  %v9535_v38 = vpop.permute.xlu0 %289  ;;  %v9558_v35 = vsel %vm17738_vm4, %v583_v24, %v585_v25  ;;  %v9597_v25 = vsel %vm17738_vm4, %v589_v31, %v591_v36 }
  0xd1   :  { %18047 = vst [vmem:[#allocation117_spill] sm:$0xff] %v9535_v38  ;;  %623 = vrot.lane.b32.xlu1 %v9526_v8, %s17772_s20  ;;  %18050 = vst [vmem:[#allocation120_spill] sm:$0xff] %v9558_v35 }
  0xd2   :  { %621 = vrot.lane.b32.xlu0 %v9533_v40, %s17772_s20  ;;  %18055 = vst [vmem:[#allocation125_spill] sm:$0xff] %v9597_v25 }
  0xd3   :  { %v9546_v4 = vpop.permute.xlu1 %295 }
  0xd4   :  { %18048 = vst [vmem:[#allocation118_spill] sm:$0xff] %v9546_v4  ;;  %v9551_v44 = vpop.permute.xlu0 %293 }
  0xd5   :  { %18049 = vst [vmem:[#allocation119_spill] sm:$0xff] %v9551_v44  ;;  %627 = vrot.lane.b32.xlu1 %v9542_v63, %s17772_s20  ;;  %v9574_v44 = vsel %vm17738_vm4, %v587_v30, %v589_v31  ;;  %v9613_v31 = vsel %vm17738_vm4, %v593_v37, %v595_v42 }
  0xd6   :  { %625 = vrot.lane.b32.xlu0 %v9549_v21, %s17772_s20  ;;  %18052 = vst [vmem:[#allocation122_spill] sm:$0xff] %v9574_v44  ;;  %18058 = vst [vmem:[#allocation128_spill] sm:$0xff] %v9613_v31 }
  0xd7   :  { %v9562_v38 = vpop.permute.xlu1 %371 }
  0xd8   :  { %v9567_v41 = vpop.permute.xlu0 %369 }
  0xd9   :  { %631 = vrot.lane.b32.xlu1 %v9558_v35, %s17772_s20  ;;  %v9590_v35 = vsel %vm17738_vm4, %v591_v36, %v593_v37  ;;  %v9629_v37 = vsel %vm17738_vm4, %v597_v43, %v599_v48 }
  0xda   :  { %629 = vrot.lane.b32.xlu0 %v9565_v33, %s17772_s20  ;;  %18054 = vst [vmem:[#allocation124_spill] sm:$0xff] %v9590_v35  ;;  %18062 = vst [vmem:[#allocation132_spill] sm:$0xff] %v9629_v37 }
  0xdb   :  { %v9578_v4 = vpop.permute.xlu1 %375 }
  0xdc   :  { %v9583_v24 = vpop.permute.xlu0 %373 }
  0xdd   :  { %635 = vrot.lane.b32.xlu1 %v9574_v44, %s17772_s20  ;;  %v9606_v44 = vsel %vm17738_vm4, %v595_v42, %v597_v43 }
  0xde   :  { %633 = vrot.lane.b32.xlu0 %v9581_v19, %s17772_s20  ;;  %18056 = vst [vmem:[#allocation126_spill] sm:$0xff] %v9606_v44 }
  0xdf   :  { %v9594_v33 = vpop.permute.xlu1 %379 }
  0xe0   :  { %v9599_v30 = vpop.permute.xlu0 %377 }
  0xe1   :  { %639 = vrot.lane.b32.xlu1 %v9590_v35, %s17772_s20  ;;  %v9622_v35 = vsel %vm17738_vm4, %v599_v48, %v601_v49  ;;  %v683_v48 = vrot.slane %v8737_v5, 6  ;;  %v9660_v49 = vsel %vm17738_vm4, %v605_v55, %v9646_v61 }
  0xe2   :  { %637 = vrot.lane.b32.xlu0 %v9597_v25, %s17772_s20  ;;  %18060 = vst [vmem:[#allocation130_spill] sm:$0xff] %v9622_v35  ;;  %18070 = vst [vmem:[#allocation140_spill] sm:$0xff] %v9660_v49 }
  0xe3   :  { %v9610_v19 = vpop.permute.xlu1 %383 }
  0xe4   :  { %18057 = vst [vmem:[#allocation127_spill] sm:$0xff] %v9610_v19  ;;  %v9615_v36 = vpop.permute.xlu0 %381  ;;  %v18133_v19 = vld [vmem:[#allocation5_spill] sm:$0xff] }
  0xe5   :  { %18059 = vst [vmem:[#allocation129_spill] sm:$0xff] %v9615_v36  ;;  %643 = vrot.lane.b32.xlu1 %v9606_v44, %s17772_s20  ;;  %v9638_v44 = vsel %vm17738_vm4, %v603_v54, %v605_v55  ;;  %v8592_v36 = vld [vmem:[%s17641_s0] sm:$0xff]  ;;  %vm17744_vm4 = vcmask 244736  }
  0xe6   :  { %641 = vrot.lane.b32.xlu0 %v9613_v31, %s17772_s20  ;;  %18064 = vst [vmem:[#allocation134_spill] sm:$0xff] %v9638_v44 }
  0xe7   :  { %v9626_v25 = vpop.permute.xlu1 %387 }
  0xe8   :  { %18061 = vst [vmem:[#allocation131_spill] sm:$0xff] %v9626_v25  ;;  %v9631_v42 = vpop.permute.xlu0 %385 }
  0xe9   :  { %18063 = vst [vmem:[#allocation133_spill] sm:$0xff] %v9631_v42  ;;  %647 = vrot.lane.b32.xlu1 %v9622_v35, %s17772_s20  ;;  %v685_v35 = vrot.slane %v8720_v0, 6 }
  0xea   :  { %645 = vrot.lane.b32.xlu0 %v9629_v37, %s17772_s20 }
  0xeb   :  { %v9640_v31 = vpop.permute.xlu1 %391 }
  0xec   :  { %18065 = vst [vmem:[#allocation135_spill] sm:$0xff] %v9640_v31  ;;  %v9648_v43 = vpop.permute.xlu0 %389  ;;  %v684_v31 = vsel %vm17743_vm5, %v682_v6, %v683_v48 }
  0xed   :  { %18068 = vst [vmem:[#allocation138_spill] sm:$0xff] %v9648_v43  ;;  %651 = vrot.lane.b32.xlu1 %v9638_v44, %s17772_s20  ;;  %v9670_v44 = vsel %vm17743_vm5, %v683_v48, %v685_v35 }
  0xee   :  { %649 = vrot.lane.b32.xlu0 %v9643_v60, %s17772_s20  ;;  %v689_v60 = vrot.slane %v8743_v7, 6 }
  0xef   :  { %v9656_v37 = vpop.permute.xlu1 %395 }
  0xf0   :  { %18069 = vst [vmem:[#allocation139_spill] sm:$0xff] %v9656_v37  ;;  %v9663_v54 = vpop.permute.xlu0 %393  ;;  %v687_v37 = vrot.slane %v8725_v1, 6 }
  0xf1   :  { %18071 = vst [vmem:[#allocation141_spill] sm:$0xff] %v9663_v54  ;;  %655 = vrot.lane.b32.xlu1 %v9646_v61, %s17772_s20  ;;  %v693_v54 = vrot.slane %v8755_v11, 6  ;;  %v803_v11 = vrot.slane %v8737_v5, 7 }
  0xf2   :  { %653 = vrot.lane.b32.xlu0 %v9660_v49, %s17772_s20  ;;  %v9683_v61 = vsel %vm17743_vm5, %v687_v37, %v689_v60  ;;  %v691_v49 = vrot.slane %v8750_v10, 6  ;;  %v802_v10 = vrot.slane %v8730_v2, 7  ;;  %s17800_s20 = smov 112  }
  0xf3   :  { %v9674_v55 = vpop.permute.xlu1 %399 }
  0xf4   :  { %18072 = vst [vmem:[#allocation142_spill] sm:$0xff] %v9674_v55  ;;  %v9677_v43 = vpop.permute.xlu0 %397  ;;  %v9690_v55 = vsel %vm17743_vm5, %v685_v35, %v687_v37  ;;  %v9706_v35 = vsel %vm17743_vm5, %v689_v60, %v691_v49  ;;  %v17732_v37 = vrot.slane %v8775_v18, 6  ;;  %v804_v2 = vsel %vm17745_vm6, %v802_v10, %v803_v11 }
  0xf5   :  { %18073 = vst [vmem:[#allocation143_spill] sm:$0xff] %v9677_v43  ;;  %731 = vrot.lane.b32.xlu1 %v9670_v44, %s17770_s21 }
  0xf6   :  { %729 = vrot.lane.b32.xlu0 %v684_v31, %s17770_s21  ;;  %v9699_v31 = vsel %vm17743_vm5, %v691_v49, %v693_v54  ;;  %v9721_v60 = vsel %vm17743_vm5, %v693_v54, %v17732_v37  ;;  %v805_v49 = vrot.slane %v8720_v0, 7  ;;  %v807_v37 = vrot.slane %v8725_v1, 7 }
  0xf7   :  { %v9687_v25 = vpop.permute.xlu1 %403 }
  0xf8   :  { %18074 = vst [vmem:[#allocation144_spill] sm:$0xff] %v9687_v25  ;;  %v9692_v48 = vpop.permute.xlu0 %401  ;;  %v9732_v10 = vsel %vm17745_vm6, %v803_v11, %v805_v49 }
  0xf9   :  { %18075 = vst [vmem:[#allocation145_spill] sm:$0xff] %v9692_v48  ;;  %735 = vrot.lane.b32.xlu1 %v9683_v61, %s17770_s21 }
  0xfa   :  { %733 = vrot.lane.b32.xlu0 %v9690_v55, %s17770_s21 }
  0xfb   :  { %v9703_v6 = vpop.permute.xlu1 %407 }
  0xfc   :  { %18076 = vst [vmem:[#allocation146_spill] sm:$0xff] %v9703_v6  ;;  %v9709_v25 = vpop.permute.xlu0 %405 }
  0xfd   :  { %18077 = vst [vmem:[#allocation147_spill] sm:$0xff] %v9709_v25  ;;  %739 = vrot.lane.b32.xlu1 %v9699_v31, %s17770_s21 }
  0xfe   :  { %737 = vrot.lane.b32.xlu0 %v9706_v35, %s17770_s21 }
  0xff   :  { %v9716_v48 = vpop.permute.xlu1 %411 }
 0x100   :  { %18078 = vst [vmem:[#allocation148_spill] sm:$0xff] %v9716_v48  ;;  %v9724_v6 = vpop.permute.xlu0 %409 }
 0x101   :  { %18079 = vst [vmem:[#allocation149_spill] sm:$0xff] %v9724_v6  ;;  %849 = vrot.lane.b32.xlu1 %v804_v2, %s17768_s22 }
 0x102   :  { %741 = vrot.lane.b32.xlu0 %v9721_v60, %s17770_s21 }
 0x103   :  { %v9729_v25 = vpop.permute.xlu1 %415 }
 0x104   :  { %18080 = vst [vmem:[#allocation150_spill] sm:$0xff] %v9729_v25  ;;  %v9734_v48 = vpop.permute.xlu0 %413 }
 0x105   :  { %18081 = vst [vmem:[#allocation151_spill] sm:$0xff] %v9734_v48  ;;  %922 = vrot.lane.b32.xlu1 %v8737_v5, %s8643_s24  ;;  %v809_v5 = vrot.slane %v8743_v7, 7 }
 0x106   :  { %851 = vrot.lane.b32.xlu0 %v9732_v10, %s17768_s22 }
 0x107   :  { %v9740_v54 = vpop.permute.xlu1 %491  ;;  %v9770_v1 = vsel %vm17745_vm6, %v807_v37, %v809_v5 }
 0x108   :  { %v9742_v2 = vpop.permute.xlu0 %489 }
 0x109   :  { %996 = vrot.lane.b32.xlu1 %v8770_v17, %s17766_s25  ;;  %v9761_v17 = vsel %vm17745_vm6, %v805_v49, %v807_v37  ;;  %v9789_v37 = vld [vmem:[%s17641_s0 + $0x18] sm:$0xff] }
 0x10a   :  { %924 = vrot.lane.b32.xlu0 %v8720_v0, %s8643_s24 }
 0x10b   :  { %v9748_v11 = vpop.permute.xlu1 %495 }
 0x10c   :  { %v9751_v48 = vpop.permute.xlu0 %493 }
 0x10d   :  { %1070 = vrot.lane.b32.xlu1 %v8982_v27, %s17764_s26 }
 0x10e   :  { %998 = vrot.lane.b32.xlu0 %v8758_v12, %s17766_s25 }
 0x10f   :  { %v9758_v25 = vpop.permute.xlu1 %499 }
 0x110   :  { %18082 = vst [vmem:[#allocation152_spill] sm:$0xff] %v9758_v25  ;;  %v9763_v0 = vpop.permute.xlu0 %497 }
 0x111   :  { %1072 = vrot.lane.b32.xlu1 %v8996_v46, %s17764_s26 }
 0x112   :  { %853 = vrot.lane.b32.xlu0 %v9761_v17, %s17768_s22 }
 0x113   :  { %v9772_v27 = vpop.permute.xlu1 %503 }
 0x114   :  { %18083 = vst [vmem:[#allocation153_spill] sm:$0xff] %v9772_v27  ;;  %v9774_v12 = vpop.permute.xlu0 %501 }
 0x115   :  { %18084 = vst [vmem:[#allocation154_spill] sm:$0xff] %v9774_v12  ;;  %855 = vrot.lane.b32.xlu1 %v9770_v1, %s17768_s22  ;;  %v18135_v12 = vld [vmem:[#allocation8_spill] sm:$0xff] }
 0x116   :  { %1144 = vrot.lane.b32.xlu0 %v9123_v3, %s17762_s27  ;;  %v9800_v3 = vld [vmem:[%s17641_s0 + $0x20] sm:$0xff] }
 0x117   :  { %v9780_v7 = vpop.permute.xlu1 %507 }
 0x118   :  { %18085 = vst [vmem:[#allocation155_spill] sm:$0xff] %v9780_v7  ;;  %v9782_v46 = vpop.permute.xlu0 %505 }
 0x119   :  { %18086 = vst [vmem:[#allocation156_spill] sm:$0xff] %v9782_v46  ;;  %1146 = vrot.lane.b32.xlu1 %v9137_v56, %s17762_s27 }
 0x11a   :  { %926 = vrot.lane.b32.xlu0 %v9789_v37, %s8643_s24 }
 0x11b   :  { %v9793_v49 = vpop.permute.xlu1 %511 }
 0x11c   :  { %18087 = vst [vmem:[#allocation157_spill] sm:$0xff] %v9793_v49  ;;  %v9795_v6 = vpop.permute.xlu0 %509 }
 0x11d   :  { %18088 = vst [vmem:[#allocation158_spill] sm:$0xff] %v9795_v6  ;;  %928 = vrot.lane.b32.xlu1 %v9800_v3, %s8643_s24 }
 0x11e   :  { %1218 = vrot.lane.b32.xlu0 %v9292_v45, %s17760_s11  ;;  %v9825_v45 = vld [vmem:[%s17641_s0 + $0x28] sm:$0xff] }
 0x11f   :  { %v9806_v56 = vpop.permute.xlu1 %515 }
 0x120   :  { %18089 = vst [vmem:[#allocation159_spill] sm:$0xff] %v9806_v56  ;;  %v9808_v43 = vpop.permute.xlu0 %513 }
 0x121   :  { %18090 = vst [vmem:[#allocation160_spill] sm:$0xff] %v9808_v43  ;;  %1220 = vrot.lane.b32.xlu1 %v9312_v22, %s17760_s11  ;;  %v811_v22 = vrot.slane %v9825_v45, 7 }
 0x122   :  { %1000 = vrot.lane.b32.xlu0 %v8765_v14, %s17766_s25 }
 0x123   :  { %v9814_v49 = vpop.permute.xlu1 %519 }
 0x124   :  { %18091 = vst [vmem:[#allocation161_spill] sm:$0xff] %v9814_v49  ;;  %v9816_v6 = vpop.permute.xlu0 %517 }
 0x125   :  { %18092 = vst [vmem:[#allocation162_spill] sm:$0xff] %v9816_v6  ;;  %1002 = vrot.lane.b32.xlu1 %v8792_v23, %s17766_s25  ;;  %v1892_v23 = vld [vmem:[%s17642_s1 + $0x28] sm:$0xff]  ;;  %v9954_v6 = vld [vmem:[%s17641_s0 + $0x38] sm:$0xff] }
 0x126   :  { %1292 = vrot.lane.b32.xlu0 %v9481_v53, %s17754_s12  ;;  %v9840_v53 = vsel %vm17745_vm6, %v809_v5, %v811_v22  ;;  %7475 = vmatprep.subr.mxu0 %v1892_v23  ;;  %18112 = vst [vmem:[#allocation181_spill] sm:$0xff] %v9954_v6  ;;  %v815_v43 = vrot.slane %v9954_v6, 7 }
 0x127   :  { %v9828_v56 = vpop.permute.xlu1 %523  ;;  %7476 = vmatpush3.msra.mxu0 %v1892_v23 }
 0x128   :  { %18093 = vst [vmem:[#allocation163_spill] sm:$0xff] %v9828_v56  ;;  %v9830_v14 = vpop.permute.xlu0 %521  ;;  %v1891_v56 = vld [vmem:[%s17642_s1 + $0x20] sm:$0xff] }
 0x129   :  { %18094 = vst [vmem:[#allocation164_spill] sm:$0xff] %v9830_v14  ;;  %1294 = vrot.lane.b32.xlu1 %v9501_v62, %s17754_s12  ;;  %7477 = vmatprep.subr.mxu0 %v1891_v56  ;;  %v1889_v62 = vld [vmem:[%s17642_s1 + $0x10] sm:$0xff] }
 0x12a   :  { %1074 = vrot.lane.b32.xlu0 %v8991_v39, %s17764_s26  ;;  %7478 = vmatpush3.msra.mxu0 %v1891_v56  ;;  %v1890_v39 = vld [vmem:[%s17642_s1 + $0x18] sm:$0xff]  ;;  %v1888_v56 = vld [vmem:[%s17642_s1 + $0x8] sm:$0xff] }
 0x12b   :  { %v9845_v49 = vpop.permute.xlu1 %527  ;;  %7479 = vmatprep.subr.mxu0 %v1890_v39 }
 0x12c   :  { %18095 = vst [vmem:[#allocation165_spill] sm:$0xff] %v9845_v49  ;;  %v9847_v14 = vpop.permute.xlu0 %525  ;;  %7480 = vmatpush3.msra.mxu0 %v1890_v39 }
 0x12d   :  { %18096 = vst [vmem:[#allocation166_spill] sm:$0xff] %v9847_v14  ;;  %857 = vrot.lane.b32.xlu1 %v9840_v53, %s17768_s22  ;;  %7481 = vmatprep.subr.mxu0 %v1889_v62 }
 0x12e   :  { %1366 = vrot.lane.b32.xlu0 %v9670_v44, %s17752_s13  ;;  %7482 = vmatpush3.msra.mxu0 %v1889_v62  ;;  %v1887_v44 = vld [vmem:[%s17642_s1] sm:$0xff] }
 0x12f   :  { %v9859_v5 = vpop.permute.xlu1 %531  ;;  %7483 = vmatprep.subr.mxu0 %v1888_v56 }
 0x130   :  { %18097 = vst [vmem:[#allocation167_spill] sm:$0xff] %v9859_v5  ;;  %v9861_v23 = vpop.permute.xlu0 %529  ;;  %v9878_v5 = vld [vmem:[%s17641_s0 + $0x30] sm:$0xff]  ;;  %7484 = vmatpush3.msra.mxu0 %v1888_v56 }
 0x131   :  { %18098 = vst [vmem:[#allocation168_spill] sm:$0xff] %v9861_v23  ;;  %1148 = vrot.lane.b32.xlu1 %v9132_v15, %s17762_s27  ;;  %18100 = vst [vmem:[#allocation170_spill] sm:$0xff] %v9878_v5  ;;  %v813_v15 = vrot.slane %v9878_v5, 7  ;;  %7485 = vmatprep.subr.mxu0 %v1887_v44 }
 0x132   :  { %1076 = vrot.lane.b32.xlu0 %v9008_v58, %s17764_s26  ;;  %7486 = vmatpush3.msra.mxu0 %v1887_v44 }
 0x133   :  { %v9873_v39 = vpop.permute.xlu1 %535 }
 0x134   :  { %18099 = vst [vmem:[#allocation169_spill] sm:$0xff] %v9873_v39  ;;  %v9881_v62 = vpop.permute.xlu0 %533  ;;  %v9890_v39 = vsel %vm17745_vm6, %v811_v22, %v813_v15 }
 0x135   :  { %18101 = vst [vmem:[#allocation171_spill] sm:$0xff] %v9881_v62  ;;  %1440 = vrot.lane.b32.xlu1 %v9732_v10, %s17750_s15 }
 0x136   :  { %1368 = vrot.lane.b32.xlu0 %v9690_v55, %s17752_s13 }
 0x137   :  { %v9887_v58 = vpop.permute.xlu1 %611 }
 0x138   :  { %v9892_v23 = vpop.permute.xlu0 %609 }
 0x139   :  { %930 = vrot.lane.b32.xlu1 %v9825_v45, %s8643_s24 }
 0x13a   :  { %859 = vrot.lane.b32.xlu0 %v9890_v39, %s17768_s22 }
 0x13b   :  { %v9898_v56 = vpop.permute.xlu1 %615 }
 0x13c   :  { %v9900_v10 = vpop.permute.xlu0 %613 }
 0x13d   :  { %1222 = vrot.lane.b32.xlu1 %v9305_v59, %s17760_s11 }
 0x13e   :  { %1150 = vrot.lane.b32.xlu0 %v9149_v50, %s17762_s27 }
 0x13f   :  { %v9906_v55 = vpop.permute.xlu1 %619 }
 0x140   :  { %18102 = vst [vmem:[#allocation172_spill] sm:$0xff] %v9906_v55  ;;  %v9908_v22 = vpop.permute.xlu0 %617 }
 0x141   :  { %932 = vrot.lane.b32.xlu1 %v9878_v5, %s8643_s24 }
 0x142   :  { %1442 = vrot.lane.b32.xlu0 %v9761_v17, %s17750_s15  ;;  %v9933_v17 = vld [vmem:[%s17641_s0 + $0x40] sm:$0xff] }
 0x143   :  { %v9914_v44 = vpop.permute.xlu1 %623  ;;  %18107 = vst [vmem:[#allocation177_spill] sm:$0xff] %v9933_v17 }
 0x144   :  { %18103 = vst [vmem:[#allocation173_spill] sm:$0xff] %v9914_v44  ;;  %v9916_v62 = vpop.permute.xlu0 %621  ;;  %v18132_v44 = vld [vmem:[#allocation75_spill] sm:$0xff] }
 0x145   :  { %18104 = vst [vmem:[#allocation174_spill] sm:$0xff] %v9916_v62  ;;  %1224 = vrot.lane.b32.xlu1 %v9328_v52, %s17760_s11  ;;  %v697_v52 = vrot.slane %v9933_v17, 6 }
 0x146   :  { %1004 = vrot.lane.b32.xlu0 %v8787_v20, %s17766_s25 }
 0x147   :  { %v9922_v50 = vpop.permute.xlu1 %627 }
 0x148   :  { %18105 = vst [vmem:[#allocation175_spill] sm:$0xff] %v9922_v50  ;;  %v9924_v59 = vpop.permute.xlu0 %625 }
 0x149   :  { %18106 = vst [vmem:[#allocation176_spill] sm:$0xff] %v9924_v59  ;;  %1006 = vrot.lane.b32.xlu1 %v8814_v29, %s17766_s25  ;;  %v18110_v29 = vrot.slane %v8775_v18, 6 }
 0x14a   :  { %1296 = vrot.lane.b32.xlu0 %v9494_v13, %s17754_s12 }
 0x14b   :  { %v9936_v49 = vpop.permute.xlu1 %631  ;;  %v9947_v13 = vsel %vm17743_vm5, %v18110_v29, %v697_v52  ;;  %v817_v29 = vrot.slane %v9933_v17, 7 }
 0x14c   :  { %18108 = vst [vmem:[#allocation178_spill] sm:$0xff] %v9936_v49  ;;  %v9938_v20 = vpop.permute.xlu0 %629 }
 0x14d   :  { %18109 = vst [vmem:[#allocation179_spill] sm:$0xff] %v9938_v20  ;;  %1298 = vrot.lane.b32.xlu1 %v9517_v32, %s17754_s12 }
 0x14e   :  { %1078 = vrot.lane.b32.xlu0 %v9003_v51, %s17764_s26  ;;  %v9966_v51 = vsel %vm17745_vm6, %v813_v15, %v815_v43 }
 0x14f   :  { %v9949_v14 = vpop.permute.xlu1 %635 }
 0x150   :  { %18111 = vst [vmem:[#allocation180_spill] sm:$0xff] %v9949_v14  ;;  %v9957_v49 = vpop.permute.xlu0 %633 }
 0x151   :  { %18113 = vst [vmem:[#allocation182_spill] sm:$0xff] %v9957_v49  ;;  %743 = vrot.lane.b32.xlu1 %v9947_v13, %s17770_s21 }
 0x152   :  { %1370 = vrot.lane.b32.xlu0 %v9683_v61, %s17752_s13  ;;  %v9984_v61 = vsel %vm17745_vm6, %v815_v43, %v817_v29 }
 0x153   :  { %v9963_v18 = vpop.permute.xlu1 %639 }
 0x154   :  { %18114 = vst [vmem:[#allocation183_spill] sm:$0xff] %v9963_v18  ;;  %v9968_v32 = vpop.permute.xlu0 %637 }
 0x155   :  { %18115 = vst [vmem:[#allocation184_spill] sm:$0xff] %v9968_v32  ;;  %1080 = vrot.lane.b32.xlu1 %v9020_v16, %s17764_s26 }
 0x156   :  { %861 = vrot.lane.b32.xlu0 %v9966_v51, %s17768_s22 }
 0x157   :  { %v9975_v14 = vpop.permute.xlu1 %643 }
 0x158   :  { %18116 = vst [vmem:[#allocation185_spill] sm:$0xff] %v9975_v14  ;;  %v9977_v49 = vpop.permute.xlu0 %641 }
 0x159   :  { %18117 = vst [vmem:[#allocation186_spill] sm:$0xff] %v9977_v49  ;;  %1372 = vrot.lane.b32.xlu1 %v9706_v35, %s17752_s13 }
 0x15a   :  { %1152 = vrot.lane.b32.xlu0 %v9144_v9, %s17762_s27 }
 0x15b   :  { %v9986_v15 = vpop.permute.xlu1 %647 }
 0x15c   :  { %18118 = vst [vmem:[#allocation187_spill] sm:$0xff] %v9986_v15  ;;  %v9988_v16 = vpop.permute.xlu0 %645 }
 0x15d   :  { %18119 = vst [vmem:[#allocation188_spill] sm:$0xff] %v9988_v16  ;;  %863 = vrot.lane.b32.xlu1 %v9984_v61, %s17768_s22 }
 0x15e   :  { %1444 = vrot.lane.b32.xlu0 %v9770_v1, %s17750_s15 }
 0x15f   :  { %v9994_v14 = vpop.permute.xlu1 %651 }
 0x160   :  { %18120 = vst [vmem:[#allocation189_spill] sm:$0xff] %v9994_v14  ;;  %v9996_v49 = vpop.permute.xlu0 %649 }
 0x161   :  { %18121 = vst [vmem:[#allocation190_spill] sm:$0xff] %v9996_v49  ;;  %1154 = vrot.lane.b32.xlu1 %v9161_v57, %s17762_s27  ;;  %v18126_v49 = vld [vmem:[#allocation6_spill] sm:$0xff] }
 0x162   :  { %934 = vrot.lane.b32.xlu0 %v9954_v6, %s8643_s24 }
 0x163   :  { %v10002_v9 = vpop.permute.xlu1 %655 }
 0x164   :  { %18122 = vst [vmem:[#allocation191_spill] sm:$0xff] %v10002_v9  ;;  %v10004_v43 = vpop.permute.xlu0 %653 }
 0x165   :  { %18123 = vst [vmem:[#allocation192_spill] sm:$0xff] %v10004_v43  ;;  %1446 = vrot.lane.b32.xlu1 %v9840_v53, %s17750_s15  ;;  %v10023_v43 = vld [vmem:[%s17641_s0 + $0x48] sm:$0xff] }
 0x166   :  { %1226 = vrot.lane.b32.xlu0 %v9321_v47, %s17760_s11  ;;  %18124 = vst [vmem:[#allocation193_spill] sm:$0xff] %v10023_v43  ;;  %v699_v53 = vrot.slane %v10023_v43, 6  ;;  %v819_v32 = vrot.slane %v10023_v43, 7 }
 0x167   :  { %v10010_v35 = vpop.permute.xlu1 %731 }
 0x168   :  { %v10012_v1 = vpop.permute.xlu0 %729  ;;  %v10035_v9 = vsel %vm17743_vm5, %v697_v52, %v699_v53  ;;  %v18128_v52 = vld [vmem:[#allocation21_spill] sm:$0xff] }
 0x169   :  { %1008 = vrot.lane.b32.xlu1 %v8809_v26, %s17766_s25 }
 0x16a   :  { %936 = vrot.lane.b32.xlu0 %v9933_v17, %s8643_s24 }
 0x16b   :  { %v10018_v57 = vpop.permute.xlu1 %735 }
 0x16c   :  { %v10026_v47 = vpop.permute.xlu0 %733 }
 0x16d   :  { %1300 = vrot.lane.b32.xlu1 %v9510_v34, %s17754_s12  ;;  %v10046_v34 = vld [vmem:[%s17641_s0 + $0x50] sm:$0xff] }
 0x16e   :  { %1228 = vrot.lane.b32.xlu0 %v9344_v28, %s17760_s11  ;;  %v701_v28 = vrot.slane %v10046_v34, 6  ;;  %v17734_v7 = vrot.slane %v10046_v34, 7 }
 0x16f   :  { %v10032_v26 = vpop.permute.xlu1 %739 }
 0x170   :  { %18125 = vst [vmem:[#allocation194_spill] sm:$0xff] %v10032_v26  ;;  %v10037_v14 = vpop.permute.xlu0 %737  ;;  %v18137_v26 = vld [vmem:[#allocation85_spill] sm:$0xff] }
 0x171   :  { %1010 = vrot.lane.b32.xlu1 %v18126_v49, %s17766_s25  ;;  %v10058_v49 = vsel %vm17743_vm5, %v699_v53, %v701_v28  ;;  %v18129_v53 = vld [vmem:[#allocation23_spill] sm:$0xff] }
 0x172   :  { %745 = vrot.lane.b32.xlu0 %v10035_v9, %s17770_s21 }
 0x173   :  { %v10049_v15 = vpop.permute.xlu1 %849 }
 0x174   :  { %v10051_v16 = vpop.permute.xlu0 %741 }
 0x175   :  { %18127 = vst [vmem:[#allocation6_spill] sm:$0xff] %v10051_v16  ;;  %1302 = vrot.lane.b32.xlu1 %v9533_v40, %s17754_s12  ;;  %v10072_v40 = vsel %vm17745_vm6, %v817_v29, %v819_v32  ;;  %v10092_v29 = vsel %vm17745_vm6, %v819_v32, %v17734_v7 }
 0x176   :  { %1082 = vrot.lane.b32.xlu0 %v18128_v52, %s17764_s26 }
 0x177   :  { %v10060_v18 = vpop.permute.xlu1 %922 }
 0x178   :  { %v10063_v20 = vpop.permute.xlu0 %851 }
 0x179   :  { %747 = vrot.lane.b32.xlu1 %v10058_v49, %s17770_s21 }
 0x17a   :  { %1374 = vrot.lane.b32.xlu0 %v9699_v31, %s17752_s13  ;;  %v18130_v31 = vld [vmem:[#allocation38_spill] sm:$0xff] }
 0x17b   :  { %v10069_v50 = vpop.permute.xlu1 %996 }
 0x17c   :  { %v10074_v52 = vpop.permute.xlu0 %924 }
 0x17d   :  { %1084 = vrot.lane.b32.xlu1 %v18129_v53, %s17764_s26 }
 0x17e   :  { %865 = vrot.lane.b32.xlu0 %v10072_v40, %s17768_s22 }
 0x17f   :  { %v10081_v59 = vpop.permute.xlu1 %1070 }
 0x180   :  { %v10083_v46 = vpop.permute.xlu0 %998 }
 0x181   :  { %1376 = vrot.lane.b32.xlu1 %v9721_v60, %s17752_s13 }
 0x182   :  { %1156 = vrot.lane.b32.xlu0 %v18130_v31, %s17762_s27  ;;  %v18131_v31 = vld [vmem:[#allocation40_spill] sm:$0xff] }
 0x183   :  { %v10094_v53 = vpop.permute.xlu1 %1072 }
 0x184   :  { %v10096_v42 = vpop.permute.xlu0 %853 }
 0x185   :  { %867 = vrot.lane.b32.xlu1 %v10092_v29, %s17768_s22 }
 0x186   :  { %1448 = vrot.lane.b32.xlu0 %v9890_v39, %s17750_s15 }
 0x187   :  { %v10102_v17 = vpop.permute.xlu1 %855 }
 0x188   :  { %v1145_v60 = vpop.permute.xlu0 %1144 }
 0x189   :  { %1158 = vrot.lane.b32.xlu1 %v18131_v31, %s17762_s27 }
 0x18a   :  { %938 = vrot.lane.b32.xlu0 %v10023_v43, %s8643_s24  ;;  %v10127_v43 = vld [vmem:[%s17641_s0 + $0x58] sm:$0xff] }
 0x18b   :  { %v10108_v32 = vpop.permute.xlu1 %1146 }
 0x18c   :  { %v10110_v7 = vpop.permute.xlu0 %926 }
 0x18d   :  { %1450 = vrot.lane.b32.xlu1 %v9966_v51, %s17750_s15  ;;  %v703_v51 = vrot.slane %v10127_v43, 6 }
 0x18e   :  { %1230 = vrot.lane.b32.xlu0 %v18132_v44, %s17760_s11  ;;  %v18134_v44 = vld [vmem:[#allocation80_spill] sm:$0xff] }
 0x18f   :  { %v10116_v39 = vpop.permute.xlu1 %928  ;;  %v10139_v16 = vsel %vm17743_vm5, %v701_v28, %v703_v51  ;;  %v10153_v28 = vld [vmem:[%s17641_s0 + $0x60] sm:$0xff] }
 0x190   :  { %v1219_v27 = vpop.permute.xlu0 %1218 }
 0x191   :  { %1012 = vrot.lane.b32.xlu1 %v18133_v19, %s17766_s25 }
 0x192   :  { %940 = vrot.lane.b32.xlu0 %v10046_v34, %s8643_s24 }
 0x193   :  { %v10122_v31 = vpop.permute.xlu1 %1220 }
 0x194   :  { %v10130_v6 = vpop.permute.xlu0 %1000 }
 0x195   :  { %1304 = vrot.lane.b32.xlu1 %v9526_v8, %s17754_s12  ;;  %v18136_v8 = vld [vmem:[#allocation44_spill] sm:$0xff] }
 0x196   :  { %1232 = vrot.lane.b32.xlu0 %v18134_v44, %s17760_s11  ;;  %v1513_v5 = vsel %vm17746_vm7, %v8592_v36, %v18136_v8 }
 0x197   :  { %v10136_v19 = vpop.permute.xlu1 %1002 }
 0x198   :  { %v1293_v62 = vpop.permute.xlu0 %1292 }
 0x199   :  { %1014 = vrot.lane.b32.xlu1 %v18135_v12, %s17766_s25  ;;  %v1538_v12 = vsel %vm17791_vm8, %v1513_v5, %v18137_v26  ;;  %v18138_v5 = vld [vmem:[#allocation22_spill] sm:$0xff]  ;;  %v18139_v26 = vrot.slane %v10153_v28, 6 }
 0x19a   :  { %749 = vrot.lane.b32.xlu0 %v10139_v16, %s17770_s21  ;;  %v1563_v36 = vsel %vm17790_vm9, %v1538_v12, %v9567_v41 }
 0x19b   :  { %v10158_v55 = vpop.permute.xlu1 %1294  ;;  %v1588_v25 = vsel %vm17789_vm10, %v1563_v36, %v9742_v2  ;;  %v10175_v41 = vsel %vm17743_vm5, %v703_v51, %v18139_v26  ;;  %vm17783_vm5 = vcmask 367616  }
 0x19c   :  { %v10162_v8 = vpop.permute.xlu0 %1074  ;;  %v1613_v44 = vsel %vm17788_vm11, %v1588_v25, %v9892_v23 }
 0x19d   :  { %1306 = vrot.lane.b32.xlu1 %v9549_v21, %s17754_s12  ;;  %v1638_v12 = vsel %vm17759_vm12, %v1613_v44, %v10012_v1  ;;  %v823_v21 = vrot.slane %v10127_v43, 7  ;;  %v18140_v44 = vrot.slane %v10046_v34, 7 }
 0x19e   :  { %1086 = vrot.lane.b32.xlu0 %v18138_v5, %s17764_s26  ;;  %v1663_v25 = vsel %vm17758_vm13, %v1638_v12, %v10049_v15  ;;  %v825_v12 = vrot.slane %v10153_v28, 7 }
 0x19f   :  { %v10179_v2 = vpop.permute.xlu1 %857  ;;  %v1688_v36 = vsel %vm1687_vm14, %v1663_v25, %v10060_v18  ;;  %v10199_v18 = vsel %vm17745_vm6, %v18140_v44, %v823_v21  ;;  %v18142_v25 = vld [vmem:[#allocation48_spill] sm:$0xff] }
 0x1a0   :  { %v1367_v23 = vpop.permute.xlu0 %1366  ;;  %v1713_v1 = vsel %vm17787_vm15, %v1688_v36, %v10069_v50 }
 0x1a1   :  { %751 = vrot.lane.b32.xlu1 %v10175_v41, %s17770_s21  ;;  %v1738_v51 = vsel %vm17744_vm4, %v1713_v1, %v10081_v59  ;;  %vm17749_vm4 = vcmask 392192  }
 0x1a2   :  { %1378 = vrot.lane.b32.xlu0 %v9947_v13, %s17752_s13  ;;  %v1763_v5 = vsel %vm17786_vm3, %v1738_v51, %v1145_v60  ;;  %v18141_v13 = vld [vmem:[#allocation25_spill] sm:$0xff]  ;;  %v18143_v51 = vld [vmem:[#allocation83_spill] sm:$0xff] }
 0x1a3   :  { %v10194_v15 = vpop.permute.xlu1 %1148  ;;  %v1788_v50 = vsel %vm17748_vm2, %v1763_v5, %v1219_v27  ;;  %v8594_v60 = vld [vmem:[%s17641_s0 + $0x8] sm:$0xff] }
 0x1a4   :  { %v10202_v26 = vpop.permute.xlu0 %1076  ;;  %v1813_v59 = vsel %vm17785_vm1, %v1788_v50, %v1293_v62  ;;  %v1514_v36 = vsel %vm17746_vm7, %v8594_v60, %v18142_v25 }
 0x1a5   :  { %1088 = vrot.lane.b32.xlu1 %v18141_v13, %s17764_s26  ;;  %v1838_v27 = vsel %vm17784_vm0, %v1813_v59, %v1367_v23  ;;  %v1539_v44 = vsel %vm17791_vm8, %v1514_v36, %v18143_v51  ;;  %v18144_v23 = vld [vmem:[#allocation39_spill] sm:$0xff]  ;;  %v10232_v59 = vsel %vm17745_vm6, %v823_v21, %v825_v12  ;;  %vm18145_vm6 = vcmask 244736  }
 0x1a6   :  { %869 = vrot.lane.b32.xlu0 %v10199_v18, %s17768_s22  ;;  %v1564_v50 = vsel %vm17790_vm9, %v1539_v44, %v9562_v38 }
 0x1a7   :  { %v1441_v1 = vpop.permute.xlu1 %1440  ;;  %v1589_v13 = vsel %vm17789_vm10, %v1564_v50, %v9740_v54 }
 0x1a8   :  { %v1369_v62 = vpop.permute.xlu0 %1368  ;;  %v1863_v5 = vsel %vm17783_vm5, %v1838_v27, %v1441_v1  ;;  %v1614_v60 = vsel %vm17788_vm11, %v1589_v13, %v9887_v58  ;;  %v18146_v1 = vld [vmem:[#allocation43_spill] sm:$0xff] }
 0x1a9   :  { %1380 = vrot.lane.b32.xlu1 %v10035_v9, %s17752_s13  ;;  %7487 = vmatprep.mubr.msk.f32.mxu0 %vm17749_vm4, %v1863_v5  ;;  %v1639_v9 = vsel %vm17759_vm12, %v1614_v60, %v10010_v35 }
 0x1aa   :  { %1160 = vrot.lane.b32.xlu0 %v18144_v23, %s17762_s27  ;;  %v1664_v54 = vsel %vm17758_vm13, %v1639_v9, %v10063_v20  ;;  %v18149_v23 = vld [vmem:[#allocation84_spill] sm:$0xff]  ;;  %v18150_v9 = vrot.slane %v10153_v28, 6 }
 0x1ab   :  { %v10236_v38 = vpop.permute.xlu1 %930  ;;  %v1689_v21 = vsel %vm1687_vm14, %v1664_v54, %v10074_v52 }
 0x1ac   :  { %v10240_v25 = vpop.permute.xlu0 %859  ;;  %v1714_v58 = vsel %vm17787_vm15, %v1689_v21, %v10083_v46 }
 0x1ad   :  { %871 = vrot.lane.b32.xlu1 %v10232_v59, %s17768_s22  ;;  %v1739_v35 = vsel %vm18145_vm6, %v1714_v58, %v10094_v53  ;;  %vm18151_vm6 = vcmask 1041408   ;;  %v18152_v58 = vld [vmem:[#allocation10_spill] sm:$0xff] }
 0x1ae   :  { %1452 = vrot.lane.b32.xlu0 %v9984_v61, %s17750_s15  ;;  %v1764_v20 = vsel %vm17786_vm3, %v1739_v35, %v10108_v32  ;;  %v18147_v32 = vld [vmem:[#allocation78_spill] sm:$0xff] }
 0x1af   :  { %v10252_v36 = vpop.permute.xlu1 %1222  ;;  %v1789_v52 = vsel %vm17748_vm2, %v1764_v20, %v10122_v31  ;;  %v8597_v20 = vld [vmem:[%s17641_s0 + $0x10] sm:$0xff] }
 0x1b0   :  { %v10256_v27 = vpop.permute.xlu0 %1150  ;;  %v1814_v46 = vsel %vm17785_vm1, %v1789_v52, %v10158_v55  ;;  %v18148_v55 = vld [vmem:[#allocation7_spill] sm:$0xff] }
 0x1b1   :  { %1162 = vrot.lane.b32.xlu1 %v18146_v1, %s17762_s27  ;;  %v1839_v53 = vsel %vm17784_vm0, %v1814_v46, %v1369_v62  ;;  %v18153_v1 = vld [vmem:[#allocation42_spill] sm:$0xff] }
 0x1b2   :  { %942 = vrot.lane.b32.xlu0 %v10127_v43, %s8643_s24  ;;  %v1515_v52 = vsel %vm17746_vm7, %v8597_v20, %v18153_v1 }
 0x1b3   :  { %v10268_v61 = vpop.permute.xlu1 %932 }
 0x1b4   :  { %v1443_v51 = vpop.permute.xlu0 %1442 }
 0x1b5   :  { %v1864_v44 = vsel %vm17783_vm5, %v1839_v53, %v1443_v51  ;;  %1454 = vrot.lane.b32.xlu1 %v10072_v40, %s17750_s15  ;;  %v10290_v40 = vld [vmem:[%s17641_s0 + $0x68] sm:$0xff] }
 0x1b6   :  { %1234 = vrot.lane.b32.xlu0 %v18147_v32, %s17760_s11  ;;  %7488 = vmatmul.mubr.msk.f32.vlgmr.msra.gmra.mxu0 %vm17749_vm4, %v1864_v44  ;;  %v707_v50 = vrot.slane %v10290_v40, 6  ;;  %v18154_v53 = vld [vmem:[#allocation89_spill] sm:$0xff] }
 0x1b7   :  { %v10277_v31 = vpop.permute.xlu1 %1224  ;;  %v1540_v51 = vsel %vm17791_vm8, %v1515_v52, %v18154_v53 }
 0x1b8   :  { %v10279_v5 = vpop.permute.xlu0 %1004  ;;  %v10300_v54 = vsel %vm18151_vm6, %v18150_v9, %v707_v50  ;;  %v1565_v32 = vsel %vm17790_vm9, %v1540_v51, %v9583_v24  ;;  %v18156_v9 = vld [vmem:[#allocation24_spill] sm:$0xff]  ;;  %v827_v24 = vrot.slane %v10290_v40, 7 }
 0x1b9   :  { %1016 = vrot.lane.b32.xlu1 %v18148_v55, %s17766_s25  ;;  %v18155_v55 = vld [vmem:[#allocation121_spill] sm:$0xff] }
 0x1ba   :  { %944 = vrot.lane.b32.xlu0 %v10153_v28, %s8643_s24 }
 0x1bb   :  { %v10285_v62 = vpop.permute.xlu1 %1006 }
 0x1bc   :  { %v1297_v13 = vpop.permute.xlu0 %1296 }
 0x1bd   :  { %1308 = vrot.lane.b32.xlu1 %v9542_v63, %s17754_s12  ;;  %v10311_v63 = vld [vmem:[%s17641_s0 + $0x70] sm:$0xff] }
 0x1be   :  { %1236 = vrot.lane.b32.xlu0 %v18149_v23, %s17760_s11  ;;  %v709_v35 = vrot.slane %v10311_v63, 6  ;;  %v1590_v23 = vsel %vm17789_vm10, %v1565_v32, %v9751_v48  ;;  %v18158_v32 = vld [vmem:[#allocation87_spill] sm:$0xff] }
 0x1bf   :  { %v1299_v60 = vpop.permute.xlu1 %1298  ;;  %v1615_v20 = vsel %vm17788_vm11, %v1590_v23, %v9900_v10 }
 0x1c0   :  { %v10302_v21 = vpop.permute.xlu0 %1078  ;;  %v1640_v52 = vsel %vm17759_vm12, %v1615_v20, %v10026_v47  ;;  %v18161_v20 = vld [vmem:[#allocation27_spill] sm:$0xff] }
 0x1c1   :  { %1018 = vrot.lane.b32.xlu1 %v18152_v58, %s17766_s25  ;;  %v10334_v58 = vsel %vm18151_vm6, %v707_v50, %v709_v35  ;;  %v1665_v48 = vsel %vm17758_vm13, %v1640_v52, %v10096_v42  ;;  %v18157_v50 = vld [vmem:[#allocation46_spill] sm:$0xff]  ;;  %vm18159_vm6 = vcmask 1040384  }
 0x1c2   :  { %753 = vrot.lane.b32.xlu0 %v10300_v54, %s17770_s21  ;;  %v1516_v51 = vsel %vm17746_vm7, %v9789_v37, %v18157_v50  ;;  %v1690_v10 = vsel %vm1687_vm14, %v1665_v48, %v10110_v7  ;;  %v10363_v23 = vsel %vm18159_vm6, %v825_v12, %v827_v24  ;;  %vm18160_vm7 = vcmask 244736  }
 0x1c3   :  { %v10319_v46 = vpop.permute.xlu1 %743  ;;  %v1541_v47 = vsel %vm17791_vm8, %v1516_v51, %v18158_v32 }
 0x1c4   :  { %v1371_v44 = vpop.permute.xlu0 %1370  ;;  %v1566_v37 = vsel %vm17790_vm9, %v1541_v47, %v9578_v4 }
 0x1c5   :  { %1310 = vrot.lane.b32.xlu1 %v18155_v55, %s17754_s12  ;;  %v1715_v55 = vsel %vm17787_vm15, %v1690_v10, %v10130_v6 }
 0x1c6   :  { %1090 = vrot.lane.b32.xlu0 %v18156_v9, %s17764_s26  ;;  %v1740_v7 = vsel %vm18160_vm7, %v1715_v55, %v10162_v8  ;;  %v829_v8 = vrot.slane %v10311_v63, 7  ;;  %vm18163_vm7 = vmmov %vm18159_vm6  ;;  %vm18164_vm6 = vcmask 244736  }
 0x1c7   :  { %v10338_v1 = vpop.permute.xlu1 %1080  ;;  %v1765_v6 = vsel %vm17786_vm3, %v1740_v7, %v10194_v15  ;;  %v18167_v7 = vld [vmem:[#allocation9_spill] sm:$0xff] }
 0x1c8   :  { %v10343_v53 = vpop.permute.xlu0 %861  ;;  %v1790_v4 = vsel %vm17748_vm2, %v1765_v6, %v10252_v36  ;;  %v10448_v6 = vld [vmem:[%s17641_s0 + $0x78] sm:$0xff] }
 0x1c9   :  { %755 = vrot.lane.b32.xlu1 %v10334_v58, %s17770_s21  ;;  %v1815_v52 = vsel %vm17785_vm1, %v1790_v4, %v1297_v13  ;;  %v18162_v13 = vld [vmem:[#allocation41_spill] sm:$0xff]  ;;  %v18169_v4 = vld [vmem:[#allocation88_spill] sm:$0xff] }
 0x1ca   :  { %1382 = vrot.lane.b32.xlu0 %v10058_v49, %s17752_s13  ;;  %v1591_v49 = vsel %vm17789_vm10, %v1566_v37, %v9748_v11 }
 0x1cb   :  { %v1373_v42 = vpop.permute.xlu1 %1372  ;;  %v1616_v12 = vsel %vm17788_vm11, %v1591_v49, %v9898_v56  ;;  %v1840_v56 = vsel %vm17784_vm0, %v1815_v52, %v1371_v44 }
 0x1cc   :  { %v10369_v9 = vpop.permute.xlu0 %1152  ;;  %v1641_v11 = vsel %vm17759_vm12, %v1616_v12, %v10018_v57  ;;  %v18168_v12 = vld [vmem:[#allocation120_spill] sm:$0xff] }
 0x1cd   :  { %1092 = vrot.lane.b32.xlu1 %v18161_v20, %s17764_s26  ;;  %v1666_v48 = vsel %vm17758_vm13, %v1641_v11, %v10102_v17  ;;  %v10405_v17 = vsel %vm18163_vm7, %v827_v24, %v829_v8  ;;  %vm18170_vm7 = vcmask 1041408  }
 0x1ce   :  { %873 = vrot.lane.b32.xlu0 %v10363_v23, %s17768_s22  ;;  %v1691_v36 = vsel %vm1687_vm14, %v1666_v48, %v10116_v39 }
 0x1cf   :  { %v10387_v15 = vpop.permute.xlu1 %863  ;;  %v1716_v57 = vsel %vm17787_vm15, %v1691_v36, %v10136_v19 }
 0x1d0   :  { %v1445_v50 = vpop.permute.xlu0 %1444  ;;  %v1741_v39 = vsel %vm18164_vm6, %v1716_v57, %v10202_v26  ;;  %vm18173_vm6 = vcmask 23552  }
 0x1d1   :  { %v1865_v51 = vsel %vm17783_vm5, %v1840_v56, %v1445_v50  ;;  %1384 = vrot.lane.b32.xlu1 %v10139_v16, %s17752_s13  ;;  %v1766_v16 = vsel %vm17786_vm3, %v1741_v39, %v10256_v27  ;;  %v18165_v27 = vld [vmem:[#allocation47_spill] sm:$0xff]  ;;  %v18171_v56 = vld [vmem:[#allocation12_spill] sm:$0xff] }
 0x1d2   :  { %1164 = vrot.lane.b32.xlu0 %v18162_v13, %s17762_s27  ;;  %7490 = vmatprep.mubr.msk.f32.mxu0 %vm17749_vm4, %v1865_v51  ;;  %v1791_v19 = vsel %vm17748_vm2, %v1766_v16, %v10277_v31  ;;  %v10471_v50 = vld [vmem:[%s17641_s0 + $0x80] sm:$0xff]  ;;  %v18174_v13 = vld [vmem:[#allocation93_spill] sm:$0xff] }
 0x1d3   :  { %v10409_v44 = vpop.permute.xlu1 %1154  ;;  %v1816_v32 = vsel %vm17785_vm1, %v1791_v19, %v1299_v60  ;;  %v713_v36 = vrot.slane %v10471_v50, 6  ;;  %v18172_v51 = vld [vmem:[#allocation52_spill] sm:$0xff] }
 0x1d4   :  { %v10413_v10 = vpop.permute.xlu0 %934  ;;  %v1841_v26 = vsel %vm17784_vm0, %v1816_v32, %v1373_v42  ;;  %v18175_v32 = vld [vmem:[#allocation123_spill] sm:$0xff] }
 0x1d5   :  { %875 = vrot.lane.b32.xlu1 %v10405_v17, %s17768_s22 }
 0x1d6   :  { %1456 = vrot.lane.b32.xlu0 %v10092_v29, %s17750_s15  ;;  %v18166_v29 = vld [vmem:[#allocation82_spill] sm:$0xff] }
 0x1d7   :  { %v1447_v24 = vpop.permute.xlu1 %1446 }
 0x1d8   :  { %v1866_v47 = vsel %vm17783_vm5, %v1841_v26, %v1447_v24  ;;  %v1227_v55 = vpop.permute.xlu0 %1226  ;;  %v18176_v24 = vld [vmem:[#allocation26_spill] sm:$0xff] }
 0x1d9   :  { %1166 = vrot.lane.b32.xlu1 %v18165_v27, %s17762_s27  ;;  %7491 = vmatmul.mubr.msk.f32.gmra.mxu0 %vm17749_vm4, %v1866_v47 }
 0x1da   :  { %946 = vrot.lane.b32.xlu0 %v10290_v40, %s8643_s24 }
 0x1db   :  { %v10429_v31 = vpop.permute.xlu1 %1008 }
 0x1dc   :  { %v10431_v60 = vpop.permute.xlu0 %936 }
 0x1dd   :  { %1458 = vrot.lane.b32.xlu1 %v10199_v18, %s17750_s15  ;;  %v711_v18 = vrot.slane %v10448_v6, 6 }
 0x1de   :  { %1238 = vrot.lane.b32.xlu0 %v18166_v29, %s17760_s11 }
 0x1df   :  { %v1301_v42 = vpop.permute.xlu1 %1300  ;;  %v10460_v52 = vsel %vm18170_vm7, %v709_v35, %v711_v18  ;;  %v1517_v35 = vsel %vm18173_vm6, %v9800_v3, %v18172_v51  ;;  %v10492_v3 = vsel %vm18170_vm7, %v711_v18, %v713_v36  ;;  %v18177_v18 = vld [vmem:[#allocation50_spill] sm:$0xff]  ;;  %vm18179_vm7 = vcmask 1040384  }
 0x1e0   :  { %v10437_v37 = vpop.permute.xlu0 %1228  ;;  %v1542_v39 = vsel %vm17791_vm8, %v1517_v35, %v18174_v13 }
 0x1e1   :  { %1020 = vrot.lane.b32.xlu1 %v18167_v7, %s17766_s25  ;;  %v1567_v19 = vsel %vm17790_vm9, %v1542_v39, %v9599_v30  ;;  %v831_v30 = vrot.slane %v10448_v6, 7  ;;  %v18182_v39 = vld [vmem:[#allocation29_spill] sm:$0xff] }
 0x1e2   :  { %948 = vrot.lane.b32.xlu0 %v10311_v63, %s8643_s24  ;;  %v1592_v26 = vsel %vm17789_vm10, %v1567_v19, %v9763_v0  ;;  %v18183_v19 = vld [vmem:[#allocation172_spill] sm:$0xff] }
 0x1e3   :  { %v10443_v49 = vpop.permute.xlu1 %1010  ;;  %v1617_v47 = vsel %vm17788_vm11, %v1592_v26, %v9908_v22  ;;  %v10521_v51 = vsel %vm18179_vm7, %v829_v8, %v831_v30 }
 0x1e4   :  { %v10451_v20 = vpop.permute.xlu0 %745  ;;  %v1642_v29 = vsel %vm17759_vm12, %v1617_v47, %v10037_v14 }
 0x1e5   :  { %1312 = vrot.lane.b32.xlu1 %v18168_v12, %s17754_s12  ;;  %v1667_v0 = vsel %vm17758_vm13, %v1642_v29, %v10179_v2  ;;  %v1518_v12 = vsel %vm18173_vm6, %v9825_v45, %v18177_v18  ;;  %vm18180_vm6 = vcmask 244736  }
 0x1e6   :  { %1240 = vrot.lane.b32.xlu0 %v18169_v4, %s17760_s11  ;;  %v1692_v22 = vsel %vm1687_vm14, %v1667_v0, %v10236_v38  ;;  %v18178_v4 = vld [vmem:[#allocation91_spill] sm:$0xff] }
 0x1e7   :  { %v1303_v11 = vpop.permute.xlu1 %1302  ;;  %v1543_v14 = vsel %vm17791_vm8, %v1518_v12, %v18178_v4 }
 0x1e8   :  { %v10462_v48 = vpop.permute.xlu0 %1082  ;;  %v1568_v45 = vsel %vm17790_vm9, %v1543_v14, %v9594_v33  ;;  %v833_v33 = vrot.slane %v10471_v50, 7 }
 0x1e9   :  { %1022 = vrot.lane.b32.xlu1 %v18171_v56, %s17766_s25  ;;  %v1717_v56 = vsel %vm17787_vm15, %v1692_v22, %v10279_v5 }
 0x1ea   :  { %757 = vrot.lane.b32.xlu0 %v10460_v52, %s17770_s21  ;;  %v1742_v38 = vsel %vm18180_vm6, %v1717_v56, %v10302_v21  ;;  %v18184_v21 = vld [vmem:[#allocation194_spill] sm:$0xff] }
 0x1eb   :  { %v10477_v57 = vpop.permute.xlu1 %747  ;;  %v1767_v5 = vsel %vm17786_vm3, %v1742_v38, %v10369_v9  ;;  %v18188_v38 = vld [vmem:[#allocation11_spill] sm:$0xff] }
 0x1ec   :  { %v1375_v16 = vpop.permute.xlu0 %1374 }
 0x1ed   :  { %1314 = vrot.lane.b32.xlu1 %v18175_v32, %s17754_s12  ;;  %v1792_v32 = vsel %vm17748_vm2, %v1767_v5, %v1227_v55 }
 0x1ee   :  { %1094 = vrot.lane.b32.xlu0 %v18176_v24, %s17764_s26  ;;  %v1817_v24 = vsel %vm17785_vm1, %v1792_v32, %v1301_v42  ;;  %v18185_v42 = vld [vmem:[#allocation45_spill] sm:$0xff] }
 0x1ef   :  { %v10496_v27 = vpop.permute.xlu1 %1084  ;;  %v1842_v29 = vsel %vm17784_vm0, %v1817_v24, %v1375_v16  ;;  %v10628_v24 = vld [vmem:[%s17641_s0 + $0x90] sm:$0xff] }
 0x1f0   :  { %v10501_v7 = vpop.permute.xlu0 %865 }
 0x1f1   :  { %759 = vrot.lane.b32.xlu1 %v10492_v3, %s17770_s21 }
 0x1f2   :  { %1386 = vrot.lane.b32.xlu0 %v10175_v41, %s17752_s13  ;;  %v18181_v41 = vld [vmem:[#allocation152_spill] sm:$0xff] }
 0x1f3   :  { %v1377_v2 = vpop.permute.xlu1 %1376  ;;  %v1593_v13 = vsel %vm17789_vm10, %v1568_v45, %v18181_v41 }
 0x1f4   :  { %v10527_v35 = vpop.permute.xlu0 %1156  ;;  %v1618_v8 = vsel %vm17788_vm11, %v1593_v13, %v18183_v19  ;;  %v10605_v13 = vld [vmem:[%s17641_s0 + $0x88] sm:$0xff]  ;;  %v18190_v19 = vld [vmem:[#allocation92_spill] sm:$0xff] }
 0x1f5   :  { %1096 = vrot.lane.b32.xlu1 %v18182_v39, %s17764_s26  ;;  %v1643_v26 = vsel %vm17759_vm12, %v1618_v8, %v18184_v21  ;;  %v18189_v39 = vld [vmem:[#allocation122_spill] sm:$0xff] }
 0x1f6   :  { %877 = vrot.lane.b32.xlu0 %v10521_v51, %s17768_s22  ;;  %v1668_v9 = vsel %vm17758_vm13, %v1643_v26, %v10240_v25  ;;  %v10562_v25 = vsel %vm18179_vm7, %v831_v30, %v833_v33  ;;  %vm18191_vm7 = vcmask 1041408   ;;  %v18192_v26 = vld [vmem:[#allocation14_spill] sm:$0xff] }
 0x1f7   :  { %v10544_v47 = vpop.permute.xlu1 %867  ;;  %v1693_v55 = vsel %vm1687_vm14, %v1668_v9, %v10268_v61  ;;  %v717_v9 = vrot.slane %v10628_v24, 6 }
 0x1f8   :  { %v1449_v0 = vpop.permute.xlu0 %1448  ;;  %v1718_v12 = vsel %vm17787_vm15, %v1693_v55, %v10285_v62 }
 0x1f9   :  { %v1867_v18 = vsel %vm17783_vm5, %v1842_v29, %v1449_v0  ;;  %1388 = vrot.lane.b32.xlu1 %v10300_v54, %s17752_s13  ;;  %v1743_v61 = vsel %vm18180_vm6, %v1718_v12, %v10338_v1  ;;  %v18193_v29 = vld [vmem:[#allocation56_spill] sm:$0xff]  ;;  %v18194_v0 = vld [vmem:[#allocation170_spill] sm:$0xff]  ;;  %vm18195_vm6 = vcmask 23552  }
 0x1fa   :  { %1168 = vrot.lane.b32.xlu0 %v18185_v42, %s17762_s27  ;;  %7493 = vmatprep.mubr.msk.f32.mxu0 %vm17749_vm4, %v1867_v18  ;;  %v1768_v54 = vsel %vm17786_vm3, %v1743_v61, %v10409_v44  ;;  %v18186_v44 = vld [vmem:[#allocation51_spill] sm:$0xff]  ;;  %v18196_v18 = vld [vmem:[#allocation97_spill] sm:$0xff] }
 0x1fb   :  { %v10566_v16 = vpop.permute.xlu1 %1158  ;;  %v1793_v62 = vsel %vm17748_vm2, %v1768_v54, %v10437_v37  ;;  %v18197_v61 = vld [vmem:[#allocation129_spill] sm:$0xff] }
 0x1fc   :  { %v10570_v22 = vpop.permute.xlu0 %938  ;;  %v1818_v4 = vsel %vm17785_vm1, %v1793_v62, %v1303_v11  ;;  %v18198_v62 = vld [vmem:[#allocation125_spill] sm:$0xff] }
 0x1fd   :  { %879 = vrot.lane.b32.xlu1 %v10562_v25, %s17768_s22  ;;  %v1843_v1 = vsel %vm17784_vm0, %v1818_v4, %v1377_v2  ;;  %v18199_v4 = vld [vmem:[#allocation154_spill] sm:$0xff] }
 0x1fe   :  { %1460 = vrot.lane.b32.xlu0 %v10232_v59, %s17750_s15  ;;  %v18187_v59 = vld [vmem:[#allocation86_spill] sm:$0xff] }
 0x1ff   :  { %v1451_v30 = vpop.permute.xlu1 %1450 }
 0x200   :  { %v1868_v14 = vsel %vm17783_vm5, %v1843_v1, %v1451_v30  ;;  %v1231_v56 = vpop.permute.xlu0 %1230  ;;  %v18200_v30 = vld [vmem:[#allocation28_spill] sm:$0xff] }
 0x201   :  { %1170 = vrot.lane.b32.xlu1 %v18186_v44, %s17762_s27  ;;  %7494 = vmatmul.mubr.msk.f32.gmra.mxu0 %vm17749_vm4, %v1868_v14  ;;  %v18201_v44 = vld [vmem:[#allocation174_spill] sm:$0xff] }
 0x202   :  { %950 = vrot.lane.b32.xlu0 %v10448_v6, %s8643_s24 }
 0x203   :  { %v10586_v37 = vpop.permute.xlu1 %1012 }
 0x204   :  { %v10588_v11 = vpop.permute.xlu0 %940 }
 0x205   :  { %1462 = vrot.lane.b32.xlu1 %v10363_v23, %s17750_s15  ;;  %v715_v23 = vrot.slane %v10605_v13, 6 }
 0x206   :  { %1242 = vrot.lane.b32.xlu0 %v18187_v59, %s17760_s11 }
 0x207   :  { %v1305_v2 = vpop.permute.xlu1 %1304  ;;  %v10617_v32 = vsel %vm18191_vm7, %v713_v36, %v715_v23  ;;  %v1519_v36 = vsel %vm18195_vm6, %v18194_v0, %v18193_v29  ;;  %v10649_v14 = vsel %vm18191_vm7, %v715_v23, %v717_v9  ;;  %v18203_v23 = vld [vmem:[#allocation54_spill] sm:$0xff]  ;;  %vm18206_vm7 = vcmask 1040384  }
 0x208   :  { %v10594_v45 = vpop.permute.xlu0 %1232  ;;  %v1544_v12 = vsel %vm17791_vm8, %v1519_v36, %v18196_v18  ;;  %v18204_v36 = vld [vmem:[#allocation181_spill] sm:$0xff] }
 0x209   :  { %1024 = vrot.lane.b32.xlu1 %v18188_v38, %s17766_s25  ;;  %v1569_v54 = vsel %vm17790_vm9, %v1544_v12, %v18197_v61  ;;  %v1520_v18 = vsel %vm18195_vm6, %v18204_v36, %v18203_v23  ;;  %v18205_v61 = vld [vmem:[#allocation95_spill] sm:$0xff]  ;;  %vm18208_vm6 = vcmask 244736  }
 0x20a   :  { %952 = vrot.lane.b32.xlu0 %v10471_v50, %s8643_s24  ;;  %v1594_v1 = vsel %vm17789_vm10, %v1569_v54, %v18199_v4  ;;  %v1545_v54 = vsel %vm17791_vm8, %v1520_v18, %v18205_v61 }
 0x20b   :  { %v10600_v41 = vpop.permute.xlu1 %1014  ;;  %v1619_v59 = vsel %vm17788_vm11, %v1594_v1, %v18201_v44  ;;  %v18207_v1 = vld [vmem:[#allocation127_spill] sm:$0xff] }
 0x20c   :  { %v10608_v5 = vpop.permute.xlu0 %749 }
 0x20d   :  { %1316 = vrot.lane.b32.xlu1 %v18189_v39, %s17754_s12  ;;  %v835_v39 = vrot.slane %v10605_v13, 7 }
 0x20e   :  { %1244 = vrot.lane.b32.xlu0 %v18190_v19, %s17760_s11  ;;  %v18202_v19 = vld [vmem:[#allocation6_spill] sm:$0xff] }
 0x20f   :  { %v1307_v8 = vpop.permute.xlu1 %1306  ;;  %v10678_v4 = vsel %vm18206_vm7, %v833_v33, %v835_v39 }
 0x210   :  { %v10619_v21 = vpop.permute.xlu0 %1086 }
 0x211   :  { %1026 = vrot.lane.b32.xlu1 %v18192_v26, %s17766_s25  ;;  %v1644_v26 = vsel %vm17759_vm12, %v1619_v59, %v18202_v19  ;;  %v18210_v19 = vld [vmem:[#allocation31_spill] sm:$0xff] }
 0x212   :  { %761 = vrot.lane.b32.xlu0 %v10617_v32, %s17770_s21  ;;  %v1669_v0 = vsel %vm17758_vm13, %v1644_v26, %v10343_v53  ;;  %v18211_v26 = vld [vmem:[#allocation173_spill] sm:$0xff] }
 0x213   :  { %v10634_v55 = vpop.permute.xlu1 %751  ;;  %v1694_v12 = vsel %vm1687_vm14, %v1669_v0, %v10413_v10 }
 0x214   :  { %v1379_v42 = vpop.permute.xlu0 %1378 }
 0x215   :  { %1318 = vrot.lane.b32.xlu1 %v18198_v62, %s17754_s12  ;;  %v1719_v62 = vsel %vm17787_vm15, %v1694_v12, %v10429_v31 }
 0x216   :  { %1098 = vrot.lane.b32.xlu0 %v18200_v30, %s17764_s26  ;;  %v1570_v30 = vsel %vm17790_vm9, %v1545_v54, %v18207_v1  ;;  %v1744_v10 = vsel %vm18208_vm6, %v1719_v62, %v10462_v48  ;;  %v837_v48 = vrot.slane %v10628_v24, 7 }
 0x217   :  { %v10653_v38 = vpop.permute.xlu1 %1088  ;;  %v1769_v31 = vsel %vm17786_vm3, %v1744_v10, %v10527_v35 }
 0x218   :  { %v10658_v29 = vpop.permute.xlu0 %869  ;;  %v1794_v0 = vsel %vm17748_vm2, %v1769_v31, %v1231_v56 }
 0x219   :  { %763 = vrot.lane.b32.xlu1 %v10649_v14, %s17770_s21  ;;  %v1819_v36 = vsel %vm17785_vm1, %v1794_v0, %v1305_v2  ;;  %v18212_v2 = vld [vmem:[#allocation49_spill] sm:$0xff] }
 0x21a   :  { %1390 = vrot.lane.b32.xlu0 %v10334_v58, %s17752_s13  ;;  %v18209_v58 = vld [vmem:[#allocation153_spill] sm:$0xff]  ;;  %v1844_v12 = vsel %vm17784_vm0, %v1819_v36, %v1379_v42  ;;  %v18219_v36 = vld [vmem:[#allocation16_spill] sm:$0xff] }
 0x21b   :  { %v1381_v53 = vpop.permute.xlu1 %1380  ;;  %v1595_v59 = vsel %vm17789_vm10, %v1570_v30, %v18209_v58 }
 0x21c   :  { %v10684_v44 = vpop.permute.xlu0 %1160  ;;  %v1620_v33 = vsel %vm17788_vm11, %v1595_v59, %v18211_v26  ;;  %v18215_v59 = vld [vmem:[#allocation13_spill] sm:$0xff]  ;;  %v18216_v26 = vld [vmem:[#allocation124_spill] sm:$0xff] }
 0x21d   :  { %1100 = vrot.lane.b32.xlu1 %v18210_v19, %s17764_s26  ;;  %v1645_v23 = vsel %vm17759_vm12, %v1620_v33, %v10319_v46 }
 0x21e   :  { %881 = vrot.lane.b32.xlu0 %v10678_v4, %s17768_s22  ;;  %v1670_v35 = vsel %vm17758_vm13, %v1645_v23, %v10387_v15  ;;  %v10719_v15 = vsel %vm18206_vm7, %v835_v39, %v837_v48  ;;  %v18218_v23 = vld [vmem:[#allocation30_spill] sm:$0xff]  ;;  %vm18222_vm7 = vcmask 23552  }
 0x21f   :  { %v10701_v18 = vpop.permute.xlu1 %871  ;;  %v1695_v56 = vsel %vm1687_vm14, %v1670_v35, %v10431_v60  ;;  %v18220_v35 = vld [vmem:[#allocation60_spill] sm:$0xff] }
 0x220   :  { %v1453_v61 = vpop.permute.xlu0 %1452  ;;  %v1720_v46 = vsel %vm17787_vm15, %v1695_v56, %v10443_v49 }
 0x221   :  { %v1869_v54 = vsel %vm17783_vm5, %v1844_v12, %v1453_v61  ;;  %1392 = vrot.lane.b32.xlu1 %v10460_v52, %s17752_s13  ;;  %v1745_v60 = vsel %vm18208_vm6, %v1720_v46, %v10496_v27  ;;  %v18221_v12 = vld [vmem:[#allocation177_spill] sm:$0xff]  ;;  %vm18231_vm6 = vmmov %vm18222_vm7 }
 0x222   :  { %1172 = vrot.lane.b32.xlu0 %v18212_v2, %s17762_s27  ;;  %7496 = vmatprep.mubr.msk.f32.mxu0 %vm17749_vm4, %v1869_v54  ;;  %v1770_v52 = vsel %vm17786_vm3, %v1745_v60, %v10566_v16  ;;  %v18213_v16 = vld [vmem:[#allocation55_spill] sm:$0xff]  ;;  %v1521_v61 = vsel %vm18222_vm7, %v18221_v12, %v18220_v35  ;;  %v18223_v54 = vld [vmem:[#allocation101_spill] sm:$0xff]  ;;  %vm18235_vm7 = vcmask 244736  }
 0x223   :  { %v10723_v42 = vpop.permute.xlu1 %1162  ;;  %v1795_v49 = vsel %vm17748_vm2, %v1770_v52, %v10594_v45  ;;  %v1546_v46 = vsel %vm17791_vm8, %v1521_v61, %v18223_v54  ;;  %v18224_v60 = vld [vmem:[#allocation133_spill] sm:$0xff]  ;;  %v18233_v61 = vld [vmem:[#allocation99_spill] sm:$0xff] }
 0x224   :  { %v10727_v62 = vpop.permute.xlu0 %942  ;;  %v1820_v1 = vsel %vm17785_vm1, %v1795_v49, %v1307_v8  ;;  %v1571_v52 = vsel %vm17790_vm9, %v1546_v46, %v18224_v60  ;;  %v18225_v49 = vld [vmem:[#allocation156_spill] sm:$0xff]  ;;  %v18232_v12 = vld [vmem:[#allocation33_spill] sm:$0xff]  ;;  %v10812_v46 = vld [vmem:[%s17641_s0 + $0x98] sm:$0xff] }
 0x225   :  { %883 = vrot.lane.b32.xlu1 %v10719_v15, %s17768_s22  ;;  %v1845_v27 = vsel %vm17784_vm0, %v1820_v1, %v1381_v53  ;;  %v1596_v1 = vsel %vm17789_vm10, %v1571_v52, %v18225_v49  ;;  %v719_v60 = vrot.slane %v10812_v46, 6  ;;  %v18234_v52 = vld [vmem:[#allocation131_spill] sm:$0xff] }
 0x226   :  { %1464 = vrot.lane.b32.xlu0 %v10405_v17, %s17750_s15  ;;  %v18214_v17 = vld [vmem:[#allocation90_spill] sm:$0xff] }
 0x227   :  { %v1455_v39 = vpop.permute.xlu1 %1454 }
 0x228   :  { %v1870_v30 = vsel %vm17783_vm5, %v1845_v27, %v1455_v39  ;;  %v1235_v10 = vpop.permute.xlu0 %1234  ;;  %v18226_v27 = vld [vmem:[#allocation128_spill] sm:$0xff] }
 0x229   :  { %1174 = vrot.lane.b32.xlu1 %v18213_v16, %s17762_s27  ;;  %7497 = vmatmul.mubr.msk.f32.gmra.mxu0 %vm17749_vm4, %v1870_v30  ;;  %v18227_v39 = vld [vmem:[#allocation176_spill] sm:$0xff] }
 0x22a   :  { %954 = vrot.lane.b32.xlu0 %v10605_v13, %s8643_s24  ;;  %v1621_v30 = vsel %vm17788_vm11, %v1596_v1, %v18227_v39 }
 0x22b   :  { %v10743_v45 = vpop.permute.xlu1 %1016 }
 0x22c   :  { %v10745_v8 = vpop.permute.xlu0 %944 }
 0x22d   :  { %1466 = vrot.lane.b32.xlu1 %v10521_v51, %s17750_s15  ;;  %v18217_v51 = vld [vmem:[#allocation96_spill] sm:$0xff] }
 0x22e   :  { %1246 = vrot.lane.b32.xlu0 %v18214_v17, %s17760_s11  ;;  %v1646_v17 = vsel %vm17759_vm12, %v1621_v30, %v10451_v20  ;;  %v18237_v30 = vld [vmem:[#allocation175_spill] sm:$0xff] }
 0x22f   :  { %v1309_v53 = vpop.permute.xlu1 %1308 }
 0x230   :  { %v10751_v58 = vpop.permute.xlu0 %1236 }
 0x231   :  { %1028 = vrot.lane.b32.xlu1 %v18215_v59, %s17766_s25 }
 0x232   :  { %956 = vrot.lane.b32.xlu0 %v10628_v24, %s8643_s24 }
 0x233   :  { %v10757_v31 = vpop.permute.xlu1 %1018 }
 0x234   :  { %v10759_v19 = vpop.permute.xlu0 %753 }
 0x235   :  { %1320 = vrot.lane.b32.xlu1 %v18216_v26, %s17754_s12  ;;  %v1671_v26 = vsel %vm17758_vm13, %v1646_v17, %v10501_v7 }
 0x236   :  { %1248 = vrot.lane.b32.xlu0 %v18217_v51, %s17760_s11  ;;  %v18229_v51 = vld [vmem:[#allocation58_spill] sm:$0xff]  ;;  %v1696_v35 = vsel %vm1687_vm14, %v1671_v26, %v10570_v22 }
 0x237   :  { %v1311_v33 = vpop.permute.xlu1 %1310  ;;  %v1721_v54 = vsel %vm17787_vm15, %v1696_v35, %v10586_v37 }
 0x238   :  { %v10765_v0 = vpop.permute.xlu0 %1090  ;;  %v1746_v49 = vsel %vm18235_vm7, %v1721_v54, %v10619_v21 }
 0x239   :  { %1102 = vrot.lane.b32.xlu1 %v18218_v23, %s17764_s26  ;;  %v18230_v23 = vld [vmem:[#allocation193_spill] sm:$0xff]  ;;  %v1771_v37 = vsel %vm17786_vm3, %v1746_v49, %v10684_v44 }
 0x23a   :  { %1030 = vrot.lane.b32.xlu0 %v18219_v36, %s17766_s25  ;;  %v1522_v36 = vsel %vm18231_vm6, %v18230_v23, %v18229_v51  ;;  %v1796_v26 = vsel %vm17748_vm2, %v1771_v37, %v1235_v10  ;;  %vm18238_vm6 = vcmask 1041408  }
 0x23b   :  { %v10774_v56 = vpop.permute.xlu1 %755  ;;  %v1547_v20 = vsel %vm17791_vm8, %v1522_v36, %v18233_v61  ;;  %v720_v44 = vsel %vm18238_vm6, %v717_v9, %v719_v60  ;;  %vm18241_vm6 = vcmask 1040384  }
 0x23c   :  { %v1383_v2 = vpop.permute.xlu0 %1382  ;;  %v1572_v22 = vsel %vm17790_vm9, %v1547_v20, %v18234_v52  ;;  %v18240_v20 = vld [vmem:[#allocation94_spill] sm:$0xff] }
 0x23d   :  { %1394 = vrot.lane.b32.xlu1 %v10492_v3, %s17752_s13  ;;  %v18228_v3 = vld [vmem:[#allocation53_spill] sm:$0xff] }
 0x23e   :  { %1322 = vrot.lane.b32.xlu0 %v18226_v27, %s17754_s12  ;;  %v18236_v27 = vld [vmem:[#allocation155_spill] sm:$0xff] }
 0x23f   :  { %v10788_v16 = vpop.permute.xlu1 %1092  ;;  %v1597_v39 = vsel %vm17789_vm10, %v1572_v22, %v18236_v27 }
 0x240   :  { %v10792_v59 = vpop.permute.xlu0 %873  ;;  %v1622_v17 = vsel %vm17788_vm11, %v1597_v39, %v18237_v30 }
 0x241   :  { %1176 = vrot.lane.b32.xlu1 %v18228_v3, %s17762_s27  ;;  %v1647_v21 = vsel %vm17759_vm12, %v1622_v17, %v10477_v57  ;;  %v1821_v3 = vsel %vm17785_vm1, %v1796_v26, %v1309_v53  ;;  %v18239_v57 = vld [vmem:[#allocation59_spill] sm:$0xff]  ;;  %v18245_v17 = vld [vmem:[#allocation132_spill] sm:$0xff] }
 0x242   :  { %1104 = vrot.lane.b32.xlu0 %v18232_v12, %s17764_s26  ;;  %v1846_v23 = vsel %vm17784_vm0, %v1821_v3, %v1383_v2  ;;  %v18246_v3 = vld [vmem:[#allocation15_spill] sm:$0xff] }
 0x243   :  { %v1385_v7 = vpop.permute.xlu1 %1384 }
 0x244   :  { %v10819_v1 = vpop.permute.xlu0 %1164 }
 0x245   :  { %1468 = vrot.lane.b32.xlu1 %v10562_v25, %s17750_s15  ;;  %v1672_v25 = vsel %vm17758_vm13, %v1647_v21, %v10544_v47  ;;  %v839_v47 = vrot.slane %v10812_v46, 7 }
 0x246   :  { %1396 = vrot.lane.b32.xlu0 %v10617_v32, %s17752_s13  ;;  %v1697_v32 = vsel %vm1687_vm14, %v1672_v25, %v10588_v11  ;;  %v10860_v11 = vld [vmem:[%s17641_s0 + $0xa0] sm:$0xff]  ;;  %v18247_v25 = vld [vmem:[#allocation65_spill] sm:$0xff] }
 0x247   :  { %v10835_v51 = vpop.permute.xlu1 %875  ;;  %v1722_v53 = vsel %vm17787_vm15, %v1697_v32, %v10600_v41  ;;  %v721_v35 = vrot.slane %v10860_v11, 6  ;;  %v840_v54 = vsel %vm18241_vm6, %v837_v48, %v839_v47  ;;  %v841_v24 = vrot.slane %v10860_v11, 7 }
 0x248   :  { %v1457_v10 = vpop.permute.xlu0 %1456  ;;  %v1747_v9 = vsel %vm18235_vm7, %v1722_v53, %v10653_v38  ;;  %vm18242_vm7 = vcmask 1041408  }
 0x249   :  { %v1871_v36 = vsel %vm17783_vm5, %v1846_v23, %v1457_v10  ;;  %1178 = vrot.lane.b32.xlu1 %v18239_v57, %s17762_s27  ;;  %v1772_v41 = vsel %vm17786_vm3, %v1747_v9, %v10723_v42  ;;  %v10879_v22 = vsel %vm18242_vm7, %v719_v60, %v721_v35  ;;  %v10896_v27 = vsel %vm18241_vm6, %v839_v47, %v841_v24  ;;  %v18250_v47 = vld [vmem:[#allocation138_spill] sm:$0xff] }
 0x24a   :  { %765 = vrot.lane.b32.xlu0 %v720_v44, %s17770_s21  ;;  %7499 = vmatprep.mubr.msk.f32.mxu0 %vm17749_vm4, %v1871_v36  ;;  %v1797_v61 = vsel %vm17748_vm2, %v1772_v41, %v10751_v58  ;;  %vm18248_vm7 = vcmask 23552   ;;  %v18249_v36 = vld [vmem:[#allocation106_spill] sm:$0xff]  ;;  %vm18253_vm6 = vcmask 1041408  }
 0x24b   :  { %v10855_v2 = vpop.permute.xlu1 %1166  ;;  %v1822_v38 = vsel %vm17785_vm1, %v1797_v61, %v1311_v33  ;;  %v18243_v33 = vld [vmem:[#allocation126_spill] sm:$0xff]  ;;  %v1523_v23 = vsel %vm18248_vm7, %v10046_v34, %v18247_v25  ;;  %v18252_v61 = vld [vmem:[#allocation179_spill] sm:$0xff] }
 0x24c   :  { %v10865_v12 = vpop.permute.xlu0 %946  ;;  %v1847_v52 = vsel %vm17784_vm0, %v1822_v38, %v1385_v7  ;;  %v18244_v7 = vld [vmem:[#allocation100_spill] sm:$0xff]  ;;  %v1548_v57 = vsel %vm17791_vm8, %v1523_v23, %v18249_v36  ;;  %v18251_v34 = vld [vmem:[#allocation158_spill] sm:$0xff] }
 0x24d   :  { %1470 = vrot.lane.b32.xlu1 %v10678_v4, %s17750_s15  ;;  %v1573_v9 = vsel %vm17790_vm9, %v1548_v57, %v18250_v47  ;;  %v10970_v23 = vld [vmem:[%s17641_s0 + $0xb0] sm:$0xff] }
 0x24e   :  { %1250 = vrot.lane.b32.xlu0 %v18240_v20, %s17760_s11  ;;  %v1598_v41 = vsel %vm17789_vm10, %v1573_v9, %v18251_v34  ;;  %v18259_v9 = vld [vmem:[#allocation157_spill] sm:$0xff] }
 0x24f   :  { %v1459_v42 = vpop.permute.xlu1 %1458  ;;  %v1623_v38 = vsel %vm17788_vm11, %v1598_v41, %v18252_v61  ;;  %v18260_v41 = vld [vmem:[#allocation178_spill] sm:$0xff] }
 0x250   :  { %v1872_v58 = vsel %vm17783_vm5, %v1847_v52, %v1459_v42  ;;  %v1239_v49 = vpop.permute.xlu0 %1238  ;;  %v1648_v42 = vsel %vm17759_vm12, %v1623_v38, %v10608_v5 }
 0x251   :  { %885 = vrot.lane.b32.xlu1 %v840_v54, %s17768_s22  ;;  %7500 = vmatmul.mubr.msk.f32.gmra.mxu0 %vm17749_vm4, %v1872_v58 }
 0x252   :  { %767 = vrot.lane.b32.xlu0 %v10879_v22, %s17770_s21 }
 0x253   :  { %v10886_v4 = vpop.permute.xlu1 %1020 }
 0x254   :  { %v10889_v48 = vpop.permute.xlu0 %948 }
 0x255   :  { %1324 = vrot.lane.b32.xlu1 %v18243_v33, %s17754_s12  ;;  %v18254_v33 = vld [vmem:[#allocation18_spill] sm:$0xff] }
 0x256   :  { %1252 = vrot.lane.b32.xlu0 %v18244_v7, %s17760_s11 }
 0x257   :  { %v1313_v60 = vpop.permute.xlu1 %1312 }
 0x258   :  { %v10898_v39 = vpop.permute.xlu0 %1240 }
 0x259   :  { %958 = vrot.lane.b32.xlu1 %v10812_v46, %s8643_s24 }
 0x25a   :  { %887 = vrot.lane.b32.xlu0 %v10896_v27, %s17768_s22 }
 0x25b   :  { %v10904_v37 = vpop.permute.xlu1 %1022 }
 0x25c   :  { %v10906_v30 = vpop.permute.xlu0 %757 }
 0x25d   :  { %1398 = vrot.lane.b32.xlu1 %v10649_v14, %s17752_s13  ;;  %v10928_v14 = vld [vmem:[%s17641_s0 + $0xa8] sm:$0xff] }
 0x25e   :  { %1326 = vrot.lane.b32.xlu0 %v18245_v17, %s17754_s12  ;;  %v723_v32 = vrot.slane %v10928_v14, 6  ;;  %v843_v5 = vrot.slane %v10928_v14, 7 }
 0x25f   :  { %v10912_v26 = vpop.permute.xlu1 %1314 }
 0x260   :  { %v10914_v21 = vpop.permute.xlu0 %1094  ;;  %v10945_v52 = vsel %vm18253_vm6, %v721_v35, %v723_v32  ;;  %v18256_v35 = vld [vmem:[#allocation103_spill] sm:$0xff]  ;;  %vm18258_vm6 = vcmask 244736  }
 0x261   :  { %1032 = vrot.lane.b32.xlu1 %v18246_v3, %s17766_s25 }
 0x262   :  { %960 = vrot.lane.b32.xlu0 %v10860_v11, %s8643_s24 }
 0x263   :  { %v10923_v10 = vpop.permute.xlu1 %759 }
 0x264   :  { %v1387_v53 = vpop.permute.xlu0 %1386 }
 0x265   :  { %1472 = vrot.lane.b32.xlu1 %v10719_v15, %s17750_s15  ;;  %v1673_v15 = vsel %vm17758_vm13, %v1648_v42, %v10658_v29  ;;  %v18261_v42 = vld [vmem:[#allocation32_spill] sm:$0xff] }
 0x266   :  { %1400 = vrot.lane.b32.xlu0 %v720_v44, %s17752_s13  ;;  %v18255_v44 = vld [vmem:[#allocation62_spill] sm:$0xff]  ;;  %v1698_v17 = vsel %vm1687_vm14, %v1673_v15, %v10727_v62  ;;  %v18257_v62 = vld [vmem:[#allocation135_spill] sm:$0xff] }
 0x267   :  { %v10942_v20 = vpop.permute.xlu1 %1096  ;;  %v1524_v7 = vsel %vm18248_vm7, %v10127_v43, %v18255_v44  ;;  %v1723_v29 = vsel %vm17787_vm15, %v1698_v17, %v10743_v45  ;;  %v725_v43 = vrot.slane %v10970_v23, 6  ;;  %vm18262_vm7 = vcmask 1040384  }
 0x268   :  { %v10949_v58 = vpop.permute.xlu0 %877  ;;  %v1549_v3 = vsel %vm17791_vm8, %v1524_v7, %v18256_v35  ;;  %v1748_v57 = vsel %vm18258_vm6, %v1723_v29, %v10765_v0  ;;  %v10990_v0 = vsel %vm18262_vm7, %v841_v24, %v843_v5  ;;  %vm18263_vm6 = vcmask 1041408  }
 0x269   :  { %1034 = vrot.lane.b32.xlu1 %v18254_v33, %s17766_s25  ;;  %v1574_v36 = vsel %vm17790_vm9, %v1549_v3, %v18257_v62  ;;  %v1773_v45 = vsel %vm17786_vm3, %v1748_v57, %v10819_v1  ;;  %v11000_v1 = vsel %vm18263_vm6, %v723_v32, %v725_v43  ;;  %vm18264_vm7 = vcmask 244736   ;;  %v18265_v3 = vld [vmem:[#allocation57_spill] sm:$0xff]  ;;  %v18266_v62 = vld [vmem:[#allocation35_spill] sm:$0xff] }
 0x26a   :  { %769 = vrot.lane.b32.xlu0 %v10945_v52, %s17770_s21  ;;  %v1599_v34 = vsel %vm17789_vm10, %v1574_v36, %v18259_v9  ;;  %v1798_v38 = vsel %vm17748_vm2, %v1773_v45, %v1239_v49  ;;  %vm18267_vm6 = vcmask 1040384  }
 0x26b   :  { %v1389_v25 = vpop.permute.xlu1 %1388  ;;  %v1624_v61 = vsel %vm17788_vm11, %v1599_v34, %v18260_v41  ;;  %v1823_v33 = vsel %vm17785_vm1, %v1798_v38, %v1313_v60  ;;  %v18268_v38 = vld [vmem:[#allocation98_spill] sm:$0xff] }
 0x26c   :  { %v10977_v47 = vpop.permute.xlu0 %1168  ;;  %v1649_v15 = vsel %vm17759_vm12, %v1624_v61, %v10634_v55  ;;  %v1848_v49 = vsel %vm17784_vm0, %v1823_v33, %v1387_v53 }
 0x26d   :  { %1474 = vrot.lane.b32.xlu1 %v840_v54, %s17750_s15  ;;  %v1674_v54 = vsel %vm17758_vm13, %v1649_v15, %v10701_v18 }
 0x26e   :  { %1106 = vrot.lane.b32.xlu0 %v18261_v42, %s17764_s26  ;;  %v1699_v24 = vsel %vm1687_vm14, %v1674_v54, %v10745_v8  ;;  %v845_v8 = vrot.slane %v10970_v23, 7  ;;  %v18269_v42 = vld [vmem:[#allocation63_spill] sm:$0xff]  ;;  %v18270_v54 = vld [vmem:[#allocation17_spill] sm:$0xff] }
 0x26f   :  { %v10995_v44 = vpop.permute.xlu1 %879  ;;  %v1724_v60 = vsel %vm17787_vm15, %v1699_v24, %v10757_v31  ;;  %v11027_v31 = vld [vmem:[%s17643_s2] ss:$0 sm:$0xff]  ;;  %v18271_v24 = vld [vmem:[#allocation130_spill] sm:$0xff] }
 0x270   :  { %v1461_v7 = vpop.permute.xlu0 %1460  ;;  %v1749_v18 = vsel %vm18264_vm7, %v1724_v60, %v10788_v16  ;;  %v11042_v9 = vsel %vm18267_vm6, %v843_v5, %v845_v8  ;;  %vm17747_vm7 = vcmask 64512   ;;  %vm18276_vm6 = vcmask 23552  }
 0x271   :  { %v1873_v55 = vsel %vm17783_vm5, %v1848_v49, %v1461_v7  ;;  %889 = vrot.lane.b32.xlu1 %v10990_v0, %s17768_s22  ;;  %v1774_v53 = vsel %vm17786_vm3, %v1749_v18, %v10855_v2 }
 0x272   :  { %771 = vrot.lane.b32.xlu0 %v11000_v1, %s17770_s21  ;;  %7502 = vmatprep.mubr.msk.f32.mxu0 %vm17749_vm4, %v1873_v55  ;;  %v1799_v35 = vsel %vm17748_vm2, %v1774_v53, %v10898_v39  ;;  %v18272_v55 = vld [vmem:[#allocation104_spill] sm:$0xff]  ;;  %v18273_v53 = vld [vmem:[#allocation34_spill] sm:$0xff] }
 0x273   :  { %v11017_v32 = vpop.permute.xlu1 %1170  ;;  %v1824_v16 = vsel %vm17785_vm1, %v1799_v35, %v10912_v26  ;;  %v18274_v35 = vld [vmem:[#allocation20_spill] sm:$0xff] }
 0x274   :  { %v11022_v17 = vpop.permute.xlu0 %950  ;;  %v1849_v2 = vsel %vm17784_vm0, %v1824_v16, %v1389_v25 }
 0x275   :  { %1180 = vrot.lane.b32.xlu1 %v18265_v3, %s17762_s27  ;;  %v18275_v3 = vld [vmem:[#allocation68_spill] sm:$0xff] }
 0x276   :  { %v7489_v29 = vpop.f32.mrf.mxu0  ;;  %1108 = vrot.lane.b32.xlu0 %v18266_v62, %s17764_s26  ;;  %v1525_v16 = vsel %vm18276_vm6, %v10153_v28, %v18275_v3  ;;  %v18277_v62 = vld [vmem:[#allocation109_spill] sm:$0xff] }
 0x277   :  { %v2045_v36 = vadd.f32 %v7489_v29, %v11027_v31  ;;  %v1463_v57 = vpop.permute.xlu1 %1462  ;;  %v18284_v3 = vld [vmem:[#allocation37_spill] sm:$0xff] }
 0x278   :  { %v1874_v39 = vsel %vm17783_vm5, %v1849_v2, %v1463_v57  ;;  %v2039_v34 = vpop.f32.mrf.mxu0  ;;  %v1243_v45 = vpop.permute.xlu0 %1242  ;;  %v1550_v2 = vsel %vm17791_vm8, %v1525_v16, %v18277_v62  ;;  %v18278_v57 = vld [vmem:[#allocation141_spill] sm:$0xff]  ;;  %v18285_v16 = vld [vmem:[#allocation107_spill] sm:$0xff] }
 0x279   :  { %v2159_v26 = vmax.f32 %v2045_v36, 0.0  ;;  %v2040_v41 = vadd.f32 %v11027_v31, %v2039_v34  ;;  %962 = vrot.lane.b32.xlu1 %v10928_v14, %s8643_s24  ;;  %7503 = vmatmul.mubr.msk.f32.gmra.mxu0 %vm17749_vm4, %v1874_v39  ;;  %v1575_v39 = vsel %vm17790_vm9, %v1550_v2, %v18278_v57  ;;  %v18279_v34 = vld [vmem:[#allocation160_spill] sm:$0xff]  ;;  %v18286_v2 = vld [vmem:[#allocation139_spill] sm:$0xff] }
 0x27a   :  { %891 = vrot.lane.b32.xlu0 %v11042_v9, %s17768_s22 }
 0x27b   :  { %2184 = vst.msk [vmem:[#allocation2 + $0x8] sm:$0xff] %vm17747_vm7, %v2159_v26  ;;  %v2158_v5 = vmax.f32 %v2040_v41, 0.0  ;;  %v11052_v25 = vpop.permute.xlu1 %1024  ;;  %v1600_v26 = vsel %vm17789_vm10, %v1575_v39, %v18279_v34  ;;  %v18280_v41 = vld [vmem:[#allocation136_spill] sm:$0xff]  ;;  %v18288_v34 = vld [vmem:[#allocation159_spill] sm:$0xff] }
 0x27c   :  { %v11054_v61 = vpop.permute.xlu0 %952 }
 0x27d   :  { %2183 = vst.msk [vmem:[#allocation2] sm:$0xff] %vm17747_vm7, %v2158_v5  ;;  %1254 = vrot.lane.b32.xlu1 %v18268_v38, %s17760_s11  ;;  %v18281_v5 = vld [vmem:[#allocation182_spill] sm:$0xff]  ;;  %vm18287_vm7 = vcmask 244736  }
 0x27e   :  { %1182 = vrot.lane.b32.xlu0 %v18269_v42, %s17762_s27  ;;  %v1625_v28 = vsel %vm17788_vm11, %v1600_v26, %v18281_v5 }
 0x27f   :  { %v1317_v15 = vpop.permute.xlu1 %1316  ;;  %v1650_v42 = vsel %vm17759_vm12, %v1625_v28, %v10759_v19 }
 0x280   :  { %v11061_v33 = vpop.permute.xlu0 %1244 }
 0x281   :  { %1036 = vrot.lane.b32.xlu1 %v18270_v54, %s17766_s25 }
 0x282   :  { %964 = vrot.lane.b32.xlu0 %v10970_v23, %s8643_s24 }
 0x283   :  { %v11067_v49 = vpop.permute.xlu1 %1026 }
 0x284   :  { %v11069_v7 = vpop.permute.xlu0 %761 }
 0x285   :  { %1328 = vrot.lane.b32.xlu1 %v18271_v24, %s17754_s12  ;;  %v1675_v24 = vsel %vm17758_vm13, %v1650_v42, %v10792_v59 }
 0x286   :  { %1256 = vrot.lane.b32.xlu0 %v18272_v55, %s17760_s11  ;;  %v18283_v55 = vld [vmem:[#allocation66_spill] sm:$0xff] }
 0x287   :  { %v1319_v60 = vpop.permute.xlu1 %1318 }
 0x288   :  { %v11075_v18 = vpop.permute.xlu0 %1098 }
 0x289   :  { %1110 = vrot.lane.b32.xlu1 %v18273_v53, %s17764_s26  ;;  %v1526_v53 = vsel %vm18276_vm6, %v10290_v40, %v18283_v55  ;;  %vm18293_vm6 = vcmask 64512  }
 0x28a   :  { %1038 = vrot.lane.b32.xlu0 %v18274_v35, %s17766_s25  ;;  %v1700_v35 = vsel %vm1687_vm14, %v1675_v24, %v10865_v12  ;;  %v1551_v19 = vsel %vm17791_vm8, %v1526_v53, %v18285_v16  ;;  %v18291_v53 = vld [vmem:[#allocation67_spill] sm:$0xff] }
 0x28b   :  { %v11084_v29 = vpop.permute.xlu1 %763  ;;  %v1725_v62 = vsel %vm17787_vm15, %v1700_v35, %v10886_v4  ;;  %v1576_v57 = vsel %vm17790_vm9, %v1551_v19, %v18286_v2 }
 0x28c   :  { %v1391_v36 = vpop.permute.xlu0 %1390  ;;  %v1750_v39 = vsel %vm18287_vm7, %v1725_v62, %v10914_v21  ;;  %v1601_v12 = vsel %vm17789_vm10, %v1576_v57, %v18288_v34  ;;  %v18292_v57 = vld [vmem:[#allocation108_spill] sm:$0xff] }
 0x28d   :  { %1402 = vrot.lane.b32.xlu1 %v10879_v22, %s17752_s13  ;;  %v18282_v22 = vld [vmem:[#allocation61_spill] sm:$0xff]  ;;  %v1775_v26 = vsel %vm17786_vm3, %v1750_v39, %v10977_v47 }
 0x28e   :  { %1330 = vrot.lane.b32.xlu0 %v18280_v41, %s17754_s12  ;;  %v18289_v41 = vld [vmem:[#allocation180_spill] sm:$0xff]  ;;  %v1800_v5 = vsel %vm17748_vm2, %v1775_v26, %v1243_v45 }
 0x28f   :  { %v11098_v38 = vpop.permute.xlu1 %1100  ;;  %v1626_v4 = vsel %vm17788_vm11, %v1601_v12, %v18289_v41  ;;  %v1825_v28 = vsel %vm17785_vm1, %v1800_v5, %v1317_v15 }
 0x290   :  { %v11102_v54 = vpop.permute.xlu0 %881  ;;  %v1651_v21 = vsel %vm17759_vm12, %v1626_v4, %v10774_v56 }
 0x291   :  { %1184 = vrot.lane.b32.xlu1 %v18282_v22, %s17762_s27  ;;  %v1676_v47 = vsel %vm17758_vm13, %v1651_v21, %v10835_v51  ;;  %v11158_v51 = vld [vmem:[%s17641_s0 + $0xb8] sm:$0xff] }
 0x292   :  { %1112 = vrot.lane.b32.xlu0 %v18284_v3, %s17764_s26  ;;  %v1701_v22 = vsel %vm1687_vm14, %v1676_v47, %v10889_v48  ;;  %v11161_v48 = vrot.slane %v11158_v51, 6 }
 0x293   :  { %v1393_v59 = vpop.permute.xlu1 %1392  ;;  %v1726_v56 = vsel %vm17787_vm15, %v1701_v22, %v10904_v37  ;;  %v18302_v22 = vld [vmem:[#allocation143_spill] sm:$0xff] }
 0x294   :  { %v11123_v40 = vpop.permute.xlu0 %1172 }
 0x295   :  { %1476 = vrot.lane.b32.xlu1 %v10896_v27, %s17750_s15  ;;  %v1850_v27 = vsel %vm17784_vm0, %v1825_v28, %v1391_v36  ;;  %v1751_v36 = vsel %vm18287_vm7, %v1726_v56, %v10942_v20  ;;  %vm18294_vm7 = vcmask 1041408   ;;  %v18299_v28 = vld [vmem:[#allocation70_spill] sm:$0xff] }
 0x296   :  { %1404 = vrot.lane.b32.xlu0 %v10945_v52, %s17752_s13  ;;  %v18290_v52 = vld [vmem:[#allocation102_spill] sm:$0xff]  ;;  %v1776_v3 = vsel %vm17786_vm3, %v1751_v36, %v11017_v32  ;;  %v728_v32 = vsel %vm18294_vm7, %v725_v43, %v11161_v48 }
 0x297   :  { %v11139_v42 = vpop.permute.xlu1 %883  ;;  %v1801_v2 = vsel %vm17748_vm2, %v1776_v3, %v11061_v33  ;;  %vm18295_vm2 = vmmov %vm18293_vm6  ;;  %v18305_v3 = vld [vmem:[#allocation69_spill] sm:$0xff] }
 0x298   :  { %v1465_v24 = vpop.permute.xlu0 %1464  ;;  %v1826_v39 = vsel %vm17785_vm1, %v1801_v2, %v1319_v60  ;;  %v18296_v60 = vld [vmem:[#allocation134_spill] sm:$0xff] }
 0x299   :  { %v1875_v45 = vsel %vm17783_vm5, %v1850_v27, %v1465_v24  ;;  %1258 = vrot.lane.b32.xlu1 %v18290_v52, %s17760_s11  ;;  %v7492_v55 = vpop.f32.mrf.mxu0  ;;  %v1851_v34 = vsel %vm17784_vm0, %v1826_v39, %v1393_v59  ;;  %v18297_v59 = vld [vmem:[#allocation140_spill] sm:$0xff]  ;;  %v18309_v39 = vld [vmem:[#allocation142_spill] sm:$0xff] }
 0x29a   :  { %v2055_v15 = vadd.f32 %v7492_v55, %v11027_v31  ;;  %1186 = vrot.lane.b32.xlu0 %v18291_v53, %s17762_s27  ;;  %7505 = vmatprep.mubr.msk.f32.mxu0 %vm17749_vm4, %v1875_v45  ;;  %v18303_v45 = vld [vmem:[#allocation162_spill] sm:$0xff] }
 0x29b   :  { %v11165_v35 = vpop.permute.xlu1 %1174  ;;  %v2049_v37 = vpop.f32.mrf.mxu0 }
 0x29c   :  { %v2161_v16 = vmax.f32 %v2055_v15, 0.0  ;;  %v2050_v19 = vadd.f32 %v11027_v31, %v2049_v37  ;;  %v11170_v62 = vpop.permute.xlu0 %954  ;;  %v11234_v37 = vld [vmem:[%s17641_s0 + $0xc0] sm:$0xff] }
 0x29d   :  { %1260 = vrot.lane.b32.xlu1 %v18292_v57, %s17760_s11  ;;  %v994_v57 = vrot.slane %v11234_v37, 1 }
 0x29e   :  { %2186 = vst.msk [vmem:[#allocation2 + $0x18] sm:$0xff] %vm18293_vm6, %v2161_v16  ;;  %v2160_v20 = vmax.f32 %v2050_v19, 0.0  ;;  %1478 = vrot.lane.b32.xlu0 %v10990_v0, %s17750_s15  ;;  %v11192_v0 = vrot.slane %v11158_v51, 7  ;;  %vm18300_vm6 = vcmask 23552  }
 0x29f   :  { %v1467_v12 = vpop.permute.xlu1 %1466  ;;  %v1527_v47 = vsel %vm18300_vm6, %v10311_v63, %v18299_v28  ;;  %v18304_v63 = vld [vmem:[#allocation184_spill] sm:$0xff]  ;;  %vm18306_vm7 = vmmov %vm18300_vm6  ;;  %vm18311_vm6 = vcmask 293888  }
 0x2a0   :  { %2185 = vst.msk [vmem:[#allocation2 + $0x10] sm:$0xff] %vm18295_vm2, %v2160_v20  ;;  %v1876_v33 = vsel %vm17783_vm5, %v1851_v34, %v1467_v12  ;;  %v1247_v26 = vpop.permute.xlu0 %1246  ;;  %vm18298_vm2 = vcmask 1040384  }
 0x2a1   :  { %773 = vrot.lane.b32.xlu1 %v728_v32, %s17770_s21  ;;  %7506 = vmatmul.mubr.msk.f32.gmra.mxu0 %vm17749_vm4, %v1876_v33  ;;  %v848_v4 = vsel %vm18298_vm2, %v845_v8, %v11192_v0  ;;  %vm18308_vm2 = vcmask 244736  }
 0x2a2   :  { %1332 = vrot.lane.b32.xlu0 %v18296_v60, %s17754_s12 }
 0x2a3   :  { %v11194_v41 = vpop.permute.xlu1 %1028 }
 0x2a4   :  { %v11196_v43 = vpop.permute.xlu0 %956 }
 0x2a5   :  { %1406 = vrot.lane.b32.xlu1 %v11000_v1, %s17752_s13  ;;  %v18301_v1 = vld [vmem:[#allocation111_spill] sm:$0xff] }
 0x2a6   :  { %1334 = vrot.lane.b32.xlu0 %v18297_v59, %s17754_s12  ;;  %v1552_v27 = vsel %vm17791_vm8, %v1527_v47, %v18301_v1  ;;  %v18313_v47 = vld [vmem:[#allocation19_spill] sm:$0xff] }
 0x2a7   :  { %v1321_v5 = vpop.permute.xlu1 %1320  ;;  %v1577_v23 = vsel %vm17790_vm9, %v1552_v27, %v18302_v22 }
 0x2a8   :  { %v1249_v21 = vpop.permute.xlu0 %1248  ;;  %v1602_v52 = vsel %vm17789_vm10, %v1577_v23, %v18303_v45 }
 0x2a9   :  { %893 = vrot.lane.b32.xlu1 %v848_v4, %s17768_s22  ;;  %v1627_v55 = vsel %vm17788_vm11, %v1602_v52, %v18304_v63  ;;  %v1142_v63 = vrot.slane %v11234_v37, 3 }
 0x2aa   :  { %775 = vrot.lane.b32.xlu0 %v11161_v48, %s17770_s21  ;;  %v1652_v56 = vsel %vm17759_vm12, %v1627_v55, %v10906_v30  ;;  %v1528_v30 = vsel %vm18306_vm7, %v10448_v6, %v18305_v3  ;;  %vm18314_vm7 = vcmask 1046528   ;;  %v1216_v3 = vrot.slane %v11234_v37, 4  ;;  %s18586_s21 = smov 27  }
 0x2ab   :  { %v11214_v24 = vpop.permute.xlu1 %1102  ;;  %v1677_v53 = vsel %vm17758_vm13, %v1652_v56, %v10949_v58  ;;  %v18307_v58 = vld [vmem:[#allocation110_spill] sm:$0xff]  ;;  %v995_v1 = vsel %vm18314_vm7, %v18313_v47, %v994_v57  ;;  %vm18317_vm7 = vcmask 293888  }
 0x2ac   :  { %v11218_v8 = vpop.permute.xlu0 %1030  ;;  %v1553_v19 = vsel %vm17791_vm8, %v1528_v30, %v18307_v58 }
 0x2ad   :  { %1480 = vrot.lane.b32.xlu1 %v11042_v9, %s17750_s15  ;;  %v1702_v9 = vsel %vm1687_vm14, %v1677_v53, %v11022_v17  ;;  %v1578_v20 = vsel %vm17790_vm9, %v1553_v19, %v18309_v39  ;;  %v18318_v53 = vld [vmem:[#allocation64_spill] sm:$0xff]  ;;  %v18320_v19 = vld [vmem:[#allocation105_spill] sm:$0xff] }
 0x2ae   :  { %1408 = vrot.lane.b32.xlu0 %v728_v32, %s17752_s13  ;;  %v1727_v16 = vsel %vm17787_vm15, %v1702_v9, %v11052_v25  ;;  %v18310_v32 = vld [vmem:[#allocation161_spill] sm:$0xff] }
 0x2af   :  { %v1395_v15 = vpop.permute.xlu1 %1394  ;;  %v1752_v2 = vsel %vm18308_vm2, %v1727_v16, %v11075_v18  ;;  %v1603_v34 = vsel %vm17789_vm10, %v1578_v20, %v18310_v32  ;;  %v18312_v18 = vld [vmem:[#allocation183_spill] sm:$0xff] }
 0x2b0   :  { %v1323_v36 = vpop.permute.xlu0 %1322  ;;  %v1777_v6 = vsel %vm17786_vm3, %v1752_v2, %v11123_v40  ;;  %v1628_v33 = vsel %vm17788_vm11, %v1603_v34, %v18312_v18 }
 0x2b1   :  { %966 = vrot.lane.b32.xlu1 %v11158_v51, %s8643_s24  ;;  %v1802_v12 = vsel %vm18311_vm6, %v1777_v6, %v1247_v26  ;;  %v1653_v40 = vsel %vm17759_vm12, %v1628_v33, %v10923_v10  ;;  %v1068_v26 = vrot.slane %v11234_v37, 2  ;;  %vm18316_vm6 = vcmask 1045504  }
 0x2b2   :  { %895 = vrot.lane.b32.xlu0 %v11192_v0, %s17768_s22  ;;  %v1827_v60 = vsel %vm17785_vm1, %v1802_v12, %v1321_v5  ;;  %v1678_v27 = vsel %vm17758_vm13, %v1653_v40, %v10995_v44  ;;  %v18315_v44 = vld [vmem:[#allocation36_spill] sm:$0xff]  ;;  %v18323_v12 = vld [vmem:[#allocation137_spill] sm:$0xff]  ;;  %v1364_v33 = vrot.slane %v11234_v37, 6  ;;  %v2234_v40 = vld [vmem:[#allocation2 + $0x11] ss:$2 sm:$0xff]  ;;  %s18596_s22 = smov 33  }
 0x2b3   :  { %v11251_v17 = vpop.permute.xlu1 %1176  ;;  %v1852_v59 = vsel %vm17784_vm0, %v1827_v60, %v1395_v15  ;;  %v1069_v52 = vsel %vm18316_vm6, %v18315_v44, %v1068_v26  ;;  %vm18321_vm6 = vcmask 1043456   ;;  %v2210_v60 = vld [vmem:[#allocation2 + $0x10] ss:$2 sm:$0xff] }
 0x2b4   :  { %v11258_v25 = vpop.permute.xlu0 %1104  ;;  %v1217_v2 = vsel %vm18321_vm6, %v18320_v19, %v1216_v3  ;;  %v11342_v44 = vmax.f32 %v2210_v60, %v2234_v40 }
 0x2b5   :  { %968 = vrot.lane.b32.xlu1 %v11234_v37, %s8643_s24 }
 0x2b6   :  { %1482 = vrot.lane.b32.xlu0 %v848_v4, %s17750_s15  ;;  %v1703_v4 = vsel %vm1687_vm14, %v1678_v27, %v11054_v61  ;;  %v18328_v27 = vld [vmem:[#allocation71_spill] sm:$0xff]  ;;  %v2278_v60 = vrot.slane %v11342_v44, 1 }
 0x2b7   :  { %v1469_v28 = vpop.permute.xlu1 %1468  ;;  %v1728_v10 = vsel %vm17787_vm15, %v1703_v4, %v11067_v49 }
 0x2b8   :  { %v1877_v22 = vsel %vm17783_vm5, %v1852_v59, %v1469_v28  ;;  %v1397_v23 = vpop.permute.xlu0 %1396  ;;  %v1753_v5 = vsel %vm18308_vm2, %v1728_v10, %v11098_v38  ;;  %vm18319_vm2 = vcmask 1044480   ;;  %v18326_v28 = vld [vmem:[#allocation72_spill] sm:$0xff]  ;;  %v18331_v10 = vld [vmem:[#allocation145_spill] sm:$0xff] }
 0x2b9   :  { %1042 = vrot.lane.b32.xlu1 %v994_v57, %s17766_s25  ;;  %7508 = vmatprep.mubr.msk.f32.mxu0 %vm17749_vm4, %v1877_v22  ;;  %v1778_v61 = vsel %vm17786_vm3, %v1753_v5, %v11165_v35  ;;  %v1143_v9 = vsel %vm18319_vm2, %v18318_v53, %v1142_v63  ;;  %v1290_v57 = vrot.slane %v11234_v37, 5  ;;  %vm18324_vm2 = vcmask 1042432   ;;  %v18335_v53 = vld [vmem:[#allocation144_spill] sm:$0xff] }
 0x2ba   :  { %1040 = vrot.lane.b32.xlu0 %v995_v1, %s17766_s25  ;;  %v1803_v56 = vsel %vm18317_vm7, %v1778_v61, %v1249_v21  ;;  %vm18322_vm7 = vcmask 64512   ;;  %v2208_v1 = vld [vmem:[#allocation2] ss:$2 sm:$0xff]  ;;  %s17802_s25 = smov 96  }
 0x2bb   :  { %v11287_v45 = vpop.permute.xlu1 %1178  ;;  %v1828_v49 = vsel %vm17785_vm1, %v1803_v56, %v1323_v36  ;;  %v1291_v18 = vsel %vm18324_vm2, %v18323_v12, %v1290_v57  ;;  %vm18325_vm6 = vmmov %vm18322_vm7  ;;  %v18333_v61 = vld [vmem:[#allocation112_spill] sm:$0xff]  ;;  %vm18339_vm2 = vcmask 1040384  }
 0x2bc   :  { %v11294_v55 = vpop.permute.xlu0 %765  ;;  %v1853_v38 = vsel %vm17784_vm0, %v1828_v49, %v1397_v23  ;;  %v18330_v23 = vld [vmem:[#allocation113_spill] sm:$0xff]  ;;  %v18334_v56 = vld [vmem:[#allocation164_spill] sm:$0xff] }
 0x2bd   :  { %1116 = vrot.lane.b32.xlu1 %v1068_v26, %s17764_s26  ;;  %v2232_v26 = vld [vmem:[#allocation2 + $0x1] ss:$2 sm:$0xff] }
 0x2be   :  { %1114 = vrot.lane.b32.xlu0 %v1069_v52, %s17764_s26  ;;  %s17797_s26 = smov 88  }
 0x2bf   :  { %v1471_v15 = vpop.permute.xlu1 %1470 }
 0x2c0   :  { %v1878_v35 = vsel %vm17783_vm5, %v1853_v38, %v1471_v15  ;;  %v11305_v30 = vpop.permute.xlu0 %1250  ;;  %v11353_v38 = vmax.f32 %v2208_v1, %v2232_v26 }
 0x2c1   :  { %1190 = vrot.lane.b32.xlu1 %v1142_v63, %s17762_s27  ;;  %v7495_v21 = vpop.f32.mrf.mxu0  ;;  %7509 = vmatmul.mubr.msk.f32.gmra.mxu0 %vm17749_vm4, %v1878_v35  ;;  %vm18327_vm4 = vcmask 23552   ;;  %v1438_v63 = vrot.slane %v11234_v37, 7 }
 0x2c2   :  { %v2065_v36 = vadd.f32 %v7495_v21, %v11027_v31  ;;  %1188 = vrot.lane.b32.xlu0 %v1143_v9, %s17762_s27  ;;  %v1529_v47 = vsel %vm18327_vm4, %v10471_v50, %v18326_v28  ;;  %v2425_v40 = vrot.slane %v11353_v38, 4  ;;  %v2375_v28 = vrot.slane %v11353_v38, 3  ;;  %s17804_s27 = smov 72  }
 0x2c3   :  { %v11311_v16 = vpop.permute.xlu1 %885  ;;  %v2059_v58 = vpop.f32.mrf.mxu0  ;;  %v1554_v4 = vsel %vm17791_vm8, %v1529_v47, %v18330_v23  ;;  %v2426_v23 = vrot.slane %v11342_v44, 4 }
 0x2c4   :  { %v2163_v39 = vmax.f32 %v2065_v36, 0.0  ;;  %v2060_v20 = vadd.f32 %v11027_v31, %v2059_v58  ;;  %v11317_v6 = vpop.permute.xlu0 %767  ;;  %v1579_v5 = vsel %vm17790_vm9, %v1554_v4, %v18331_v10  ;;  %v18338_v36 = vld [vmem:[#allocation185_spill] sm:$0xff]  ;;  %v2376_v4 = vrot.slane %v11342_v44, 3 }
 0x2c5   :  { %1264 = vrot.lane.b32.xlu1 %v1216_v3, %s17760_s11  ;;  %v1604_v49 = vsel %vm17789_vm10, %v1579_v5, %v18334_v56  ;;  %v18336_v3 = vld [vmem:[#allocation186_spill] sm:$0xff] }
 0x2c6   :  { %2188 = vst.msk [vmem:[#allocation2 + $0x28] sm:$0xff] %vm18322_vm7, %v2163_v39  ;;  %v2162_v32 = vmax.f32 %v2060_v20, 0.0  ;;  %1262 = vrot.lane.b32.xlu0 %v1217_v2, %s17760_s11  ;;  %vm18329_vm7 = vmmov %vm18327_vm4  ;;  %vm18332_vm4 = vcmask 1041408   ;;  %v1629_v35 = vsel %vm17788_vm11, %v1604_v49, %v18336_v3  ;;  %v1439_v20 = vsel %vm18339_vm2, %v11192_v0, %v1438_v63  ;;  %s17806_s11 = smov 80  }
 0x2c7   :  { %v11322_v34 = vpop.permute.xlu1 %1324  ;;  %v1530_v22 = vsel %vm18329_vm7, %v10605_v13, %v18328_v27  ;;  %v1365_v50 = vsel %vm18332_vm4, %v11161_v48, %v1364_v33  ;;  %v18337_v48 = vld [vmem:[#allocation163_spill] sm:$0xff]  ;;  %v1654_v21 = vsel %vm17759_vm12, %v1629_v35, %v11069_v7  ;;  %v2277_v0 = vrot.slane %v11353_v38, 1 }
 0x2c8   :  { %2187 = vst.msk [vmem:[#allocation2 + $0x20] sm:$0xff] %vm18325_vm6, %v2162_v32  ;;  %v11328_v59 = vpop.permute.xlu0 %1252  ;;  %v1555_v13 = vsel %vm17791_vm8, %v1530_v22, %v18333_v61  ;;  %v1679_v19 = vsel %vm17758_vm13, %v1654_v21, %v11102_v54  ;;  %v2327_v32 = vrot.slane %v11342_v44, 2  ;;  %vm18340_vm6 = vcmask 244736  }
 0x2c9   :  { %1338 = vrot.lane.b32.xlu1 %v1290_v57, %s17754_s12  ;;  %v1580_v9 = vsel %vm17790_vm9, %v1555_v13, %v18335_v53  ;;  %v1704_v12 = vsel %vm1687_vm14, %v1679_v19, %v11170_v62  ;;  %vm18341_vm7 = vcmask 1045504   ;;  %vm18343_vm2 = vcmask 1046528  }
 0x2ca   :  { %1336 = vrot.lane.b32.xlu0 %v1291_v18, %s17754_s12  ;;  %v1605_v37 = vsel %vm17789_vm10, %v1580_v9, %v18337_v48  ;;  %v1729_v54 = vsel %vm17787_vm15, %v1704_v12, %v11194_v41  ;;  %vm18342_vm4 = vmmov %vm18341_vm7  ;;  %s17795_s12 = smov 104  }
 0x2cb   :  { %v11344_v52 = vpop.permute.xlu1 %958  ;;  %v1630_v58 = vsel %vm17788_vm11, %v1605_v37, %v18338_v36  ;;  %v1754_v41 = vsel %vm18340_vm6, %v1729_v54, %v11214_v24  ;;  %v2279_v24 = vsel %vm18343_vm2, %v2277_v0, %v2278_v60  ;;  %vm18344_vm6 = vmmov %vm18343_vm2  ;;  %vm18347_vm2 = vcmask 1044480  }
 0x2cc   :  { %v11355_v15 = vpop.permute.xlu0 %887  ;;  %v1779_v10 = vsel %vm17786_vm3, %v1754_v41, %v11251_v17  ;;  %v1655_v61 = vsel %vm17759_vm12, %v1630_v58, %v11084_v29  ;;  %v2477_v36 = vrot.slane %v11342_v44, 5 }
 0x2cd   :  { %1412 = vrot.lane.b32.xlu1 %v1364_v33, %s17752_s13  ;;  %v2326_v33 = vrot.slane %v11353_v38, 2 }
 0x2ce   :  { %1410 = vrot.lane.b32.xlu0 %v1365_v50, %s17752_s13  ;;  %s17793_s13 = smov 120  }
 0x2cf   :  { %v2212_v2 = vld [vmem:[#allocation2 + $0x20] ss:$2 sm:$0xff]  ;;  %v2236_v57 = vld [vmem:[#allocation2 + $0x21] ss:$2 sm:$0xff]  ;;  %v1399_v39 = vpop.permute.xlu1 %1398  ;;  %v2328_v22 = vsel %vm18341_vm7, %v2326_v33, %v2327_v32  ;;  %vm18345_vm7 = vcmask 293888  }
 0x2d0   :  { %v11376_v7 = vmax.f32 %v2212_v2, %v2236_v57  ;;  %v11378_v18 = vpop.permute.xlu0 %1326  ;;  %v1804_v17 = vsel %vm18345_vm7, %v1779_v10, %v11305_v30  ;;  %v1680_v30 = vsel %vm17758_vm13, %v1655_v61, %v11139_v42  ;;  %vm18349_vm7 = vmmov %vm18347_vm2  ;;  %v2476_v57 = vrot.slane %v11353_v38, 5 }
 0x2d1   :  { %1486 = vrot.lane.b32.xlu1 %v1438_v63, %s17750_s15  ;;  %v1829_v49 = vsel %vm17785_vm1, %v1804_v17, %v11322_v34  ;;  %v2377_v21 = vsel %vm18349_vm7, %v2375_v28, %v2376_v4  ;;  %v1705_v42 = vsel %vm1687_vm14, %v1680_v30, %v11196_v43 }
 0x2d2   :  { %1484 = vrot.lane.b32.xlu0 %v1439_v20, %s17750_s15  ;;  %v2329_v62 = vrot.slane %v11376_v7, 2  ;;  %v2280_v47 = vrot.slane %v11376_v7, 1  ;;  %v2428_v1 = vrot.slane %v11376_v7, 4  ;;  %v2378_v26 = vrot.slane %v11376_v7, 3  ;;  %s17808_s15 = smov 64  }
 0x2d3   :  { %v11395_v27 = vpop.permute.xlu1 %1032  ;;  %v2479_v29 = vrot.slane %v11376_v7, 5  ;;  %v1854_v3 = vsel %vm17784_vm0, %v1829_v49, %v1399_v39  ;;  %v1730_v2 = vsel %vm17787_vm15, %v1705_v42, %v11218_v8  ;;  %v2530_v20 = vrot.slane %v11376_v7, 6 }
 0x2d4   :  { %v11402_v5 = vpop.permute.xlu0 %960  ;;  %v11407_v50 = vsel %vm18342_vm4, %v2327_v32, %v2329_v62  ;;  %v11413_v63 = vsel %vm18344_vm6, %v2278_v60, %v2280_v47  ;;  %vm18346_vm4 = vcmask 1043456   ;;  %v11431_v9 = vsel %vm18347_vm2, %v2376_v4, %v2378_v26 }
 0x2d5   :  { %v7723_v13 = vpack.i.bf16 %v11407_v50, %v2328_v22  ;;  %v7718_v56 = vpack.i.bf16 %v11413_v63, %v2279_v24  ;;  %v11426_v53 = vsel %vm18346_vm4, %v2426_v23, %v2428_v1  ;;  %vm18348_vm6 = vmmov %vm18346_vm4  ;;  %vm18350_vm4 = vcmask 392192  }
 0x2d6   :  { %v2427_v37 = vsel %vm18348_vm6, %v2425_v40, %v2426_v23  ;;  %v7728_v19 = vpack.i.bf16 %v11431_v9, %v2377_v21  ;;  %vm18351_vm2 = vcmask 1042432   ;;  %vm18352_vm6 = vcmask 244736  }
 0x2d7   :  { %v1473_v35 = vpop.permute.xlu1 %1472  ;;  %7724 = vrot.lane.b32.xlu1 %v7723_v13, %s17829_s29  ;;  %7719 = vrot.lane.b32.xlu0 %v7718_v56, %s17831_s30  ;;  %v7733_v58 = vpack.i.bf16 %v11426_v53, %v2427_v37  ;;  %v11454_v39 = vsel %vm18351_vm2, %v2477_v36, %v2479_v29  ;;  %v1755_v43 = vsel %vm18352_vm6, %v1730_v2, %v11258_v25  ;;  %vm18353_vm7 = vmmov %vm18351_vm2  ;;  %v2528_v60 = vrot.slane %v11342_v44, 6 }
 0x2d8   :  { %v1879_v34 = vsel %vm17783_vm5, %v1854_v3, %v1473_v35  ;;  %v1401_v48 = vpop.permute.xlu0 %1400  ;;  %v1780_v8 = vsel %vm17786_vm3, %v1755_v43, %v11287_v45  ;;  %v2478_v33 = vsel %vm18353_vm7, %v2476_v57, %v2477_v36  ;;  %v2527_v40 = vrot.slane %v11353_v38, 6 }
 0x2d9   :  { %7511 = vmatprep.mubr.msk.f32.mxu0 %vm18350_vm4, %v1879_v34  ;;  %vm18354_vm4 = vcmask 293888   ;;  %v7743_v25 = vpack.i.bf16 %v11454_v39, %v2478_v33  ;;  %vm18355_vm2 = vcmask 1041408   ;;  %v2581_v28 = vrot.slane %v11376_v7, 7  ;;  %v8607_v33 = vld [vmem:[%s17641_s0 + $0x90] sm:$0xff] }
 0x2da   :  { %v1805_v54 = vsel %vm18354_vm4, %v1780_v8, %v11328_v59  ;;  %v11478_v45 = vsel %vm18355_vm2, %v2528_v60, %v2530_v20  ;;  %vm18356_vm6 = vmmov %vm18355_vm2  ;;  %v2579_v4 = vrot.slane %v11342_v44, 7  ;;  %vm18357_vm7 = vcmask 392192  }
 0x2db   :  { %v11459_v32 = vpop.permute.xlu1 %1034  ;;  %7734 = vrot.lane.b32.xlu1 %v7733_v58, %s17816_s10  ;;  %7729 = vrot.lane.b32.xlu0 %v7728_v19, %s8643_s24  ;;  %v1830_v0 = vsel %vm17785_vm1, %v1805_v54, %v11378_v18  ;;  %v2529_v18 = vsel %vm18356_vm6, %v2527_v40, %v2528_v60  ;;  %v2578_v24 = vrot.slane %v11353_v38, 7  ;;  %vm18358_vm4 = vcmask 1040384   ;;  %v18362_v60 = vld [vmem:[#allocation74_spill] sm:$0xff] }
 0x2dc   :  { %v11465_v12 = vpop.permute.xlu0 %769  ;;  %v1855_v41 = vsel %vm17784_vm0, %v1830_v0, %v1401_v48  ;;  %v7753_v10 = vpack.i.bf16 %v11478_v45, %v2529_v18  ;;  %v11494_v61 = vsel %vm18358_vm4, %v2579_v4, %v2581_v28  ;;  %vm18359_vm2 = vmmov %vm18358_vm4  ;;  %v7773_v34 = vpack.i.bf16 %v11376_v7, %v11342_v44 }
 0x2dd   :  { %v2580_v56 = vsel %vm18359_vm2, %v2578_v24, %v2579_v4  ;;  %vm18360_vm6 = vcmask 64512   ;;  %vm18363_vm4 = vcmask 23552   ;;  %v18365_v4 = vld [vmem:[#allocation147_spill] sm:$0xff]  ;;  %vm18368_vm2 = vcmask 1042432  }
 0x2de   :  { %v7763_v49 = vpack.i.bf16 %v11494_v61, %v2580_v56  ;;  %v1531_v54 = vsel %vm18363_vm4, %v8607_v33, %v18362_v60  ;;  %v18367_v33 = vld [vmem:[#allocation188_spill] sm:$0xff]  ;;  %vm18371_vm4 = vcmask 1044480  }
 0x2df   :  { %v1475_v22 = vpop.permute.xlu1 %1474  ;;  %7744 = vrot.lane.b32.xlu1 %v7743_v25, %s17814_s14 }
 0x2e0   :  { %v1880_v59 = vsel %vm17783_vm5, %v1855_v41, %v1475_v22  ;;  %v11484_v23 = vpop.permute.xlu0 %1106  ;;  %v18364_v41 = vld [vmem:[#allocation115_spill] sm:$0xff] }
 0x2e1   :  { %7512 = vmatmul.mubr.msk.f32.gmra.mxu0 %vm18357_vm7, %v1880_v59  ;;  %vm18361_vm7 = vmmov %vm18360_vm6  ;;  %v1556_v22 = vsel %vm17791_vm8, %v1531_v54, %v18364_v41 }
 0x2e3   :  { %v11496_v17 = vpop.permute.xlu1 %889  ;;  %7754 = vrot.lane.b32.xlu1 %v7753_v10, %s17812_s16  ;;  %v1581_v10 = vsel %vm17790_vm9, %v1556_v22, %v18365_v4 }
 0x2e4   :  { %v11499_v13 = vpop.permute.xlu0 %771 }
 0x2e7   :  { %v11503_v30 = vpop.permute.xlu1 %1180  ;;  %7764 = vrot.lane.b32.xlu1 %v7763_v49, %s17810_s28 }
 0x2e8   :  { %v11506_v3 = vpop.permute.xlu0 %1108 }
 0x2e9   :  { %v7498_v35 = vpop.f32.mrf.mxu0 }
 0x2ea   :  { %v2075_v48 = vadd.f32 %v7498_v35, %v11027_v31 }
 0x2eb   :  { %v11511_v37 = vpop.permute.xlu1 %962  ;;  %7774 = vrot.lane.b32.xlu1 %v7773_v34, %s17808_s15  ;;  %v2069_v21 = vpop.f32.mrf.mxu0  ;;  %v18366_v34 = vld [vmem:[#allocation166_spill] sm:$0xff] }
 0x2ec   :  { %v2165_v36 = vmax.f32 %v2075_v48, 0.0  ;;  %v2070_v42 = vadd.f32 %v11027_v31, %v2069_v21  ;;  %v11515_v58 = vpop.permute.xlu0 %891  ;;  %v1606_v48 = vsel %vm17789_vm10, %v1581_v10, %v18366_v34  ;;  %v18375_v34 = vld [vmem:[#allocation73_spill] sm:$0xff] }
 0x2ed   :  { %v1631_v60 = vsel %vm17788_vm11, %v1606_v48, %v18367_v33 }
 0x2ee   :  { %2190 = vst.msk [vmem:[#allocation2 + $0x38] sm:$0xff] %vm18360_vm6, %v2165_v36  ;;  %v2164_v19 = vmax.f32 %v2070_v42, 0.0  ;;  %vm18369_vm6 = vcmask 1046528   ;;  %v1656_v22 = vsel %vm17759_vm12, %v1631_v60, %v11294_v55 }
 0x2ef   :  { %v1255_v2 = vpop.permute.xlu1 %1254 }
 0x2f0   :  { %2189 = vst.msk [vmem:[#allocation2 + $0x30] sm:$0xff] %vm18361_vm7, %v2164_v19  ;;  %v11519_v57 = vpop.permute.xlu0 %1182  ;;  %vm18370_vm7 = vcmask 1045504  }
 0x2f3   :  { %v11521_v43 = vpop.permute.xlu1 %1036 }
 0x2f4   :  { %v11523_v8 = vpop.permute.xlu0 %964 }
 0x2f7   :  { %v2214_v25 = vld [vmem:[#allocation2 + $0x30] ss:$2 sm:$0xff]  ;;  %v2238_v0 = vld [vmem:[#allocation2 + $0x31] ss:$2 sm:$0xff]  ;;  %v1329_v40 = vpop.permute.xlu1 %1328 }
 0x2f8   :  { %v11532_v59 = vmax.f32 %v2214_v25, %v2238_v0  ;;  %v1257_v18 = vpop.permute.xlu0 %1256 }
 0x2fa   :  { %v2481_v24 = vrot.slane %v11532_v59, 5  ;;  %v2282_v56 = vrot.slane %v11532_v59, 1  ;;  %v2331_v49 = vrot.slane %v11532_v59, 2  ;;  %v2380_v35 = vrot.slane %v11532_v59, 3 }
 0x2fb   :  { %v11542_v21 = vpop.permute.xlu1 %1110  ;;  %v2430_v36 = vrot.slane %v11532_v59, 4  ;;  %v17756_v42 = vrot.slane %v11532_v59, 7  ;;  %v17757_v19 = vrot.slane %v11532_v59, 6 }
 0x2fc   :  { %v11549_v54 = vpop.permute.xlu0 %1038  ;;  %v11556_v25 = vsel %vm18368_vm2, %v2479_v29, %v2481_v24  ;;  %v11563_v0 = vsel %vm18369_vm6, %v2280_v47, %v2282_v56  ;;  %v11570_v41 = vsel %vm18370_vm7, %v2329_v62, %v2331_v49  ;;  %v11579_v29 = vsel %vm18371_vm4, %v2378_v26, %v2380_v35 }
 0x2fd   :  { %vm18372_vm2 = vcmask 1043456   ;;  %vm18373_vm6 = vcmask 1040384   ;;  %vm18374_vm7 = vcmask 1041408   ;;  %vm18376_vm4 = vcmask 23552  }
 0x2fe   :  { %v11586_v47 = vsel %vm18372_vm2, %v2428_v1, %v2430_v36  ;;  %v11597_v26 = vsel %vm18373_vm6, %v2581_v28, %v17756_v42  ;;  %v11604_v1 = vsel %vm18374_vm7, %v2530_v20, %v17757_v19  ;;  %v1681_v20 = vsel %vm17758_vm13, %v1656_v22, %v11311_v16  ;;  %v18378_v42 = vld [vmem:[#allocation114_spill] sm:$0xff] }
 0x2ff   :  { %v1403_v10 = vpop.permute.xlu1 %1402  ;;  %v1706_v4 = vsel %vm1687_vm14, %v1681_v20, %v11344_v52  ;;  %v1532_v48 = vsel %vm18376_vm4, %v10812_v46, %v18375_v34  ;;  %vm18377_vm2 = vcmask 244736   ;;  %v18379_v52 = vld [vmem:[#allocation146_spill] sm:$0xff]  ;;  %vm18380_vm6 = vcmask 293888  }
 0x300   :  { %v1331_v60 = vpop.permute.xlu0 %1330  ;;  %v1731_v55 = vsel %vm17787_vm15, %v1706_v4, %v11395_v27  ;;  %v1557_v33 = vsel %vm17791_vm8, %v1532_v48, %v18378_v42  ;;  %v18381_v4 = vld [vmem:[#allocation165_spill] sm:$0xff]  ;;  %vm18383_vm7 = vcmask 392192   ;;  %vm18384_vm4 = vmmov %vm18377_vm2 }
 0x301   :  { %v1756_v28 = vsel %vm18377_vm2, %v1731_v55, %v11484_v23  ;;  %v1582_v20 = vsel %vm17790_vm9, %v1557_v33, %v18379_v52  ;;  %v18382_v23 = vld [vmem:[#allocation187_spill] sm:$0xff]  ;;  %vm18385_vm2 = vmmov %vm18380_vm6 }
 0x302   :  { %v1781_v16 = vsel %vm17786_vm3, %v1756_v28, %v11503_v30  ;;  %v1607_v46 = vsel %vm17789_vm10, %v1582_v20, %v18381_v4 }
 0x303   :  { %v1185_v62 = vpop.permute.xlu1 %1184  ;;  %v1806_v27 = vsel %vm18380_vm6, %v1781_v16, %v1255_v2  ;;  %v1632_v55 = vsel %vm17788_vm11, %v1607_v46, %v18382_v23  ;;  %vm18387_vm6 = vcmask 23552  }
 0x304   :  { %v11631_v22 = vpop.permute.xlu0 %1112  ;;  %v1831_v34 = vsel %vm17785_vm1, %v1806_v27, %v1329_v40  ;;  %v1657_v30 = vsel %vm17759_vm12, %v1632_v55, %v11317_v6 }
 0x305   :  { %v1856_v42 = vsel %vm17784_vm0, %v1831_v34, %v1403_v10  ;;  %v1682_v2 = vsel %vm17758_vm13, %v1657_v30, %v11355_v15 }
 0x306   :  { %v1707_v40 = vsel %vm1687_vm14, %v1682_v2, %v11402_v5  ;;  %v18390_v2 = vld [vmem:[#allocation168_spill] sm:$0xff] }
 0x307   :  { %v1477_v48 = vpop.permute.xlu1 %1476  ;;  %v1732_v33 = vsel %vm17787_vm15, %v1707_v40, %v11459_v32  ;;  %v18386_v32 = vld [vmem:[#allocation77_spill] sm:$0xff]  ;;  %v18391_v40 = vld [vmem:[#allocation190_spill] sm:$0xff] }
 0x308   :  { %v1881_v28 = vsel %vm17783_vm5, %v1856_v42, %v1477_v48  ;;  %v1405_v19 = vpop.permute.xlu0 %1404  ;;  %v1757_v10 = vsel %vm18384_vm4, %v1732_v33, %v11506_v3  ;;  %v1533_v23 = vsel %vm18387_vm6, %v10860_v11, %v18386_v32  ;;  %v18389_v42 = vld [vmem:[#allocation149_spill] sm:$0xff]  ;;  %vm18392_vm4 = vcmask 64512  }
 0x309   :  { %7514 = vmatprep.mubr.msk.f32.mxu0 %vm18383_vm7, %v1881_v28  ;;  %v1782_v6 = vsel %vm17786_vm3, %v1757_v10, %v11519_v57  ;;  %v18388_v57 = vld [vmem:[#allocation117_spill] sm:$0xff] }
 0x30a   :  { %v1807_v20 = vsel %vm18385_vm2, %v1782_v6, %v1257_v18  ;;  %v1558_v18 = vsel %vm17791_vm8, %v1533_v23, %v18388_v57  ;;  %vm18393_vm2 = vmmov %vm18392_vm4 }
 0x30b   :  { %v1259_v16 = vpop.permute.xlu1 %1258  ;;  %v1832_v15 = vsel %vm17785_vm1, %v1807_v20, %v1331_v60 }
 0x30c   :  { %v1187_v52 = vpop.permute.xlu0 %1186  ;;  %v1857_v4 = vsel %vm17784_vm0, %v1832_v15, %v1405_v19  ;;  %v1583_v19 = vsel %vm17790_vm9, %v1558_v18, %v18389_v42  ;;  %v18399_v42 = vld [vmem:[#allocation167_spill] sm:$0xff] }
 0x30d   :  { %v1608_v11 = vsel %vm17789_vm10, %v1583_v19, %v18390_v2 }
 0x30e   :  { %v1633_v33 = vsel %vm17788_vm11, %v1608_v11, %v18391_v40 }
 0x30f   :  { %v1261_v27 = vpop.permute.xlu1 %1260  ;;  %v1658_v6 = vsel %vm17759_vm12, %v1633_v33, %v11465_v12 }
 0x310   :  { %v1479_v46 = vpop.permute.xlu0 %1478  ;;  %v1683_v15 = vsel %vm17758_vm13, %v1658_v6, %v11496_v17 }
 0x311   :  { %v1882_v5 = vsel %vm17783_vm5, %v1857_v4, %v1479_v46  ;;  %v7501_v34 = vpop.f32.mrf.mxu0  ;;  %v1708_v46 = vsel %vm1687_vm14, %v1683_v15, %v11511_v37  ;;  %v18397_v37 = vld [vmem:[#allocation148_spill] sm:$0xff] }
 0x312   :  { %v2085_v3 = vadd.f32 %v7501_v34, %v11027_v31  ;;  %7515 = vmatmul.mubr.msk.f32.gmra.mxu0 %vm18383_vm7, %v1882_v5  ;;  %v1733_v5 = vsel %vm17787_vm15, %v1708_v46, %v11521_v43  ;;  %v18394_v34 = vld [vmem:[#allocation76_spill] sm:$0xff]  ;;  %vm18395_vm7 = vcmask 244736  }
 0x313   :  { %v11667_v55 = vpop.permute.xlu1 %773  ;;  %v2079_v60 = vpop.f32.mrf.mxu0  ;;  %v1534_v32 = vsel %vm18387_vm6, %v10928_v14, %v18394_v34  ;;  %v1758_v12 = vsel %vm18395_vm7, %v1733_v5, %v11542_v21  ;;  %v18400_v21 = vld [vmem:[#allocation189_spill] sm:$0xff]  ;;  %vm18402_vm6 = vmmov %vm18395_vm7  ;;  %vm18403_vm7 = vcmask 1042432  }
 0x314   :  { %v2167_v48 = vmax.f32 %v2085_v3, 0.0  ;;  %v2080_v30 = vadd.f32 %v11027_v31, %v2079_v60  ;;  %v1333_v28 = vpop.permute.xlu0 %1332  ;;  %v18396_v3 = vld [vmem:[#allocation116_spill] sm:$0xff]  ;;  %v1783_v57 = vsel %vm17786_vm3, %v1758_v12, %v1185_v62 }
 0x315   :  { %v1559_v17 = vsel %vm17791_vm8, %v1534_v32, %v18396_v3 }
 0x316   :  { %2192 = vst.msk [vmem:[#allocation2 + $0x48] sm:$0xff] %vm18392_vm4, %v2167_v48  ;;  %v2166_v10 = vmax.f32 %v2080_v30, 0.0  ;;  %v1584_v60 = vsel %vm17790_vm9, %v1559_v17, %v18397_v37  ;;  %vm18398_vm4 = vcmask 293888  }
 0x317   :  { %v1407_v20 = vpop.permute.xlu1 %1406  ;;  %v1808_v43 = vsel %vm18398_vm4, %v1783_v57, %v1259_v16  ;;  %v1609_v14 = vsel %vm17789_vm10, %v1584_v60, %v18399_v42  ;;  %vm18404_vm4 = vcmask 1046528  }
 0x318   :  { %2191 = vst.msk [vmem:[#allocation2 + $0x40] sm:$0xff] %vm18393_vm2, %v2166_v10  ;;  %v1335_v4 = vpop.permute.xlu0 %1334  ;;  %v1833_v19 = vsel %vm17785_vm1, %v1808_v43, %v1333_v28  ;;  %v1634_v48 = vsel %vm17788_vm11, %v1609_v14, %v18400_v21  ;;  %vm18401_vm2 = vcmask 392192  }
 0x319   :  { %v1858_v11 = vsel %vm17784_vm0, %v1833_v19, %v1407_v20  ;;  %v1659_v40 = vsel %vm17759_vm12, %v1634_v48, %v11499_v13 }
 0x31a   :  { %v1684_v6 = vsel %vm17758_vm13, %v1659_v40, %v11515_v58  ;;  %v18412_v40 = vld [vmem:[#allocation81_spill] sm:$0xff] }
 0x31b   :  { %v11691_v23 = vpop.permute.xlu1 %893  ;;  %v1709_v28 = vsel %vm1687_vm14, %v1684_v6, %v11523_v8 }
 0x31c   :  { %v11696_v18 = vpop.permute.xlu0 %775  ;;  %v1734_v13 = vsel %vm17787_vm15, %v1709_v28, %v11549_v54 }
 0x31d   :  { %v1759_v34 = vsel %vm18402_vm6, %v1734_v13, %v11631_v22  ;;  %vm18406_vm6 = vcmask 1045504   ;;  %v18415_v13 = vld [vmem:[#allocation119_spill] sm:$0xff] }
 0x31e   :  { %v1784_v54 = vsel %vm17786_vm3, %v1759_v34, %v1187_v52 }
 0x31f   :  { %v2216_v30 = vld [vmem:[#allocation2 + $0x40] ss:$2 sm:$0xff]  ;;  %v2240_v2 = vld [vmem:[#allocation2 + $0x41] ss:$2 sm:$0xff]  ;;  %v1481_v62 = vpop.permute.xlu1 %1480 }
 0x320   :  { %v11709_v33 = vmax.f32 %v2216_v30, %v2240_v2  ;;  %v1883_v16 = vsel %vm17783_vm5, %v1858_v11, %v1481_v62  ;;  %v1409_v10 = vpop.permute.xlu0 %1408  ;;  %v18410_v11 = vld [vmem:[#allocation79_spill] sm:$0xff] }
 0x321   :  { %7517 = vmatprep.mubr.msk.f32.mxu0 %vm18401_vm2, %v1883_v16  ;;  %vm18405_vm2 = vcmask 293888  }
 0x322   :  { %v2483_v15 = vrot.slane %v11709_v33, 5  ;;  %v2284_v20 = vrot.slane %v11709_v33, 1  ;;  %v2333_v46 = vrot.slane %v11709_v33, 2  ;;  %v1809_v3 = vsel %vm18405_vm2, %v1784_v54, %v1261_v27  ;;  %v18416_v54 = vld [vmem:[#allocation150_spill] sm:$0xff] }
 0x323   :  { %v967_v5 = vpop.permute.xlu1 %966  ;;  %v1834_v17 = vsel %vm17785_vm1, %v1809_v3, %v1335_v4  ;;  %v2432_v4 = vrot.slane %v11709_v33, 4  ;;  %vm18409_vm2 = vcmask 1043456   ;;  %v18417_v3 = vld [vmem:[#allocation151_spill] sm:$0xff] }
 0x324   :  { %v896_v32 = vpop.permute.xlu0 %895  ;;  %v11729_v58 = vsel %vm18403_vm7, %v2481_v24, %v2483_v15  ;;  %v11736_v8 = vsel %vm18404_vm4, %v2282_v56, %v2284_v20  ;;  %v11749_v24 = vsel %vm18406_vm6, %v2331_v49, %v2333_v46  ;;  %v2382_v56 = vrot.slane %v11709_v33, 3 }
 0x325   :  { %v7783_v22 = vpack.i.bf16 %v11729_v58, %v11556_v25  ;;  %v7738_v12 = vpack.i.bf16 %v11736_v8, %v11563_v0  ;;  %v1859_v57 = vsel %vm17784_vm0, %v1834_v17, %v1409_v10  ;;  %v7748_v60 = vpack.i.bf16 %v11749_v24, %v11570_v41  ;;  %v18414_v10 = vld [vmem:[#allocation118_spill] sm:$0xff]  ;;  %v18418_v17 = vld [vmem:[#allocation169_spill] sm:$0xff] }
 0x326   :  { %vm18407_vm7 = vcmask 392192   ;;  %vm18408_vm4 = vcmask 1044480   ;;  %v11776_v19 = vsel %vm18409_vm2, %v2430_v36, %v2432_v4  ;;  %vm18411_vm6 = vcmask 23552   ;;  %v8608_v36 = vld [vmem:[%s17641_s0 + $0xb0] sm:$0xff] }
 0x327   :  { %v969_v52 = vpop.permute.xlu1 %968  ;;  %7784 = vrot.lane.b32.xlu1 %v7783_v22, %s17814_s14  ;;  %7739 = vrot.lane.b32.xlu0 %v7738_v12, %s17831_s30  ;;  %v11765_v49 = vsel %vm18408_vm4, %v2380_v35, %v2382_v56  ;;  %v7768_v48 = vpack.i.bf16 %v11776_v19, %v11586_v47  ;;  %v1536_v62 = vsel %vm18411_vm6, %v11158_v51, %v18410_v11  ;;  %vm18422_vm4 = vcmask 64512  }
 0x328   :  { %v1483_v37 = vpop.permute.xlu0 %1482  ;;  %v7758_v14 = vpack.i.bf16 %v11765_v49, %v11579_v29  ;;  %v1561_v6 = vsel %vm17791_vm8, %v1536_v62, %v18414_v10  ;;  %v18421_v62 = vld [vmem:[#allocation192_spill] sm:$0xff]  ;;  %vm18423_vm2 = vcmask 244736  }
 0x329   :  { %v1884_v27 = vsel %vm17783_vm5, %v1859_v57, %v1483_v37  ;;  %v1586_v22 = vsel %vm17790_vm9, %v1561_v6, %v18416_v54 }
 0x32a   :  { %7518 = vmatmul.mubr.msk.f32.gmra.mxu0 %vm18407_vm7, %v1884_v27  ;;  %vm18413_vm7 = vmmov %vm18411_vm6  ;;  %v1611_v57 = vsel %vm17789_vm10, %v1586_v22, %v18418_v17  ;;  %v18419_v27 = vld [vmem:[#allocation171_spill] sm:$0xff] }
 0x32b   :  { %v1043_v43 = vpop.permute.xlu1 %1042  ;;  %7749 = vrot.lane.b32.xlu0 %v7748_v60, %s17829_s29  ;;  %v1535_v16 = vsel %vm18413_vm7, %v8608_v36, %v18412_v40  ;;  %vm18424_vm6 = vmmov %vm18423_vm2 }
 0x32c   :  { %v1041_v42 = vpop.permute.xlu0 %1040  ;;  %v1560_v34 = vsel %vm17791_vm8, %v1535_v16, %v18415_v13  ;;  %vm18425_vm7 = vmmov %vm18422_vm4  ;;  %vm18505_vm8 = vcmask 1040384  }
 0x32d   :  { %v1585_v51 = vsel %vm17790_vm9, %v1560_v34, %v18417_v3  ;;  %vm18504_vm9 = vcmask 1043456  }
 0x32e   :  { %v1610_v60 = vsel %vm17789_vm10, %v1585_v51, %v18419_v27  ;;  %vm17867_vm10 = vcmask 916480  }
 0x32f   :  { %v1117_v21 = vpop.permute.xlu1 %1116  ;;  %7759 = vrot.lane.b32.xlu0 %v7758_v14, %s8643_s24  ;;  %v18420_v14 = vld [vmem:[#allocation191_spill] sm:$0xff]  ;;  %v1635_v36 = vsel %vm17788_vm11, %v1610_v60, %v18421_v62 }
 0x330   :  { %v1115_v35 = vpop.permute.xlu0 %1114  ;;  %v1660_v6 = vsel %vm17759_vm12, %v1635_v36, %v11667_v55 }
 0x331   :  { %v1685_v3 = vsel %vm17758_vm13, %v1660_v6, %v11691_v23 }
 0x332   :  { %v1710_v17 = vsel %vm1687_vm14, %v1685_v3, %v967_v5 }
 0x333   :  { %v1191_v30 = vpop.permute.xlu1 %1190  ;;  %7769 = vrot.lane.b32.xlu0 %v7768_v48, %s17816_s10  ;;  %v1636_v48 = vsel %vm17788_vm11, %v1611_v57, %v18420_v14  ;;  %v1735_v55 = vsel %vm17787_vm15, %v1710_v17, %v1041_v42  ;;  %v18436_v17 = vrot.slane %v11532_v59, 6  ;;  %vm18498_vm11 = vcmask 1044480  }
 0x334   :  { %v1189_v2 = vpop.permute.xlu0 %1188  ;;  %v1661_v40 = vsel %vm17759_vm12, %v1636_v48, %v11696_v18 }
 0x335   :  { %v1686_v13 = vsel %vm17758_vm13, %v1661_v40, %v896_v32  ;;  %vm18426_vm13 = vcmask 293888  }
 0x336   :  { %v1711_v51 = vsel %vm1687_vm14, %v1686_v13, %v969_v52  ;;  %vm18427_vm12 = vmmov %vm18426_vm13 }
 0x337   :  { %v1265_v28 = vpop.permute.xlu1 %1264  ;;  %v1736_v18 = vsel %vm17787_vm15, %v1711_v51, %v1043_v43  ;;  %vm17868_vm15 = vcmask 850944  }
 0x338   :  { %v1263_v12 = vpop.permute.xlu0 %1262  ;;  %v1761_v32 = vsel %vm18423_vm2, %v1736_v18, %v1117_v21  ;;  %vm18431_vm2 = vcmask 1046528  }
 0x339   :  { %v7504_v37 = vpop.f32.mrf.mxu0  ;;  %v1786_v27 = vsel %vm17786_vm3, %v1761_v32, %v1191_v30 }
 0x33a   :  { %v2095_v11 = vadd.f32 %v7504_v37, %v11027_v31  ;;  %v1811_v5 = vsel %vm18426_vm13, %v1786_v27, %v1265_v28 }
 0x33b   :  { %v1339_v16 = vpop.permute.xlu1 %1338  ;;  %v2089_v10 = vpop.f32.mrf.mxu0 }
 0x33c   :  { %v2169_v34 = vmax.f32 %v2095_v11, 0.0  ;;  %v2090_v54 = vadd.f32 %v11027_v31, %v2089_v10  ;;  %v1337_v22 = vpop.permute.xlu0 %1336  ;;  %v1760_v31 = vsel %vm18424_vm6, %v1735_v55, %v1115_v35  ;;  %v1836_v60 = vsel %vm17785_vm1, %v1811_v5, %v1339_v16 }
 0x33d   :  { %v1785_v52 = vsel %vm17786_vm3, %v1760_v31, %v1189_v2  ;;  %vm18432_vm6 = vcmask 1044480   ;;  %vm18496_vm3 = vcmask 1046528  }
 0x33e   :  { %2194 = vst.msk [vmem:[#allocation2 + $0x58] sm:$0xff] %vm18422_vm4, %v2169_v34  ;;  %v2168_v57 = vmax.f32 %v2090_v54, 0.0  ;;  %v1810_v43 = vsel %vm18427_vm12, %v1785_v52, %v1263_v12  ;;  %vm18428_vm4 = vcmask 392192   ;;  %vm18430_vm12 = vcmask 1045504  }
 0x33f   :  { %v1413_v37 = vpop.permute.xlu1 %1412  ;;  %v1835_v42 = vsel %vm17785_vm1, %v1810_v43, %v1337_v22  ;;  %vm18429_vm13 = vmmov %vm18428_vm4  ;;  %v2534_v54 = vrot.slane %v11709_v33, 6  ;;  %vm17869_vm1 = vcmask 785408  }
 0x340   :  { %2193 = vst.msk [vmem:[#allocation2 + $0x50] sm:$0xff] %vm18425_vm7, %v2168_v57  ;;  %v1411_v23 = vpop.permute.xlu0 %1410  ;;  %v1861_v21 = vsel %vm17784_vm0, %v1836_v60, %v1413_v37  ;;  %vm18433_vm7 = vcmask 1042432   ;;  %v11896_v37 = vld [vmem:[%s17643_s2] ss:$0 sm:$0xff] }
 0x341   :  { %v1860_v35 = vsel %vm17784_vm0, %v1835_v42, %v1411_v23 }
 0x343   :  { %v1487_v14 = vpop.permute.xlu1 %1486 }
 0x344   :  { %v1886_v30 = vsel %vm17783_vm5, %v1861_v21, %v1487_v14  ;;  %v1485_v48 = vpop.permute.xlu0 %1484 }
 0x345   :  { %v1885_v11 = vsel %vm17783_vm5, %v1860_v35, %v1485_v48  ;;  %vm18493_vm5 = vcmask 392192  }
 0x346   :  { %7520 = vmatprep.mubr.msk.f32.mxu0 %vm18428_vm4, %v1885_v11  ;;  %vm18434_vm4 = vcmask 1043456   ;;  %vm18494_vm0 = vmmov %vm18493_vm5 }
 0x347   :  { %v2218_v2 = vld [vmem:[#allocation2 + $0x50] ss:$2 sm:$0xff]  ;;  %v2242_v28 = vld [vmem:[#allocation2 + $0x51] ss:$2 sm:$0xff]  ;;  %7521 = vmatmul.mubr.msk.f32.gmra.mxu0 %vm18429_vm13, %v1886_v30  ;;  %vm18435_vm13 = vcmask 1041408  }
 0x348   :  { %v11835_v12 = vmax.f32 %v2218_v2, %v2242_v28  ;;  %v2585_v2 = vrot.slane %v11709_v33, 7  ;;  %v18442_v28 = vrot.slane %v11532_v59, 7 }
 0x34a   :  { %v2335_v62 = vrot.slane %v11835_v12, 2  ;;  %v2286_v36 = vrot.slane %v11835_v12, 1  ;;  %v2384_v40 = vrot.slane %v11835_v12, 3  ;;  %v2434_v16 = vrot.slane %v11835_v12, 4 }
 0x34b   :  { %v2485_v10 = vrot.slane %v11835_v12, 5  ;;  %v2536_v6 = vrot.slane %v11835_v12, 6 }
 0x34c   :  { %v11846_v13 = vsel %vm18430_vm12, %v2333_v46, %v2335_v62  ;;  %v11851_v34 = vsel %vm18431_vm2, %v2284_v20, %v2286_v36  ;;  %v11857_v22 = vsel %vm18432_vm6, %v2382_v56, %v2384_v40  ;;  %v11869_v46 = vsel %vm18434_vm4, %v2432_v4, %v2434_v16  ;;  %vm18437_vm12 = vmmov %vm18435_vm13 }
 0x34d   :  { %v11864_v3 = vsel %vm18433_vm7, %v2483_v15, %v2485_v10  ;;  %v11874_v20 = vsel %vm18435_vm13, %v2534_v54, %v2536_v6  ;;  %v7848_v51 = vpack.i.bf16 %v11851_v34, %v11736_v8  ;;  %v7868_v15 = vpack.i.bf16 %v11846_v13, %v11749_v24 }
 0x34e   :  { %v7923_v56 = vpack.i.bf16 %v11864_v3, %v11729_v58  ;;  %v11885_v18 = vsel %vm18437_vm12, %v18436_v17, %v2534_v54  ;;  %v7888_v4 = vpack.i.bf16 %v11857_v22, %v11765_v49  ;;  %v7908_v57 = vpack.i.bf16 %v11869_v46, %v11776_v19  ;;  %v3061_v17 = vld [vmem:[%s17644_s3 + $0x78] sm:$0xff] }
 0x34f   :  { %v7938_v55 = vpack.i.bf16 %v11874_v20, %v11885_v18  ;;  %vm18438_vm2 = vcmask 64512   ;;  %vm18440_vm7 = vcmask 1045504   ;;  %vm18441_vm4 = vcmask 1046528   ;;  %7523 = vmatprep.subr.mxu1 %v3061_v17 }
 0x350   :  { %vm18439_vm6 = vmmov %vm18438_vm2  ;;  %vm18443_vm13 = vcmask 1040384   ;;  %7524 = vmatpush3.msra.mxu1 %v3061_v17  ;;  %vm18446_vm12 = vcmask 1043456  }
 0x361   :  { %v7507_v32 = vpop.f32.mrf.mxu0 }
 0x362   :  { %v2105_v31 = vadd.f32 %v11896_v37, %v7507_v32  ;;  %v18444_v32 = vpack.i.bf16 %v11570_v41, %v11407_v50 }
 0x363   :  { %v2099_v27 = vpop.f32.mrf.mxu0 }
 0x364   :  { %v2171_v23 = vmax.f32 %v2105_v31, 0.0  ;;  %v2100_v52 = vadd.f32 %v11896_v37, %v2099_v27  ;;  %v18445_v31 = vpack.i.bf16 %v11563_v0, %v11413_v63  ;;  %v3060_v27 = vld [vmem:[%s17644_s3 + $0x70] sm:$0xff]  ;;  %v3059_v0 = vld [vmem:[%s17644_s3 + $0x68] sm:$0xff] }
 0x365   :  { %7525 = vmatprep.subr.mxu1 %v3060_v27 }
 0x366   :  { %2196 = vst.msk [vmem:[#allocation2 + $0x68] sm:$0xff] %vm18438_vm2, %v2171_v23  ;;  %v2170_v5 = vmax.f32 %v2100_v52, 0.0  ;;  %v7798_v52 = vpack.i.bf16 %v11885_v18, %v11604_v1  ;;  %vm18447_vm2 = vcmask 1044480   ;;  %7526 = vmatpush3.msra.mxu1 %v3060_v27  ;;  %v3056_v27 = vld [vmem:[%s17644_s3 + $0x50] sm:$0xff] }
 0x367   :  { %7527 = vmatprep.subr.mxu1 %v3059_v0 }
 0x368   :  { %2195 = vst.msk [vmem:[#allocation2 + $0x60] sm:$0xff] %vm18439_vm6, %v2170_v5  ;;  %7528 = vmatpush3.msra.mxu1 %v3059_v0  ;;  %v7828_v0 = vpack.i.bf16 %v11709_v33, %v11532_v59 }
 0x36f   :  { %v2220_v43 = vld [vmem:[#allocation2 + $0x60] ss:$2 sm:$0xff]  ;;  %v2244_v60 = vld [vmem:[#allocation2 + $0x61] ss:$2 sm:$0xff] }
 0x370   :  { %v11902_v42 = vmax.f32 %v2220_v43, %v2244_v60 }
 0x372   :  { %v2337_v21 = vrot.slane %v11902_v42, 2  ;;  %v2288_v14 = vrot.slane %v11902_v42, 1  ;;  %v2386_v54 = vrot.slane %v11902_v42, 3  ;;  %v2487_v60 = vrot.slane %v11902_v42, 5 }
 0x374   :  { %v11909_v35 = vsel %vm18440_vm7, %v2335_v62, %v2337_v21  ;;  %v11914_v30 = vsel %vm18441_vm4, %v2286_v36, %v2288_v14  ;;  %v11928_v62 = vsel %vm18443_vm13, %v18442_v28, %v2585_v2  ;;  %v2436_v36 = vrot.slane %v11902_v42, 4  ;;  %vm18451_vm4 = vmmov %vm18439_vm6 }
 0x375   :  { %v7793_v48 = vpack.i.bf16 %v11909_v35, %v11846_v13  ;;  %v7778_v11 = vpack.i.bf16 %v11914_v30, %v11851_v34  ;;  %v7813_v23 = vpack.i.bf16 %v11928_v62, %v11597_v26  ;;  %v11958_v63 = vsel %vm18447_vm2, %v2384_v40, %v2386_v54  ;;  %v3058_v40 = vld [vmem:[%s17644_s3 + $0x60] sm:$0xff]  ;;  %v12201_v34 = vpop.permute.xlu1 %7724 }
 0x376   :  { %v11953_v50 = vsel %vm18446_vm12, %v2434_v16, %v2436_v36  ;;  %v7808_v5 = vpack.i.bf16 %v11958_v63, %v11857_v22  ;;  %7529 = vmatprep.subr.mxu1 %v3058_v40  ;;  %vm18448_vm7 = vcmask 1042432   ;;  %vm18452_vm13 = vcmask 1041408  }
 0x377   :  { %7794 = vrot.lane.b32.xlu1 %v7793_v48, %s17829_s29  ;;  %7779 = vrot.lane.b32.xlu0 %v7778_v11, %s17831_s30  ;;  %v7823_v16 = vpack.i.bf16 %v11953_v50, %v11869_v46  ;;  %v3057_v11 = vld [vmem:[%s17644_s3 + $0x58] sm:$0xff]  ;;  %vm18454_vm12 = vcmask 1046528   ;;  %vm18455_vm2 = vcmask 1045504  }
 0x378   :  { %7530 = vmatpush3.msra.mxu1 %v3058_v40  ;;  %v18453_v40 = vpack.i.bf16 %v11556_v25, %v11454_v39 }
 0x379   :  { %7531 = vmatprep.subr.mxu1 %v3057_v11 }
 0x37a   :  { %7532 = vmatpush3.msra.mxu1 %v3057_v11  ;;  %v3051_v11 = vld [vmem:[%s17644_s3 + $0x28] sm:$0xff] }
 0x37b   :  { %7804 = vrot.lane.b32.xlu1 %v18444_v32, %s17806_s11  ;;  %7789 = vrot.lane.b32.xlu0 %v18445_v31, %s17804_s27  ;;  %v11986_v31 = vsel %vm18448_vm7, %v2485_v10, %v2487_v60  ;;  %vm18457_vm7 = vcmask 1044480  }
 0x37c   :  { %v7843_v10 = vpack.i.bf16 %v11986_v31, %v11864_v3  ;;  %7533 = vmatprep.subr.mxu1 %v3056_v27 }
 0x37d   :  { %7534 = vmatpush3.msra.mxu1 %v3056_v27 }
 0x37f   :  { %7814 = vrot.lane.b32.xlu1 %v7813_v23, %s17810_s28  ;;  %7799 = vrot.lane.b32.xlu0 %v7798_v52, %s17812_s16  ;;  %v18449_v23 = vpack.i.bf16 %v11586_v47, %v11426_v53  ;;  %v18450_v52 = vpack.i.bf16 %v11579_v29, %v11431_v9  ;;  %v3055_v53 = vld [vmem:[%s17644_s3 + $0x48] sm:$0xff]  ;;  %v2538_v47 = vrot.slane %v11902_v42, 6  ;;  %v3054_v9 = vld [vmem:[%s17644_s3 + $0x40] sm:$0xff] }
 0x380   :  { %7535 = vmatprep.subr.mxu1 %v3055_v53  ;;  %v3053_v29 = vld [vmem:[%s17644_s3 + $0x38] sm:$0xff] }
 0x381   :  { %v7510_v41 = vpop.f32.mrf.mxu0  ;;  %7536 = vmatpush3.msra.mxu1 %v3055_v53 }
 0x382   :  { %v2115_v43 = vadd.f32 %v11896_v37, %v7510_v41  ;;  %v12019_v41 = vsel %vm18452_vm13, %v2536_v6, %v2538_v47  ;;  %7537 = vmatprep.subr.mxu1 %v3054_v9 }
 0x383   :  { %7824 = vrot.lane.b32.xlu1 %v7823_v16, %s17816_s10  ;;  %7809 = vrot.lane.b32.xlu0 %v7808_v5, %s8643_s24  ;;  %v2109_v48 = vpop.f32.mrf.mxu0  ;;  %v7863_v6 = vpack.i.bf16 %v12019_v41, %v11874_v20 }
 0x384   :  { %v2173_v28 = vmax.f32 %v2115_v43, 0.0  ;;  %v2110_v17 = vadd.f32 %v11896_v37, %v2109_v48  ;;  %7538 = vmatpush3.msra.mxu1 %v3054_v9  ;;  %v3052_v43 = vld [vmem:[%s17644_s3 + $0x30] sm:$0xff] }
 0x385   :  { %7539 = vmatprep.subr.mxu1 %v3053_v29 }
 0x386   :  { %2198 = vst.msk [vmem:[#allocation2 + $0x78] sm:$0xff] %vm18439_vm6, %v2173_v28  ;;  %v2172_v32 = vmax.f32 %v2110_v17, 0.0  ;;  %7540 = vmatpush3.msra.mxu1 %v3053_v29  ;;  %v2589_v28 = vrot.slane %v11902_v42, 7  ;;  %vm18456_vm6 = vcmask 1040384  }
 0x387   :  { %7834 = vrot.lane.b32.xlu1 %v18449_v23, %s17802_s25  ;;  %7819 = vrot.lane.b32.xlu0 %v18450_v52, %s17797_s26  ;;  %v3050_v52 = vld [vmem:[%s17644_s3 + $0x20] sm:$0xff]  ;;  %vm18459_vm13 = vmmov %vm18456_vm6 }
 0x388   :  { %2197 = vst.msk [vmem:[#allocation2 + $0x70] sm:$0xff] %vm18451_vm4, %v2172_v32  ;;  %7541 = vmatprep.subr.mxu1 %v3052_v43  ;;  %vm18458_vm4 = vcmask 1043456  }
 0x389   :  { %7542 = vmatpush3.msra.mxu1 %v3052_v43 }
 0x38a   :  { %7543 = vmatprep.subr.mxu1 %v3051_v11 }
 0x38b   :  { %7844 = vrot.lane.b32.xlu1 %v7843_v10, %s17814_s14  ;;  %7829 = vrot.lane.b32.xlu0 %v7828_v0, %s17808_s15  ;;  %v2587_v10 = vrot.slane %v11835_v12, 7 }
 0x38c   :  { %7544 = vmatpush3.msra.mxu1 %v3051_v11 }
 0x38d   :  { %7545 = vmatprep.subr.mxu1 %v3050_v52 }
 0x38e   :  { %7546 = vmatpush3.msra.mxu1 %v3050_v52 }
 0x38f   :  { %v2222_v16 = vld [vmem:[#allocation2 + $0x70] ss:$2 sm:$0xff]  ;;  %v2246_v5 = vld [vmem:[#allocation2 + $0x71] ss:$2 sm:$0xff]  ;;  %7854 = vrot.lane.b32.xlu1 %v18453_v40, %s17795_s12  ;;  %v12088_v40 = vsel %vm18459_vm13, %v2587_v10, %v2589_v28 }
 0x390   :  { %v12028_v48 = vmax.f32 %v2222_v16, %v2246_v5  ;;  %v3049_v5 = vld [vmem:[%s17644_s3 + $0x18] sm:$0xff] }
 0x391   :  { %7547 = vmatprep.subr.mxu1 %v3049_v5 }
 0x392   :  { %v2290_v39 = vrot.slane %v12028_v48, 1  ;;  %v2339_v25 = vrot.slane %v12028_v48, 2  ;;  %v2591_v17 = vrot.slane %v12028_v48, 7  ;;  %v2388_v32 = vrot.slane %v12028_v48, 3  ;;  %7548 = vmatpush3.msra.mxu1 %v3049_v5 }
 0x393   :  { %7864 = vrot.lane.b32.xlu1 %v7863_v6, %s17812_s16  ;;  %v2438_v27 = vrot.slane %v12028_v48, 4  ;;  %v2540_v23 = vrot.slane %v12028_v48, 6  ;;  %v18461_v6 = vpack.i.bf16 %v11604_v1, %v11478_v45  ;;  %v3047_v45 = vld [vmem:[%s17644_s3 + $0x8] sm:$0xff]  ;;  %v3046_v1 = vld [vmem:[%s17644_s3] sm:$0xff] }
 0x394   :  { %v12052_v0 = vsel %vm18454_vm12, %v2288_v14, %v2290_v39  ;;  %v12059_v53 = vsel %vm18455_vm2, %v2337_v21, %v2339_v25  ;;  %v12064_v9 = vsel %vm18456_vm6, %v2589_v28, %v2591_v17  ;;  %v12073_v14 = vsel %vm18457_vm7, %v2386_v54, %v2388_v32  ;;  %v3048_v28 = vld [vmem:[%s17644_s3 + $0x10] sm:$0xff]  ;;  %vm18462_vm2 = vmmov %vm18456_vm6 }
 0x395   :  { %v7933_v29 = vpack.i.bf16 %v12059_v53, %v11909_v35  ;;  %v12080_v21 = vsel %vm18458_vm4, %v2436_v36, %v2438_v27  ;;  %v7918_v16 = vpack.i.bf16 %v12052_v0, %v11914_v30  ;;  %vm18460_vm12 = vcmask 1041408   ;;  %7549 = vmatprep.subr.mxu1 %v3048_v28  ;;  %v12214_v35 = vpop.permute.xlu1 %7734 }
 0x396   :  { %v12093_v54 = vsel %vm18460_vm12, %v2538_v47, %v2540_v23  ;;  %v2588_v43 = vsel %vm18462_vm2, %v2585_v2, %v2587_v10  ;;  %7550 = vmatpush3.msra.mxu1 %v3048_v28  ;;  %v18463_v2 = vpack.i.bf16 %v11597_v26, %v11494_v61  ;;  %v7903_v10 = vpack.i.bf16 %v11902_v42, %v11835_v12 }
 0x397   :  { %7874 = vrot.lane.b32.xlu1 %v18461_v6, %s17800_s20  ;;  %v7998_v11 = vpack.i.bf16 %v12093_v54, %v12019_v41  ;;  %v7883_v36 = vpack.i.bf16 %v12088_v40, %v2588_v43  ;;  %7551 = vmatprep.subr.mxu1 %v3047_v45  ;;  %vm18464_vm6 = vcmask 64512   ;;  %vm18466_vm4 = vcmask 1042432  }
 0x398   :  { %7552 = vmatpush3.msra.mxu1 %v3047_v45  ;;  %vm18465_vm7 = vmmov %vm18464_vm6  ;;  %vm18468_vm12 = vcmask 1046528   ;;  %vm18469_vm2 = vcmask 1045504   ;;  %v7953_v3 = vpack.i.bf16 %v2588_v43, %v11928_v62 }
 0x399   :  { %7553 = vmatprep.subr.mxu1 %v3046_v1  ;;  %vm18467_vm13 = vmmov %vm18466_vm4  ;;  %v12234_v62 = vpop.permute.xlu1 %7744 }
 0x39a   :  { %7554 = vmatpush3.msra.mxu1 %v3046_v1 }
 0x39b   :  { %7884 = vrot.lane.b32.xlu1 %v7883_v36, %s17810_s28 }
 0x39f   :  { %7894 = vrot.lane.b32.xlu1 %v18463_v2, %s17793_s13  ;;  %v2489_v2 = vrot.slane %v12028_v48, 5 }
 0x3a1   :  { %v7513_v52 = vpop.f32.mrf.mxu0 }
 0x3a2   :  { %v2125_v5 = vadd.f32 %v11896_v37, %v7513_v52 }
 0x3a3   :  { %7904 = vrot.lane.b32.xlu1 %v7903_v10, %s17808_s15  ;;  %v2119_v36 = vpop.f32.mrf.mxu0  ;;  %v12140_v10 = vsel %vm18466_vm4, %v2487_v60, %v2489_v2  ;;  %vm18472_vm4 = vcmask 1043456  }
 0x3a4   :  { %v2175_v6 = vmax.f32 %v2125_v5, 0.0  ;;  %v2120_v28 = vadd.f32 %v11896_v37, %v2119_v36 }
 0x3a6   :  { %2200 = vst.msk [vmem:[#allocation2 + $0x88] sm:$0xff] %vm18464_vm6, %v2175_v6  ;;  %v2174_v45 = vmax.f32 %v2120_v28, 0.0  ;;  %vm18470_vm6 = vcmask 1040384  }
 0x3a8   :  { %2199 = vst.msk [vmem:[#allocation2 + $0x80] sm:$0xff] %vm18465_vm7, %v2174_v45  ;;  %vm18471_vm7 = vcmask 1044480  }
 0x3af   :  { %v2224_v61 = vld [vmem:[#allocation2 + $0x80] ss:$2 sm:$0xff]  ;;  %v2248_v26 = vld [vmem:[#allocation2 + $0x81] ss:$2 sm:$0xff] }
 0x3b0   :  { %v12132_v1 = vmax.f32 %v2224_v61, %v2248_v26 }
 0x3b2   :  { %v2491_v47 = vrot.slane %v12132_v1, 5  ;;  %v2292_v52 = vrot.slane %v12132_v1, 1  ;;  %v2341_v60 = vrot.slane %v12132_v1, 2  ;;  %v2390_v26 = vrot.slane %v12132_v1, 3 }
 0x3b4   :  { %v12145_v5 = vsel %vm18467_vm13, %v2489_v2, %v2491_v47  ;;  %v12152_v36 = vsel %vm18468_vm12, %v2290_v39, %v2292_v52  ;;  %v12166_v45 = vsel %vm18469_vm2, %v2339_v25, %v2341_v60  ;;  %v2593_v39 = vrot.slane %v12132_v1, 7 }
 0x3b5   :  { %v7913_v6 = vpack.i.bf16 %v12145_v5, %v12140_v10  ;;  %v7838_v28 = vpack.i.bf16 %v12152_v36, %v12052_v0  ;;  %v7858_v61 = vpack.i.bf16 %v12166_v45, %v12059_v53  ;;  %v12199_v8 = vsel %vm18471_vm7, %v2388_v32, %v2390_v26 }
 0x3b6   :  { %v12184_v25 = vsel %vm18470_vm6, %v2591_v17, %v2593_v39  ;;  %v7963_v17 = vpack.i.bf16 %v12132_v1, %v12028_v48  ;;  %vm18473_vm13 = vcmask 1041408   ;;  %vm18474_vm12 = vcmask 64512  }
 0x3b7   :  { %7914 = vrot.lane.b32.xlu1 %v7913_v6, %s17814_s14  ;;  %7839 = vrot.lane.b32.xlu0 %v7838_v28, %s17831_s30  ;;  %v7943_v58 = vpack.i.bf16 %v12184_v25, %v12064_v9  ;;  %vm18475_vm2 = vmmov %vm18474_vm12  ;;  %vm18477_vm6 = vcmask 1045504   ;;  %vm18478_vm7 = vcmask 1046528  }
 0x3bb   :  { %7924 = vrot.lane.b32.xlu1 %v7923_v56, %s17795_s12  ;;  %7849 = vrot.lane.b32.xlu0 %v7848_v51, %s17804_s27  ;;  %v7878_v56 = vpack.i.bf16 %v12199_v8, %v12073_v14  ;;  %v2440_v51 = vrot.slane %v12132_v1, 4 }
 0x3bd   :  { %v12223_v24 = vsel %vm18472_vm4, %v2438_v27, %v2440_v51  ;;  %v2542_v27 = vrot.slane %v12132_v1, 6  ;;  %vm18479_vm4 = vcmask 1042432  }
 0x3be   :  { %v7898_v13 = vpack.i.bf16 %v12223_v24, %v12080_v21 }
 0x3bf   :  { %7934 = vrot.lane.b32.xlu1 %v7933_v29, %s17806_s11  ;;  %7859 = vrot.lane.b32.xlu0 %v7858_v61, %s17829_s29  ;;  %v12253_v2 = vsel %vm18473_vm13, %v2540_v23, %v2542_v27  ;;  %v18476_v61 = vpack.i.bf16 %v12073_v14, %v11958_v63  ;;  %vm18480_vm13 = vcmask 1040384  }
 0x3c0   :  { %v7928_v46 = vpack.i.bf16 %v12253_v2, %v12093_v54 }
 0x3c3   :  { %7944 = vrot.lane.b32.xlu1 %v7943_v58, %s17810_s28  ;;  %7869 = vrot.lane.b32.xlu0 %v7868_v15, %s17806_s11  ;;  %v12232_v15 = vpop.permute.xlu0 %7719 }
 0x3c7   :  { %7954 = vrot.lane.b32.xlu1 %v7953_v3, %s17793_s13  ;;  %7879 = vrot.lane.b32.xlu0 %v7878_v56, %s8643_s24  ;;  %v12243_v22 = vpop.permute.xlu0 %7729 }
 0x3c8   :  { %v7732_v54 = vunpack.i.h.bf16 %v12243_v22 }
 0x3cb   :  { %7964 = vrot.lane.b32.xlu1 %v7963_v17, %s17808_s15  ;;  %7889 = vrot.lane.b32.xlu0 %v7888_v4, %s17797_s26  ;;  %v12245_v4 = vpop.permute.xlu1 %7754  ;;  %v12260_v19 = vpop.permute.xlu0 %7739 }
 0x3cf   :  { %7899 = vrot.lane.b32.xlu0 %v7898_v13, %s17816_s10  ;;  %v12268_v23 = vpop.permute.xlu0 %7749 }
 0x3d2   :  { %v7516_v32 = vpop.f32.mrf.mxu0 }
 0x3d3   :  { %v2135_v53 = vadd.f32 %v11896_v37, %v7516_v32  ;;  %7909 = vrot.lane.b32.xlu0 %v7908_v57, %s17802_s25  ;;  %v12265_v57 = vpop.permute.xlu1 %7764  ;;  %v12292_v56 = vpop.permute.xlu0 %7759 }
 0x3d4   :  { %v2129_v49 = vpop.f32.mrf.mxu0 }
 0x3d5   :  { %v2177_v29 = vmax.f32 %v2135_v53, 0.0  ;;  %v2130_v43 = vadd.f32 %v11896_v37, %v2129_v49 }
 0x3d7   :  { %2202 = vst.msk [vmem:[#allocation2 + $0x98] sm:$0xff] %vm18474_vm12, %v2177_v29  ;;  %v2176_v6 = vmax.f32 %v2130_v43, 0.0  ;;  %7919 = vrot.lane.b32.xlu0 %v7918_v16, %s17804_s27  ;;  %v12274_v16 = vpop.permute.xlu1 %7774  ;;  %v7983_v29 = vpack.i.bf16 %v12140_v10, %v11986_v31  ;;  %v12328_v43 = vpop.permute.xlu0 %7769  ;;  %vm18482_vm12 = vmmov %vm18475_vm2 }
 0x3d8   :  { %v7777_v53 = vunpack.i.h.bf16 %v12274_v16 }
 0x3d9   :  { %2201 = vst.msk [vmem:[#allocation2 + $0x90] sm:$0xff] %vm18475_vm2, %v2176_v6  ;;  %vm18483_vm2 = vcmask 1044480  }
 0x3db   :  { %7929 = vrot.lane.b32.xlu0 %v7928_v46, %s17812_s16 }
 0x3df   :  { %7939 = vrot.lane.b32.xlu0 %v7938_v55, %s17800_s20  ;;  %v12290_v55 = vpop.permute.xlu1 %7784 }
 0x3e0   :  { %v2226_v30 = vld [vmem:[#allocation2 + $0x90] ss:$2 sm:$0xff]  ;;  %v2250_v0 = vld [vmem:[#allocation2 + $0x91] ss:$2 sm:$0xff] }
 0x3e1   :  { %v12276_v28 = vmax.f32 %v2226_v30, %v2250_v0 }
 0x3e3   :  { %7949 = vrot.lane.b32.xlu0 %v18476_v61, %s17797_s26  ;;  %v12283_v58 = vrot.slane %v12276_v28, 2  ;;  %v12286_v3 = vrot.slane %v12276_v28, 1  ;;  %v2493_v20 = vrot.slane %v12276_v28, 5  ;;  %v2595_v18 = vrot.slane %v12276_v28, 7 }
 0x3e4   :  { %v12332_v46 = vrot.slane %v12276_v28, 3  ;;  %v2442_v41 = vrot.slane %v12276_v28, 4 }
 0x3e5   :  { %v2344_v63 = vsel %vm18477_vm6, %v2341_v60, %v12283_v58  ;;  %v2295_v14 = vsel %vm18478_vm7, %v2292_v52, %v12286_v3  ;;  %v12307_v17 = vsel %vm18479_vm4, %v2491_v47, %v2493_v20  ;;  %v12318_v52 = vsel %vm18480_vm13, %v2593_v39, %v2595_v18  ;;  %vm18484_vm6 = vmmov %vm18482_vm12 }
 0x3e6   :  { %v7973_v13 = vpack.i.bf16 %v12283_v58, %v2344_v63  ;;  %v7958_v32 = vpack.i.bf16 %v12286_v3, %v2295_v14  ;;  %v8033_v60 = vpack.i.bf16 %v12307_v17, %v12145_v5  ;;  %v18481_v39 = vpack.i.bf16 %v12080_v21, %v11953_v50  ;;  %vm18485_vm4 = vmmov %vm18484_vm6 }
 0x3e7   :  { %v7993_v31 = vpack.i.bf16 %v2344_v63, %v12166_v45  ;;  %v7978_v10 = vpack.i.bf16 %v2295_v14, %v12152_v36  ;;  %v2393_v50 = vsel %vm18483_vm2, %v2390_v26, %v12332_v46  ;;  %v7722_v14 = vunpack.i.h.bf16 %v12232_v15  ;;  %vm18486_vm13 = vmmov %vm18485_vm4 }
 0x3e8   :  { %7974 = vrot.lane.b32.xlu1 %v7973_v13, %s17829_s29  ;;  %7959 = vrot.lane.b32.xlu0 %v7958_v32, %s17831_s30  ;;  %v7988_v36 = vpack.i.bf16 %v12332_v46, %v2393_v50  ;;  %v7721_v26 = vunpack.i.l.bf16 %v12232_v15  ;;  %vm2894_vm7 = vcmask 130048   ;;  %vm18487_vm2 = vcmask 1042432   ;;  %s19525_s30 = smov 80  }
 0x3e9   :  { %v12322_v47 = vpop.permute.xlu1 %7794  ;;  %v12345_v32 = vpop.permute.xlu0 %7779 }
 0x3ea   :  { %v7519_v49 = vpop.f32.mrf.mxu0  ;;  %v2884_v15 = vsel %vm18486_vm13, %v11353_v38, %v7721_v26  ;;  %v7737_v26 = vunpack.i.h.bf16 %v12214_v35  ;;  %vm18490_vm13 = vcmask 1041408  }
 0x3eb   :  { %v2145_v6 = vadd.f32 %v11896_v37, %v7519_v49 }
 0x3ec   :  { %7984 = vrot.lane.b32.xlu1 %v7983_v29, %s17795_s12  ;;  %7969 = vrot.lane.b32.xlu0 %v18481_v39, %s17802_s25  ;;  %v2139_v30 = vpop.f32.mrf.mxu0  ;;  %v7727_v39 = vunpack.i.h.bf16 %v12201_v34 }
 0x3ed   :  { %v2179_v0 = vmax.f32 %v2145_v6, 0.0  ;;  %v2140_v61 = vadd.f32 %v11896_v37, %v2139_v30  ;;  %v12340_v13 = vpop.permute.xlu1 %7804  ;;  %v12358_v45 = vpop.permute.xlu0 %7789  ;;  %v7726_v30 = vunpack.i.l.bf16 %v12201_v34 }
 0x3ef   :  { %2204 = vst.msk [vmem:[#allocation2 + $0xa8] sm:$0xff] %vm18482_vm12, %v2179_v0  ;;  %v2178_v49 = vmax.f32 %v2140_v61, 0.0  ;;  %vm2915_vm12 = vcmask 261120   ;;  %v2895_v38 = vsel %vm2894_vm7, %v2884_v15, %v7726_v30 }
 0x3f0   :  { %7994 = vrot.lane.b32.xlu1 %v7993_v31, %s17806_s11  ;;  %7979 = vrot.lane.b32.xlu0 %v7978_v10, %s17804_s27  ;;  %v2885_v31 = vsel %vm18485_vm4, %v11342_v44, %v7722_v14  ;;  %v8008_v10 = vpack.i.bf16 %v2393_v50, %v12199_v8 }
 0x3f1   :  { %2203 = vst.msk [vmem:[#allocation2 + $0xa0] sm:$0xff] %vm18484_vm6, %v2178_v49  ;;  %v12354_v21 = vpop.permute.xlu1 %7814  ;;  %v12382_v34 = vpop.permute.xlu0 %7799  ;;  %v2896_v8 = vsel %vm2894_vm7, %v2885_v31, %v7727_v39  ;;  %vm18488_vm6 = vcmask 1043456   ;;  %v2544_v39 = vrot.slane %v12276_v28, 6 }
 0x3f2   :  { %vm18489_vm4 = vmmov %vm18488_vm6 }
 0x3f4   :  { %7989 = vrot.lane.b32.xlu0 %v7988_v36, %s8643_s24 }
 0x3f5   :  { %v12360_v63 = vpop.permute.xlu1 %7824 }
 0x3f8   :  { %v2228_v29 = vld [vmem:[#allocation2 + $0xa0] ss:$2 sm:$0xff]  ;;  %v2252_v6 = vld [vmem:[#allocation2 + $0xa1] ss:$2 sm:$0xff]  ;;  %7999 = vrot.lane.b32.xlu0 %v7998_v11, %s17800_s20  ;;  %v7731_v11 = vunpack.i.l.bf16 %v12243_v22 }
 0x3f9   :  { %v12370_v0 = vmax.f32 %v2228_v29, %v2252_v6  ;;  %v12372_v61 = vpop.permute.xlu1 %7834  ;;  %v7736_v29 = vunpack.i.l.bf16 %v12214_v35  ;;  %v2443_v6 = vsel %vm18489_vm4, %v2440_v51, %v2442_v41  ;;  %vm18491_vm4 = vmmov %vm18490_vm13 }
 0x3fa   :  { %v2905_v30 = vsel %vm1687_vm14, %v2895_v38, %v7731_v11  ;;  %v12425_v11 = vpop.permute.xlu0 %7809 }
 0x3fb   :  { %v17782_v49 = vrot.slane %v12370_v0, 5  ;;  %v17780_v36 = vrot.slane %v12370_v0, 4  ;;  %v17781_v44 = vrot.slane %v12370_v0, 6  ;;  %v2597_v51 = vrot.slane %v12370_v0, 7 }
 0x3fc   :  { %8009 = vrot.lane.b32.xlu0 %v8008_v10, %s17797_s26  ;;  %v7747_v10 = vunpack.i.h.bf16 %v12234_v62  ;;  %v2916_v38 = vsel %vm2915_vm12, %v2905_v30, %v7736_v29 }
 0x3fd   :  { %v12390_v50 = vpop.permute.xlu1 %7844  ;;  %v12397_v22 = vsel %vm18487_vm2, %v2493_v20, %v17782_v49  ;;  %v12402_v14 = vsel %vm18488_vm6, %v2442_v41, %v17780_v36  ;;  %v2906_v20 = vsel %vm1687_vm14, %v2896_v8, %v7732_v54  ;;  %v7746_v36 = vunpack.i.l.bf16 %v12234_v62 }
 0x3fe   :  { %v8018_v31 = vpack.i.bf16 %v12397_v22, %v12307_v17  ;;  %v8003_v15 = vpack.i.bf16 %v12402_v14, %v2443_v6  ;;  %v12420_v35 = vsel %vm18490_vm13, %v2544_v39, %v17781_v44  ;;  %vm2926_vm2 = vcmask 326656  }
 0x3ff   :  { %v7757_v41 = vunpack.i.h.bf16 %v12245_v4  ;;  %v7756_v54 = vunpack.i.l.bf16 %v12245_v4  ;;  %vm17934_vm6 = vcmask 457728   ;;  %v7767_v8 = vunpack.i.h.bf16 %v12265_v57 }
 0x400   :  { %8019 = vrot.lane.b32.xlu0 %v8018_v31, %s17814_s14  ;;  %8004 = vrot.lane.b32.xlu1 %v8003_v15, %s17816_s10  ;;  %v7766_v44 = vunpack.i.l.bf16 %v12265_v57  ;;  %v12437_v49 = vsel %vm18491_vm4, %v2542_v27, %v2544_v39  ;;  %v2917_v4 = vsel %vm2915_vm12, %v2906_v20, %v7737_v26  ;;  %v7776_v31 = vunpack.i.l.bf16 %v12274_v16  ;;  %s19416_s14 = smov 64  }
 0x401   :  { %v12429_v62 = vpop.permute.xlu1 %7854  ;;  %v8028_v15 = vpack.i.bf16 %v12420_v35, %v12437_v49  ;;  %v2927_v29 = vsel %vm2926_vm2, %v2916_v38, %v7746_v36  ;;  %v2928_v30 = vsel %vm2926_vm2, %v2917_v4, %v7747_v10  ;;  %vm2958_vm13 = vcmask 523264   ;;  %v7820_v38 = vpop.permute.xlu0 %7819 }
 0x402   :  { %vm18492_vm4 = vcmask 1040384   ;;  %v2937_v57 = vsel %vm18493_vm5, %v2927_v29, %v7756_v54  ;;  %v2938_v26 = vsel %vm18494_vm0, %v2928_v30, %v7757_v41  ;;  %v7792_v16 = vunpack.i.h.bf16 %v12358_v45 }
 0x403   :  { %v12451_v27 = vsel %vm18492_vm4, %v2595_v18, %v2597_v51  ;;  %v7791_v39 = vunpack.i.l.bf16 %v12358_v45  ;;  %v18495_v36 = vpack.i.bf16 %v12064_v9, %v12088_v40  ;;  %v2948_v18 = vsel %vm17934_vm6, %v2937_v57, %v7766_v44 }
 0x404   :  { %8029 = vrot.lane.b32.xlu0 %v8028_v15, %s17812_s16  ;;  %v2949_v10 = vsel %vm17934_vm6, %v2938_v26, %v7767_v8  ;;  %vm2969_vm5 = vcmask 588800   ;;  %v2959_v41 = vsel %vm2958_vm13, %v2948_v18, %v7776_v31  ;;  %v8038_v4 = vpack.i.bf16 %v12451_v27, %v12318_v52 }
 0x405   :  { %8014 = vrot.lane.b32.xlu1 %v18495_v36, %s17793_s13  ;;  %v12462_v20 = vpop.permute.xlu1 %7864  ;;  %v2960_v54 = vsel %vm2958_vm13, %v2949_v10, %v7777_v53  ;;  %v8023_v15 = vpack.i.bf16 %v2443_v6, %v12223_v24  ;;  %vm2980_vm0 = vcmask 654336   ;;  %v2659_v9 = vrot.slane %v12370_v0, 1 }
 0x406   :  { %v7807_v40 = vunpack.i.h.bf16 %v12340_v13  ;;  %v7806_v44 = vunpack.i.l.bf16 %v12340_v13  ;;  %v2970_v8 = vsel %vm2969_vm5, %v2959_v41, %v7791_v39  ;;  %v2971_v31 = vsel %vm2969_vm5, %v2960_v54, %v7792_v16 }
 0x407   :  { %v7522_v45 = vpop.f32.mrf.mxu0  ;;  %v7822_v30 = vunpack.i.h.bf16 %v7820_v38  ;;  %v7821_v57 = vunpack.i.l.bf16 %v7820_v38  ;;  %vm17929_vm4 = vcmask 719872   ;;  %v8048_v6 = vpack.i.bf16 %v12370_v0, %v12276_v28 }
 0x408   :  { %8039 = vrot.lane.b32.xlu0 %v8038_v4, %s17810_s28  ;;  %v2660_v26 = vsel %vm18496_vm3, %v12286_v3, %v2659_v9  ;;  %v2723_v16 = vrot.slane %v12370_v0, 3  ;;  %v7837_v39 = vunpack.i.h.bf16 %v12372_v61  ;;  %v7836_v36 = vunpack.i.l.bf16 %v12372_v61 }
 0x409   :  { %8024 = vrot.lane.b32.xlu1 %v8023_v15, %s17802_s25  ;;  %v2149_v53 = vpop.f32.mrf.mxu0  ;;  %v7875_v29 = vpop.permute.xlu1 %7874  ;;  %v2981_v18 = vsel %vm2980_vm0, %v2970_v8, %v7806_v44  ;;  %v7857_v54 = vunpack.i.h.bf16 %v12429_v62  ;;  %v7856_v61 = vunpack.i.l.bf16 %v12429_v62  ;;  %vm18497_vm3 = vcmask 64512  }
 0x40a   :  { %v2150_v24 = vadd.f32 %v11896_v37, %v2149_v53  ;;  %v2982_v37 = vsel %vm2980_vm0, %v2971_v31, %v7807_v40  ;;  %v2992_v3 = vsel %vm17929_vm4, %v2981_v18, %v7821_v57  ;;  %v7877_v38 = vunpack.i.h.bf16 %v7875_v29 }
 0x40b   :  { %v2993_v41 = vsel %vm17929_vm4, %v2982_v37, %v7822_v30  ;;  %v7876_v45 = vunpack.i.l.bf16 %v7875_v29  ;;  %v8058_v4 = vpack.i.bf16 %v2659_v9, %v2660_v26  ;;  %v8043_v15 = vpack.i.bf16 %v12437_v49, %v12253_v2 }
 0x40c   :  { %v2180_v13 = vmax.f32 %v2150_v24, 0.0  ;;  %8049 = vrot.lane.b32.xlu0 %v8048_v6, %s17808_s15  ;;  %v2724_v5 = vsel %vm18498_vm11, %v12332_v46, %v2723_v16  ;;  %v2691_v17 = vrot.slane %v12370_v0, 2  ;;  %v3003_v62 = vsel %vm17869_vm1, %v2992_v3, %v7836_v36 }
 0x40d   :  { %8034 = vrot.lane.b32.xlu1 %v8033_v60, %s17795_s12  ;;  %v12493_v10 = vpop.permute.xlu1 %7884  ;;  %v3004_v40 = vsel %vm17869_vm1, %v2993_v41, %v7837_v39  ;;  %v3014_v2 = vsel %vm17868_vm15, %v3003_v62, %v7856_v61  ;;  %v8068_v46 = vpack.i.bf16 %v2723_v16, %v2724_v5  ;;  %vm18499_vm11 = vcmask 1045504  }
 0x40e   :  { %2205 = vst.msk [vmem:[#allocation2 + $0xb0] sm:$0xff] %vm18497_vm3, %v2180_v13  ;;  %vm17792_vm3 = vcmask 982016   ;;  %v3015_v49 = vsel %vm17868_vm15, %v3004_v40, %v7857_v54  ;;  %v3025_v8 = vsel %vm17867_vm10, %v3014_v2, %v7876_v45  ;;  %v2692_v30 = vsel %vm18499_vm11, %v12283_v58, %v2691_v17 }
 0x40f   :  { %v3026_v31 = vsel %vm17867_vm10, %v3015_v49, %v7877_v38  ;;  %v18500_v57 = vpack.i.bf16 %v12318_v52, %v12184_v25  ;;  %v8063_v26 = vpack.i.bf16 %v2691_v17, %v2692_v30  ;;  %v18501_v58 = vrot.slane %v12370_v0, 5 }
 0x410   :  { %8059 = vrot.lane.b32.xlu0 %v8058_v4, %s17804_s27  ;;  %vm18502_vm11 = vcmask 1042432   ;;  %v18503_v3 = vrot.slane %v12370_v0, 4  ;;  %v18506_v61 = vrot.slane %v12370_v0, 6  ;;  %v7752_v40 = vunpack.i.h.bf16 %v12268_v23  ;;  %s18609_s27 = smov 39  }
 0x411   :  { %8044 = vrot.lane.b32.xlu1 %v8043_v15, %s17800_s20  ;;  %v7895_v60 = vpop.permute.xlu1 %7894  ;;  %v7762_v2 = vunpack.i.h.bf16 %v12292_v56  ;;  %v7761_v49 = vunpack.i.l.bf16 %v12292_v56 }
 0x412   :  { %v7897_v9 = vunpack.i.h.bf16 %v7895_v60  ;;  %v7896_v44 = vunpack.i.l.bf16 %v7895_v60 }
 0x414   :  { %v3036_v53 = vsel %vm17792_vm3, %v3025_v8, %v7896_v44  ;;  %v3037_v29 = vsel %vm17792_vm3, %v3026_v31, %v7897_v9  ;;  %8069 = vrot.lane.b32.xlu0 %v8068_v46, %s17797_s26  ;;  %vm18507_vm3 = vcmask 1041408   ;;  %v7751_v9 = vunpack.i.l.bf16 %v12268_v23  ;;  %s18564_s26 = smov 12  }
 0x415   :  { %8054 = vrot.lane.b32.xlu1 %v18500_v57, %s17793_s13  ;;  %v2230_v24 = vld [vmem:[#allocation2 + $0xb0] ss:$2 sm:$0xf]  ;;  %v2254_v6 = vld [vmem:[#allocation2 + $0xb1] ss:$2 sm:$0xf]  ;;  %7555 = vmatprep.mubr.f32.mxu1 %v3036_v53  ;;  %v12547_v0 = vpop.permute.xlu1 %7904  ;;  %v7772_v46 = vunpack.i.h.bf16 %v12328_v43  ;;  %v7771_v8 = vunpack.i.l.bf16 %v12328_v43 }
 0x416   :  { %v2266_v13 = vmax.f32 %v2230_v24, %v2254_v6  ;;  %7556 = vmatmul.mubr.f32.vlgmr.msra.gmra.mxu1 %v3037_v29  ;;  %v7802_v24 = vunpack.i.h.bf16 %v12382_v34 }
 0x418   :  { %v2788_v16 = vrot.slane %v2266_v13, 5  ;;  %v2756_v39 = vrot.slane %v2266_v13, 4  ;;  %v2852_v36 = vrot.slane %v2266_v13, 7  ;;  %v2820_v18 = vrot.slane %v2266_v13, 6 }
 0x419   :  { %8064 = vrot.lane.b32.xlu1 %v8063_v26, %s17806_s11  ;;  %v7786_v13 = vunpack.i.l.bf16 %v12290_v55 }
 0x41a   :  { %v2789_v37 = vsel %vm18502_vm11, %v18501_v58, %v2788_v16  ;;  %v2757_v25 = vsel %vm18504_vm9, %v18503_v3, %v2756_v39  ;;  %v2853_v54 = vsel %vm18505_vm8, %v2597_v51, %v2852_v36  ;;  %v2821_v38 = vsel %vm18507_vm3, %v18506_v61, %v2820_v18 }
 0x41b   :  { %v8078_v52 = vpack.i.bf16 %v2789_v37, %v12397_v22  ;;  %v8073_v41 = vpack.i.bf16 %v2757_v25, %v12402_v14  ;;  %v8088_v45 = vpack.i.bf16 %v2853_v54, %v12451_v27  ;;  %v8083_v4 = vpack.i.bf16 %v2821_v38, %v12420_v35  ;;  %v7830_v22 = vpop.permute.xlu0 %7829 }
 0x41c   :  { %v7742_v27 = vunpack.i.h.bf16 %v12260_v19  ;;  %v7741_v35 = vunpack.i.l.bf16 %v12260_v19  ;;  %vm18508_vm8 = vcmask 64512   ;;  %v7817_v16 = vunpack.i.h.bf16 %v12354_v21 }
 0x41d   :  { %8079 = vrot.lane.b32.xlu0 %v8078_v52, %s17795_s12  ;;  %8074 = vrot.lane.b32.xlu1 %v8073_v41, %s17802_s25  ;;  %vm18509_vm9 = vmmov %vm18508_vm8  ;;  %v7816_v39 = vunpack.i.l.bf16 %v12354_v21  ;;  %vm18510_vm3 = vcmask 392192   ;;  %v7831_v3 = vunpack.i.l.bf16 %v7830_v22  ;;  %s18571_s12 = smov 15  }
 0x41e   :  { %v2887_v31 = vsel %vm18508_vm8, %v11532_v59, %v7742_v27  ;;  %v2886_v19 = vsel %vm18509_vm9, %v11376_v7, %v7741_v35  ;;  %v7801_v59 = vunpack.i.l.bf16 %v12382_v34  ;;  %v7787_v7 = vunpack.i.h.bf16 %v12290_v55  ;;  %vm18511_vm11 = vmmov %vm18510_vm3 }
 0x41f   :  { %v2897_v29 = vsel %vm2894_vm7, %v2886_v19, %v7751_v9  ;;  %v2898_v23 = vsel %vm2894_vm7, %v2887_v31, %v7752_v40  ;;  %v7832_v34 = vunpack.i.h.bf16 %v7830_v22  ;;  %vm18512_vm8 = vcmask 982016  }
 0x420   :  { %v2907_v30 = vsel %vm1687_vm14, %v2897_v29, %v7761_v49  ;;  %v2908_v56 = vsel %vm1687_vm14, %v2898_v23, %v7762_v2  ;;  %vm18513_vm9 = vmmov %vm18512_vm8 }
 0x421   :  { %8089 = vrot.lane.b32.xlu0 %v8088_v45, %s17793_s13  ;;  %8084 = vrot.lane.b32.xlu1 %v8083_v4, %s17800_s20  ;;  %v2918_v57 = vsel %vm2915_vm12, %v2907_v30, %v7771_v8  ;;  %v2919_v43 = vsel %vm2915_vm12, %v2908_v56, %v7772_v46  ;;  %s18576_s13 = smov 18  }
 0x422   :  { %v2929_v36 = vsel %vm2926_vm2, %v2918_v57, %v7786_v13  ;;  %v2930_v18 = vsel %vm2926_vm2, %v2919_v43, %v7787_v7 }
 0x423   :  { %v2939_v58 = vsel %vm18510_vm3, %v2929_v36, %v7801_v59  ;;  %v2940_v37 = vsel %vm18511_vm11, %v2930_v18, %v7802_v24  ;;  %v7782_v18 = vunpack.i.h.bf16 %v12345_v32  ;;  %vm18514_vm3 = vcmask 64512  }
 0x424   :  { %v2950_v21 = vsel %vm17934_vm6, %v2939_v58, %v7816_v39  ;;  %v2951_v38 = vsel %vm17934_vm6, %v2940_v37, %v7817_v16  ;;  %v7781_v58 = vunpack.i.l.bf16 %v12345_v32  ;;  %vm18515_vm11 = vmmov %vm18514_vm3 }
 0x425   :  { %v2961_v27 = vsel %vm2958_vm13, %v2950_v21, %v7831_v3  ;;  %v2962_v35 = vsel %vm2958_vm13, %v2951_v38, %v7832_v34  ;;  %v7797_v3 = vunpack.i.h.bf16 %v12322_v47  ;;  %v7811_v21 = vunpack.i.l.bf16 %v12425_v11 }
 0x429   :  { %v12543_v14 = vpop.permute.xlu0 %7839  ;;  %v12549_v17 = vpop.permute.xlu1 %7914 }
 0x42d   :  { %v7850_v51 = vpop.permute.xlu0 %7849  ;;  %v7925_v44 = vpop.permute.xlu1 %7924 }
 0x42e   :  { %v7852_v25 = vunpack.i.h.bf16 %v7850_v51  ;;  %v7851_v52 = vunpack.i.l.bf16 %v7850_v51  ;;  %v7927_v29 = vunpack.i.h.bf16 %v7925_v44  ;;  %v7926_v23 = vunpack.i.l.bf16 %v7925_v44 }
 0x430   :  { %v2972_v51 = vsel %vm2969_vm5, %v2961_v27, %v7851_v52  ;;  %v2973_v9 = vsel %vm2969_vm5, %v2962_v35, %v7852_v25  ;;  %v7796_v25 = vunpack.i.l.bf16 %v12322_v47  ;;  %v2889_v52 = vsel %vm18514_vm3, %v11835_v12, %v7782_v18 }
 0x431   :  { %v12545_v15 = vpop.permute.xlu0 %7859  ;;  %v12575_v6 = vpop.permute.xlu1 %7934  ;;  %v2900_v27 = vsel %vm2894_vm7, %v2889_v52, %v7797_v3  ;;  %v7847_v35 = vunpack.i.h.bf16 %v12390_v50 }
 0x435   :  { %v7870_v5 = vpop.permute.xlu0 %7869  ;;  %v12587_v55 = vpop.permute.xlu1 %7944 }
 0x436   :  { %v7872_v54 = vunpack.i.h.bf16 %v7870_v5  ;;  %v7871_v61 = vunpack.i.l.bf16 %v7870_v5 }
 0x438   :  { %v2983_v5 = vsel %vm2980_vm0, %v2972_v51, %v7871_v61  ;;  %v2984_v49 = vsel %vm2980_vm0, %v2973_v9, %v7872_v54  ;;  %v2888_v54 = vsel %vm18515_vm11, %v11709_v33, %v7781_v58  ;;  %v7812_v61 = vunpack.i.h.bf16 %v12425_v11  ;;  %vm18518_vm11 = vmmov %vm18514_vm3 }
 0x439   :  { %v12551_v60 = vpop.permute.xlu0 %7879  ;;  %v7955_v8 = vpop.permute.xlu1 %7954  ;;  %v2899_v47 = vsel %vm2894_vm7, %v2888_v54, %v7796_v25  ;;  %v7846_v11 = vunpack.i.l.bf16 %v12390_v50  ;;  %v7866_v51 = vunpack.i.l.bf16 %v12462_v20  ;;  %v7886_v9 = vunpack.i.l.bf16 %v12493_v10 }
 0x43a   :  { %v7957_v43 = vunpack.i.h.bf16 %v7955_v8  ;;  %v7956_v24 = vunpack.i.l.bf16 %v7955_v8  ;;  %v2909_v12 = vsel %vm1687_vm14, %v2899_v47, %v7811_v21  ;;  %v2910_v33 = vsel %vm1687_vm14, %v2900_v27, %v7812_v61 }
 0x43b   :  { %v7936_v58 = vunpack.i.l.bf16 %v12575_v6 }
 0x43d   :  { %v7890_v62 = vpop.permute.xlu0 %7889  ;;  %v12617_v34 = vpop.permute.xlu1 %7964 }
 0x43e   :  { %v7892_v45 = vunpack.i.h.bf16 %v7890_v62  ;;  %v7891_v4 = vunpack.i.l.bf16 %v7890_v62 }
 0x440   :  { %v2994_v46 = vsel %vm17929_vm4, %v2983_v5, %v7891_v4  ;;  %v2995_v62 = vsel %vm17929_vm4, %v2984_v49, %v7892_v45  ;;  %v7827_v45 = vunpack.i.h.bf16 %v12360_v63  ;;  %v7826_v4 = vunpack.i.l.bf16 %v12360_v63 }
 0x441   :  { %v12565_v53 = vpop.permute.xlu0 %7899  ;;  %v7887_v63 = vunpack.i.h.bf16 %v12493_v10 }
 0x442   :  { %v2920_v5 = vsel %vm2915_vm12, %v2909_v12, %v7826_v4  ;;  %v2921_v49 = vsel %vm2915_vm12, %v2910_v33, %v7827_v45  ;;  %v7917_v45 = vunpack.i.h.bf16 %v12549_v17  ;;  %v7916_v4 = vunpack.i.l.bf16 %v12549_v17 }
 0x443   :  { %v2931_v50 = vsel %vm2926_vm2, %v2920_v5, %v7846_v11 }
 0x445   :  { %v7910_v26 = vpop.permute.xlu0 %7909 }
 0x446   :  { %v7912_v40 = vunpack.i.h.bf16 %v7910_v26  ;;  %v7911_v22 = vunpack.i.l.bf16 %v7910_v26 }
 0x448   :  { %v3005_v31 = vsel %vm17869_vm1, %v2994_v46, %v7911_v22  ;;  %v3006_v19 = vsel %vm17869_vm1, %v2995_v62, %v7912_v40  ;;  %v7867_v22 = vunpack.i.h.bf16 %v12462_v20  ;;  %v7907_v46 = vunpack.i.h.bf16 %v12547_v0 }
 0x449   :  { %v12585_v41 = vpop.permute.xlu0 %7919  ;;  %v3016_v59 = vsel %vm17868_vm15, %v3005_v31, %v7926_v23  ;;  %v3017_v7 = vsel %vm17868_vm15, %v3006_v19, %v7927_v29  ;;  %v7906_v62 = vunpack.i.l.bf16 %v12547_v0  ;;  %v2932_v31 = vsel %vm2926_vm2, %v2921_v49, %v7847_v35 }
 0x44a   :  { %v7842_v20 = vunpack.i.h.bf16 %v12543_v14  ;;  %v7841_v19 = vunpack.i.l.bf16 %v12543_v14  ;;  %v7861_v0 = vunpack.i.l.bf16 %v12545_v15 }
 0x44d   :  { %v12595_v2 = vpop.permute.xlu0 %7929 }
 0x44e   :  { %v7932_v12 = vunpack.i.h.bf16 %v12595_v2 }
 0x451   :  { %v7940_v30 = vpop.permute.xlu0 %7939 }
 0x452   :  { %v7942_v56 = vunpack.i.h.bf16 %v7940_v30  ;;  %v7941_v57 = vunpack.i.l.bf16 %v7940_v30  ;;  %v7862_v30 = vunpack.i.h.bf16 %v12545_v15  ;;  %v2890_v15 = vsel %vm18518_vm11, %v11902_v42, %v7841_v19 }
 0x453   :  { %v2901_v3 = vsel %vm2894_vm7, %v2890_v15, %v7861_v0 }
 0x454   :  { %v3027_v13 = vsel %vm17867_vm10, %v3016_v59, %v7941_v57  ;;  %v3028_v26 = vsel %vm17867_vm10, %v3017_v7, %v7942_v56  ;;  %v7882_v7 = vunpack.i.h.bf16 %v12551_v60 }
 0x455   :  { %v12607_v16 = vpop.permute.xlu0 %7949  ;;  %v3038_v39 = vsel %vm18512_vm8, %v3027_v13, %v7956_v24  ;;  %v3039_v36 = vsel %vm18513_vm9, %v3028_v26, %v7957_v43  ;;  %vm18516_vm8 = vcmask 392192   ;;  %v7922_v43 = vunpack.i.h.bf16 %v12585_v41 }
 0x456   :  { %7558 = vmatprep.mubr.f32.mxu1 %v3038_v39  ;;  %v2941_v10 = vsel %vm18516_vm8, %v2931_v50, %v7866_v51  ;;  %vm18517_vm9 = vmmov %vm18516_vm8  ;;  %v7921_v24 = vunpack.i.l.bf16 %v12585_v41  ;;  %v7881_v13 = vunpack.i.l.bf16 %v12551_v60  ;;  %v2891_v26 = vsel %vm18514_vm3, %v12028_v48, %v7842_v20 }
 0x457   :  { %7559 = vmatmul.mubr.f32.gmra.mxu1 %v3039_v36  ;;  %v2942_v23 = vsel %vm18517_vm9, %v2932_v31, %v7867_v22  ;;  %v2952_v56 = vsel %vm17934_vm6, %v2941_v10, %v7886_v9  ;;  %v7902_v39 = vunpack.i.h.bf16 %v12565_v53  ;;  %v7901_v36 = vunpack.i.l.bf16 %v12565_v53  ;;  %vm18519_vm9 = vmmov %vm18516_vm8 }
 0x458   :  { %v2953_v57 = vsel %vm17934_vm6, %v2942_v23, %v7887_v63  ;;  %v2963_v14 = vsel %vm2958_vm13, %v2952_v56, %v7906_v62  ;;  %v7937_v41 = vunpack.i.h.bf16 %v12575_v6  ;;  %v2902_v60 = vsel %vm2894_vm7, %v2891_v26, %v7862_v30 }
 0x459   :  { %v2964_v59 = vsel %vm2958_vm13, %v2953_v57, %v7907_v46  ;;  %v2974_v48 = vsel %vm2969_vm5, %v2963_v14, %v7921_v24  ;;  %v7952_v52 = vunpack.i.h.bf16 %v12607_v16  ;;  %v7951_v53 = vunpack.i.l.bf16 %v12607_v16 }
 0x45a   :  { %v12611_v44 = vpop.permute.xlu0 %7959  ;;  %v12629_v32 = vpop.permute.xlu1 %7974  ;;  %v2975_v42 = vsel %vm2969_vm5, %v2964_v59, %v7922_v43  ;;  %v2911_v54 = vsel %vm1687_vm14, %v2901_v3, %v7881_v13  ;;  %v2912_v61 = vsel %vm1687_vm14, %v2902_v60, %v7882_v7  ;;  %v7931_v16 = vunpack.i.l.bf16 %v12595_v2 }
 0x45b   :  { %v2922_v47 = vsel %vm2915_vm12, %v2911_v54, %v7901_v36  ;;  %v2923_v27 = vsel %vm2915_vm12, %v2912_v61, %v7902_v39  ;;  %v2985_v33 = vsel %vm2980_vm0, %v2974_v48, %v7936_v58  ;;  %v2986_v35 = vsel %vm2980_vm0, %v2975_v42, %v7937_v41 }
 0x45c   :  { %v2997_v17 = vsel %vm17929_vm4, %v2986_v35, %v7952_v52  ;;  %v2933_v46 = vsel %vm2926_vm2, %v2922_v47, %v7916_v4  ;;  %v2934_v62 = vsel %vm2926_vm2, %v2923_v27, %v7917_v45  ;;  %v7962_v20 = vunpack.i.h.bf16 %v12611_v44 }
 0x45d   :  { %v2943_v50 = vsel %vm18516_vm8, %v2933_v46, %v7931_v16  ;;  %v2944_v31 = vsel %vm18519_vm9, %v2934_v62, %v7932_v12  ;;  %v7947_v56 = vunpack.i.h.bf16 %v12587_v55  ;;  %v7946_v57 = vunpack.i.l.bf16 %v12587_v55 }
 0x45e   :  { %v12615_v37 = vpop.permute.xlu0 %7969  ;;  %v12649_v8 = vpop.permute.xlu1 %7984  ;;  %v7967_v14 = vunpack.i.h.bf16 %v12617_v34  ;;  %vm18520_vm3 = vcmask 982016   ;;  %v7977_v15 = vunpack.i.h.bf16 %v12629_v32  ;;  %v7976_v55 = vunpack.i.l.bf16 %v12629_v32 }
 0x45f   :  { %v7972_v6 = vunpack.i.h.bf16 %v12615_v37  ;;  %v7971_v21 = vunpack.i.l.bf16 %v12615_v37  ;;  %v2996_v37 = vsel %vm17929_vm4, %v2985_v33, %v7951_v53  ;;  %v7987_v51 = vunpack.i.h.bf16 %v12649_v8  ;;  %vm18521_vm11 = vmmov %vm18520_vm3 }
 0x460   :  { %v7986_v63 = vunpack.i.l.bf16 %v12649_v8  ;;  %v7961_v8 = vunpack.i.l.bf16 %v12611_v44  ;;  %v7966_v44 = vunpack.i.l.bf16 %v12617_v34  ;;  %v2954_v13 = vsel %vm17934_vm6, %v2943_v50, %v7946_v57 }
 0x461   :  { %v3007_v9 = vsel %vm17869_vm1, %v2996_v37, %v7971_v21  ;;  %v3008_v2 = vsel %vm17869_vm1, %v2997_v17, %v7972_v6  ;;  %v2955_v26 = vsel %vm17934_vm6, %v2944_v31, %v7947_v56  ;;  %vm18522_vm8 = vcmask 64512  }
 0x462   :  { %v12627_v38 = vpop.permute.xlu0 %7979  ;;  %v12681_v25 = vpop.permute.xlu1 %7994  ;;  %v3018_v0 = vsel %vm17868_vm15, %v3007_v9, %v7986_v63  ;;  %v2893_v41 = vsel %vm18522_vm8, %v12276_v28, %v7962_v20  ;;  %vm18523_vm9 = vmmov %vm18522_vm8  ;;  %v2965_v32 = vsel %vm2958_vm13, %v2954_v13, %v7966_v44  ;;  %v2966_v42 = vsel %vm2958_vm13, %v2955_v26, %v7967_v14 }
 0x463   :  { %v2892_v34 = vsel %vm18523_vm9, %v12132_v1, %v7961_v8  ;;  %v7982_v58 = vunpack.i.h.bf16 %v12627_v38  ;;  %v7981_v3 = vunpack.i.l.bf16 %v12627_v38  ;;  %v7997_v53 = vunpack.i.h.bf16 %v12681_v25 }
 0x464   :  { %v7996_v1 = vunpack.i.l.bf16 %v12681_v25  ;;  %v2903_v54 = vsel %vm2894_vm7, %v2892_v34, %v7976_v55  ;;  %v2904_v38 = vsel %vm2894_vm7, %v2893_v41, %v7977_v15  ;;  %vm18526_vm8 = vcmask 982016  }
 0x465   :  { %v2977_v21 = vsel %vm2969_vm5, %v2966_v42, %v7982_v58  ;;  %vm18527_vm9 = vmmov %vm18526_vm8 }
 0x466   :  { %v12639_v40 = vpop.permute.xlu0 %7989 }
 0x467   :  { %v7992_v60 = vunpack.i.h.bf16 %v12639_v40  ;;  %v7991_v48 = vunpack.i.l.bf16 %v12639_v40  ;;  %v2976_v40 = vsel %vm2969_vm5, %v2965_v32, %v7981_v3 }
 0x468   :  { %v2987_v35 = vsel %vm2980_vm0, %v2976_v40, %v7996_v1 }
 0x469   :  { %v2913_v47 = vsel %vm1687_vm14, %v2903_v54, %v7991_v48  ;;  %v2914_v27 = vsel %vm1687_vm14, %v2904_v38, %v7992_v60 }
 0x46a   :  { %v12655_v29 = vpop.permute.xlu0 %7999 }
 0x46b   :  { %v8002_v5 = vunpack.i.h.bf16 %v12655_v29  ;;  %v8001_v49 = vunpack.i.l.bf16 %v12655_v29  ;;  %v3019_v29 = vsel %vm17868_vm15, %v3008_v2, %v7987_v51 }
 0x46d   :  { %v3029_v43 = vsel %vm17867_vm10, %v3018_v0, %v8001_v49  ;;  %v3030_v24 = vsel %vm17867_vm10, %v3019_v29, %v8002_v5 }
 0x46e   :  { %v12675_v18 = vpop.permute.xlu0 %8009 }
 0x46f   :  { %v8012_v45 = vunpack.i.h.bf16 %v12675_v18  ;;  %v8011_v4 = vunpack.i.l.bf16 %v12675_v18 }
 0x471   :  { %v2998_v18 = vsel %vm17929_vm4, %v2987_v35, %v8011_v4 }
 0x472   :  { %v12699_v11 = vpop.permute.xlu1 %8004  ;;  %v12701_v22 = vpop.permute.xlu0 %8019 }
 0x473   :  { %v8007_v52 = vunpack.i.h.bf16 %v12699_v11  ;;  %v8006_v28 = vunpack.i.l.bf16 %v12699_v11  ;;  %v8022_v25 = vunpack.i.h.bf16 %v12701_v22  ;;  %v8021_v12 = vunpack.i.l.bf16 %v12701_v22 }
 0x474   :  { %v2988_v11 = vsel %vm2980_vm0, %v2977_v21, %v7997_v53 }
 0x475   :  { %v2924_v16 = vsel %vm2915_vm12, %v2913_v47, %v8006_v28  ;;  %v2925_v33 = vsel %vm2915_vm12, %v2914_v27, %v8007_v52  ;;  %v2999_v63 = vsel %vm17929_vm4, %v2988_v11, %v8012_v45 }
 0x476   :  { %v12717_v10 = vpop.permute.xlu0 %8029  ;;  %v2935_v5 = vsel %vm2926_vm2, %v2924_v16, %v8021_v12  ;;  %v2936_v22 = vsel %vm2926_vm2, %v2925_v33, %v8022_v25 }
 0x477   :  { %v8015_v19 = vpop.permute.xlu1 %8014  ;;  %v8032_v50 = vunpack.i.h.bf16 %v12717_v10  ;;  %v8031_v31 = vunpack.i.l.bf16 %v12717_v10 }
 0x478   :  { %v8017_v23 = vunpack.i.h.bf16 %v8015_v19  ;;  %v8016_v30 = vunpack.i.l.bf16 %v8015_v19 }
 0x47a   :  { %v3040_v59 = vsel %vm18520_vm3, %v3029_v43, %v8016_v30  ;;  %v3041_v7 = vsel %vm18521_vm11, %v3030_v24, %v8017_v23  ;;  %v12733_v36 = vpop.permute.xlu0 %8039  ;;  %vm18524_vm3 = vcmask 392192  }
 0x47b   :  { %v8025_v39 = vpop.permute.xlu1 %8024  ;;  %7561 = vmatprep.mubr.f32.mxu1 %v3040_v59  ;;  %v8042_v20 = vunpack.i.h.bf16 %v12733_v36  ;;  %v8041_v8 = vunpack.i.l.bf16 %v12733_v36  ;;  %vm18525_vm11 = vmmov %vm18524_vm3 }
 0x47c   :  { %7562 = vmatmul.mubr.f32.gmra.mxu1 %v3041_v7  ;;  %v8027_v37 = vunpack.i.h.bf16 %v8025_v39  ;;  %v8026_v17 = vunpack.i.l.bf16 %v8025_v39  ;;  %v2945_v7 = vsel %vm18524_vm3, %v2935_v5, %v8031_v31  ;;  %v2946_v13 = vsel %vm18525_vm11, %v2936_v22, %v8032_v50  ;;  %vm18528_vm3 = vmmov %vm18526_vm8 }
 0x47d   :  { %v2956_v55 = vsel %vm17934_vm6, %v2945_v7, %v8041_v8  ;;  %v2957_v39 = vsel %vm17934_vm6, %v2946_v13, %v8042_v20  ;;  %vm18529_vm11 = vmmov %vm18528_vm3 }
 0x47e   :  { %v8050_v6 = vpop.permute.xlu0 %8049  ;;  %v3009_v19 = vsel %vm17869_vm1, %v2998_v18, %v8026_v17  ;;  %v3010_v23 = vsel %vm17869_vm1, %v2999_v63, %v8027_v37 }
 0x47f   :  { %v8035_v61 = vpop.permute.xlu1 %8034  ;;  %v8052_v30 = vunpack.i.h.bf16 %v8050_v6  ;;  %v8051_v0 = vunpack.i.l.bf16 %v8050_v6 }
 0x480   :  { %v8037_v9 = vunpack.i.h.bf16 %v8035_v61  ;;  %v8036_v2 = vunpack.i.l.bf16 %v8035_v61 }
 0x481   :  { %v2967_v34 = vsel %vm2958_vm13, %v2956_v55, %v8051_v0  ;;  %v2968_v58 = vsel %vm2958_vm13, %v2957_v39, %v8052_v30  ;;  %v3446_v55 = vld [vmem:[%s17646_s5 + $0xe8] sm:$0xff] }
 0x482   :  { %v8060_v62 = vpop.permute.xlu0 %8059  ;;  %v3020_v43 = vsel %vm17868_vm15, %v3009_v19, %v8036_v2  ;;  %v3021_v24 = vsel %vm17868_vm15, %v3010_v23, %v8037_v9  ;;  %v12802_v9 = vld [vmem:[%s17645_s4] ss:$0 sm:$0xff]  ;;  %v3430_v39 = vld [vmem:[%s17646_s5 + $0x68] sm:$0xff] }
 0x483   :  { %v8045_v51 = vpop.permute.xlu1 %8044  ;;  %v8062_v14 = vunpack.i.h.bf16 %v8060_v62  ;;  %v8061_v44 = vunpack.i.l.bf16 %v8060_v62 }
 0x484   :  { %v8047_v49 = vunpack.i.h.bf16 %v8045_v51  ;;  %v8046_v46 = vunpack.i.l.bf16 %v8045_v51 }
 0x485   :  { %v2978_v48 = vsel %vm2969_vm5, %v2967_v34, %v8061_v44  ;;  %v2979_v32 = vsel %vm2969_vm5, %v2968_v58, %v8062_v14  ;;  %v3447_v14 = vld [vmem:[%s17646_s5 + $0xf0] sm:$0xff]  ;;  %v3429_v34 = vld [vmem:[%s17646_s5 + $0x60] sm:$0xff] }
 0x486   :  { %v3031_v10 = vsel %vm17867_vm10, %v3020_v43, %v8046_v46  ;;  %v3032_v59 = vsel %vm17867_vm10, %v3021_v24, %v8047_v49  ;;  %v8070_v36 = vpop.permute.xlu0 %8069  ;;  %v3448_v43 = vld [vmem:[%s17646_s5 + $0xf8] sm:$0xff] }
 0x487   :  { %v8055_v29 = vpop.permute.xlu1 %8054  ;;  %v8072_v28 = vunpack.i.h.bf16 %v8070_v36  ;;  %v8071_v53 = vunpack.i.l.bf16 %v8070_v36  ;;  %v3432_v24 = vld [vmem:[%s17646_s5 + $0x78] sm:$0xff]  ;;  %7327 = vmatprep.subr.mxu0 %v3448_v43  ;;  %v3445_v36 = vld [vmem:[%s17646_s5 + $0xe0] sm:$0xff]  ;;  %v3423_v43 = vld [vmem:[%s17646_s5 + $0x30] sm:$0xff] }
 0x488   :  { %v8057_v56 = vunpack.i.h.bf16 %v8055_v29  ;;  %v8056_v57 = vunpack.i.l.bf16 %v8055_v29  ;;  %7328 = vmatpush3.msra.mxu0 %v3432_v24 }
 0x489   :  { %7329 = vmatprep.subr.mxu0 %v3447_v14  ;;  %v3438_v14 = vld [vmem:[%s17646_s5 + $0xa8] sm:$0xff] }
 0x48a   :  { %v3042_v26 = vsel %vm18526_vm8, %v3031_v10, %v8056_v57  ;;  %v3043_v15 = vsel %vm18527_vm9, %v3032_v59, %v8057_v56  ;;  %v3431_v10 = vld [vmem:[%s17646_s5 + $0x70] sm:$0xff]  ;;  %vm18530_vm8 = vcmask 1045504   ;;  %vm18531_vm9 = vcmask 1046528  }
 0x48b   :  { %v8065_v41 = vpop.permute.xlu1 %8064  ;;  %7564 = vmatprep.mubr.f32.mxu1 %v3042_v26  ;;  %7330 = vmatpush3.msra.mxu0 %v3431_v10  ;;  %v3422_v10 = vld [vmem:[%s17646_s5 + $0x28] sm:$0xff] }
 0x48c   :  { %v8067_v3 = vunpack.i.h.bf16 %v8065_v41  ;;  %v8066_v60 = vunpack.i.l.bf16 %v8065_v41  ;;  %7565 = vmatmul.mubr.f32.gmra.mxu1 %v3043_v15  ;;  %7331 = vmatprep.subr.mxu0 %v3446_v55 }
 0x48d   :  { %7332 = vmatpush3.msra.mxu0 %v3430_v39  ;;  %v3421_v39 = vld [vmem:[%s17646_s5 + $0x20] sm:$0xff] }
 0x48e   :  { %v2989_v42 = vsel %vm2980_vm0, %v2978_v48, %v8066_v60  ;;  %v2990_v52 = vsel %vm2980_vm0, %v2979_v32, %v8067_v3  ;;  %7333 = vmatprep.subr.mxu0 %v3445_v36 }
 0x48f   :  { %v8075_v1 = vpop.permute.xlu1 %8074  ;;  %v8080_v54 = vpop.permute.xlu0 %8079  ;;  %v3000_v6 = vsel %vm17929_vm4, %v2989_v42, %v8071_v53  ;;  %v3001_v40 = vsel %vm17929_vm4, %v2990_v52, %v8072_v28  ;;  %7334 = vmatpush3.msra.mxu0 %v3429_v34  ;;  %v3444_v42 = vld [vmem:[%s17646_s5 + $0xd8] sm:$0xff]  ;;  %v3443_v28 = vld [vmem:[%s17646_s5 + $0xd0] sm:$0xff]  ;;  %vm19491_vm4 = vcmask 318464  }
 0x490   :  { %v8077_v38 = vunpack.i.h.bf16 %v8075_v1  ;;  %v8076_v61 = vunpack.i.l.bf16 %v8075_v1  ;;  %v8082_v21 = vunpack.i.h.bf16 %v8080_v54  ;;  %v8081_v45 = vunpack.i.l.bf16 %v8080_v54  ;;  %v3428_v52 = vld [vmem:[%s17646_s5 + $0x58] sm:$0xff]  ;;  %7335 = vmatprep.subr.mxu0 %v3444_v42 }
 0x491   :  { %7336 = vmatpush3.msra.mxu0 %v3428_v52 }
 0x492   :  { %v3011_v4 = vsel %vm17869_vm1, %v3000_v6, %v8076_v61  ;;  %v3012_v47 = vsel %vm17869_vm1, %v3001_v40, %v8077_v38  ;;  %v3427_v61 = vld [vmem:[%s17646_s5 + $0x50] sm:$0xff]  ;;  %7337 = vmatprep.subr.mxu0 %v3443_v28 }
 0x493   :  { %v8085_v27 = vpop.permute.xlu1 %8084  ;;  %v8090_v25 = vpop.permute.xlu0 %8089  ;;  %v3022_v11 = vsel %vm17868_vm15, %v3011_v4, %v8081_v45  ;;  %v3023_v37 = vsel %vm17868_vm15, %v3012_v47, %v8082_v21  ;;  %7338 = vmatpush3.msra.mxu0 %v3427_v61  ;;  %v3435_v28 = vld [vmem:[%s17646_s5 + $0x90] sm:$0xff]  ;;  %vm18791_vm15 = vcmask 318464  }
 0x494   :  { %v8087_v12 = vunpack.i.h.bf16 %v8085_v27  ;;  %v8086_v16 = vunpack.i.l.bf16 %v8085_v27  ;;  %v8092_v33 = vunpack.i.h.bf16 %v8090_v25  ;;  %v8091_v35 = vunpack.i.l.bf16 %v8090_v25 }
 0x496   :  { %v3033_v17 = vsel %vm17867_vm10, %v3022_v11, %v8086_v16  ;;  %v3034_v51 = vsel %vm17867_vm10, %v3023_v37, %v8087_v12  ;;  %v3442_v37 = vld [vmem:[%s17646_s5 + $0xc8] sm:$0xff] }
 0x497   :  { %v3044_v18 = vsel %vm18528_vm3, %v3033_v17, %v8091_v35  ;;  %v3045_v63 = vsel %vm18529_vm11, %v3034_v51, %v8092_v33  ;;  %vm18532_vm3 = vmmov %vm18530_vm8  ;;  %v3426_v17 = vld [vmem:[%s17646_s5 + $0x48] sm:$0xff]  ;;  %7339 = vmatprep.subr.mxu0 %v3442_v37 }
 0x498   :  { %7567 = vmatprep.mubr.f32.mxu1 %v3044_v18  ;;  %vm18533_vm11 = vmmov %vm18531_vm9  ;;  %7340 = vmatpush3.msra.mxu0 %v3426_v17 }
 0x499   :  { %7568 = vmatmul.mubr.f32.gmra.mxu1 %v3045_v63 }
 0x4d6   :  { %v7557_v2 = vpop.f32.mrf.mxu1 }
 0x4d7   :  { %v3141_v5 = vadd.f32 %v7557_v2, %v12802_v9 }
 0x4d8   :  { %v3135_v22 = vpop.f32.mrf.mxu1 }
 0x4d9   :  { %v3185_v49 = vmax.f32 %v3141_v5, 0.0  ;;  %v3136_v46 = vadd.f32 %v12802_v9, %v3135_v22  ;;  %v3441_v5 = vld [vmem:[%s17646_s5 + $0xc0] sm:$0xff] }
 0x4da   :  { %7341 = vmatprep.subr.mxu0 %v3441_v5 }
 0x4db   :  { %3195 = vst.msk [vmem:[#allocation3 + $0x8] sm:$0xff] %vm2894_vm7, %v3185_v49  ;;  %v3184_v62 = vmax.f32 %v3136_v46, 0.0 }
 0x4dd   :  { %3194 = vst.msk [vmem:[#allocation3] sm:$0xff] %vm2894_vm7, %v3184_v62 }
 0x4e4   :  { %v3205_v13 = vld [vmem:[#allocation3] ss:$2 sm:$0xff]  ;;  %v3215_v26 = vld [vmem:[#allocation3 + $0x1] ss:$2 sm:$0xff] }
 0x4e5   :  { %v12839_v41 = vmax.f32 %v3205_v13, %v3215_v26 }
 0x4e7   :  { %v3247_v1 = vrot.slane %v12839_v41, 2  ;;  %v3232_v54 = vrot.slane %v12839_v41, 1  ;;  %v3279_v63 = vrot.slane %v12839_v41, 4  ;;  %v3263_v2 = vrot.slane %v12839_v41, 3 }
 0x4e8   :  { %v3327_v37 = vrot.slane %v12839_v41, 7 }
 0x517   :  { %v7560_v50 = vpop.f32.mrf.mxu1 }
 0x518   :  { %v3151_v31 = vadd.f32 %v7560_v50, %v12802_v9  ;;  %v3425_v50 = vld [vmem:[%s17646_s5 + $0x40] sm:$0xff] }
 0x519   :  { %v3145_v20 = vpop.f32.mrf.mxu1  ;;  %7342 = vmatpush3.msra.mxu0 %v3425_v50 }
 0x51a   :  { %v3187_v8 = vmax.f32 %v3151_v31, 0.0  ;;  %v3146_v19 = vadd.f32 %v12802_v9, %v3145_v20  ;;  %v3440_v31 = vld [vmem:[%s17646_s5 + $0xb8] sm:$0xff] }
 0x51b   :  { %7343 = vmatprep.subr.mxu0 %v3440_v31 }
 0x51c   :  { %3197 = vst.msk [vmem:[#allocation3 + $0x18] sm:$0xff] %vm2894_vm7, %v3187_v8  ;;  %v3186_v23 = vmax.f32 %v3146_v19, 0.0 }
 0x51e   :  { %3196 = vst.msk [vmem:[#allocation3 + $0x10] sm:$0xff] %vm2894_vm7, %v3186_v23 }
 0x525   :  { %v3207_v59 = vld [vmem:[#allocation3 + $0x10] ss:$2 sm:$0xff]  ;;  %v3217_v7 = vld [vmem:[#allocation3 + $0x11] ss:$2 sm:$0xff] }
 0x526   :  { %v12828_v15 = vmax.f32 %v3207_v59, %v3217_v7  ;;  %v3437_v7 = vld [vmem:[%s17646_s5 + $0xa0] sm:$0xff] }
 0x528   :  { %v3248_v60 = vrot.slane %v12828_v15, 2  ;;  %v3233_v48 = vrot.slane %v12828_v15, 1  ;;  %v3280_v38 = vrot.slane %v12828_v15, 4  ;;  %v3264_v25 = vrot.slane %v12828_v15, 3 }
 0x529   :  { %v3296_v19 = vrot.slane %v12828_v15, 5 }
 0x52a   :  { %v3249_v47 = vsel %vm18530_vm8, %v3247_v1, %v3248_v60  ;;  %v3234_v27 = vsel %vm18531_vm9, %v3232_v54, %v3233_v48  ;;  %vm18534_vm8 = vcmask 1043456   ;;  %vm18535_vm9 = vcmask 1044480  }
 0x52b   :  { %v3312_v54 = vrot.slane %v12828_v15, 6 }
 0x53c   :  { %v7563_v30 = vpop.f32.mrf.mxu1 }
 0x53d   :  { %v3161_v0 = vadd.f32 %v7563_v30, %v12802_v9 }
 0x53e   :  { %v3155_v29 = vpop.f32.mrf.mxu1 }
 0x53f   :  { %v3189_v56 = vmax.f32 %v3161_v0, 0.0  ;;  %v3156_v57 = vadd.f32 %v12802_v9, %v3155_v29  ;;  %v3424_v0 = vld [vmem:[%s17646_s5 + $0x38] sm:$0xff]  ;;  %v3295_v29 = vrot.slane %v12839_v41, 5 }
 0x540   :  { %7344 = vmatpush3.msra.mxu0 %v3424_v0 }
 0x541   :  { %3199 = vst.msk [vmem:[#allocation3 + $0x28] sm:$0xff] %vm2894_vm7, %v3189_v56  ;;  %v3188_v44 = vmax.f32 %v3156_v57, 0.0  ;;  %v3439_v57 = vld [vmem:[%s17646_s5 + $0xb0] sm:$0xff] }
 0x542   :  { %7345 = vmatprep.subr.mxu0 %v3439_v57  ;;  %v13007_v57 = vld [vmem:[%s17641_s0 + $0xd0] sm:$0xff] }
 0x543   :  { %3198 = vst.msk [vmem:[#allocation3 + $0x20] sm:$0xff] %vm2894_vm7, %v3188_v44  ;;  %7346 = vmatpush3.msra.mxu0 %v3423_v43 }
 0x544   :  { %7347 = vmatprep.subr.mxu0 %v3438_v14 }
 0x545   :  { %7348 = vmatpush3.msra.mxu0 %v3422_v10  ;;  %v3696_v10 = vrot.slane %v13007_v57, 1 }
 0x546   :  { %7349 = vmatprep.subr.mxu0 %v3437_v7 }
 0x547   :  { %7350 = vmatpush3.msra.mxu0 %v3421_v39 }
 0x54a   :  { %v3209_v58 = vld [vmem:[#allocation3 + $0x20] ss:$2 sm:$0xff]  ;;  %v3219_v3 = vld [vmem:[#allocation3 + $0x21] ss:$2 sm:$0xff] }
 0x54b   :  { %v12846_v32 = vmax.f32 %v3209_v58, %v3219_v3  ;;  %v3436_v58 = vld [vmem:[%s17646_s5 + $0x98] sm:$0xff] }
 0x54c   :  { %v7566_v53 = vpop.f32.mrf.mxu1  ;;  %7351 = vmatprep.subr.mxu0 %v3436_v58 }
 0x54d   :  { %v3171_v6 = vadd.f32 %v7566_v53, %v12802_v9  ;;  %v3250_v40 = vrot.slane %v12846_v32, 2  ;;  %v12866_v21 = vrot.slane %v12846_v32, 1  ;;  %v3282_v45 = vrot.slane %v12846_v32, 4 }
 0x54e   :  { %v3165_v4 = vpop.f32.mrf.mxu1  ;;  %v3266_v12 = vrot.slane %v12846_v32, 3  ;;  %v3298_v62 = vrot.slane %v12846_v32, 5  ;;  %v3314_v52 = vrot.slane %v12846_v32, 6 }
 0x54f   :  { %v3191_v16 = vmax.f32 %v3171_v6, 0.0  ;;  %v3166_v33 = vadd.f32 %v12802_v9, %v3165_v4  ;;  %v3251_v35 = vsel %vm18532_vm3, %v3248_v60, %v3250_v40  ;;  %v3236_v11 = vsel %vm18533_vm11, %v3233_v48, %v12866_v21  ;;  %vm18536_vm3 = vmmov %vm18534_vm8  ;;  %v3420_v48 = vld [vmem:[%s17646_s5 + $0x18] sm:$0xff]  ;;  %v3418_v6 = vld [vmem:[%s17646_s5 + $0x8] sm:$0xff] }
 0x550   :  { %v8098_v51 = vpack.i.bf16 %v3249_v47, %v3251_v35  ;;  %v8093_v18 = vpack.i.bf16 %v3234_v27, %v3236_v11  ;;  %v3283_v49 = vsel %vm18534_vm8, %v3280_v38, %v3282_v45  ;;  %v3267_v46 = vsel %vm18535_vm9, %v3264_v25, %v3266_v12  ;;  %vm18537_vm11 = vmmov %vm18535_vm9  ;;  %7352 = vmatpush3.msra.mxu0 %v3420_v48 }
 0x551   :  { %3201 = vst.msk [vmem:[#allocation3 + $0x38] sm:$0xff] %vm2894_vm7, %v3191_v16  ;;  %v3190_v22 = vmax.f32 %v3166_v33, 0.0  ;;  %v3281_v20 = vsel %vm18536_vm3, %v3279_v63, %v3280_v38  ;;  %v3265_v8 = vsel %vm18537_vm11, %v3263_v2, %v3264_v25  ;;  %vm18538_vm8 = vcmask 1042432   ;;  %v3434_v38 = vld [vmem:[%s17646_s5 + $0x88] sm:$0xff]  ;;  %7353 = vmatprep.subr.mxu0 %v3435_v28  ;;  %v3433_v25 = vld [vmem:[%s17646_s5 + $0x80] sm:$0xff] }
 0x552   :  { %8099 = vrot.lane.b32.xlu0 %v8098_v51, %s17816_s10  ;;  %8094 = vrot.lane.b32.xlu1 %v8093_v18, %s17829_s29  ;;  %v8108_v23 = vpack.i.bf16 %v3281_v20, %v3283_v49  ;;  %v8103_v30 = vpack.i.bf16 %v3265_v8, %v3267_v46  ;;  %v3299_v56 = vsel %vm18538_vm8, %v3296_v19, %v3298_v62  ;;  %vm18539_vm9 = vmmov %vm18538_vm8  ;;  %vm17799_vm3 = vcmask 126976   ;;  %v3417_v16 = vld [vmem:[%s17646_s5] sm:$0xff] }
 0x553   :  { %3200 = vst.msk [vmem:[#allocation3 + $0x30] sm:$0xff] %vm2894_vm7, %v3190_v22  ;;  %v3297_v24 = vsel %vm18539_vm9, %v3295_v29, %v3296_v19  ;;  %vm18540_vm11 = vcmask 1046528   ;;  %v3311_v4 = vrot.slane %v12839_v41, 6  ;;  %vm18541_vm8 = vcmask 1041408  }
 0x554   :  { %v8113_v44 = vpack.i.bf16 %v3297_v24, %v3299_v56  ;;  %v3315_v47 = vsel %vm18541_vm8, %v3312_v54, %v3314_v52  ;;  %v3330_v27 = vrot.slane %v12846_v32, 7  ;;  %vm18542_vm9 = vmmov %vm18541_vm8  ;;  %v3328_v35 = vrot.slane %v12828_v15, 7  ;;  %v13002_v56 = vld [vmem:[%s17641_s0 + $0xc8] sm:$0xff] }
 0x555   :  { %v3313_v33 = vsel %vm18542_vm9, %v3311_v4, %v3312_v54  ;;  %vm18545_vm9 = vcmask 1042432  }
 0x556   :  { %8109 = vrot.lane.b32.xlu0 %v8108_v23, %s17808_s15  ;;  %8104 = vrot.lane.b32.xlu1 %v8103_v30, %s17812_s16  ;;  %v8128_v11 = vpack.i.bf16 %v3313_v33, %v3315_v47  ;;  %v13062_v33 = vld [vmem:[%s17641_s0 + $0xe0] sm:$0xff] }
 0x559   :  { %v7569_v59 = vpop.f32.mrf.mxu1 }
 0x55a   :  { %v3211_v13 = vld [vmem:[#allocation3 + $0x30] ss:$2 sm:$0xff]  ;;  %v3221_v26 = vld [vmem:[#allocation3 + $0x31] ss:$2 sm:$0xff]  ;;  %v3181_v55 = vadd.f32 %v7569_v59, %v12802_v9  ;;  %8114 = vrot.lane.b32.xlu1 %v8113_v44, %s17806_s11 }
 0x55b   :  { %v12940_v36 = vmax.f32 %v3211_v13, %v3221_v26  ;;  %v3175_v34 = vpop.f32.mrf.mxu1 }
 0x55c   :  { %v3193_v3 = vmax.f32 %v3181_v55, 0.0  ;;  %v3176_v60 = vadd.f32 %v12802_v9, %v3175_v34  ;;  %v3419_v9 = vld [vmem:[%s17646_s5 + $0x10] sm:$0xff] }
 0x55d   :  { %v3343_v42 = vrot.slane %v12940_v36, 1  ;;  %7354 = vmatpush3.msra.mxu0 %v3419_v9  ;;  %v3300_v22 = vrot.slane %v12940_v36, 5  ;;  %v3252_v49 = vrot.slane %v12940_v36, 2  ;;  %v3332_v8 = vrot.slane %v12940_v36, 7 }
 0x55e   :  { %3204 = vst.msk [vmem:[#allocation3 + $0x48] sm:$0x1f] %vm17799_vm3, %v3193_v3  ;;  %v3192_v53 = vmax.f32 %v3176_v60, 0.0  ;;  %7355 = vmatprep.subr.mxu0 %v3434_v38  ;;  %v3268_v19 = vrot.slane %v12940_v36, 3  ;;  %v3284_v13 = vrot.slane %v12940_v36, 4  ;;  %v3814_v60 = vrot.slane %v13002_v56, 2 }
 0x55f   :  { %v3344_v1 = vsel %vm18540_vm11, %v12866_v21, %v3343_v42  ;;  %7356 = vmatpush3.msra.mxu0 %v3418_v6  ;;  %vm18543_vm11 = vcmask 1040384   ;;  %v3301_v23 = vsel %vm18545_vm9, %v3298_v62, %v3300_v22  ;;  %v3316_v48 = vrot.slane %v12940_v36, 6  ;;  %v13042_v38 = vld [vmem:[%s17641_s0 + $0xd8] sm:$0xff] }
 0x560   :  { %3202 = vst.msk [vmem:[#allocation3 + $0x40] sm:$0xff] %vm2894_vm7, %v3192_v53  ;;  %v8118_v61 = vpack.i.bf16 %v3343_v42, %v3344_v1  ;;  %7357 = vmatprep.subr.mxu0 %v3433_v25  ;;  %v3331_v17 = vsel %vm18543_vm11, %v3328_v35, %v3330_v27  ;;  %vm18544_vm8 = vmmov %vm18543_vm11  ;;  %v3934_v1 = vrot.slane %v13007_v57, 3  ;;  %v4052_v6 = vrot.slane %v13002_v56, 4 }
 0x561   :  { %7358 = vmatpush3.msra.mxu0 %v3417_v16  ;;  %v3329_v51 = vsel %vm18544_vm8, %v3327_v37, %v3328_v35  ;;  %vm18546_vm11 = vmmov %vm18545_vm9  ;;  %vm18547_vm8 = vcmask 1045504   ;;  %vm18549_vm9 = vcmask 1040384   ;;  %v3698_v4 = vrot.slane %v13042_v38, 1  ;;  %v13067_v35 = vld [vmem:[%s17641_s0 + $0xe8] sm:$0xff] }
 0x562   :  { %8119 = vrot.lane.b32.xlu0 %v8118_v61, %s17829_s29  ;;  %v8138_v2 = vpack.i.bf16 %v3329_v51, %v3331_v17  ;;  %v3253_v0 = vsel %vm18547_vm8, %v3250_v40, %v3252_v49  ;;  %vm18548_vm3 = vmmov %vm18547_vm8  ;;  %v3695_v40 = vrot.slane %v13002_v56, 1  ;;  %v4055_v47 = vrot.slane %v13042_v38, 4 }
 0x563   :  { %v3817_v16 = vrot.slane %v13042_v38, 2  ;;  %v3700_v37 = vrot.slane %v13062_v33, 1  ;;  %v3702_v17 = vrot.slane %v13067_v35, 1  ;;  %v3936_v51 = vrot.slane %v13042_v38, 3 }
 0x566   :  { %8129 = vrot.lane.b32.xlu0 %v8128_v11, %s17802_s25 }
 0x567   :  { %v3213_v18 = vld [vmem:[#allocation3 + $0x40] ss:$2 sm:$0x3f]  ;;  %v3223_v63 = vld [vmem:[#allocation3 + $0x41] ss:$2 sm:$0x3f] }
 0x568   :  { %v3228_v5 = vmax.f32 %v3213_v18, %v3223_v63  ;;  %v4172_v18 = vrot.slane %v13007_v57, 5  ;;  %v4174_v63 = vrot.slane %v13042_v38, 5 }
 0x56a   :  { %8139 = vrot.lane.b32.xlu0 %v8138_v2, %s17800_s20  ;;  %v3367_v46 = vrot.slane %v3228_v5, 5  ;;  %v3352_v50 = vrot.slane %v3228_v5, 2  ;;  %v3377_v31 = vrot.slane %v3228_v5, 7  ;;  %v3357_v20 = vrot.slane %v3228_v5, 3 }
 0x56b   :  { %v3362_v44 = vrot.slane %v3228_v5, 4  ;;  %v3372_v34 = vrot.slane %v3228_v5, 6 }
 0x56c   :  { %v3368_v30 = vsel %vm18546_vm11, %v3300_v22, %v3367_v46  ;;  %v3353_v29 = vsel %vm18548_vm3, %v3252_v49, %v3352_v50  ;;  %v3378_v24 = vsel %vm18549_vm9, %v3332_v8, %v3377_v31  ;;  %vm18550_vm11 = vcmask 1044480   ;;  %vm18551_vm3 = vmmov %vm18549_vm9 }
 0x56d   :  { %v8148_v43 = vpack.i.bf16 %v3368_v30, %v3301_v23  ;;  %v8123_v62 = vpack.i.bf16 %v3353_v29, %v3253_v0  ;;  %v3358_v14 = vsel %vm18550_vm11, %v3268_v19, %v3357_v20  ;;  %v3333_v59 = vsel %vm18551_vm3, %v3330_v27, %v3332_v8  ;;  %vm18552_vm8 = vmmov %vm18550_vm11 }
 0x56e   :  { %v3269_v7 = vsel %vm18552_vm8, %v3266_v12, %v3268_v19  ;;  %v8158_v26 = vpack.i.bf16 %v3378_v24, %v3333_v59  ;;  %vm18553_vm9 = vcmask 1043456   ;;  %vm18554_vm11 = vcmask 1046528  }
 0x56f   :  { %8149 = vrot.lane.b32.xlu0 %v8148_v43, %s17806_s11  ;;  %8124 = vrot.lane.b32.xlu1 %v8123_v62, %s17816_s10  ;;  %v8133_v55 = vpack.i.bf16 %v3358_v14, %v3269_v7  ;;  %v3363_v39 = vsel %vm18553_vm9, %v3284_v13, %v3362_v44  ;;  %v3697_v58 = vsel %vm18554_vm11, %v3695_v40, %v3696_v10  ;;  %vm18555_vm3 = vmmov %vm18553_vm9  ;;  %v3815_v12 = vrot.slane %v13007_v57, 2  ;;  %s18617_s11 = smov 42   ;;  %s19406_s10 = smov 56  }
 0x570   :  { %v3285_v3 = vsel %vm18555_vm3, %v3282_v45, %v3284_v13  ;;  %vm18556_vm8 = vcmask 1041408   ;;  %vm18557_vm9 = vcmask 1045504   ;;  %v3933_v45 = vrot.slane %v13002_v56, 3 }
 0x571   :  { %v8143_v42 = vpack.i.bf16 %v3363_v39, %v3285_v3  ;;  %v3373_v28 = vsel %vm18556_vm8, %v3316_v48, %v3372_v34  ;;  %v3816_v53 = vsel %vm18557_vm9, %v3814_v60, %v3815_v12  ;;  %vm18558_vm11 = vmmov %vm18556_vm8  ;;  %vm18560_vm3 = vcmask 1044480  }
 0x572   :  { %v3317_v9 = vsel %vm18558_vm11, %v3314_v52, %v3316_v48  ;;  %v3935_v61 = vsel %vm18560_vm3, %v3933_v45, %v3934_v1  ;;  %v4053_v52 = vrot.slane %v13007_v57, 4  ;;  %vm18562_vm8 = vcmask 1043456  }
 0x573   :  { %8159 = vrot.lane.b32.xlu0 %v8158_v26, %s17800_s20  ;;  %8134 = vrot.lane.b32.xlu1 %v8133_v55, %s17812_s16  ;;  %v8153_v54 = vpack.i.bf16 %v3373_v28, %v3317_v9  ;;  %vm18563_vm9 = vcmask 1046528   ;;  %vm18565_vm11 = vmmov %vm18562_vm8  ;;  %vm18566_vm3 = vcmask 1045504   ;;  %v3819_v46 = vrot.slane %v13062_v33, 2  ;;  %s18591_s20 = smov 30  }
 0x574   :  { %v4054_v27 = vsel %vm18562_vm8, %v4052_v6, %v4053_v52  ;;  %v13056_v25 = vsel %vm18563_vm9, %v3696_v10, %v3698_v4  ;;  %v13076_v11 = vsel %vm18566_vm3, %v3815_v12, %v3817_v16  ;;  %vm18567_vm8 = vmmov %vm18563_vm9  ;;  %vm18568_vm9 = vcmask 1044480   ;;  %v13141_v10 = vld [vmem:[%s17641_s0 + $0xf0] sm:$0xff] }
 0x575   :  { %v13088_v2 = vsel %vm18567_vm8, %v3700_v37, %v3702_v17  ;;  %v13091_v5 = vsel %vm18568_vm9, %v3934_v1, %v3936_v51  ;;  %vm18570_vm3 = vmmov %vm18567_vm8  ;;  %v3821_v50 = vrot.slane %v13067_v35, 2  ;;  %v4171_v31 = vrot.slane %v13002_v56, 5 }
 0x576   :  { %v13101_v49 = vsel %vm18570_vm3, %v3698_v4, %v3700_v37  ;;  %v4291_v20 = vrot.slane %v13007_v57, 6  ;;  %v4293_v8 = vrot.slane %v13042_v38, 6  ;;  %vm18572_vm8 = vcmask 1045504  }
 0x577   :  { %3742 = vrot.lane.b32.xlu0 %v3697_v58, %s8636_s23  ;;  %8144 = vrot.lane.b32.xlu1 %v8143_v42, %s17808_s15  ;;  %v13113_v19 = vsel %vm18572_vm8, %v3819_v46, %v3821_v50  ;;  %vm18575_vm3 = vmmov %vm18572_vm8  ;;  %v3938_v29 = vrot.slane %v13062_v33, 3  ;;  %v3940_v43 = vrot.slane %v13067_v35, 3  ;;  %v4290_v62 = vrot.slane %v13002_v56, 6  ;;  %s18622_s15 = smov 45  }
 0x578   :  { %v13123_v0 = vsel %vm18575_vm3, %v3817_v16, %v3819_v46  ;;  %vm18577_vm8 = vcmask 1044480   ;;  %v4410_v44 = vrot.slane %v13007_v57, 7  ;;  %v4412_v40 = vrot.slane %v13042_v38, 7 }
 0x579   :  { %v13133_v24 = vsel %vm18577_vm8, %v3938_v29, %v3940_v43  ;;  %vm18580_vm3 = vmmov %vm18577_vm8  ;;  %v3704_v13 = vrot.slane %v13141_v10, 1  ;;  %v4409_v26 = vrot.slane %v13002_v56, 7  ;;  %vm18582_vm8 = vcmask 1046528  }
 0x57a   :  { %v13150_v7 = vsel %vm18580_vm3, %v3936_v51, %v3938_v29  ;;  %v4176_v34 = vrot.slane %v13062_v33, 5  ;;  %v4057_v58 = vrot.slane %v13062_v33, 4  ;;  %vm18585_vm3 = vcmask 1043456  }
 0x57b   :  { %3861 = vrot.lane.b32.xlu0 %v3816_v53, %s18559_s17  ;;  %8154 = vrot.lane.b32.xlu1 %v8153_v54, %s17802_s25  ;;  %v13159_v55 = vsel %vm18582_vm8, %v3702_v17, %v3704_v13  ;;  %v3823_v60 = vrot.slane %v13141_v10, 2  ;;  %v4059_v12 = vrot.slane %v13067_v35, 4  ;;  %vm18587_vm8 = vcmask 1045504   ;;  %v13193_v53 = vld [vmem:[%s17641_s0 + $0xf8] sm:$0xff]  ;;  %s18600_s25 = smov 36  }
 0x57c   :  { %v13171_v3 = vsel %vm18585_vm3, %v4055_v47, %v4057_v58  ;;  %v4295_v28 = vrot.slane %v13062_v33, 6  ;;  %v3706_v9 = vrot.slane %v13193_v53, 1  ;;  %v3942_v1 = vrot.slane %v13141_v10, 3 }
 0x57d   :  { %v13184_v48 = vsel %vm18587_vm8, %v3821_v50, %v3823_v60  ;;  %v4178_v54 = vrot.slane %v13067_v35, 5  ;;  %vm18592_vm8 = vcmask 1044480   ;;  %v4414_v6 = vrot.slane %v13062_v33, 7 }
 0x57e   :  { %v3825_v4 = vrot.slane %v13193_v53, 2  ;;  %v3944_v37 = vrot.slane %v13193_v53, 3 }
 0x57f   :  { %3980 = vrot.lane.b32.xlu0 %v3935_v61, %s18561_s18  ;;  %3241 = vrot.lane.b32.xlu1 %v12866_v21, %s17829_s29  ;;  %v13073_v21 = vsel %vm18565_vm11, %v4053_v52, %v4055_v47  ;;  %vm18569_vm11 = vcmask 1042432   ;;  %v13217_v61 = vsel %vm18592_vm8, %v3940_v43, %v3942_v1  ;;  %vm18597_vm8 = vcmask 1043456   ;;  %v13301_v43 = vld [vmem:[%s17641_s0 + $0x108] sm:$0xff] }
 0x580   :  { %v13098_v22 = vsel %vm18569_vm11, %v4172_v18, %v4174_v63  ;;  %vm18573_vm9 = vmmov %vm18569_vm11  ;;  %vm18574_vm11 = vcmask 1041408  }
 0x581   :  { %v4173_v23 = vsel %vm18573_vm9, %v4171_v31, %v4172_v18  ;;  %v13120_v30 = vsel %vm18574_vm11, %v4291_v20, %v4293_v8  ;;  %vm18578_vm9 = vmmov %vm18574_vm11  ;;  %vm18579_vm11 = vcmask 1040384   ;;  %v13289_v31 = vld [vmem:[%s17641_s0 + $0x100] sm:$0xff] }
 0x582   :  { %v4292_v14 = vsel %vm18578_vm9, %v4290_v62, %v4291_v20  ;;  %v13147_v59 = vsel %vm18579_vm11, %v4410_v44, %v4412_v40  ;;  %vm18583_vm9 = vmmov %vm18579_vm11  ;;  %vm18584_vm11 = vcmask 1042432  }
 0x583   :  { %4099 = vrot.lane.b32.xlu0 %v4054_v27, %s18564_s26  ;;  %3744 = vrot.lane.b32.xlu1 %v13056_v25, %s8636_s23  ;;  %v4411_v39 = vsel %vm18583_vm9, %v4409_v26, %v4410_v44  ;;  %v13168_v56 = vsel %vm18584_vm11, %v4174_v63, %v4176_v34  ;;  %vm18588_vm9 = vmmov %vm18585_vm3  ;;  %vm18589_vm11 = vcmask 1041408   ;;  %vm18590_vm3 = vcmask 1046528  }
 0x584   :  { %v13187_v42 = vsel %vm18588_vm9, %v4057_v58, %v4059_v12  ;;  %v13208_v45 = vsel %vm18590_vm3, %v3704_v13, %v3706_v9  ;;  %vm18593_vm9 = vcmask 1042432   ;;  %vm18595_vm3 = vcmask 1045504  }
 0x585   :  { %v13240_v47 = vsel %vm18595_vm3, %v3823_v60, %v3825_v4  ;;  %v4061_v27 = vrot.slane %v13141_v10, 4  ;;  %v4063_v63 = vrot.slane %v13193_v53, 4  ;;  %vm18601_vm3 = vmmov %vm18597_vm8 }
 0x587   :  { %4101 = vrot.lane.b32.xlu0 %v13073_v21, %s18564_s26  ;;  %3863 = vrot.lane.b32.xlu1 %v13076_v11, %s18559_s17  ;;  %v13249_v16 = vsel %vm18597_vm8, %v4059_v12, %v4061_v27  ;;  %v13279_v46 = vsel %vm18601_vm3, %v4061_v27, %v4063_v63  ;;  %vm18602_vm8 = vcmask 1040384  }
 0x58b   :  { %3748 = vrot.lane.b32.xlu0 %v13088_v2, %s8636_s23  ;;  %3982 = vrot.lane.b32.xlu1 %v13091_v5, %s18561_s18 }
 0x58f   :  { %4220 = vrot.lane.b32.xlu0 %v13098_v22, %s18571_s12  ;;  %3746 = vrot.lane.b32.xlu1 %v13101_v49, %s8636_s23 }
 0x593   :  { %3867 = vrot.lane.b32.xlu0 %v13113_v19, %s18559_s17  ;;  %4218 = vrot.lane.b32.xlu1 %v4173_v23, %s18571_s12 }
 0x597   :  { %4339 = vrot.lane.b32.xlu0 %v13120_v30, %s18576_s13  ;;  %3865 = vrot.lane.b32.xlu1 %v13123_v0, %s18559_s17 }
 0x59b   :  { %3986 = vrot.lane.b32.xlu0 %v13133_v24, %s18561_s18  ;;  %4337 = vrot.lane.b32.xlu1 %v4292_v14, %s18576_s13 }
 0x59f   :  { %4458 = vrot.lane.b32.xlu0 %v13147_v59, %s18581_s19  ;;  %3984 = vrot.lane.b32.xlu1 %v13150_v7, %s18561_s18 }
 0x5a3   :  { %3750 = vrot.lane.b32.xlu0 %v13159_v55, %s8636_s23  ;;  %4456 = vrot.lane.b32.xlu1 %v4411_v39, %s18581_s19  ;;  %v3710_v39 = vrot.slane %v13301_v43, 1 }
 0x5a7   :  { %4222 = vrot.lane.b32.xlu0 %v13168_v56, %s18571_s12  ;;  %4103 = vrot.lane.b32.xlu1 %v13171_v3, %s18564_s26 }
 0x5ab   :  { %4603 = vrot.lane.b32.xlu0 %v13056_v25, %s18586_s21  ;;  %4529 = vrot.lane.b32.xlu1 %v13007_v57, %s8643_s24  ;;  %v13200_v57 = vsel %vm18589_vm11, %v4293_v8, %v4295_v28  ;;  %vm18594_vm11 = vcmask 1040384   ;;  %v4297_v25 = vrot.slane %v13067_v35, 6  ;;  %v3708_v8 = vrot.slane %v13289_v31, 1 }
 0x5ac   :  { %v13230_v52 = vsel %vm18594_vm11, %v4412_v40, %v4414_v6  ;;  %vm18599_vm11 = vcmask 1044480  }
 0x5ad   :  { %v13268_v18 = vsel %vm18599_vm11, %v3942_v1, %v3944_v37  ;;  %vm18604_vm11 = vcmask 392192  }
 0x5ae   :  { %vm18605_vm3 = vmmov %vm18604_vm11 }
 0x5af   :  { %3869 = vrot.lane.b32.xlu0 %v13184_v48, %s18559_s17  ;;  %4105 = vrot.lane.b32.xlu1 %v13187_v42, %s18564_s26 }
 0x5b3   :  { %4341 = vrot.lane.b32.xlu0 %v13200_v57, %s18576_s13  ;;  %4531 = vrot.lane.b32.xlu1 %v13042_v38, %s8643_s24  ;;  %v13222_v38 = vsel %vm18593_vm9, %v4176_v34, %v4178_v54  ;;  %vm18598_vm9 = vcmask 1041408   ;;  %v4180_v34 = vrot.slane %v13141_v10, 5 }
 0x5b7   :  { %4677 = vrot.lane.b32.xlu0 %v13076_v11, %s18591_s20  ;;  %3752 = vrot.lane.b32.xlu1 %v13208_v45, %s8636_s23  ;;  %v13254_v11 = vsel %vm18598_vm9, %v4295_v28, %v4297_v25  ;;  %vm18603_vm9 = vcmask 1046528  }
 0x5b8   :  { %v13312_v26 = vsel %vm18603_vm9, %v3706_v9, %v3708_v8 }
 0x5bb   :  { %3988 = vrot.lane.b32.xlu0 %v13217_v61, %s18561_s18  ;;  %4224 = vrot.lane.b32.xlu1 %v13222_v38, %s18571_s12 }
 0x5bf   :  { %4460 = vrot.lane.b32.xlu0 %v13230_v52, %s18581_s19  ;;  %4605 = vrot.lane.b32.xlu1 %v13101_v49, %s18586_s21 }
 0x5c3   :  { %4751 = vrot.lane.b32.xlu0 %v13091_v5, %s18596_s22  ;;  %3871 = vrot.lane.b32.xlu1 %v13240_v47, %s18559_s17  ;;  %v4416_v5 = vrot.slane %v13067_v35, 7 }
 0x5c4   :  { %v8100_v17 = vpop.permute.xlu0 %8099  ;;  %v8095_v51 = vpop.permute.xlu1 %8094 }
 0x5c5   :  { %v13284_v50 = vsel %vm18602_vm8, %v4414_v6, %v4416_v5  ;;  %v8096_v20 = vunpack.i.l.bf16 %v8095_v51  ;;  %v8102_v23 = vunpack.i.h.bf16 %v8100_v17  ;;  %vm18606_vm8 = vmmov %vm18603_vm9  ;;  %vm18607_vm9 = vcmask 1042432  }
 0x5c7   :  { %4107 = vrot.lane.b32.xlu0 %v13249_v16, %s18564_s26  ;;  %4343 = vrot.lane.b32.xlu1 %v13254_v11, %s18576_s13  ;;  %v3383_v14 = vsel %vm2894_vm7, %v12828_v15, %v8096_v20 }
 0x5c8   :  { %v8110_v49 = vpop.permute.xlu0 %8109 }
 0x5c9   :  { %v8111_v58 = vunpack.i.l.bf16 %v8110_v49 }
 0x5cb   :  { %4533 = vrot.lane.b32.xlu0 %v13062_v33, %s8643_s24  ;;  %4679 = vrot.lane.b32.xlu1 %v13123_v0, %s18591_s20  ;;  %v8105_v33 = vpop.permute.xlu1 %8104  ;;  %v8101_v0 = vunpack.i.l.bf16 %v8100_v17  ;;  %v13327_v17 = vsel %vm18606_vm8, %v3708_v8, %v3710_v39  ;;  %vm18611_vm8 = vcmask 392192  }
 0x5cc   :  { %v8107_v44 = vunpack.i.h.bf16 %v8105_v33  ;;  %v8106_v40 = vunpack.i.l.bf16 %v8105_v33  ;;  %v13333_v33 = vsel %vm18607_vm9, %v4178_v54, %v4180_v34 }
 0x5cd   :  { %v3386_v60 = vsel %vm2915_vm12, %v3383_v14, %v8101_v0 }
 0x5ce   :  { %v3389_v1 = vsel %vm18605_vm3, %v3386_v60, %v8106_v40  ;;  %vm18610_vm3 = vcmask 1045504  }
 0x5cf   :  { %4825 = vrot.lane.b32.xlu0 %v13073_v21, %s18600_s25  ;;  %3990 = vrot.lane.b32.xlu1 %v13268_v18, %s18561_s18  ;;  %v8097_v21 = vunpack.i.h.bf16 %v8095_v51  ;;  %v8115_v13 = vpop.permute.xlu1 %8114 }
 0x5d0   :  { %v8117_v6 = vunpack.i.h.bf16 %v8115_v13 }
 0x5d1   :  { %v3382_v62 = vsel %vm2894_vm7, %v12839_v41, %v8097_v21  ;;  %v8112_v41 = vunpack.i.h.bf16 %v8110_v49  ;;  %v3392_v21 = vsel %vm2958_vm13, %v3389_v1, %v8111_v58  ;;  %v3827_v58 = vrot.slane %v13289_v31, 2 }
 0x5d2   :  { %v3385_v15 = vsel %vm2915_vm12, %v3382_v62, %v8102_v23 }
 0x5d3   :  { %4109 = vrot.lane.b32.xlu0 %v13279_v46, %s18564_s26  ;;  %4462 = vrot.lane.b32.xlu1 %v13284_v50, %s18581_s19  ;;  %v3388_v28 = vsel %vm18604_vm11, %v3385_v15, %v8107_v44  ;;  %vm18608_vm11 = vmmov %vm18607_vm9 }
 0x5d4   :  { %v13296_v29 = vpop.permute.xlu0 %8119  ;;  %v3391_v51 = vsel %vm2958_vm13, %v3388_v28, %v8112_v41  ;;  %vm18612_vm9 = vmmov %vm18610_vm3 }
 0x5d5   :  { %v3394_v20 = vsel %vm2980_vm0, %v3391_v51, %v8117_v6  ;;  %v8121_v15 = vunpack.i.l.bf16 %v13296_v29 }
 0x5d7   :  { %4535 = vrot.lane.b32.xlu0 %v13067_v35, %s8643_s24  ;;  %4753 = vrot.lane.b32.xlu1 %v13150_v7, %s18596_s22  ;;  %v8116_v7 = vunpack.i.l.bf16 %v8115_v13 }
 0x5d8   :  { %v8130_v12 = vpop.permute.xlu0 %8129 }
 0x5d9   :  { %v8132_v27 = vunpack.i.h.bf16 %v8130_v12  ;;  %v8131_v9 = vunpack.i.l.bf16 %v8130_v12  ;;  %v3395_v62 = vsel %vm2980_vm0, %v3392_v21, %v8116_v7 }
 0x5db   :  { %4827 = vrot.lane.b32.xlu0 %v13171_v3, %s18600_s25  ;;  %3754 = vrot.lane.b32.xlu1 %v13312_v26, %s8636_s23  ;;  %v4182_v3 = vrot.slane %v13193_v53, 5  ;;  %v3398_v8 = vsel %vm17869_vm1, %v3395_v62, %v8131_v9  ;;  %v3397_v14 = vsel %vm17869_vm1, %v3394_v20, %v8132_v27  ;;  %v13374_v27 = vsel %vm18610_vm3, %v3825_v4, %v3827_v58 }
 0x5dc   :  { %v8140_v49 = vpop.permute.xlu0 %8139  ;;  %v4299_v9 = vrot.slane %v13141_v10, 6  ;;  %vm18614_vm3 = vcmask 1041408  }
 0x5dd   :  { %v8142_v23 = vunpack.i.h.bf16 %v8140_v49  ;;  %v8141_v0 = vunpack.i.l.bf16 %v8140_v49  ;;  %v13353_v40 = vsel %vm18608_vm11, %v4180_v34, %v4182_v3  ;;  %v8122_v34 = vunpack.i.h.bf16 %v13296_v29  ;;  %vm18613_vm11 = vmmov %vm18611_vm8 }
 0x5de   :  { %v3403_v29 = vsel %vm2894_vm7, %v12846_v32, %v8121_v15 }
 0x5df   :  { %3756 = vrot.lane.b32.xlu0 %v13327_v17, %s8636_s23  ;;  %4226 = vrot.lane.b32.xlu1 %v13333_v33, %s18571_s12  ;;  %v13346_v54 = vsel %vm17867_vm10, %v3398_v8, %v8141_v0  ;;  %v3400_v44 = vsel %vm17867_vm10, %v3397_v14, %v8142_v23  ;;  %v13400_v8 = vsel %vm18614_vm3, %v4297_v25, %v4299_v9  ;;  %v4301_v14 = vrot.slane %v13193_v53, 6 }
 0x5e0   :  { %3520 = vmatprep.mubr.f32.mxu0 %v13346_v54 }
 0x5e1   :  { %3521 = vmatmul.mubr.f32.vlgmr.msra.gmra.mxu0 %v3400_v44  ;;  %v13355_v13 = vpop.permute.xlu0 %8149  ;;  %v8125_v41 = vpop.permute.xlu1 %8124 }
 0x5e2   :  { %v8126_v28 = vunpack.i.l.bf16 %v8125_v41  ;;  %v8127_v1 = vunpack.i.h.bf16 %v8125_v41 }
 0x5e3   :  { %4228 = vrot.lane.b32.xlu0 %v13353_v40, %s18571_s12  ;;  %4607 = vrot.lane.b32.xlu1 %v13088_v2, %s18586_s21  ;;  %v3829_v2 = vrot.slane %v13301_v43, 2 }
 0x5e5   :  { %v13363_v60 = vpop.permute.xlu0 %8159  ;;  %v8135_v12 = vpop.permute.xlu1 %8134  ;;  %v13393_v0 = vsel %vm18612_vm9, %v3827_v58, %v3829_v2  ;;  %v8152_v58 = vunpack.i.h.bf16 %v13355_v13  ;;  %vm18616_vm9 = vmmov %vm18613_vm11 }
 0x5e6   :  { %v8136_v6 = vunpack.i.l.bf16 %v8135_v12  ;;  %v8137_v7 = vunpack.i.h.bf16 %v8135_v12 }
 0x5e7   :  { %4609 = vrot.lane.b32.xlu0 %v13159_v55, %s18586_s21  ;;  %4899 = vrot.lane.b32.xlu1 %v13098_v22, %s18609_s27  ;;  %v3404_v55 = vsel %vm2894_vm7, %v12940_v36, %v8122_v34  ;;  %v3405_v22 = vsel %vm2915_vm12, %v3403_v29, %v8126_v28 }
 0x5e8   :  { %v3406_v23 = vsel %vm2915_vm12, %v3404_v55, %v8127_v1  ;;  %v3407_v4 = vsel %vm18611_vm8, %v3405_v22, %v8136_v6  ;;  %v8161_v1 = vunpack.i.l.bf16 %v13363_v60  ;;  %vm18615_vm8 = vmmov %vm18614_vm3 }
 0x5e9   :  { %v13379_v51 = vpop.permute.xlu0 %3742  ;;  %v8145_v49 = vpop.permute.xlu1 %8144  ;;  %v3408_v36 = vsel %vm18613_vm11, %v3406_v23, %v8137_v7  ;;  %v13418_v29 = vsel %vm18615_vm8, %v4299_v9, %v4301_v14  ;;  %v8162_v23 = vunpack.i.h.bf16 %v13363_v60  ;;  %v3946_v60 = vrot.slane %v13289_v31, 3 }
 0x5ea   :  { %v8147_v21 = vunpack.i.h.bf16 %v8145_v49  ;;  %v8146_v20 = vunpack.i.l.bf16 %v8145_v49  ;;  %vm18618_vm11 = vcmask 1044480   ;;  %vm18620_vm8 = vcmask 1040384  }
 0x5eb   :  { %4901 = vrot.lane.b32.xlu0 %v13168_v56, %s18609_s27  ;;  %3873 = vrot.lane.b32.xlu1 %v13374_v27, %s18559_s17  ;;  %v8151_v56 = vunpack.i.l.bf16 %v13355_v13  ;;  %vm18619_vm3 = vmmov %vm18618_vm11 }
 0x5ec   :  { %v3409_v62 = vsel %vm2958_vm13, %v3407_v4, %v8146_v20  ;;  %v3410_v44 = vsel %vm2958_vm13, %v3408_v36, %v8147_v21 }
 0x5ed   :  { %v13405_v41 = vpop.permute.xlu0 %3861  ;;  %v8155_v15 = vpop.permute.xlu1 %8154  ;;  %v3411_v25 = vsel %vm2980_vm0, %v3409_v62, %v8151_v56  ;;  %v3412_v13 = vsel %vm2980_vm0, %v3410_v44, %v8152_v58  ;;  %v17822_v58 = vrot.slane %v13301_v43, 3 }
 0x5ee   :  { %v8157_v12 = vunpack.i.h.bf16 %v8155_v15  ;;  %v8156_v34 = vunpack.i.l.bf16 %v8155_v15 }
 0x5ef   :  { %3875 = vrot.lane.b32.xlu0 %v13393_v0, %s18559_s17  ;;  %4345 = vrot.lane.b32.xlu1 %v13400_v8, %s18576_s13 }
 0x5f0   :  { %v3413_v7 = vsel %vm17869_vm1, %v3411_v25, %v8156_v34  ;;  %v3414_v21 = vsel %vm17869_vm1, %v3412_v13, %v8157_v12  ;;  %v4065_v25 = vrot.slane %v13289_v31, 4 }
 0x5f1   :  { %v13421_v49 = vpop.permute.xlu0 %3980  ;;  %v3242_v55 = vpop.permute.xlu1 %3241  ;;  %v3415_v22 = vsel %vm17867_vm10, %v3413_v7, %v8161_v1  ;;  %v3416_v62 = vsel %vm17867_vm10, %v3414_v21, %v8162_v23  ;;  %v13531_v23 = vld [vmem:[%s17641_s0 + $0x110] sm:$0xff] }
 0x5f2   :  { %v3384_v4 = vsel %vm2894_vm7, %v12846_v32, %v3242_v55  ;;  %3525 = vmatprep.mubr.f32.mxu0 %v3415_v22  ;;  %v17819_v22 = vrot.slane %v13301_v43, 4 }
 0x5f3   :  { %v3387_v36 = vsel %vm2915_vm12, %v3384_v4, %v8126_v28  ;;  %4347 = vrot.lane.b32.xlu0 %v13418_v29, %s18576_s13  ;;  %4681 = vrot.lane.b32.xlu1 %v13113_v19, %s18591_s20 }
 0x5f4   :  { %v3390_v9 = vsel %vm18616_vm9, %v3387_v36, %v8136_v6  ;;  %3526 = vmatmul.mubr.f32.gmra.mxu0 %v13346_v54  ;;  %v13452_v6 = vsel %vm18618_vm11, %v3944_v37, %v3946_v60  ;;  %v17821_v37 = vrot.slane %v13193_v53, 7  ;;  %vm18621_vm9 = vmmov %vm18620_vm8  ;;  %vm18623_vm11 = vcmask 1043456  }
 0x5f5   :  { %3530 = vmatprep.mubr.f32.mxu0 %v3416_v62  ;;  %v13437_v44 = vpop.permute.xlu0 %4099  ;;  %v13439_v32 = vpop.permute.xlu1 %3744  ;;  %v3393_v28 = vsel %vm2958_vm13, %v3390_v9, %v8146_v20  ;;  %v4418_v20 = vrot.slane %v13141_v10, 7  ;;  %v13508_v55 = vsel %vm18623_vm11, %v4063_v63, %v4065_v25  ;;  %v13545_v9 = vld [vmem:[%s17641_s0 + $0x118] sm:$0xff] }
 0x5f6   :  { %v3396_v15 = vsel %vm2980_vm0, %v3393_v28, %v8151_v56  ;;  %v17818_v62 = vrot.slane %v13545_v9, 1 }
 0x5f7   :  { %4683 = vrot.lane.b32.xlu0 %v13184_v48, %s18591_s20  ;;  %4973 = vrot.lane.b32.xlu1 %v13120_v30, %s18617_s11  ;;  %v3399_v19 = vsel %vm17869_vm1, %v3396_v15, %v8156_v34  ;;  %v13467_v30 = vsel %vm18619_vm3, %v3946_v60, %v17822_v58  ;;  %v13472_v48 = vsel %vm18620_vm8, %v4416_v5, %v4418_v20  ;;  %vm18624_vm3 = vmmov %vm18623_vm11  ;;  %vm18626_vm8 = vcmask 1046528  }
 0x5f8   :  { %v3402_v54 = vsel %vm17867_vm10, %v3399_v19, %v8161_v1  ;;  %v4184_v60 = vrot.slane %v13289_v31, 5  ;;  %vm18629_vm11 = vcmask 1042432   ;;  %v17820_v19 = vrot.slane %v13301_v43, 5 }
 0x5f9   :  { %v13456_v56 = vpop.permute.xlu0 %4101  ;;  %v13458_v12 = vpop.permute.xlu1 %3863  ;;  %3531 = vmatmul.mubr.f32.gmra.mxu0 %v3402_v54  ;;  %vm18781_vm10 = vcmask 244736  }
 0x5fb   :  { %4975 = vrot.lane.b32.xlu0 %v13200_v57, %s18617_s11  ;;  %3992 = vrot.lane.b32.xlu1 %v13452_v6, %s18561_s18  ;;  %v13486_v57 = vsel %vm18621_vm9, %v4418_v20, %v17821_v37  ;;  %vm18628_vm9 = vmmov %vm18626_vm8 }
 0x5fd   :  { %v13475_v34 = vpop.permute.xlu0 %3748  ;;  %v13477_v1 = vpop.permute.xlu1 %3982 }
 0x5ff   :  { %3994 = vrot.lane.b32.xlu0 %v13467_v30, %s18561_s18  ;;  %4464 = vrot.lane.b32.xlu1 %v13472_v48, %s18581_s19 }
 0x601   :  { %v13488_v35 = vpop.permute.xlu0 %4220  ;;  %v13490_v5 = vpop.permute.xlu1 %3746 }
 0x603   :  { %4466 = vrot.lane.b32.xlu0 %v13486_v57, %s18581_s19  ;;  %4755 = vrot.lane.b32.xlu1 %v13133_v24, %s18596_s22 }
 0x605   :  { %v13497_v7 = vpop.permute.xlu0 %3867  ;;  %v13499_v13 = vpop.permute.xlu1 %4218 }
 0x607   :  { %4757 = vrot.lane.b32.xlu0 %v13217_v61, %s18596_s22  ;;  %5047 = vrot.lane.b32.xlu1 %v13147_v59, %s18622_s15  ;;  %v13522_v59 = vsel %vm18624_vm3, %v4065_v25, %v17819_v22  ;;  %vm18630_vm3 = vmmov %vm18629_vm11 }
 0x609   :  { %v13511_v24 = vpop.permute.xlu0 %4339  ;;  %v13513_v21 = vpop.permute.xlu1 %3865 }
 0x60b   :  { %5049 = vrot.lane.b32.xlu0 %v13230_v52, %s18622_s15  ;;  %4111 = vrot.lane.b32.xlu1 %v13508_v55, %s18564_s26  ;;  %v3712_v52 = vrot.slane %v13531_v23, 1 }
 0x60d   :  { %v13524_v61 = vpop.permute.xlu0 %3986  ;;  %v13526_v63 = vpop.permute.xlu1 %4337 }
 0x60f   :  { %4113 = vrot.lane.b32.xlu0 %v13522_v59, %s18564_s26  ;;  %4537 = vrot.lane.b32.xlu1 %v13141_v10, %s8643_s24  ;;  %v13554_v10 = vsel %vm18626_vm8, %v3710_v39, %v3712_v52  ;;  %v13574_v39 = vsel %vm18629_vm11, %v4182_v3, %v4184_v60  ;;  %vm18633_vm8 = vcmask 1045504   ;;  %vm18637_vm11 = vcmask 1041408  }
 0x611   :  { %v13538_v4 = vpop.permute.xlu0 %4458  ;;  %v13540_v36 = vpop.permute.xlu1 %3984 }
 0x612   :  { %18625 = vst [vmem:[#allocation21_spill] sm:$0xff] %v13538_v4 }
 0x613   :  { %4539 = vrot.lane.b32.xlu0 %v13193_v53, %s8643_s24  ;;  %4829 = vrot.lane.b32.xlu1 %v13187_v42, %s18600_s25  ;;  %v13569_v42 = vsel %vm18628_vm9, %v3712_v52, %v17818_v62  ;;  %v3831_v52 = vrot.slane %v13531_v23, 2  ;;  %vm18636_vm9 = vmmov %vm18633_vm8 }
 0x615   :  { %v13558_v28 = vpop.permute.xlu0 %3750  ;;  %v13560_v15 = vpop.permute.xlu1 %4456 }
 0x616   :  { %18627 = vst [vmem:[#allocation23_spill] sm:$0xff] %v13558_v28 }
 0x617   :  { %4831 = vrot.lane.b32.xlu0 %v13249_v16, %s18600_s25  ;;  %3758 = vrot.lane.b32.xlu1 %v13554_v10, %s8636_s23  ;;  %v13588_v16 = vsel %vm18630_vm3, %v4184_v60, %v17820_v19  ;;  %v13610_v60 = vsel %vm18633_vm8, %v3829_v2, %v3831_v52  ;;  %v17823_v19 = vrot.slane %v13545_v9, 2  ;;  %v17824_v2 = vrot.slane %v13301_v43, 6  ;;  %vm18639_vm3 = vmmov %vm18637_vm11 }
 0x618   :  { %vm18645_vm8 = vcmask 1044480  }
 0x619   :  { %v13577_v54 = vpop.permute.xlu0 %4222  ;;  %v13579_v20 = vpop.permute.xlu1 %4103 }
 0x61b   :  { %3760 = vrot.lane.b32.xlu0 %v13569_v42, %s8636_s23  ;;  %4230 = vrot.lane.b32.xlu1 %v13574_v39, %s18571_s12 }
 0x61d   :  { %v13590_v25 = vpop.permute.xlu0 %4603  ;;  %v13592_v3 = vpop.permute.xlu1 %4529 }
 0x61f   :  { %4232 = vrot.lane.b32.xlu0 %v13588_v16, %s18571_s12  ;;  %4611 = vrot.lane.b32.xlu1 %v13208_v45, %s18586_s21  ;;  %v4303_v45 = vrot.slane %v13289_v31, 6 }
 0x621   :  { %v13599_v62 = vpop.permute.xlu0 %3869  ;;  %v13601_v22 = vpop.permute.xlu1 %4105 }
 0x622   :  { %18631 = vst [vmem:[#allocation38_spill] sm:$0xff] %v13599_v62  ;;  %18632 = vst [vmem:[#allocation40_spill] sm:$0xff] %v13601_v22 }
 0x623   :  { %4613 = vrot.lane.b32.xlu0 %v13312_v26, %s18586_s21  ;;  %4903 = vrot.lane.b32.xlu1 %v13222_v38, %s18609_s27  ;;  %v13625_v38 = vsel %vm18636_vm9, %v3831_v52, %v17823_v19  ;;  %v13630_v26 = vsel %vm18637_vm11, %v4301_v14, %v4303_v45  ;;  %v3950_v19 = vrot.slane %v13531_v23, 3  ;;  %vm18647_vm9 = vmmov %vm18645_vm8  ;;  %vm18649_vm11 = vcmask 1040384  }
 0x625   :  { %v13614_v37 = vpop.permute.xlu0 %4341  ;;  %v13616_v58 = vpop.permute.xlu1 %4531 }
 0x626   :  { %18634 = vst [vmem:[#allocation75_spill] sm:$0xff] %v13614_v37  ;;  %18635 = vst [vmem:[#allocation5_spill] sm:$0xff] %v13616_v58 }
 0x627   :  { %4905 = vrot.lane.b32.xlu0 %v13333_v33, %s18609_s27  ;;  %3877 = vrot.lane.b32.xlu1 %v13610_v60, %s18559_s17  ;;  %v13644_v33 = vsel %vm18639_vm3, %v4303_v45, %v17824_v2  ;;  %v18644_v45 = vrot.slane %v13301_v43, 3  ;;  %vm18652_vm3 = vmmov %vm18649_vm11 }
 0x629   :  { %v13633_v62 = vpop.permute.xlu0 %4677  ;;  %v13635_v28 = vpop.permute.xlu1 %3752  ;;  %v13666_v2 = vsel %vm18645_vm8, %v18644_v45, %v3950_v19  ;;  %vm18657_vm8 = vcmask 1043456  }
 0x62a   :  { %18638 = vst [vmem:[#allocation80_spill] sm:$0xff] %v13635_v28 }
 0x62b   :  { %3879 = vrot.lane.b32.xlu0 %v13625_v38, %s18559_s17  ;;  %4349 = vrot.lane.b32.xlu1 %v13630_v26, %s18576_s13 }
 0x62d   :  { %v13646_v52 = vpop.permute.xlu0 %3988  ;;  %v13648_v14 = vpop.permute.xlu1 %4224 }
 0x62e   :  { %18640 = vst [vmem:[#allocation8_spill] sm:$0xff] %v13646_v52  ;;  %18641 = vst [vmem:[#allocation44_spill] sm:$0xff] %v13648_v14  ;;  %v17825_v52 = vrot.slane %v13545_v9, 3 }
 0x62f   :  { %4351 = vrot.lane.b32.xlu0 %v13644_v33, %s18576_s13  ;;  %4685 = vrot.lane.b32.xlu1 %v13240_v47, %s18591_s20  ;;  %v4422_v47 = vrot.slane %v13289_v31, 7 }
 0x631   :  { %v13655_v28 = vpop.permute.xlu0 %4460  ;;  %v13657_v58 = vpop.permute.xlu1 %4605 }
 0x632   :  { %18642 = vst [vmem:[#allocation85_spill] sm:$0xff] %v13655_v28  ;;  %18643 = vst [vmem:[#allocation22_spill] sm:$0xff] %v13657_v58  ;;  %v17826_v58 = vrot.slane %v13301_v43, 7 }
 0x633   :  { %4687 = vrot.lane.b32.xlu0 %v13374_v27, %s18591_s20  ;;  %4977 = vrot.lane.b32.xlu1 %v13254_v11, %s18617_s11  ;;  %v13681_v11 = vsel %vm18647_vm9, %v3950_v19, %v17825_v52  ;;  %v18648_v27 = vrot.slane %v13193_v53, 7  ;;  %vm18660_vm9 = vmmov %vm18657_vm8 }
 0x635   :  { %v13670_v14 = vpop.permute.xlu0 %4751  ;;  %v13672_v28 = vpop.permute.xlu1 %3871  ;;  %v13686_v45 = vsel %vm18649_vm11, %v18648_v27, %v4422_v47  ;;  %v4069_v27 = vrot.slane %v13531_v23, 4  ;;  %vm17864_vm11 = vmmov 0  }
 0x636   :  { %18646 = vst [vmem:[#allocation25_spill] sm:$0xff] %v13672_v28 }
 0x637   :  { %4979 = vrot.lane.b32.xlu0 %v13400_v8, %s18617_s11  ;;  %3996 = vrot.lane.b32.xlu1 %v13666_v2, %s18561_s18  ;;  %v13700_v8 = vsel %vm18652_vm3, %v4422_v47, %v17826_v58  ;;  %v18656_v47 = vrot.slane %v13301_v43, 4  ;;  %vm18667_vm3 = vcmask 1046528  }
 0x639   :  { %v13689_v37 = vpop.permute.xlu0 %4107  ;;  %v13691_v28 = vpop.permute.xlu1 %4343  ;;  %v13722_v58 = vsel %vm18657_vm8, %v18656_v47, %v4069_v27  ;;  %vm18670_vm8 = vmmov %vm18667_vm3 }
 0x63a   :  { %18650 = vst [vmem:[#allocation48_spill] sm:$0xff] %v13689_v37  ;;  %18651 = vst [vmem:[#allocation83_spill] sm:$0xff] %v13691_v28 }
 0x63b   :  { %3998 = vrot.lane.b32.xlu0 %v13681_v11, %s18561_s18  ;;  %4468 = vrot.lane.b32.xlu1 %v13686_v45, %s18581_s19 }
 0x63d   :  { %v13702_v53 = vpop.permute.xlu0 %4533  ;;  %v13704_v19 = vpop.permute.xlu1 %4679 }
 0x63e   :  { %18653 = vst [vmem:[#allocation39_spill] sm:$0xff] %v13702_v53  ;;  %18654 = vst [vmem:[#allocation43_spill] sm:$0xff] %v13704_v19  ;;  %v17833_v19 = vrot.slane %v13545_v9, 4 }
 0x63f   :  { %4470 = vrot.lane.b32.xlu0 %v13700_v8, %s18581_s19  ;;  %4759 = vrot.lane.b32.xlu1 %v13268_v18, %s18596_s22  ;;  %v17827_v18 = vmov 0.0  }
 0x640   :  { %7570 = vmatprep.subr.mxu1 %v17827_v18 }
 0x641   :  { %v13711_v52 = vpop.permute.xlu0 %4825  ;;  %v13713_v37 = vpop.permute.xlu1 %3990 }
 0x642   :  { %18655 = vst [vmem:[#allocation78_spill] sm:$0xff] %v13713_v37 }
 0x643   :  { %4761 = vrot.lane.b32.xlu0 %v13452_v6, %s18596_s22  ;;  %5051 = vrot.lane.b32.xlu1 %v13284_v50, %s18622_s15  ;;  %v13737_v50 = vsel %vm18660_vm9, %v4069_v27, %v17833_v19  ;;  %v3562_v6 = vld [vmem:[%s17647_s7 + $0x18] sm:$0xff]  ;;  %v18663_v27 = vmov 0.0   ;;  %v3560_v19 = vld [vmem:[%s17647_s7 + $0x8] sm:$0xff]  ;;  %vm18672_vm9 = vcmask 1042432  }
 0x644   :  { %7571 = vmatpush3.msra.mxu1 %v3562_v6  ;;  %7578 = vmatprep.mubr.msk.f32.mxu1 %vm17864_vm11, %v18663_v27  ;;  %vm18768_vm11 = vcmask 97280  }
 0x645   :  { %v13726_v53 = vpop.permute.xlu0 %4109  ;;  %v13728_v28 = vpop.permute.xlu1 %4462  ;;  %7572 = vmatprep.subr.mxu1 %v18663_v27 }
 0x646   :  { %18658 = vst [vmem:[#allocation7_spill] sm:$0xff] %v13726_v53  ;;  %18659 = vst [vmem:[#allocation84_spill] sm:$0xff] %v13728_v28  ;;  %v3561_v53 = vld [vmem:[%s17647_s7 + $0x10] sm:$0xff]  ;;  %v4188_v28 = vrot.slane %v13531_v23, 5 }
 0x647   :  { %5053 = vrot.lane.b32.xlu0 %v13472_v48, %s18622_s15  ;;  %4115 = vrot.lane.b32.xlu1 %v13722_v58, %s18564_s26  ;;  %v13749_v48 = vld [vmem:[%s17641_s0 + $0x120] sm:$0xff] }
 0x648   :  { %v3716_v37 = vrot.slane %v13749_v48, 1  ;;  %7573 = vmatpush3.msra.mxu1 %v3561_v53  ;;  %v13785_v53 = vld [vmem:[%s17642_s1 + $0x28] sm:$0xff] }
 0x649   :  { %v13742_v47 = vpop.permute.xlu0 %4535  ;;  %v13744_v18 = vpop.permute.xlu1 %4753  ;;  %7574 = vmatprep.subr.mxu1 %v18663_v27 }
 0x64a   :  { %18661 = vst [vmem:[#allocation10_spill] sm:$0xff] %v13742_v47  ;;  %18662 = vst [vmem:[#allocation42_spill] sm:$0xff] %v13744_v18  ;;  %v13772_v47 = vld [vmem:[%s17641_s0 + $0x128] sm:$0xff]  ;;  %7575 = vmatpush3.msra.mxu1 %v3560_v19 }
 0x64b   :  { %4117 = vrot.lane.b32.xlu0 %v13737_v50, %s18564_s26  ;;  %4541 = vrot.lane.b32.xlu1 %v13289_v31, %s8643_s24  ;;  %v3559_v31 = vld [vmem:[%s17647_s7] sm:$0xff]  ;;  %v17835_v19 = vrot.slane %v13772_v47, 1 }
 0x64c   :  { %7576 = vmatprep.subr.mxu1 %v18663_v27 }
 0x64d   :  { %v13765_v6 = vpop.permute.xlu0 %4827  ;;  %v13767_v18 = vpop.permute.xlu1 %3754  ;;  %7577 = vmatpush3.msra.mxu1 %v3559_v31  ;;  %v17836_v31 = vrot.slane %v13545_v9, 5 }
 0x64e   :  { %18664 = vst [vmem:[#allocation89_spill] sm:$0xff] %v13765_v6  ;;  %18665 = vst [vmem:[#allocation121_spill] sm:$0xff] %v13767_v18  ;;  %v18666_v18 = vrot.slane %v13545_v9, 1  ;;  %7581 = vmatprep.subr.mxu1 %v13785_v53 }
 0x64f   :  { %4543 = vrot.lane.b32.xlu0 %v13301_v43, %s8643_s24  ;;  %4833 = vrot.lane.b32.xlu1 %v13279_v46, %s18600_s25  ;;  %v13807_v46 = vsel %vm18670_vm8, %v3716_v37, %v17835_v19  ;;  %v3835_v19 = vrot.slane %v13749_v48, 2  ;;  %vm18681_vm8 = vcmask 1045504  }
 0x650   :  { %v13790_v6 = vsel %vm18667_vm3, %v18666_v18, %v3716_v37  ;;  %v18671_v18 = vrot.slane %v13301_v43, 5  ;;  %vm18675_vm3 = vmmov %vm18672_vm9 }
 0x651   :  { %v13795_v22 = vpop.permute.xlu0 %3756  ;;  %v13797_v4 = vpop.permute.xlu1 %4226  ;;  %v13826_v37 = vsel %vm18675_vm3, %v4188_v28, %v17836_v31  ;;  %vm18687_vm3 = vcmask 1041408  }
 0x652   :  { %18668 = vst [vmem:[#allocation24_spill] sm:$0xff] %v13795_v22  ;;  %18669 = vst [vmem:[#allocation46_spill] sm:$0xff] %v13797_v4  ;;  %v13812_v27 = vsel %vm18672_vm9, %v18671_v18, %v4188_v28  ;;  %v18680_v28 = vrot.slane %v13545_v9, 2 }
 0x653   :  { %4835 = vrot.lane.b32.xlu0 %v13508_v55, %s18600_s25  ;;  %3762 = vrot.lane.b32.xlu1 %v13790_v6, %s8636_s23  ;;  %18676 = vst [vmem:[#allocation41_spill] sm:$0xff] %v13826_v37  ;;  %vm18684_vm9 = vmmov %vm18681_vm8 }
 0x654   :  { %v13848_v31 = vsel %vm18681_vm8, %v18680_v28, %v3835_v19  ;;  %vm18689_vm8 = vmmov %vm18687_vm3 }
 0x655   :  { %v13815_v22 = vpop.permute.xlu0 %4228  ;;  %v13817_v4 = vpop.permute.xlu1 %4607 }
 0x656   :  { %18673 = vst [vmem:[#allocation87_spill] sm:$0xff] %v13815_v22  ;;  %18674 = vst [vmem:[#allocation27_spill] sm:$0xff] %v13817_v4 }
 0x657   :  { %3764 = vrot.lane.b32.xlu0 %v13807_v46, %s8636_s23  ;;  %4234 = vrot.lane.b32.xlu1 %v13812_v27, %s18571_s12 }
 0x659   :  { %v13828_v55 = vpop.permute.xlu0 %4609  ;;  %v13830_v18 = vpop.permute.xlu1 %4899 }
 0x65a   :  { %18677 = vst [vmem:[#allocation47_spill] sm:$0xff] %v13828_v55 }
 0x65b   :  { %4236 = vrot.lane.b32.xlu0 %v13826_v37, %s18571_s12  ;;  %4615 = vrot.lane.b32.xlu1 %v13327_v17, %s18586_s21  ;;  %v17838_v37 = vrot.slane %v13772_v47, 2  ;;  %v4307_v17 = vrot.slane %v13531_v23, 6 }
 0x65d   :  { %v13837_v22 = vpop.permute.xlu0 %4901  ;;  %v13839_v4 = vpop.permute.xlu1 %3873 }
 0x65e   :  { %18678 = vst [vmem:[#allocation82_spill] sm:$0xff] %v13837_v22  ;;  %18679 = vst [vmem:[#allocation9_spill] sm:$0xff] %v13839_v4 }
 0x65f   :  { %4617 = vrot.lane.b32.xlu0 %v13554_v10, %s18586_s21  ;;  %4907 = vrot.lane.b32.xlu1 %v13353_v40, %s18609_s27  ;;  %v13863_v40 = vsel %vm18684_vm9, %v3835_v19, %v17838_v37  ;;  %v18686_v10 = vrot.slane %v13301_v43, 6  ;;  %v3954_v37 = vrot.slane %v13749_v48, 3  ;;  %vm18695_vm9 = vcmask 1044480  }
 0x660   :  { %18685 = vst [vmem:[#allocation12_spill] sm:$0xff] %v13863_v40 }
 0x661   :  { %v13852_v55 = vpop.permute.xlu0 %3875  ;;  %v13854_v22 = vpop.permute.xlu1 %4345  ;;  %v13868_v28 = vsel %vm18687_vm3, %v18686_v10, %v4307_v17  ;;  %vm18698_vm3 = vmmov %vm18695_vm9 }
 0x662   :  { %18682 = vst [vmem:[#allocation120_spill] sm:$0xff] %v13852_v55  ;;  %18683 = vst [vmem:[#allocation88_spill] sm:$0xff] %v13854_v22  ;;  %v17840_v55 = vrot.slane %v13545_v9, 6 }
 0x663   :  { %4909 = vrot.lane.b32.xlu0 %v13574_v39, %s18609_s27  ;;  %3881 = vrot.lane.b32.xlu1 %v13848_v31, %s18559_s17 }
 0x664   :  { %v13882_v39 = vsel %vm18689_vm8, %v4307_v17, %v17840_v55  ;;  %v18694_v17 = vrot.slane %v13545_v9, 3  ;;  %vm18701_vm8 = vcmask 1040384  }
 0x665   :  { %v13871_v4 = vpop.permute.xlu0 %4347  ;;  %v13873_v22 = vpop.permute.xlu1 %4681  ;;  %18690 = vst [vmem:[#allocation93_spill] sm:$0xff] %v13882_v39 }
 0x666   :  { %18688 = vst [vmem:[#allocation52_spill] sm:$0xff] %v13871_v4  ;;  %v13904_v55 = vsel %vm18695_vm9, %v18694_v17, %v3954_v37  ;;  %vm18703_vm9 = vmmov %vm18701_vm8 }
 0x667   :  { %3883 = vrot.lane.b32.xlu0 %v13863_v40, %s18559_s17  ;;  %4353 = vrot.lane.b32.xlu1 %v13868_v28, %s18576_s13 }
 0x669   :  { %v13884_v19 = vpop.permute.xlu0 %4683  ;;  %v13886_v10 = vpop.permute.xlu1 %4973 }
 0x66a   :  { %18691 = vst [vmem:[#allocation123_spill] sm:$0xff] %v13884_v19 }
 0x66b   :  { %4355 = vrot.lane.b32.xlu0 %v13882_v39, %s18576_s13  ;;  %4689 = vrot.lane.b32.xlu1 %v13393_v0, %s18591_s20  ;;  %v17842_v39 = vrot.slane %v13772_v47, 3  ;;  %v4426_v0 = vrot.slane %v13531_v23, 7 }
 0x66d   :  { %v13893_v4 = vpop.permute.xlu0 %4975  ;;  %v13895_v40 = vpop.permute.xlu1 %3992 }
 0x66e   :  { %18692 = vst [vmem:[#allocation26_spill] sm:$0xff] %v13893_v4  ;;  %18693 = vst [vmem:[#allocation50_spill] sm:$0xff] %v13895_v40 }
 0x66f   :  { %4691 = vrot.lane.b32.xlu0 %v13610_v60, %s18591_s20  ;;  %4981 = vrot.lane.b32.xlu1 %v13418_v29, %s18617_s11  ;;  %v13919_v29 = vsel %vm18698_vm3, %v3954_v37, %v17842_v39  ;;  %v18700_v60 = vrot.slane %v13301_v43, 7  ;;  %vm18709_vm3 = vcmask 1043456  }
 0x670   :  { %18699 = vst [vmem:[#allocation29_spill] sm:$0xff] %v13919_v29 }
 0x671   :  { %v13908_v19 = vpop.permute.xlu0 %3994  ;;  %v13910_v4 = vpop.permute.xlu1 %4464  ;;  %v13924_v17 = vsel %vm18701_vm8, %v18700_v60, %v4426_v0  ;;  %v4073_v60 = vrot.slane %v13749_v48, 4  ;;  %vm18712_vm8 = vmmov %vm18709_vm3 }
 0x672   :  { %18696 = vst [vmem:[#allocation91_spill] sm:$0xff] %v13908_v19  ;;  %18697 = vst [vmem:[#allocation152_spill] sm:$0xff] %v13910_v4  ;;  %v17844_v19 = vrot.slane %v13545_v9, 7 }
 0x673   :  { %4983 = vrot.lane.b32.xlu0 %v13630_v26, %s18617_s11  ;;  %4000 = vrot.lane.b32.xlu1 %v13904_v55, %s18561_s18 }
 0x674   :  { %v13938_v26 = vsel %vm18703_vm9, %v4426_v0, %v17844_v19  ;;  %v18708_v0 = vrot.slane %v13545_v9, 4  ;;  %vm18718_vm9 = vcmask 1046528  }
 0x675   :  { %v13927_v40 = vpop.permute.xlu0 %4466  ;;  %v13929_v4 = vpop.permute.xlu1 %4755  ;;  %18704 = vst [vmem:[#allocation194_spill] sm:$0xff] %v13938_v26 }
 0x676   :  { %18702 = vst [vmem:[#allocation172_spill] sm:$0xff] %v13927_v40  ;;  %v13960_v19 = vsel %vm18709_vm3, %v18708_v0, %v4073_v60  ;;  %vm18721_vm3 = vmmov %vm18718_vm9 }
 0x677   :  { %4002 = vrot.lane.b32.xlu0 %v13919_v29, %s18561_s18  ;;  %4472 = vrot.lane.b32.xlu1 %v13924_v17, %s18581_s19 }
 0x679   :  { %v13940_v43 = vpop.permute.xlu0 %4757  ;;  %v13942_v37 = vpop.permute.xlu1 %5047 }
 0x67a   :  { %18705 = vst [vmem:[#allocation45_spill] sm:$0xff] %v13940_v43 }
 0x67b   :  { %4474 = vrot.lane.b32.xlu0 %v13938_v26, %s18581_s19  ;;  %4763 = vrot.lane.b32.xlu1 %v13467_v30, %s18596_s22  ;;  %v17846_v26 = vrot.slane %v13772_v47, 4 }
 0x67d   :  { %v13949_v39 = vpop.permute.xlu0 %5049  ;;  %v13951_v29 = vpop.permute.xlu1 %4111 }
 0x67e   :  { %18706 = vst [vmem:[#allocation51_spill] sm:$0xff] %v13949_v39  ;;  %18707 = vst [vmem:[#allocation86_spill] sm:$0xff] %v13951_v29 }
 0x67f   :  { %4765 = vrot.lane.b32.xlu0 %v13666_v2, %s18596_s22  ;;  %5055 = vrot.lane.b32.xlu1 %v13486_v57, %s18622_s15  ;;  %v13974_v57 = vsel %vm18712_vm8, %v4073_v60, %v17846_v26  ;;  %v13997_v26 = vld [vmem:[%s17641_s0 + $0x138] sm:$0xff]  ;;  %vm18724_vm8 = vcmask 1042432  }
 0x680   :  { %18713 = vst [vmem:[#allocation92_spill] sm:$0xff] %v13974_v57 }
 0x681   :  { %v13963_v30 = vpop.permute.xlu0 %4113  ;;  %v13965_v40 = vpop.permute.xlu1 %4537 }
 0x682   :  { %18710 = vst [vmem:[#allocation11_spill] sm:$0xff] %v13963_v30  ;;  %18711 = vst [vmem:[#allocation122_spill] sm:$0xff] %v13965_v40  ;;  %v13983_v30 = vld [vmem:[%s17641_s0 + $0x130] sm:$0xff] }
 0x683   :  { %5057 = vrot.lane.b32.xlu0 %v13686_v45, %s18622_s15  ;;  %4119 = vrot.lane.b32.xlu1 %v13960_v19, %s18564_s26  ;;  %v3720_v45 = vrot.slane %v13983_v30, 1 }
 0x685   :  { %v13976_v2 = vpop.permute.xlu0 %4539  ;;  %v13978_v0 = vpop.permute.xlu1 %4829 }
 0x686   :  { %18714 = vst [vmem:[#allocation14_spill] sm:$0xff] %v13976_v2  ;;  %v17848_v2 = vrot.slane %v13997_v26, 1 }
 0x687   :  { %4121 = vrot.lane.b32.xlu0 %v13974_v57, %s18564_s26  ;;  %4545 = vrot.lane.b32.xlu1 %v13531_v23, %s8643_s24  ;;  %v18717_v57 = vrot.slane %v13772_v47, 1 }
 0x689   :  { %v13990_v29 = vpop.permute.xlu0 %4831  ;;  %v13992_v60 = vpop.permute.xlu1 %3758  ;;  %v14006_v23 = vsel %vm18718_vm9, %v18717_v57, %v3720_v45  ;;  %v18723_v57 = vrot.slane %v13545_v9, 5  ;;  %vm18727_vm9 = vmmov %vm18724_vm8 }
 0x68a   :  { %18715 = vst [vmem:[#allocation56_spill] sm:$0xff] %v13990_v29  ;;  %18716 = vst [vmem:[#allocation170_spill] sm:$0xff] %v13992_v60  ;;  %v4192_v60 = vrot.slane %v13749_v48, 5 }
 0x68b   :  { %4547 = vrot.lane.b32.xlu0 %v13545_v9, %s8643_s24  ;;  %4837 = vrot.lane.b32.xlu1 %v13522_v59, %s18600_s25  ;;  %v14021_v59 = vsel %vm18721_vm3, %v3720_v45, %v17848_v2  ;;  %v3839_v2 = vrot.slane %v13983_v30, 2  ;;  %vm18733_vm3 = vcmask 1045504  }
 0x68c   :  { %18722 = vst [vmem:[#allocation125_spill] sm:$0xff] %v14021_v59  ;;  %v14026_v39 = vsel %vm18724_vm8, %v18723_v57, %v4192_v60  ;;  %vm18737_vm8 = vmmov %vm18733_vm3 }
 0x68d   :  { %v14010_v40 = vpop.permute.xlu0 %3760  ;;  %v14012_v29 = vpop.permute.xlu1 %4230 }
 0x68e   :  { %18719 = vst [vmem:[#allocation97_spill] sm:$0xff] %v14010_v40  ;;  %18720 = vst [vmem:[#allocation129_spill] sm:$0xff] %v14012_v29  ;;  %v17850_v40 = vrot.slane %v13772_v47, 5 }
 0x68f   :  { %4839 = vrot.lane.b32.xlu0 %v13722_v58, %s18600_s25  ;;  %3766 = vrot.lane.b32.xlu1 %v14006_v23, %s8636_s23 }
 0x690   :  { %v14040_v58 = vsel %vm18727_vm9, %v4192_v60, %v17850_v40  ;;  %v18732_v60 = vrot.slane %v13772_v47, 2  ;;  %vm18740_vm9 = vcmask 1041408  }
 0x691   :  { %v14029_v43 = vpop.permute.xlu0 %4232  ;;  %v14031_v29 = vpop.permute.xlu1 %4611  ;;  %18728 = vst [vmem:[#allocation174_spill] sm:$0xff] %v14040_v58 }
 0x692   :  { %18725 = vst [vmem:[#allocation154_spill] sm:$0xff] %v14029_v43  ;;  %18726 = vst [vmem:[#allocation28_spill] sm:$0xff] %v14031_v29  ;;  %v14062_v40 = vsel %vm18733_vm3, %v18732_v60, %v3839_v2 }
 0x693   :  { %3768 = vrot.lane.b32.xlu0 %v14021_v59, %s8636_s23  ;;  %4238 = vrot.lane.b32.xlu1 %v14026_v39, %s18571_s12  ;;  %18734 = vst [vmem:[#allocation95_spill] sm:$0xff] %v14062_v40  ;;  %vm18744_vm3 = vmmov %vm18740_vm9 }
 0x695   :  { %v14042_v45 = vpop.permute.xlu0 %4613  ;;  %v14044_v57 = vpop.permute.xlu1 %4903 }
 0x696   :  { %18729 = vst [vmem:[#allocation6_spill] sm:$0xff] %v14042_v45 }
 0x697   :  { %4240 = vrot.lane.b32.xlu0 %v14040_v58, %s18571_s12  ;;  %4619 = vrot.lane.b32.xlu1 %v13569_v42, %s18586_s21  ;;  %v17853_v58 = vrot.slane %v13997_v26, 2  ;;  %v4311_v42 = vrot.slane %v13749_v48, 6 }
 0x699   :  { %v14051_v43 = vpop.permute.xlu0 %4905  ;;  %v14053_v59 = vpop.permute.xlu1 %3877 }
 0x69a   :  { %18730 = vst [vmem:[#allocation54_spill] sm:$0xff] %v14051_v43  ;;  %18731 = vst [vmem:[#allocation181_spill] sm:$0xff] %v14053_v59 }
 0x69b   :  { %4621 = vrot.lane.b32.xlu0 %v13790_v6, %s18586_s21  ;;  %4911 = vrot.lane.b32.xlu1 %v13588_v16, %s18609_s27  ;;  %v14077_v16 = vsel %vm18737_vm8, %v3839_v2, %v17853_v58  ;;  %v18739_v6 = vrot.slane %v13545_v9, 6  ;;  %vm18749_vm8 = vcmask 1044480  }
 0x69c   :  { %18738 = vst [vmem:[#allocation31_spill] sm:$0xff] %v14077_v16 }
 0x69d   :  { %v14066_v45 = vpop.permute.xlu0 %3879  ;;  %v14068_v29 = vpop.permute.xlu1 %4349  ;;  %v14082_v60 = vsel %vm18740_vm9, %v18739_v6, %v4311_v42  ;;  %vm18753_vm9 = vmmov %vm18749_vm8 }
 0x69e   :  { %18735 = vst [vmem:[#allocation127_spill] sm:$0xff] %v14066_v45  ;;  %18736 = vst [vmem:[#allocation153_spill] sm:$0xff] %v14068_v29  ;;  %v17856_v45 = vrot.slane %v13772_v47, 6 }
 0x69f   :  { %4913 = vrot.lane.b32.xlu0 %v13812_v27, %s18609_s27  ;;  %3885 = vrot.lane.b32.xlu1 %v14062_v40, %s18559_s17  ;;  %18741 = vst [vmem:[#allocation173_spill] sm:$0xff] %v14082_v60  ;;  %v7213_v27 = vld [vmem:[%s17648_s6] ss:$0 sm:$0xff] }
 0x6a0   :  { %v14099_v6 = vsel %vm18744_vm3, %v4311_v42, %v17856_v45  ;;  %v18748_v42 = vrot.slane %v13772_v47, 3  ;;  %vm18756_vm3 = vcmask 1040384  }
 0x6a1   :  { %v7359_v59 = vpop.f32.mrf.mxu0  ;;  %v14085_v29 = vpop.permute.xlu0 %4351  ;;  %18745 = vst [vmem:[#allocation90_spill] sm:$0xff] %v14099_v6 }
 0x6a2   :  { %18742 = vst [vmem:[#allocation49_spill] sm:$0xff] %v14085_v29  ;;  %v14087_v43 = vpop.permute.xlu1 %4685 }
 0x6a3   :  { %18743 = vst [vmem:[#allocation55_spill] sm:$0xff] %v14087_v43  ;;  %v7360_v40 = vpop.f32.mrf.mxu0  ;;  %3887 = vrot.lane.b32.xlu0 %v14077_v16, %s18559_s17  ;;  %4357 = vrot.lane.b32.xlu1 %v14082_v60, %s18576_s13  ;;  %v3958_v60 = vrot.slane %v13983_v30, 3 }
 0x6a4   :  { %v7361_v2 = vadd.f32 %v7360_v40, %v7359_v59 }
 0x6a5   :  { %v14101_v58 = vpop.permute.xlu0 %4687 }
 0x6a6   :  { %18746 = vst [vmem:[#allocation13_spill] sm:$0xff] %v14101_v58  ;;  %v3523_v29 = vadd.f32 %v7361_v2, %v7213_v27  ;;  %v14103_v43 = vpop.permute.xlu1 %4977  ;;  %v14122_v2 = vsel %vm18749_vm8, %v18748_v42, %v3958_v60  ;;  %vm18759_vm8 = vmmov %vm18756_vm3  ;;  %v17866_v58 = vrot.slane %v13997_v26, 4 }
 0x6a7   :  { %4359 = vrot.lane.b32.xlu0 %v14099_v6, %s18576_s13  ;;  %4693 = vrot.lane.b32.xlu1 %v13625_v38, %s18591_s20  ;;  %18750 = vst [vmem:[#allocation96_spill] sm:$0xff] %v14122_v2  ;;  %v17857_v38 = vrot.slane %v13997_v26, 3 }
 0x6a8   :  { %v3536_v16 = vmax.f32 %v3523_v29, 0.0  ;;  %v4430_v29 = vrot.slane %v13749_v48, 7 }
 0x6a9   :  { %v14110_v40 = vpop.permute.xlu0 %4979 }
 0x6aa   :  { %3539 = vst.msk [vmem:[#allocation4] sm:$0xff] %vm2915_vm12, %v3536_v16  ;;  %v14113_v59 = vpop.permute.xlu1 %3996 }
 0x6ab   :  { %18747 = vst [vmem:[#allocation124_spill] sm:$0xff] %v14113_v59  ;;  %4695 = vrot.lane.b32.xlu0 %v13848_v31, %s18591_s20  ;;  %4985 = vrot.lane.b32.xlu1 %v13644_v33, %s18617_s11  ;;  %v14137_v33 = vsel %vm18753_vm9, %v3958_v60, %v17857_v38  ;;  %v18755_v31 = vrot.slane %v13545_v9, 7  ;;  %vm18762_vm9 = vcmask 23552  }
 0x6ac   :  { %18754 = vst [vmem:[#allocation60_spill] sm:$0xff] %v14137_v33 }
 0x6ad   :  { %v14126_v45 = vpop.permute.xlu0 %3998  ;;  %v14142_v42 = vsel %vm18756_vm3, %v18755_v31, %v4430_v29  ;;  %vm18764_vm3 = vcmask 1043456  }
 0x6ae   :  { %18751 = vst [vmem:[#allocation30_spill] sm:$0xff] %v14126_v45  ;;  %v14128_v16 = vpop.permute.xlu1 %4468  ;;  %18757 = vst [vmem:[#allocation177_spill] sm:$0xff] %v14142_v42  ;;  %v17862_v45 = vrot.slane %v13772_v47, 7 }
 0x6af   :  { %18752 = vst [vmem:[#allocation16_spill] sm:$0xff] %v14128_v16  ;;  %4987 = vrot.lane.b32.xlu0 %v13868_v28, %s18617_s11  ;;  %4004 = vrot.lane.b32.xlu1 %v14122_v2, %s18561_s18 }
 0x6b0   :  { %v14156_v9 = vsel %vm18759_vm8, %v4430_v29, %v17862_v45  ;;  %v8610_v29 = vld [vmem:[%s17641_s0 + $0xc8] sm:$0xff]  ;;  %vm18765_vm8 = vcmask 48128  }
 0x6b1   :  { %v14145_v59 = vpop.permute.xlu0 %4470  ;;  %18760 = vst [vmem:[#allocation133_spill] sm:$0xff] %v14156_v9  ;;  %v5119_v45 = vsel %vm18762_vm9, %v8610_v29, %v13379_v51  ;;  %vm17865_vm9 = vcmask 260096  }
 0x6b2   :  { %18758 = vst [vmem:[#allocation101_spill] sm:$0xff] %v14145_v59  ;;  %v14147_v16 = vpop.permute.xlu1 %4759  ;;  %v5143_v51 = vsel %vm18765_vm8, %v5119_v45, %v13405_v41  ;;  %vm18767_vm8 = vcmask 1043456   ;;  %v14207_v45 = vld [vmem:[%s17641_s0 + $0x140] sm:$0xff] }
 0x6b3   :  { %4006 = vrot.lane.b32.xlu0 %v14137_v33, %s18561_s18  ;;  %4476 = vrot.lane.b32.xlu1 %v14142_v42, %s18581_s19  ;;  %v4077_v33 = vrot.slane %v13983_v30, 4 }
 0x6b4   :  { %v7362_v28 = vpop.f32.mrf.mxu0 }
 0x6b5   :  { %v14158_v60 = vpop.permute.xlu0 %4761  ;;  %v14202_v41 = vsel %vm18767_vm8, %v4077_v33, %v17866_v58  ;;  %vm18770_vm8 = vcmask 146432  }
 0x6b6   :  { %18761 = vst [vmem:[#allocation156_spill] sm:$0xff] %v14158_v60  ;;  %v14160_v31 = vpop.permute.xlu1 %5051  ;;  %v7363_v38 = vpop.f32.mrf.mxu0 }
 0x6b7   :  { %v7364_v59 = vadd.f32 %v7363_v38, %v7362_v28  ;;  %4478 = vrot.lane.b32.xlu0 %v14156_v9, %s18581_s19  ;;  %4767 = vrot.lane.b32.xlu1 %v13681_v11, %s18596_s22  ;;  %v18763_v9 = vrot.slane %v13772_v47, 4 }
 0x6b9   :  { %v3528_v6 = vadd.f32 %v7364_v59, %v7213_v27  ;;  %v14167_v42 = vpop.permute.xlu0 %5053  ;;  %v7365_v2 = vpop.f32.mrf.mxu0  ;;  %v14183_v60 = vsel %vm18764_vm3, %v18763_v9, %v4077_v33  ;;  %vm18766_vm3 = vcmask 72704   ;;  %v3724_v33 = vrot.slane %v14207_v45, 1 }
 0x6ba   :  { %v14174_v38 = vpop.permute.xlu1 %4115 }
 0x6bb   :  { %v3537_v28 = vmax.f32 %v3528_v6, 0.0  ;;  %4769 = vrot.lane.b32.xlu0 %v13904_v55, %s18596_s22  ;;  %5059 = vrot.lane.b32.xlu1 %v13700_v8, %s18622_s15  ;;  %v7366_v11 = vpop.f32.mrf.mxu0  ;;  %v5167_v8 = vsel %vm18766_vm3, %v5143_v51, %v13421_v49  ;;  %vm18769_vm3 = vcmask 121856  }
 0x6bc   :  { %v7367_v59 = vadd.f32 %v7366_v11, %v7365_v2  ;;  %v5191_v49 = vsel %vm18768_vm11, %v5167_v8, %v13437_v44  ;;  %v14230_v44 = vld [vmem:[%s17641_s0 + $0x148] sm:$0xff]  ;;  %vm18771_vm11 = vcmask 171008  }
 0x6bd   :  { %3540 = vst.msk [vmem:[#allocation4 + $0x8] sm:$0xff] %vm2915_vm12, %v3537_v28  ;;  %v14189_v6 = vpop.permute.xlu0 %4117  ;;  %v5215_v9 = vsel %vm18769_vm3, %v5191_v49, %v13499_v13  ;;  %v8611_v49 = vld [vmem:[%s17641_s0 + $0xd0] sm:$0xff]  ;;  %vm18773_vm3 = vcmask 23552  }
 0x6be   :  { %v3533_v55 = vadd.f32 %v7367_v59, %v7213_v27  ;;  %v14191_v29 = vpop.permute.xlu1 %4541  ;;  %v5239_v59 = vsel %vm18770_vm8, %v5215_v9, %v13526_v63  ;;  %v18774_v9 = vrot.slane %v13997_v26, 1  ;;  %vm18775_vm8 = vcmask 1046528  }
 0x6bf   :  { %5061 = vrot.lane.b32.xlu0 %v13924_v17, %s18622_s15  ;;  %4123 = vrot.lane.b32.xlu1 %v14183_v60, %s18564_s26 }
 0x6c0   :  { %v3538_v2 = vmax.f32 %v3533_v55, 0.0 }
 0x6c1   :  { %v14209_v27 = vpop.permute.xlu0 %4543 }
 0x6c2   :  { %3542 = vst.msk [vmem:[#allocation4 + $0x10] sm:$0x7f] %vm17865_vm9, %v3538_v2  ;;  %v14212_v17 = vpop.permute.xlu1 %4833  ;;  %vm18779_vm9 = vcmask 220160  }
 0x6c3   :  { %4125 = vrot.lane.b32.xlu0 %v14202_v41, %s18564_s26  ;;  %4549 = vrot.lane.b32.xlu1 %v13749_v48, %s8643_s24  ;;  %v5263_v48 = vsel %vm18771_vm11, %v5239_v59, %v13560_v15  ;;  %v5120_v15 = vsel %vm18773_vm3, %v8611_v49, %v13439_v32  ;;  %vm18776_vm11 = vcmask 48128   ;;  %v8612_v32 = vld [vmem:[%s17641_s0 + $0xe0] sm:$0xff] }
 0x6c4   :  { %v3543_v28 = vld [vmem:[#allocation4] ss:$6 sm:$0x7]  ;;  %v3545_v11 = vld [vmem:[#allocation4 + $0x1] ss:$6 sm:$0x7]  ;;  %v5287_v13 = vsel %vm1687_vm14, %v5263_v48, %v13592_v3  ;;  %v5144_v59 = vsel %vm18776_vm11, %v5120_v15, %v13458_v12  ;;  %v5122_v49 = vsel %vm18773_vm3, %v8612_v32, %v13475_v34  ;;  %vm18780_vm11 = vmmov %vm18773_vm3 }
 0x6c5   :  { %v14225_v51 = vpop.permute.xlu0 %4835  ;;  %v3546_v55 = vmax.f32 %v3543_v28, %v3545_v11  ;;  %v3548_v2 = vld [vmem:[#allocation4 + $0x2] ss:$6 sm:$0x7]  ;;  %v14250_v28 = vsel %vm18775_vm8, %v18774_v9, %v3724_v33  ;;  %v3551_v3 = vld [vmem:[#allocation4 + $0x3] ss:$6 sm:$0x7]  ;;  %v5311_v58 = vsel %vm18779_vm9, %v5287_v13, %v13590_v25 }
 0x6c6   :  { %v14234_v8 = vpop.permute.xlu1 %3762  ;;  %v3726_v11 = vrot.slane %v14230_v44, 1  ;;  %vm18778_vm8 = vcmask 72704   ;;  %vm18782_vm9 = vcmask 48128   ;;  %vm18783_vm3 = vcmask 269312  }
 0x6c7   :  { %18772 = vst [vmem:[#allocation128_spill] sm:$0xff] %v14234_v8  ;;  %4551 = vrot.lane.b32.xlu0 %v13772_v47, %s8643_s24  ;;  %4841 = vrot.lane.b32.xlu1 %v13737_v50, %s18600_s25  ;;  %v3549_v63 = vmax.f32 %v3546_v55, %v3548_v2  ;;  %v4196_v2 = vrot.slane %v13983_v30, 5  ;;  %v5168_v9 = vsel %vm18778_vm8, %v5144_v59, %v13477_v1  ;;  %vm18784_vm8 = vcmask 1046528  }
 0x6c9   :  { %v14255_v50 = vpop.permute.xlu0 %3764  ;;  %v3552_v55 = vmax.f32 %v3549_v63, %v3551_v3  ;;  %v3554_v48 = vld [vmem:[#allocation4 + $0x4] ss:$6 sm:$0x7]  ;;  %v5335_v3 = vsel %vm18781_vm10, %v5311_v58, %v13633_v62  ;;  %v3557_v13 = vld [vmem:[#allocation4 + $0x5] ss:$6 sm:$0x7] }
 0x6ca   :  { %18777 = vst [vmem:[#allocation176_spill] sm:$0xff] %v14255_v50  ;;  %v14267_v12 = vpop.permute.xlu1 %4234  ;;  %v8613_v63 = vld [vmem:[%s17641_s0 + $0xd8] sm:$0xff]  ;;  %v5359_v25 = vsel %vm18783_vm3, %v5335_v3, %v13670_v14  ;;  %v4198_v62 = vrot.slane %v13997_v26, 5  ;;  %vm18785_vm10 = vcmask 72704   ;;  %vm18789_vm3 = vcmask 97280   ;;  %v18803_v3 = vld [vmem:[#allocation40_spill] sm:$0xff] }
 0x6cb   :  { %v5121_v15 = vsel %vm18780_vm11, %v8613_v63, %v13490_v5  ;;  %4843 = vrot.lane.b32.xlu0 %v13960_v19, %s18600_s25  ;;  %3770 = vrot.lane.b32.xlu1 %v14250_v28, %s8636_s23  ;;  %v3555_v34 = vmax.f32 %v3552_v55, %v3554_v48  ;;  %v14287_v5 = vsel %vm18784_vm8, %v3724_v33, %v3726_v11  ;;  %vm18786_vm11 = vcmask 293888   ;;  %vm18790_vm8 = vmmov %vm18789_vm3 }
 0x6cc   :  { %v5145_v1 = vsel %vm18782_vm9, %v5121_v15, %v13513_v21  ;;  %v5383_v58 = vsel %vm18786_vm11, %v5359_v25, %v13711_v52  ;;  %v18787_v55 = vrot.slane %v13772_v47, 5  ;;  %vm18788_vm9 = vcmask 1042432   ;;  %v5483_v52 = vld [vmem:[%s17642_s1 + $0x20] sm:$0xff] }
 0x6cd   :  { %v5169_v19 = vsel %vm18785_vm10, %v5145_v1, %v13540_v36  ;;  %v14294_v59 = vpop.permute.xlu0 %4236  ;;  %v3558_v21 = vmax.f32 %v3555_v34, %v3557_v13  ;;  %v5192_v33 = vsel %vm18789_vm3, %v5168_v9, %v13456_v56  ;;  %v5407_v36 = vsel %vm18791_vm15, %v5383_v58, %v13830_v18  ;;  %v18805_v34 = vld [vmem:[#allocation75_spill] sm:$0xff]  ;;  %v18808_v13 = vld [vmem:[#allocation44_spill] sm:$0xff]  ;;  %v18810_v58 = vld [vmem:[#allocation85_spill] sm:$0xff] }
 0x6ce   :  { %v14299_v14 = vsel %vm18788_vm9, %v18787_v55, %v4196_v2  ;;  %v5193_v48 = vsel %vm18790_vm8, %v5169_v19, %v13579_v20  ;;  %v14307_v32 = vpop.permute.xlu1 %4615  ;;  %vm18792_vm10 = vcmask 121856   ;;  %vm18793_vm11 = vcmask 343040   ;;  %v18812_v55 = vld [vmem:[#allocation22_spill] sm:$0xff] }
 0x6cf   :  { %v5216_v63 = vsel %vm18792_vm10, %v5192_v33, %v13488_v35  ;;  %v5431_v15 = vsel %vm18793_vm11, %v5407_v36, %v13886_v10  ;;  %7579 = vmatmul.mubr.msk.f32.vlgmr.msra.gmra.mxu1 %vm2915_vm12, %v3558_v21  ;;  %3772 = vrot.lane.b32.xlu0 %v14287_v5, %s8636_s23  ;;  %vm18794_vm9 = vcmask 48128   ;;  %vm18795_vm15 = vcmask 367616   ;;  %v5482_v35 = vld [vmem:[%s17642_s1 + $0x18] sm:$0xff] }
 0x6d0   :  { %v5146_v56 = vsel %vm18794_vm9, %v5122_v49, %v13497_v7  ;;  %v5455_v20 = vsel %vm18795_vm15, %v5431_v15, %v13942_v37  ;;  %7582 = vmatpush3.msra.mxu1 %v13785_v53  ;;  %4242 = vrot.lane.b32.xlu1 %v14299_v14, %s18571_s12  ;;  %vm18796_vm3 = vcmask 1042432   ;;  %vm18797_vm8 = vcmask 146432   ;;  %v18801_v49 = vld [vmem:[#allocation21_spill] sm:$0xff] }
 0x6d1   :  { %v14332_v18 = vsel %vm18796_vm3, %v4196_v2, %v4198_v62  ;;  %v5240_v7 = vsel %vm18797_vm8, %v5216_v63, %v13511_v24  ;;  %vm18798_vm10 = vcmask 72704   ;;  %vm18799_vm11 = vcmask 121856   ;;  %7583 = vmatprep.subr.mxu1 %v5483_v52  ;;  %v14341_v37 = vpop.permute.xlu0 %4617  ;;  %vm18806_vm1 = vmmov %vm18797_vm8  ;;  %v5480_v15 = vld [vmem:[%s17642_s1 + $0x8] sm:$0xff] }
 0x6d2   :  { %v5170_v10 = vsel %vm18798_vm10, %v5146_v56, %v13524_v61  ;;  %v5217_v53 = vsel %vm18799_vm11, %v5193_v48, %v13577_v54  ;;  %vm18800_vm9 = vcmask 392192   ;;  %vm18802_vm15 = vcmask 171008   ;;  %7584 = vmatpush3.msra.mxu1 %v5483_v52  ;;  %v14349_v1 = vpop.permute.xlu1 %4907  ;;  %v5481_v61 = vld [vmem:[%s17642_s1 + $0x10] sm:$0xff]  ;;  %v18807_v54 = vld [vmem:[#allocation5_spill] sm:$0xff]  ;;  %vm18809_vm8 = vmmov %vm18799_vm11 }
 0x6d3   :  { %7593 = vmatprep.mubr.msk.f32.mxu1 %vm18800_vm9, %v5455_v20  ;;  %v5264_v9 = vsel %vm18802_vm15, %v5240_v7, %v18801_v49  ;;  %vm18804_vm3 = vcmask 97280   ;;  %v5241_v24 = vsel %vm18806_vm1, %v5217_v53, %v18805_v34  ;;  %vm18811_vm10 = vmmov %vm18802_vm15  ;;  %7585 = vmatprep.subr.mxu1 %v5482_v35  ;;  %vm18813_vm1 = vcmask 220160   ;;  %v18814_v48 = vld [vmem:[#allocation83_spill] sm:$0xff] }
 0x6d4   :  { %v5194_v2 = vsel %vm18804_vm3, %v5170_v10, %v18803_v3  ;;  %v5288_v25 = vsel %vm1687_vm14, %v5264_v9, %v18807_v54  ;;  %v5265_v21 = vsel %vm18811_vm10, %v5241_v24, %v18810_v58  ;;  %4244 = vrot.lane.b32.xlu0 %v14332_v18, %s18571_s12  ;;  %vm18815_vm11 = vcmask 146432   ;;  %v18816_v52 = vld [vmem:[#allocation39_spill] sm:$0xff]  ;;  %7586 = vmatpush3.msra.mxu1 %v5482_v35  ;;  %v18819_v10 = vld [vmem:[#allocation84_spill] sm:$0xff]  ;;  %vm18820_vm15 = vmmov %vm18811_vm10 }
 0x6d5   :  { %v5218_v19 = vsel %vm18809_vm8, %v5194_v2, %v18808_v13  ;;  %v5312_v33 = vsel %vm18813_vm1, %v5288_v25, %v18812_v55  ;;  %v5289_v63 = vsel %vm1687_vm14, %v5265_v21, %v18816_v52  ;;  %4623 = vrot.lane.b32.xlu1 %v13807_v46, %s18586_s21  ;;  %v3843_v56 = vrot.slane %v14207_v45, 2  ;;  %v18817_v20 = vld [vmem:[#allocation43_spill] sm:$0xff]  ;;  %vm18822_vm3 = vmmov %vm18813_vm1  ;;  %7587 = vmatprep.subr.mxu1 %v5481_v61  ;;  %v14380_v35 = vpop.permute.xlu0 %4909  ;;  %v18823_v3 = vld [vmem:[#allocation10_spill] sm:$0xff] }
 0x6d6   :  { %v5242_v36 = vsel %vm18815_vm11, %v5218_v19, %v18814_v48  ;;  %vm18818_vm9 = vcmask 244736   ;;  %v18821_v49 = vld [vmem:[#allocation27_spill] sm:$0xff]  ;;  %v18824_v2 = vld [vmem:[#allocation42_spill] sm:$0xff]  ;;  %vm18825_vm8 = vcmask 269312   ;;  %7588 = vmatpush3.msra.mxu1 %v5481_v61  ;;  %v14388_v54 = vpop.permute.xlu1 %3881  ;;  %v5479_v25 = vld [vmem:[%s17642_s1] sm:$0xff]  ;;  %vm18829_vm1 = vcmask 293888  }
 0x6d7   :  { %v5336_v7 = vsel %vm18818_vm9, %v5312_v33, %v18817_v20  ;;  %v5266_v53 = vsel %vm18820_vm15, %v5242_v36, %v18819_v10  ;;  %v5313_v9 = vsel %vm18822_vm3, %v5289_v63, %v18821_v49  ;;  %vm18826_vm10 = vmmov %vm18818_vm9  ;;  %18827 = vst [vmem:[#allocation53_spill] sm:$0xff] %v14388_v54  ;;  %v18828_v13 = vld [vmem:[#allocation89_spill] sm:$0xff]  ;;  %v18830_v58 = vld [vmem:[#allocation47_spill] sm:$0xff]  ;;  %7589 = vmatprep.subr.mxu1 %v5480_v15  ;;  %vm18834_vm15 = vcmask 318464  }
 0x6d8   :  { %v5290_v46 = vsel %vm1687_vm14, %v5266_v53, %v18823_v3  ;;  %v5360_v34 = vsel %vm18825_vm8, %v5336_v7, %v18824_v2  ;;  %v5337_v24 = vsel %vm18826_vm10, %v5313_v9, %v13873_v22  ;;  %vm18831_vm11 = vmmov %vm18822_vm3  ;;  %4625 = vrot.lane.b32.xlu0 %v14006_v23, %s18586_s21  ;;  %v18833_v22 = vld [vmem:[#allocation82_spill] sm:$0xff]  ;;  %7590 = vmatpush3.msra.mxu1 %v5480_v15  ;;  %v18836_v48 = vld [vmem:[#allocation41_spill] sm:$0xff]  ;;  %v18837_v36 = vrot.slane %v13997_v26, 2 }
 0x6d9   :  { %v5384_v19 = vsel %vm18829_vm1, %v5360_v34, %v18828_v13  ;;  %v5314_v21 = vsel %vm18831_vm11, %v5290_v46, %v18830_v58  ;;  %vm18832_vm9 = vmmov %vm18825_vm8  ;;  %4915 = vrot.lane.b32.xlu1 %v18836_v48, %s18609_s27  ;;  %vm18838_vm8 = vcmask 1045504   ;;  %v18839_v63 = vld [vmem:[#allocation123_spill] sm:$0xff]  ;;  %v18840_v20 = vld [vmem:[#allocation26_spill] sm:$0xff]  ;;  %7591 = vmatprep.subr.mxu1 %v5479_v25  ;;  %v14419_v15 = vpop.permute.xlu0 %3883  ;;  %v4315_v10 = vrot.slane %v13983_v30, 6 }
 0x6da   :  { %v5361_v55 = vsel %vm18832_vm9, %v5337_v24, %v13929_v4  ;;  %v5408_v61 = vsel %vm18834_vm15, %v5384_v19, %v18833_v22  ;;  %vm18835_vm3 = vmmov %vm18829_vm1  ;;  %v14410_v52 = vsel %vm18838_vm8, %v18837_v36, %v3843_v56  ;;  %v17875_v4 = vrot.slane %v14230_v44, 2  ;;  %18843 = vst [vmem:[#allocation58_spill] sm:$0xff] %v14419_v15  ;;  %v18844_v53 = vld [vmem:[#allocation45_spill] sm:$0xff]  ;;  %v18845_v9 = vld [vmem:[#allocation51_spill] sm:$0xff]  ;;  %7592 = vmatpush3.msra.mxu1 %v5479_v25  ;;  %v14428_v2 = vpop.permute.xlu1 %4353 }
 0x6db   :  { %v5385_v33 = vsel %vm18835_vm3, %v5361_v55, %v13978_v0  ;;  %v5338_v23 = vsel %vm18826_vm10, %v5314_v21, %v18839_v63  ;;  %vm18841_vm1 = vcmask 343040   ;;  %vm18842_vm11 = vmmov %vm18834_vm15  ;;  %vm18846_vm15 = vcmask 367616   ;;  %v18848_v34 = vld [vmem:[#allocation56_spill] sm:$0xff]  ;;  %v18852_v13 = vld [vmem:[#allocation54_spill] sm:$0xff] }
 0x6dc   :  { %v5432_v7 = vsel %vm18841_vm1, %v5408_v61, %v18840_v20  ;;  %v5409_v0 = vsel %vm18842_vm11, %v5385_v33, %v14044_v57  ;;  %v5362_v49 = vsel %vm18832_vm9, %v5338_v23, %v18844_v53  ;;  %vm18847_vm3 = vmmov %vm18841_vm1  ;;  %vm18849_vm8 = vcmask 293888   ;;  %4917 = vrot.lane.b32.xlu0 %v14026_v39, %s18609_s27  ;;  %v18858_v33 = vld [vmem:[#allocation23_spill] sm:$0xff]  ;;  %v18860_v36 = vld [vmem:[#allocation12_spill] sm:$0xff] }
 0x6dd   :  { %v5456_v3 = vsel %vm18846_vm15, %v5432_v7, %v18845_v9  ;;  %v5433_v46 = vsel %vm18847_vm3, %v5409_v0, %v14103_v43  ;;  %v5386_v57 = vsel %vm18849_vm8, %v5362_v49, %v18848_v34  ;;  %vm18850_vm10 = vmmov %vm18846_vm15  ;;  %vm18851_vm1 = vcmask 392192   ;;  %3889 = vrot.lane.b32.xlu1 %v14410_v52, %s18559_s17  ;;  %v14450_v58 = vpop.permute.xlu0 %4355  ;;  %v18861_v20 = vld [vmem:[#allocation38_spill] sm:$0xff]  ;;  %v18866_v49 = vld [vmem:[#allocation95_spill] sm:$0xff] }
 0x6de   :  { %v5457_v24 = vsel %vm18850_vm10, %v5433_v46, %v14160_v31  ;;  %7594 = vmatmul.mubr.msk.f32.vlgmr.msra.gmra.mxu1 %vm18851_vm1, %v5456_v3  ;;  %v5410_v19 = vsel %vm18842_vm11, %v5386_v57, %v18852_v13  ;;  %vm18853_vm9 = vmmov %vm18851_vm1  ;;  %vm18854_vm15 = vcmask 1045504   ;;  %v17874_v31 = vrot.slane %v13997_v26, 6  ;;  %v14459_v22 = vpop.permute.xlu1 %4689  ;;  %v8615_v9 = vld [vmem:[%s17641_s0 + $0xf0] sm:$0xff]  ;;  %v18867_v3 = vld [vmem:[#allocation80_spill] sm:$0xff] }
 0x6df   :  { %7596 = vmatprep.mubr.msk.f32.mxu1 %vm18853_vm9, %v5457_v24  ;;  %v14445_v43 = vsel %vm18854_vm15, %v3843_v56, %v17875_v4  ;;  %v5434_v25 = vsel %vm18847_vm3, %v5410_v19, %v14110_v40  ;;  %v18855_v39 = vrot.slane %v13772_v47, 6  ;;  %vm18856_vm8 = vcmask 1041408   ;;  %v18869_v34 = vld [vmem:[#allocation48_spill] sm:$0xff]  ;;  %v18871_v24 = vld [vmem:[#allocation93_spill] sm:$0xff]  ;;  %v18962_v54 = vld [vmem:[#allocation50_spill] sm:$0xff] }
 0x6e0   :  { %v5458_v55 = vsel %vm18850_vm10, %v5434_v25, %v14167_v42  ;;  %3891 = vrot.lane.b32.xlu0 %v14445_v43, %s18559_s17  ;;  %vm18857_vm11 = vmmov %vm18856_vm8  ;;  %v8614_v42 = vld [vmem:[%s17641_s0 + $0xe8] sm:$0xff]  ;;  %vm18859_vm9 = vcmask 23552   ;;  %v3962_v23 = vrot.slane %v14207_v45, 3  ;;  %vm18862_vm15 = vcmask 48128  }
 0x6e1   :  { %v14455_v21 = vsel %vm18856_vm8, %v18855_v39, %v4315_v10  ;;  %v14469_v40 = vsel %vm18857_vm11, %v4315_v10, %v17874_v31  ;;  %v14471_v56 = vpop.permute.xlu0 %4691  ;;  %v5123_v48 = vsel %vm18859_vm9, %v8614_v42, %v18858_v33  ;;  %v18864_v10 = vld [vmem:[#allocation8_spill] sm:$0xff]  ;;  %vm18865_vm3 = vcmask 72704   ;;  %vm18868_vm8 = vmmov %vm18859_vm9  ;;  %v18872_v19 = vld [vmem:[#allocation25_spill] sm:$0xff] }
 0x6e2   :  { %7597 = vmatmul.mubr.msk.f32.gmra.mxu1 %vm18851_vm1, %v5458_v55  ;;  %4361 = vrot.lane.b32.xlu1 %v14455_v21, %s18576_s13  ;;  %v4982_v61 = vpop.permute.xlu1 %4981  ;;  %v5147_v7 = vsel %vm18862_vm15, %v5123_v48, %v18861_v20  ;;  %v5124_v46 = vsel %vm18868_vm8, %v8615_v9, %v18867_v3  ;;  %vm18870_vm10 = vcmask 97280   ;;  %v17870_v13 = vrot.slane %v14230_v44, 3  ;;  %vm18873_vm1 = vmmov %vm18862_vm15  ;;  %v18874_v39 = vld [vmem:[#allocation46_spill] sm:$0xff]  ;;  %v18883_v9 = vld [vmem:[#allocation7_spill] sm:$0xff] }
 0x6e3   :  { %v5171_v53 = vsel %vm18865_vm3, %v5147_v7, %v18864_v10  ;;  %v5148_v25 = vsel %vm18873_vm1, %v5124_v46, %v18872_v19  ;;  %vm18875_vm11 = vcmask 121856   ;;  %v18877_v33 = vrot.slane %v13997_v26, 3  ;;  %v18879_v20 = vld [vmem:[#allocation78_spill] sm:$0xff]  ;;  %vm18880_vm15 = vmmov %vm18865_vm3  ;;  %v18881_v10 = vld [vmem:[#allocation88_spill] sm:$0xff] }
 0x6e4   :  { %4363 = vrot.lane.b32.xlu0 %v14469_v40, %s18576_s13  ;;  %v5195_v57 = vsel %vm18870_vm10, %v5171_v53, %v18869_v34  ;;  %vm18878_vm9 = vcmask 1044480   ;;  %v5172_v7 = vsel %vm18880_vm15, %v5148_v25, %v18879_v20  ;;  %vm18882_vm3 = vcmask 146432   ;;  %vm18884_vm8 = vmmov %vm18870_vm10  ;;  %v18885_v46 = vld [vmem:[#allocation152_spill] sm:$0xff] }
 0x6e5   :  { %v4984_v63 = vpop.permute.xlu0 %4983  ;;  %v5219_v55 = vsel %vm18875_vm11, %v5195_v57, %v18874_v39  ;;  %v14510_v48 = vsel %vm18878_vm9, %v18877_v33, %v3962_v23  ;;  %v5196_v3 = vsel %vm18884_vm8, %v5172_v7, %v18883_v9  ;;  %vm18886_vm10 = vcmask 171008   ;;  %v18887_v57 = vld [vmem:[#allocation173_spill] sm:$0xff]  ;;  %vm18889_vm1 = vmmov %vm18875_vm11  ;;  %v18890_v39 = vld [vmem:[#allocation122_spill] sm:$0xff] }
 0x6e6   :  { %4697 = vrot.lane.b32.xlu1 %v18860_v36, %s18591_s20  ;;  %v14485_v0 = vpop.permute.xlu1 %4000  ;;  %v4434_v36 = vrot.slane %v13983_v30, 7  ;;  %v5243_v53 = vsel %vm18882_vm3, %v5219_v55, %v18881_v10  ;;  %vm18891_vm11 = vmmov %vm18878_vm9  ;;  %v17872_v33 = vrot.slane %v13997_v26, 7  ;;  %v18892_v20 = vld [vmem:[#allocation52_spill] sm:$0xff]  ;;  %vm18895_vm15 = vcmask 220160  }
 0x6e7   :  { %18863 = vst [vmem:[#allocation193_spill] sm:$0xff] %v14485_v0  ;;  %v5267_v34 = vsel %vm18886_vm10, %v5243_v53, %v18885_v46  ;;  %v14534_v55 = vsel %vm18891_vm11, %v3962_v23, %v17870_v13  ;;  %vm18893_vm9 = vmmov %vm18882_vm3  ;;  %v18894_v10 = vld [vmem:[#allocation28_spill] sm:$0xff]  ;;  %vm18897_vm3 = vcmask 1040384   ;;  %v18900_v23 = vld [vmem:[#allocation55_spill] sm:$0xff] }
 0x6e8   :  { %4699 = vrot.lane.b32.xlu0 %v18866_v49, %s18591_s20  ;;  %v5291_v25 = vsel %vm1687_vm14, %v5267_v34, %v18890_v39  ;;  %v18898_v34 = vld [vmem:[#allocation172_spill] sm:$0xff]  ;;  %vm18899_vm8 = vmmov %vm18886_vm10  ;;  %vm18901_vm10 = vcmask 244736   ;;  %v18902_v13 = vld [vmem:[#allocation14_spill] sm:$0xff] }
 0x6e9   :  { %v14505_v42 = vpop.permute.xlu0 %4002  ;;  %v5315_v53 = vsel %vm18895_vm15, %v5291_v25, %v18894_v10  ;;  %vm18905_vm11 = vmmov %vm18895_vm15 }
 0x6ea   :  { %4989 = vrot.lane.b32.xlu1 %v18871_v24, %s18617_s11  ;;  %18876 = vst [vmem:[#allocation33_spill] sm:$0xff] %v14505_v42  ;;  %v14517_v49 = vpop.permute.xlu1 %4472  ;;  %v18888_v24 = vld [vmem:[#allocation87_spill] sm:$0xff]  ;;  %vm18907_vm15 = vmmov %vm18897_vm3  ;;  %v18957_v42 = vld [vmem:[#allocation121_spill] sm:$0xff] }
 0x6eb   :  { %v5220_v19 = vsel %vm18889_vm1, %v5196_v3, %v18888_v24  ;;  %v18896_v3 = vrot.slane %v13772_v47, 7  ;;  %v5339_v24 = vsel %vm18901_vm10, %v5315_v53, %v18900_v23  ;;  %vm18903_vm1 = vcmask 269312   ;;  %v18904_v47 = vld [vmem:[#allocation6_spill] sm:$0xff] }
 0x6ec   :  { %4991 = vrot.lane.b32.xlu0 %v18887_v57, %s18617_s11  ;;  %v5244_v7 = vsel %vm18893_vm9, %v5220_v19, %v18892_v20  ;;  %v5363_v25 = vsel %vm18903_vm1, %v5339_v24, %v14147_v16  ;;  %vm18906_vm9 = vcmask 293888   ;;  %v14569_v10 = vsel %vm18907_vm15, %v4434_v36, %v17872_v33 }
 0x6ed   :  { %v14541_v9 = vpop.permute.xlu0 %4474  ;;  %v14546_v46 = vsel %vm18897_vm3, %v18896_v3, %v4434_v36  ;;  %v5268_v57 = vsel %vm18899_vm8, %v5244_v7, %v18898_v34  ;;  %v5387_v7 = vsel %vm18906_vm9, %v5363_v25, %v14212_v17  ;;  %vm18909_vm3 = vmmov %vm18901_vm10  ;;  %vm18910_vm8 = vcmask 318464   ;;  %v18911_v34 = vld [vmem:[#allocation156_spill] sm:$0xff] }
 0x6ee   :  { %4008 = vrot.lane.b32.xlu1 %v14510_v48, %s18561_s18  ;;  %v14552_v39 = vpop.permute.xlu1 %4763  ;;  %v5292_v19 = vsel %vm1687_vm14, %v5268_v57, %v18902_v13  ;;  %v18908_v13 = vld [vmem:[#allocation13_spill] sm:$0xff]  ;;  %v5411_v53 = vsel %vm18910_vm8, %v5387_v7, %v14349_v1  ;;  %vm18912_vm10 = vmmov %vm18903_vm1  ;;  %vm18913_vm1 = vcmask 343040   ;;  %v18922_v7 = vld [vmem:[#allocation96_spill] sm:$0xff] }
 0x6ef   :  { %v5316_v20 = vsel %vm18905_vm11, %v5292_v19, %v18904_v47  ;;  %v5435_v17 = vsel %vm18913_vm1, %v5411_v53, %v4982_v61  ;;  %vm18914_vm11 = vmmov %vm18906_vm9  ;;  %vm18915_vm9 = vcmask 367616   ;;  %v18917_v1 = vld [vmem:[#allocation29_spill] sm:$0xff]  ;;  %v4081_v47 = vrot.slane %v14207_v45, 4 }
 0x6f0   :  { %4010 = vrot.lane.b32.xlu0 %v14534_v55, %s18561_s18  ;;  %v5340_v16 = vsel %vm18909_vm3, %v5316_v20, %v18908_v13  ;;  %vm18916_vm15 = vmmov %vm18910_vm8  ;;  %vm18918_vm3 = vcmask 392192   ;;  %v17871_v13 = vrot.slane %v14230_v44, 4 }
 0x6f1   :  { %v14575_v3 = vpop.permute.xlu0 %4765  ;;  %v5364_v57 = vsel %vm18912_vm10, %v5340_v16, %v18911_v34  ;;  %vm18919_vm8 = vmmov %vm18913_vm1 }
 0x6f2   :  { %4480 = vrot.lane.b32.xlu1 %v14546_v46, %s18581_s19  ;;  %v5056_v23 = vpop.permute.xlu1 %5055  ;;  %v5388_v24 = vsel %vm18914_vm11, %v5364_v57, %v14225_v51  ;;  %vm18920_vm10 = vmmov %vm18915_vm9  ;;  %vm18927_vm11 = vcmask 1043456   ;;  %v18928_v57 = vld [vmem:[#allocation177_spill] sm:$0xff] }
 0x6f3   :  { %v5459_v36 = vsel %vm18915_vm9, %v5435_v17, %v5056_v23  ;;  %v5412_v19 = vsel %vm18916_vm15, %v5388_v24, %v14380_v35  ;;  %vm18923_vm1 = vmmov %vm18918_vm3  ;;  %v18924_v35 = vld [vmem:[#allocation194_spill] sm:$0xff]  ;;  %vm18934_vm15 = vcmask 1046528  }
 0x6f4   :  { %4482 = vrot.lane.b32.xlu0 %v14569_v10, %s18581_s19  ;;  %7599 = vmatprep.mubr.msk.f32.mxu1 %vm18918_vm3, %v5459_v36  ;;  %v5436_v25 = vsel %vm18919_vm8, %v5412_v19, %v4984_v63  ;;  %v18926_v63 = vrot.slane %v13997_v26, 4  ;;  %vm18929_vm9 = vmmov %vm18927_vm11  ;;  %v14626_v36 = vld [vmem:[%s17641_s0 + $0x150] sm:$0xff]  ;;  %vm18939_vm8 = vcmask 1042432  }
 0x6f5   :  { %v5058_v61 = vpop.permute.xlu0 %5057  ;;  %v14617_v17 = vsel %vm18929_vm9, %v4081_v47, %v17871_v13  ;;  %vm18936_vm3 = vmmov %vm18934_vm15  ;;  %v3847_v4 = vrot.slane %v14626_v36, 2  ;;  %vm18953_vm9 = vcmask 1041408  }
 0x6f6   :  { %4771 = vrot.lane.b32.xlu1 %v18917_v1, %s18596_s22  ;;  %v5460_v51 = vsel %vm18920_vm10, %v5436_v25, %v5058_v61  ;;  %v14593_v20 = vpop.permute.xlu1 %4119  ;;  %v14606_v53 = vsel %vm18927_vm11, %v18926_v63, %v4081_v47  ;;  %18930 = vst [vmem:[#allocation155_spill] sm:$0xff] %v14617_v17  ;;  %v3728_v1 = vrot.slane %v14626_v36, 1  ;;  %v14638_v25 = vld [vmem:[%s17641_s0 + $0x158] sm:$0xff]  ;;  %v18932_v47 = vld [vmem:[#allocation92_spill] sm:$0xff]  ;;  %vm18940_vm10 = vmmov %vm18939_vm8 }
 0x6f7   :  { %18921 = vst [vmem:[#allocation99_spill] sm:$0xff] %v14593_v20  ;;  %7600 = vmatmul.mubr.msk.f32.gmra.mxu1 %vm18923_vm1, %v5460_v51  ;;  %v17873_v51 = vrot.slane %v14638_v25, 1  ;;  %vm18947_vm1 = vcmask 1045504  }
 0x6f8   :  { %4773 = vrot.lane.b32.xlu0 %v18922_v7, %s18596_s22  ;;  %v14652_v7 = vsel %vm18934_vm15, %v3726_v11, %v3728_v1  ;;  %vm18949_vm11 = vmmov %vm18947_vm1 }
 0x6f9   :  { %v14601_v16 = vpop.permute.xlu0 %4121  ;;  %vm18954_vm15 = vmmov %vm18953_vm9 }
 0x6fa   :  { %5063 = vrot.lane.b32.xlu1 %v18924_v35, %s18622_s15  ;;  %18925 = vst [vmem:[#allocation131_spill] sm:$0xff] %v14601_v16  ;;  %v14608_v34 = vpop.permute.xlu1 %4545  ;;  %v4200_v35 = vrot.slane %v14207_v45, 5  ;;  %v4319_v16 = vrot.slane %v14207_v45, 6 }
 0x6fc   :  { %5065 = vrot.lane.b32.xlu0 %v18928_v57, %s18622_s15  ;;  %v14664_v57 = vsel %vm18936_vm3, %v3728_v1, %v17873_v51  ;;  %v14672_v11 = vsel %vm18939_vm8, %v4198_v62, %v4200_v35  ;;  %v18942_v62 = vld [vmem:[#allocation125_spill] sm:$0xff]  ;;  %vm18958_vm3 = vcmask 23552   ;;  %vm18960_vm8 = vcmask 48128  }
 0x6fd   :  { %v14619_v23 = vpop.permute.xlu0 %4547  ;;  %18937 = vst [vmem:[#allocation126_spill] sm:$0xff] %v14664_v57 }
 0x6fe   :  { %4127 = vrot.lane.b32.xlu1 %v14606_v53, %s18564_s26  ;;  %v14621_v24 = vpop.permute.xlu1 %4837 }
 0x700   :  { %4129 = vrot.lane.b32.xlu0 %v14617_v17, %s18564_s26  ;;  %v18974_v17 = vrot.slane %v14230_v44, 3 }
 0x701   :  { %v14632_v19 = vpop.permute.xlu0 %4839 }
 0x702   :  { %4553 = vrot.lane.b32.xlu1 %v13983_v30, %s8643_s24  ;;  %v14640_v61 = vpop.permute.xlu1 %3766 }
 0x703   :  { %18931 = vst [vmem:[#allocation175_spill] sm:$0xff] %v14640_v61 }
 0x704   :  { %4555 = vrot.lane.b32.xlu0 %v13997_v26, %s8643_s24 }
 0x705   :  { %v14647_v30 = vpop.permute.xlu0 %3768 }
 0x706   :  { %4845 = vrot.lane.b32.xlu1 %v18932_v47, %s18600_s25  ;;  %18933 = vst [vmem:[#allocation59_spill] sm:$0xff] %v14647_v30  ;;  %v14655_v63 = vpop.permute.xlu1 %4238  ;;  %v17876_v47 = vrot.slane %v14230_v44, 5 }
 0x707   :  { %18935 = vst [vmem:[#allocation94_spill] sm:$0xff] %v14655_v63 }
 0x708   :  { %4847 = vrot.lane.b32.xlu0 %v14183_v60, %s18600_s25  ;;  %v14683_v60 = vsel %vm18940_vm10, %v4200_v35, %v17876_v47  ;;  %v18944_v35 = vld [vmem:[#allocation174_spill] sm:$0xff]  ;;  %v17877_v47 = vrot.slane %v14638_v25, 2  ;;  %vm18963_vm10 = vcmask 72704  }
 0x709   :  { %v14667_v13 = vpop.permute.xlu0 %4240  ;;  %18941 = vst [vmem:[#allocation132_spill] sm:$0xff] %v14683_v60 }
 0x70a   :  { %3774 = vrot.lane.b32.xlu1 %v14652_v7, %s8636_s23  ;;  %18938 = vst [vmem:[#allocation100_spill] sm:$0xff] %v14667_v13  ;;  %v14674_v33 = vpop.permute.xlu1 %4619  ;;  %v18946_v13 = vrot.slane %v14230_v44, 2 }
 0x70c   :  { %3776 = vrot.lane.b32.xlu0 %v14664_v57, %s8636_s23 }
 0x70d   :  { %v14685_v1 = vpop.permute.xlu0 %4621 }
 0x70e   :  { %4246 = vrot.lane.b32.xlu1 %v14672_v11, %s18571_s12  ;;  %v14687_v51 = vpop.permute.xlu1 %4911 }
 0x710   :  { %4248 = vrot.lane.b32.xlu0 %v14683_v60, %s18571_s12 }
 0x711   :  { %v14693_v31 = vpop.permute.xlu0 %4913 }
 0x712   :  { %4627 = vrot.lane.b32.xlu1 %v18942_v62, %s18586_s21  ;;  %v14696_v30 = vpop.permute.xlu1 %3885  ;;  %v14708_v62 = vsel %vm18947_vm1, %v18946_v13, %v3847_v4  ;;  %v18952_v13 = vrot.slane %v13997_v26, 6  ;;  %vm18965_vm1 = vmmov %vm18958_vm3 }
 0x713   :  { %18943 = vst [vmem:[#allocation15_spill] sm:$0xff] %v14696_v30 }
 0x714   :  { %4629 = vrot.lane.b32.xlu0 %v14250_v28, %s18586_s21  ;;  %v14720_v28 = vsel %vm18949_vm11, %v3847_v4, %v17877_v47  ;;  %v14728_v30 = vsel %vm18953_vm9, %v18952_v13, %v4319_v16  ;;  %v18956_v13 = vld [vmem:[#allocation31_spill] sm:$0xff]  ;;  %vm18967_vm11 = vcmask 97280   ;;  %vm18970_vm9 = vmmov %vm18960_vm8 }
 0x715   :  { %v14703_v61 = vpop.permute.xlu0 %3887  ;;  %18950 = vst [vmem:[#allocation138_spill] sm:$0xff] %v14720_v28 }
 0x716   :  { %4919 = vrot.lane.b32.xlu1 %v18944_v35, %s18609_s27  ;;  %18945 = vst [vmem:[#allocation65_spill] sm:$0xff] %v14703_v61  ;;  %v14711_v63 = vpop.permute.xlu1 %4357  ;;  %v17878_v35 = vrot.slane %v14230_v44, 6 }
 0x717   :  { %18948 = vst [vmem:[#allocation106_spill] sm:$0xff] %v14711_v63 }
 0x718   :  { %4921 = vrot.lane.b32.xlu0 %v14299_v14, %s18609_s27  ;;  %v14739_v14 = vsel %vm18954_vm15, %v4319_v16, %v17878_v35  ;;  %v3966_v16 = vrot.slane %v14626_v36, 3  ;;  %v18959_v35 = vld [vmem:[#allocation9_spill] sm:$0xff]  ;;  %vm18972_vm15 = vcmask 121856  }
 0x719   :  { %v14723_v61 = vpop.permute.xlu0 %4359  ;;  %18955 = vst [vmem:[#allocation179_spill] sm:$0xff] %v14739_v14 }
 0x71a   :  { %3893 = vrot.lane.b32.xlu1 %v14708_v62, %s18559_s17  ;;  %18951 = vst [vmem:[#allocation158_spill] sm:$0xff] %v14723_v61  ;;  %v14730_v63 = vpop.permute.xlu1 %4693  ;;  %v8616_v61 = vld [vmem:[%s17641_s0 + $0xf8] sm:$0xff] }
 0x71b   :  { %v5125_v20 = vsel %vm18958_vm3, %v8616_v61, %v18957_v42  ;;  %v18966_v61 = vld [vmem:[#allocation86_spill] sm:$0xff]  ;;  %vm18975_vm3 = vcmask 1044480  }
 0x71c   :  { %3895 = vrot.lane.b32.xlu0 %v14720_v28, %s18559_s17  ;;  %v5149_v0 = vsel %vm18960_vm8, %v5125_v20, %v18959_v35  ;;  %v18968_v20 = vld [vmem:[#allocation90_spill] sm:$0xff]  ;;  %vm18977_vm8 = vmmov %vm18963_vm10 }
 0x71d   :  { %v14741_v4 = vpop.permute.xlu0 %4695  ;;  %v5173_v8 = vsel %vm18963_vm10, %v5149_v0, %v18962_v54  ;;  %v18971_v0 = vld [vmem:[#allocation129_spill] sm:$0xff]  ;;  %vm18979_vm10 = vcmask 146432  }
 0x71e   :  { %4365 = vrot.lane.b32.xlu1 %v14728_v30, %s18576_s13  ;;  %v4986_v47 = vpop.permute.xlu1 %4985  ;;  %v5197_v28 = vsel %vm18967_vm11, %v5173_v8, %v18966_v61  ;;  %v4438_v8 = vrot.slane %v14207_v45, 7 }
 0x720   :  { %4367 = vrot.lane.b32.xlu0 %v14739_v14, %s18576_s13  ;;  %v18964_v14 = vld [vmem:[#allocation24_spill] sm:$0xff] }
 0x721   :  { %v4988_v15 = vpop.permute.xlu0 %4987 }
 0x722   :  { %4701 = vrot.lane.b32.xlu1 %v18956_v13, %s18591_s20  ;;  %v14755_v50 = vpop.permute.xlu1 %4004  ;;  %v8617_v13 = vld [vmem:[%s17641_s0 + $0x100] sm:$0xff] }
 0x723   :  { %18961 = vst [vmem:[#allocation18_spill] sm:$0xff] %v14755_v50  ;;  %v5126_v42 = vsel %vm18965_vm1, %v8617_v13, %v18964_v14  ;;  %v18969_v50 = vld [vmem:[#allocation120_spill] sm:$0xff]  ;;  %v14780_v14 = vsel %vm18975_vm3, %v18974_v17, %v3966_v16  ;;  %v18976_v13 = vld [vmem:[#allocation91_spill] sm:$0xff]  ;;  %vm18981_vm1 = vmmov %vm18967_vm11  ;;  %vm18983_vm11 = vcmask 171008  }
 0x724   :  { %4703 = vrot.lane.b32.xlu0 %v14410_v52, %s18591_s20  ;;  %v5150_v54 = vsel %vm18970_vm9, %v5126_v42, %v18969_v50  ;;  %v5221_v52 = vsel %vm18972_vm15, %v5197_v28, %v18971_v0  ;;  %v18980_v50 = vld [vmem:[#allocation11_spill] sm:$0xff]  ;;  %v18982_v42 = vld [vmem:[#allocation16_spill] sm:$0xff]  ;;  %v18984_v17 = vld [vmem:[#allocation154_spill] sm:$0xff] }
 0x725   :  { %v14775_v60 = vpop.permute.xlu0 %4006  ;;  %v5174_v61 = vsel %vm18977_vm8, %v5150_v54, %v18976_v13  ;;  %vm18985_vm9 = vmmov %vm18972_vm15  ;;  %vm18990_vm8 = vcmask 220160  }
 0x726   :  { %4993 = vrot.lane.b32.xlu1 %v18968_v20, %s18617_s11  ;;  %18973 = vst [vmem:[#allocation62_spill] sm:$0xff] %v14775_v60  ;;  %v18978_v20 = vld [vmem:[#allocation153_spill] sm:$0xff]  ;;  %v14787_v57 = vpop.permute.xlu1 %4476  ;;  %v5198_v28 = vsel %vm18981_vm1, %v5174_v61, %v18980_v50  ;;  %vm18987_vm15 = vmmov %vm18975_vm3  ;;  %v17887_v61 = vrot.slane %v14230_v44, 7 }
 0x727   :  { %v5245_v35 = vsel %vm18979_vm10, %v5221_v52, %v18978_v20  ;;  %v5222_v60 = vsel %vm18985_vm9, %v5198_v28, %v18984_v17  ;;  %v18986_v52 = vrot.slane %v14638_v25, 3  ;;  %vm18989_vm3 = vmmov %vm18979_vm10  ;;  %vm18992_vm10 = vcmask 1040384  }
 0x728   :  { %v5269_v0 = vsel %vm18983_vm11, %v5245_v35, %v18982_v42  ;;  %4995 = vrot.lane.b32.xlu0 %v14455_v21, %s18617_s11  ;;  %v18988_v35 = vld [vmem:[#allocation49_spill] sm:$0xff]  ;;  %vm18994_vm1 = vmmov %vm18983_vm11  ;;  %vm18995_vm11 = vcmask 244736   ;;  %vm18996_vm9 = vcmask 269312  }
 0x729   :  { %v5293_v54 = vsel %vm1687_vm14, %v5269_v0, %v14191_v29  ;;  %v14804_v13 = vsel %vm18987_vm15, %v3966_v16, %v18986_v52  ;;  %v5246_v20 = vsel %vm18989_vm3, %v5222_v60, %v18988_v35  ;;  %v14811_v50 = vpop.permute.xlu0 %4478  ;;  %v18991_v29 = vrot.slane %v13997_v26, 7  ;;  %v18993_v42 = vld [vmem:[#allocation101_spill] sm:$0xff]  ;;  %vm18997_vm15 = vmmov %vm18990_vm8 }
 0x72a   :  { %4012 = vrot.lane.b32.xlu1 %v14780_v14, %s18561_s18  ;;  %v5317_v21 = vsel %vm18990_vm8, %v5293_v54, %v14307_v32  ;;  %v5270_v0 = vsel %vm18994_vm1, %v5246_v20, %v18993_v42  ;;  %v14822_v17 = vpop.permute.xlu1 %4767  ;;  %vm18998_vm3 = vcmask 293888   ;;  %vm18999_vm8 = vmmov %vm18992_vm10  ;;  %vm19001_vm1 = vcmask 318464  }
 0x72b   :  { %v14816_v28 = vsel %vm18992_vm10, %v18991_v29, %v4438_v8  ;;  %v5341_v16 = vsel %vm18995_vm11, %v5317_v21, %v14459_v22  ;;  %v5294_v60 = vsel %vm1687_vm14, %v5270_v0, %v14209_v27  ;;  %v14839_v22 = vsel %vm18999_vm8, %v4438_v8, %v17887_v61  ;;  %vm19000_vm10 = vmmov %vm18995_vm11 }
 0x72c   :  { %v5365_v32 = vsel %vm18996_vm9, %v5341_v16, %v14552_v39  ;;  %4014 = vrot.lane.b32.xlu0 %v14804_v13, %s18561_s18  ;;  %v5318_v26 = vsel %vm18997_vm15, %v5294_v60, %v14341_v37  ;;  %vm19002_vm11 = vmmov %vm18996_vm9  ;;  %vm19003_vm9 = vcmask 343040   ;;  %v4085_v21 = vrot.slane %v14626_v36, 4 }
 0x72d   :  { %v5389_v54 = vsel %vm18998_vm3, %v5365_v32, %v14621_v24  ;;  %v5342_v27 = vsel %vm19000_vm10, %v5318_v26, %v14471_v56  ;;  %v14845_v52 = vpop.permute.xlu0 %4769  ;;  %vm19004_vm15 = vmmov %vm18998_vm3  ;;  %vm19005_vm3 = vcmask 367616   ;;  %vm19008_vm10 = vcmask 392192  }
 0x72e   :  { %4484 = vrot.lane.b32.xlu1 %v14816_v28, %s18581_s19  ;;  %v5413_v39 = vsel %vm19001_vm1, %v5389_v54, %v14687_v51  ;;  %v5366_v37 = vsel %vm19002_vm11, %v5342_v27, %v14575_v3  ;;  %v5060_v35 = vpop.permute.xlu1 %5059  ;;  %vm19006_vm8 = vmmov %vm19001_vm1  ;;  %v19007_v51 = vld [vmem:[#allocation60_spill] sm:$0xff]  ;;  %v4204_v42 = vrot.slane %v14626_v36, 5 }
 0x72f   :  { %v5437_v24 = vsel %vm19003_vm9, %v5413_v39, %v4986_v47  ;;  %v5390_v20 = vsel %vm19004_vm15, %v5366_v37, %v14632_v19  ;;  %vm19009_vm1 = vmmov %vm19003_vm9  ;;  %vm19015_vm15 = vcmask 1043456   ;;  %v4323_v37 = vrot.slane %v14626_v36, 6 }
 0x730   :  { %v5461_v8 = vsel %vm19005_vm3, %v5437_v24, %v5060_v35  ;;  %4486 = vrot.lane.b32.xlu0 %v14839_v22, %s18581_s19  ;;  %v5414_v56 = vsel %vm19006_vm8, %v5390_v20, %v14693_v31  ;;  %vm19010_vm11 = vmmov %vm19005_vm3  ;;  %v19012_v31 = vld [vmem:[#allocation133_spill] sm:$0xff]  ;;  %vm19017_vm3 = vcmask 1042432  }
 0x731   :  { %7602 = vmatprep.mubr.msk.f32.mxu1 %vm19008_vm10, %v5461_v8  ;;  %v5438_v3 = vsel %vm19009_vm1, %v5414_v56, %v4988_v15  ;;  %v5062_v47 = vpop.permute.xlu0 %5061  ;;  %vm19011_vm9 = vmmov %vm19008_vm10  ;;  %v19014_v15 = vrot.slane %v14230_v44, 4  ;;  %vm19022_vm10 = vcmask 1041408  }
 0x732   :  { %4775 = vrot.lane.b32.xlu1 %v19007_v51, %s18596_s22  ;;  %v5462_v19 = vsel %vm19010_vm11, %v5438_v3, %v5062_v47  ;;  %v14863_v29 = vpop.permute.xlu1 %4123  ;;  %vm19020_vm8 = vmmov %vm19015_vm15  ;;  %v17884_v3 = vrot.slane %v14638_v25, 6 }
 0x733   :  { %7603 = vmatmul.mubr.msk.f32.gmra.mxu1 %vm19011_vm9, %v5462_v19  ;;  %v14876_v16 = vsel %vm19015_vm15, %v19014_v15, %v4085_v21  ;;  %vm19024_vm1 = vmmov %vm19017_vm3  ;;  %vm19030_vm9 = vcmask 1046528  }
 0x734   :  { %4777 = vrot.lane.b32.xlu0 %v14510_v48, %s18596_s22  ;;  %v19016_v48 = vrot.slane %v14230_v44, 5  ;;  %vm19026_vm11 = vmmov %vm19022_vm10 }
 0x735   :  { %v14871_v0 = vpop.permute.xlu0 %4125  ;;  %vm19031_vm15 = vmmov %vm19030_vm9 }
 0x736   :  { %5067 = vrot.lane.b32.xlu1 %v19012_v31, %s18622_s15  ;;  %19013 = vst [vmem:[#allocation103_spill] sm:$0xff] %v14871_v0  ;;  %v14878_v60 = vpop.permute.xlu1 %4549  ;;  %v14887_v32 = vsel %vm19017_vm3, %v19016_v48, %v4204_v42  ;;  %v14980_v48 = vld [vmem:[%s17641_s0 + $0x168] sm:$0xff]  ;;  %vm19033_vm3 = vcmask 23552  }
 0x738   :  { %5069 = vrot.lane.b32.xlu0 %v14546_v46, %s18622_s15  ;;  %v17886_v46 = vrot.slane %v14638_v25, 4 }
 0x739   :  { %v14889_v26 = vpop.permute.xlu0 %4551 }
 0x73a   :  { %4131 = vrot.lane.b32.xlu1 %v14876_v16, %s18564_s26  ;;  %v14891_v54 = vpop.permute.xlu1 %4841 }
 0x73c   :  { %4250 = vrot.lane.b32.xlu0 %v14887_v32, %s18571_s12 }
 0x73d   :  { %v14897_v27 = vpop.permute.xlu0 %4843 }
 0x73e   :  { %4557 = vrot.lane.b32.xlu1 %v14207_v45, %s8643_s24  ;;  %v14900_v39 = vpop.permute.xlu1 %3770  ;;  %v14912_v45 = vsel %vm19020_vm8, %v4085_v21, %v17886_v46  ;;  %v4442_v46 = vrot.slane %v14626_v36, 7  ;;  %vm19035_vm8 = vcmask 1040384  }
 0x73f   :  { %19018 = vst [vmem:[#allocation135_spill] sm:$0xff] %v14900_v39 }
 0x740   :  { %4631 = vrot.lane.b32.xlu0 %v14287_v5, %s18586_s21  ;;  %v19021_v5 = vrot.slane %v14230_v44, 6 }
 0x741   :  { %v14907_v24 = vpop.permute.xlu0 %3772 }
 0x742   :  { %4849 = vrot.lane.b32.xlu1 %v14202_v41, %s18600_s25  ;;  %19019 = vst [vmem:[#allocation157_spill] sm:$0xff] %v14907_v24  ;;  %v14914_v35 = vpop.permute.xlu1 %4242  ;;  %v14923_v41 = vsel %vm19022_vm10, %v19021_v5, %v4323_v37  ;;  %v17888_v5 = vrot.slane %v14980_v48, 1  ;;  %vm19037_vm10 = vcmask 48128  }
 0x744   :  { %4923 = vrot.lane.b32.xlu0 %v14332_v18, %s18609_s27  ;;  %v17885_v18 = vrot.slane %v14638_v25, 5 }
 0x746   :  { %4133 = vrot.lane.b32.xlu1 %v14912_v45, %s18564_s26  ;;  %v14925_v20 = vpop.permute.xlu0 %4244  ;;  %v14948_v21 = vsel %vm19024_vm1, %v4204_v42, %v17885_v18  ;;  %v14968_v42 = vld [vmem:[%s17641_s0 + $0x160] sm:$0xff]  ;;  %vm19040_vm1 = vcmask 72704  }
 0x747   :  { %19023 = vst [vmem:[#allocation178_spill] sm:$0xff] %v14925_v20  ;;  %v14927_v8 = vpop.permute.xlu1 %4623  ;;  %v3732_v15 = vrot.slane %v14968_v42, 1 }
 0x748   :  { %4369 = vrot.lane.b32.xlu0 %v14923_v41, %s18576_s13 }
 0x74a   :  { %4559 = vrot.lane.b32.xlu1 %v14230_v44, %s8643_s24  ;;  %v14933_v56 = vpop.permute.xlu0 %4625 }
 0x74b   :  { %v14936_v51 = vpop.permute.xlu1 %4915 }
 0x74c   :  { %4705 = vrot.lane.b32.xlu0 %v14445_v43, %s18591_s20  ;;  %v14959_v43 = vsel %vm19026_vm11, %v4323_v37, %v17884_v3  ;;  %v19029_v3 = vrot.slane %v14638_v25, 1  ;;  %vm19042_vm11 = vmmov %vm19033_vm3 }
 0x74e   :  { %4851 = vrot.lane.b32.xlu1 %v14606_v53, %s18600_s25  ;;  %v14943_v47 = vpop.permute.xlu0 %4917  ;;  %v14994_v18 = vsel %vm19030_vm9, %v19029_v3, %v3732_v15  ;;  %v8618_v3 = vld [vmem:[%s17641_s0 + $0x108] sm:$0xff]  ;;  %vm19043_vm9 = vcmask 97280  }
 0x74f   :  { %v14950_v19 = vpop.permute.xlu1 %3889 }
 0x750   :  { %19025 = vst [vmem:[#allocation32_spill] sm:$0xff] %v14950_v19  ;;  %4997 = vrot.lane.b32.xlu0 %v14469_v40, %s18617_s11 }
 0x752   :  { %4252 = vrot.lane.b32.xlu1 %v14948_v21, %s18571_s12  ;;  %v14961_v53 = vpop.permute.xlu0 %3891 }
 0x753   :  { %19027 = vst [vmem:[#allocation57_spill] sm:$0xff] %v14961_v53  ;;  %v19032_v53 = vld [vmem:[#allocation170_spill] sm:$0xff] }
 0x754   :  { %v14963_v31 = vpop.permute.xlu1 %4361  ;;  %4371 = vrot.lane.b32.xlu0 %v14959_v43, %s18576_s13  ;;  %v5127_v19 = vsel %vm19033_vm3, %v8618_v3, %v19032_v53  ;;  %v8619_v53 = vld [vmem:[%s17641_s0 + $0x110] sm:$0xff]  ;;  %v19041_v3 = vld [vmem:[#allocation97_spill] sm:$0xff]  ;;  %vm19047_vm3 = vmmov %vm19037_vm10 }
 0x756   :  { %4633 = vrot.lane.b32.xlu1 %v14652_v7, %s18586_s21  ;;  %v14974_v40 = vpop.permute.xlu0 %4363 }
 0x757   :  { %19028 = vst [vmem:[#allocation35_spill] sm:$0xff] %v14974_v40  ;;  %v19036_v40 = vld [vmem:[#allocation181_spill] sm:$0xff] }
 0x758   :  { %v14982_v37 = vpop.permute.xlu1 %4697  ;;  %4707 = vrot.lane.b32.xlu0 %v14708_v62, %s18591_s20  ;;  %v5151_v20 = vsel %vm19037_vm10, %v5127_v19, %v19036_v40  ;;  %v19044_v19 = vrot.slane %v14638_v25, 7  ;;  %v19046_v40 = vld [vmem:[#allocation127_spill] sm:$0xff]  ;;  %vm19051_vm10 = vmmov %vm19040_vm1 }
 0x75a   :  { %4925 = vrot.lane.b32.xlu1 %v14672_v11, %s18609_s27  ;;  %v14989_v7 = vpop.permute.xlu0 %4699  ;;  %v15004_v11 = vsel %vm19031_vm15, %v3732_v15, %v17888_v5  ;;  %v19039_v5 = vld [vmem:[#allocation124_spill] sm:$0xff]  ;;  %vm19045_vm15 = vmmov %vm19035_vm8 }
 0x75b   :  { %v5175_v62 = vsel %vm19040_vm1, %v5151_v20, %v19039_v5  ;;  %v15037_v20 = vsel %vm19045_vm15, %v4442_v46, %v19044_v19  ;;  %vm19052_vm1 = vcmask 146432  }
 0x75c   :  { %v4990_v61 = vpop.permute.xlu1 %4989  ;;  %4999 = vrot.lane.b32.xlu0 %v14728_v30, %s18617_s11  ;;  %v19034_v30 = vrot.slane %v14230_v44, 7  ;;  %v5128_v44 = vsel %vm19042_vm11, %v8619_v53, %v19041_v3  ;;  %v19050_v53 = vld [vmem:[#allocation30_spill] sm:$0xff]  ;;  %vm19053_vm11 = vmmov %vm19043_vm9 }
 0x75d   :  { %v5152_v5 = vsel %vm19047_vm3, %v5128_v44, %v19046_v40  ;;  %vm19056_vm3 = vmmov %vm19052_vm1 }
 0x75e   :  { %3778 = vrot.lane.b32.xlu1 %v14994_v18, %s8636_s23  ;;  %v4992_v24 = vpop.permute.xlu0 %4991  ;;  %v15015_v39 = vsel %vm19035_vm8, %v19034_v30, %v4442_v46  ;;  %v5199_v30 = vsel %vm19043_vm9, %v5175_v62, %v14174_v38  ;;  %vm19048_vm8 = vcmask 121856   ;;  %v5176_v3 = vsel %vm19051_vm10, %v5152_v5, %v19050_v53 }
 0x75f   :  { %v5200_v46 = vsel %vm19053_vm11, %v5176_v3, %v14189_v6  ;;  %vm19054_vm9 = vcmask 171008   ;;  %vm19055_vm15 = vmmov %vm19048_vm8  ;;  %vm19060_vm11 = vcmask 269312  }
 0x760   :  { %v15019_v15 = vpop.permute.xlu1 %4008  ;;  %3780 = vrot.lane.b32.xlu0 %v15004_v11, %s8636_s23  ;;  %vm19058_vm10 = vmmov %vm19054_vm9 }
 0x761   :  { %19038 = vst [vmem:[#allocation98_spill] sm:$0xff] %v15019_v15  ;;  %v5223_v15 = vsel %vm19048_vm8, %v5199_v30, %v14267_v12  ;;  %v5224_v12 = vsel %vm19055_vm15, %v5200_v46, %v14294_v59  ;;  %vm19057_vm8 = vcmask 220160   ;;  %vm19062_vm15 = vcmask 293888  }
 0x762   :  { %4488 = vrot.lane.b32.xlu1 %v15015_v39, %s18581_s19  ;;  %v15043_v0 = vpop.permute.xlu0 %4010  ;;  %v5247_v38 = vsel %vm19052_vm1, %v5223_v15, %v14428_v2  ;;  %v5248_v2 = vsel %vm19056_vm3, %v5224_v12, %v14450_v58  ;;  %vm19059_vm1 = vcmask 244736   ;;  %v19081_v12 = vld [vmem:[#allocation155_spill] sm:$0xff] }
 0x763   :  { %19049 = vst [vmem:[#allocation63_spill] sm:$0xff] %v15043_v0  ;;  %v5271_v19 = vsel %vm19054_vm9, %v5247_v38, %v14517_v49  ;;  %v3851_v49 = vrot.slane %v14968_v42, 2  ;;  %v5272_v30 = vsel %vm19058_vm10, %v5248_v2, %v14541_v9  ;;  %vm19061_vm9 = vmmov %vm19057_vm8  ;;  %vm19066_vm10 = vcmask 1045504  }
 0x764   :  { %v15049_v62 = vpop.permute.xlu1 %4480  ;;  %4490 = vrot.lane.b32.xlu0 %v15037_v20, %s18581_s19  ;;  %v5295_v44 = vsel %vm1687_vm14, %v5271_v19, %v14608_v34  ;;  %vm19063_vm3 = vmmov %vm19059_vm1 }
 0x765   :  { %v5319_v6 = vsel %vm19057_vm8, %v5295_v44, %v14674_v33  ;;  %vm19064_vm8 = vcmask 318464   ;;  %v4089_v44 = vrot.slane %v14968_v42, 4 }
 0x766   :  { %4779 = vrot.lane.b32.xlu1 %v14534_v55, %s18596_s22  ;;  %v15067_v15 = vpop.permute.xlu0 %4482  ;;  %v5343_v59 = vsel %vm19059_vm1, %v5319_v6, %v14730_v63  ;;  %v5296_v55 = vsel %vm1687_vm14, %v5272_v30, %v14619_v23  ;;  %v3970_v63 = vrot.slane %v14968_v42, 3  ;;  %vm19067_vm1 = vmmov %vm19060_vm11  ;;  %v19083_v30 = vld [vmem:[#allocation132_spill] sm:$0xff] }
 0x767   :  { %v5367_v58 = vsel %vm19060_vm11, %v5343_v59, %v14822_v17  ;;  %v5320_v33 = vsel %vm19061_vm9, %v5296_v55, %v14685_v1  ;;  %vm19068_vm11 = vcmask 343040   ;;  %vm19069_vm9 = vmmov %vm19062_vm15  ;;  %v19084_v59 = vrot.slane %v14638_v25, 4 }
 0x768   :  { %v15074_v34 = vpop.permute.xlu1 %4771  ;;  %4781 = vrot.lane.b32.xlu0 %v14780_v14, %s18596_s22  ;;  %v5391_v9 = vsel %vm19062_vm15, %v5367_v58, %v14891_v54  ;;  %v5344_v23 = vsel %vm19063_vm3, %v5320_v33, %v14741_v4  ;;  %v19065_v14 = vrot.slane %v14638_v25, 2  ;;  %vm19070_vm15 = vcmask 367616   ;;  %vm19071_vm3 = vmmov %vm19064_vm8 }
 0x769   :  { %v5415_v17 = vsel %vm19064_vm8, %v5391_v9, %v14936_v51  ;;  %v5368_v54 = vsel %vm19067_vm1, %v5344_v23, %v14845_v52  ;;  %vm19072_vm8 = vcmask 392192   ;;  %v19073_v52 = vrot.slane %v14638_v25, 3  ;;  %vm19075_vm1 = vmmov %vm19068_vm11 }
 0x76a   :  { %5071 = vrot.lane.b32.xlu1 %v14569_v10, %s18622_s15  ;;  %v15093_v40 = vpop.permute.xlu0 %4773  ;;  %v3852_v1 = vsel %vm19066_vm10, %v19065_v14, %v3851_v49  ;;  %v5439_v5 = vsel %vm19068_vm11, %v5415_v17, %v4990_v61  ;;  %v5392_v53 = vsel %vm19069_vm9, %v5368_v54, %v14897_v27  ;;  %vm19074_vm10 = vcmask 1044480   ;;  %vm19076_vm11 = vmmov %vm19070_vm15  ;;  %v19089_v17 = vld [vmem:[#allocation138_spill] sm:$0xff] }
 0x76b   :  { %v5416_v51 = vsel %vm19071_vm3, %v5392_v53, %v14943_v47  ;;  %v15113_v61 = vsel %vm19074_vm10, %v19073_v52, %v3970_v63  ;;  %vm19078_vm9 = vmmov %vm19072_vm8  ;;  %v17891_v47 = vrot.slane %v14980_v48, 2  ;;  %vm19085_vm3 = vcmask 1043456   ;;  %v19092_v53 = vld [vmem:[#allocation179_spill] sm:$0xff] }
 0x76c   :  { %v5064_v10 = vpop.permute.xlu1 %5063  ;;  %5073 = vrot.lane.b32.xlu0 %v14816_v28, %s18622_s15  ;;  %v5440_v3 = vsel %vm19075_vm1, %v5416_v51, %v4992_v24  ;;  %v19080_v24 = vld [vmem:[#allocation126_spill] sm:$0xff]  ;;  %v15150_v55 = vsel %vm19085_vm3, %v19084_v59, %v4089_v44  ;;  %v17890_v9 = vrot.slane %v14980_v48, 3  ;;  %v17889_v14 = vrot.slane %v14980_v48, 4 }
 0x76d   :  { %v5463_v4 = vsel %vm19070_vm15, %v5439_v5, %v5064_v10  ;;  %vm19082_vm15 = vcmask 1045504   ;;  %vm19097_vm1 = vcmask 1046528   ;;  %v4208_v59 = vrot.slane %v14968_v42, 5 }
 0x76e   :  { %3897 = vrot.lane.b32.xlu1 %v3852_v1, %s18559_s17  ;;  %7605 = vmatprep.mubr.msk.f32.mxu1 %vm19072_vm8, %v5463_v4  ;;  %v5066_v27 = vpop.permute.xlu0 %5065  ;;  %vm19091_vm8 = vmmov %vm19074_vm10 }
 0x76f   :  { %v5464_v38 = vsel %vm19076_vm11, %v5440_v3, %v5066_v27  ;;  %v15175_v5 = vsel %vm19091_vm8, %v3970_v63, %v17890_v9  ;;  %vm19093_vm10 = vmmov %vm19085_vm3  ;;  %v15195_v63 = vld [vmem:[%s17641_s0 + $0x170] sm:$0xff]  ;;  %v15207_v27 = vld [vmem:[%s17641_s0 + $0x178] sm:$0xff]  ;;  %vm17927_vm11 = vcmask 124928   ;;  %vm19105_vm8 = vcmask 23552  }
 0x770   :  { %v15117_v46 = vpop.permute.xlu1 %4127  ;;  %4016 = vrot.lane.b32.xlu0 %v15113_v61, %s18561_s18  ;;  %7606 = vmatmul.mubr.msk.f32.gmra.mxu1 %vm19078_vm9, %v5464_v38  ;;  %v3736_v3 = vrot.slane %v15195_v63, 1  ;;  %vm19099_vm9 = vmmov %vm19097_vm1 }
 0x771   :  { %19077 = vst [vmem:[#allocation17_spill] sm:$0xff] %v15117_v46 }
 0x772   :  { %4561 = vrot.lane.b32.xlu1 %v14626_v36, %s8643_s24  ;;  %v15124_v28 = vpop.permute.xlu0 %4129  ;;  %v15139_v36 = vsel %vm19082_vm15, %v3851_v49, %v17891_v47  ;;  %v19101_v47 = vrot.slane %v14638_v25, 5  ;;  %vm19102_vm15 = vcmask 1042432  }
 0x773   :  { %19079 = vst [vmem:[#allocation130_spill] sm:$0xff] %v15124_v28  ;;  %vm19103_vm3 = vmmov %vm19102_vm15 }
 0x774   :  { %v15127_v19 = vpop.permute.xlu1 %4553  ;;  %4635 = vrot.lane.b32.xlu0 %v19080_v24, %s18586_s21  ;;  %v17892_v24 = vrot.slane %v15207_v27, 1 }
 0x776   :  { %4853 = vrot.lane.b32.xlu1 %v19081_v12, %s18600_s25  ;;  %v15134_v2 = vpop.permute.xlu0 %4555 }
 0x778   :  { %v15141_v6 = vpop.permute.xlu1 %4845  ;;  %4927 = vrot.lane.b32.xlu0 %v19083_v30, %s18609_s27 }
 0x77a   :  { %3899 = vrot.lane.b32.xlu1 %v15139_v36, %s18559_s17  ;;  %v15152_v58 = vpop.permute.xlu0 %4847 }
 0x77c   :  { %v15154_v33 = vpop.permute.xlu1 %3774  ;;  %4135 = vrot.lane.b32.xlu0 %v15150_v55, %s18564_s26 }
 0x77d   :  { %19086 = vst [vmem:[#allocation104_spill] sm:$0xff] %v15154_v33  ;;  %v8621_v33 = vld [vmem:[%s17641_s0 + $0x120] sm:$0xff] }
 0x77e   :  { %4563 = vrot.lane.b32.xlu1 %v14638_v25, %s8643_s24  ;;  %v15160_v49 = vpop.permute.xlu0 %3776 }
 0x77f   :  { %19087 = vst [vmem:[#allocation34_spill] sm:$0xff] %v15160_v49  ;;  %v19106_v49 = vld [vmem:[#allocation53_spill] sm:$0xff] }
 0x780   :  { %v15163_v23 = vpop.permute.xlu1 %4246  ;;  %4709 = vrot.lane.b32.xlu0 %v19089_v17, %s18591_s20 }
 0x781   :  { %19088 = vst [vmem:[#allocation20_spill] sm:$0xff] %v15163_v23  ;;  %v19113_v23 = vld [vmem:[#allocation58_spill] sm:$0xff] }
 0x782   :  { %4855 = vrot.lane.b32.xlu1 %v14876_v16, %s18600_s25  ;;  %v15170_v54 = vpop.permute.xlu0 %4248  ;;  %v15186_v16 = vsel %vm19093_vm10, %v4089_v44, %v17889_v14  ;;  %v19096_v44 = vrot.slane %v14980_v48, 1  ;;  %vm19107_vm10 = vcmask 48128  }
 0x783   :  { %19090 = vst [vmem:[#allocation68_spill] sm:$0xff] %v15170_v54 }
 0x784   :  { %v15177_v10 = vpop.permute.xlu1 %4627  ;;  %5001 = vrot.lane.b32.xlu0 %v19092_v53, %s18617_s11  ;;  %v15223_v30 = vsel %vm19097_vm1, %v19096_v44, %v3736_v3  ;;  %v15235_v53 = vsel %vm19099_vm9, %v3736_v3, %v17892_v24  ;;  %v17893_v44 = vrot.slane %v14980_v48, 5  ;;  %vm19110_vm1 = vmmov %vm19105_vm8  ;;  %vm19112_vm9 = vcmask 72704  }
 0x786   :  { %4018 = vrot.lane.b32.xlu1 %v15175_v5, %s18561_s18  ;;  %v15188_v4 = vpop.permute.xlu0 %4629 }
 0x788   :  { %v15190_v51 = vpop.permute.xlu1 %4919  ;;  %4137 = vrot.lane.b32.xlu0 %v15186_v16, %s18564_s26 }
 0x78a   :  { %4637 = vrot.lane.b32.xlu1 %v14994_v18, %s18586_s21  ;;  %v15201_v52 = vpop.permute.xlu0 %4921  ;;  %v7214_v18 = vld [vmem:[%s17649_s8] ss:$0 sm:$0xff] }
 0x78c   :  { %v15209_v38 = vpop.permute.xlu1 %3893  ;;  %4711 = vrot.lane.b32.xlu0 %v3852_v1, %s18591_s20 }
 0x78d   :  { %19094 = vst [vmem:[#allocation109_spill] sm:$0xff] %v15209_v38 }
 0x78e   :  { %4929 = vrot.lane.b32.xlu1 %v14887_v32, %s18609_s27  ;;  %v15215_v12 = vpop.permute.xlu0 %3895 }
 0x78f   :  { %19095 = vst [vmem:[#allocation141_spill] sm:$0xff] %v15215_v12  ;;  %v3639_v1 = vpop.f32.mrf.mxu1  ;;  %v15243_v12 = vsel %vm19102_vm15, %v19101_v47, %v4208_v59  ;;  %vm19114_vm15 = vmmov %vm19107_vm10 }
 0x790   :  { %v15226_v17 = vpop.permute.xlu1 %4365  ;;  %5003 = vrot.lane.b32.xlu0 %v14923_v41, %s18617_s11  ;;  %v3640_v32 = vadd.f32 %v7214_v18, %v3639_v1  ;;  %v8620_v18 = vld [vmem:[%s17641_s0 + $0x118] sm:$0xff]  ;;  %v19104_v1 = vld [vmem:[#allocation128_spill] sm:$0xff] }
 0x791   :  { %19098 = vst [vmem:[#allocation160_spill] sm:$0xff] %v15226_v17  ;;  %v7580_v14 = vpop.f32.mrf.mxu1 }
 0x792   :  { %3782 = vrot.lane.b32.xlu1 %v15223_v30, %s8636_s23  ;;  %v15238_v9 = vpop.permute.xlu0 %4367  ;;  %3644 = vst.msk [vmem:[%s17650_s9] sm:$0x7] %vm17927_vm11, %v3640_v32  ;;  %v15258_v14 = vsel %vm19103_vm3, %v4208_v59, %v17893_v44  ;;  %v5129_v32 = vsel %vm19105_vm8, %v8620_v18, %v19104_v1  ;;  %v15278_v59 = vld [vmem:[%s17643_s2] ss:$0 sm:$0xff]  ;;  %v19111_v1 = vld [vmem:[#allocation193_spill] sm:$0xff]  ;;  %vm19116_vm3 = vcmask 97280   ;;  %vm19118_vm8 = vmmov %vm19112_vm9 }
 0x793   :  { %19100 = vst [vmem:[#allocation136_spill] sm:$0xff] %v15238_v9  ;;  %v5153_v38 = vsel %vm19107_vm10, %v5129_v32, %v19106_v49  ;;  %v19109_v9 = vld [vmem:[#allocation176_spill] sm:$0xff]  ;;  %v19115_v32 = vld [vmem:[#allocation99_spill] sm:$0xff]  ;;  %vm19120_vm10 = vcmask 121856   ;;  %v19122_v44 = vrot.slane %v15195_v63, 2  ;;  %vm19466_vm11 = vcmask 392192  }
 0x794   :  { %v15249_v41 = vpop.permute.xlu1 %4701  ;;  %3784 = vrot.lane.b32.xlu0 %v15235_v53, %s8636_s23  ;;  %v5130_v18 = vsel %vm19110_vm1, %v8621_v33, %v19109_v9  ;;  %v5177_v17 = vsel %vm19112_vm9, %v5153_v38, %v19111_v1  ;;  %v19117_v33 = vld [vmem:[#allocation33_spill] sm:$0xff]  ;;  %v19119_v38 = vld [vmem:[#allocation94_spill] sm:$0xff]  ;;  %vm19124_vm1 = vcmask 1045504   ;;  %vm19126_vm9 = vmmov %vm19116_vm3 }
 0x795   :  { %v5154_v49 = vsel %vm19114_vm15, %v5130_v18, %v19113_v23  ;;  %v19123_v23 = vrot.slane %v14980_v48, 2  ;;  %v19125_v18 = vld [vmem:[#allocation131_spill] sm:$0xff]  ;;  %vm19128_vm15 = vcmask 146432  }
 0x796   :  { %4254 = vrot.lane.b32.xlu1 %v15243_v12, %s18571_s12  ;;  %v15260_v47 = vpop.permute.xlu0 %4703  ;;  %v5178_v9 = vsel %vm19118_vm8, %v5154_v49, %v19117_v33  ;;  %vm19131_vm8 = vcmask 171008  }
 0x798   :  { %v15262_v3 = vpop.permute.xlu1 %4993  ;;  %4256 = vrot.lane.b32.xlu0 %v15258_v14, %s18571_s12 }
 0x79a   :  { %4783 = vrot.lane.b32.xlu1 %v14804_v13, %s18596_s22  ;;  %v15273_v24 = vpop.permute.xlu0 %4995 }
 0x79c   :  { %v15283_v13 = vpop.permute.xlu1 %4012  ;;  %4785 = vrot.lane.b32.xlu0 %v15113_v61, %s18596_s22 }
 0x79d   :  { %19108 = vst [vmem:[#allocation182_spill] sm:$0xff] %v15283_v13  ;;  %v5201_v13 = vsel %vm19116_vm3, %v5177_v17, %v19115_v32  ;;  %v15313_v17 = vsel %vm19124_vm1, %v19123_v23, %v19122_v44  ;;  %v19127_v32 = vld [vmem:[#allocation106_spill] sm:$0xff]  ;;  %vm19130_vm3 = vmmov %vm19120_vm10  ;;  %vm19135_vm1 = vcmask 64512  }
 0x79e   :  { %v7595_v54 = vpop.f32.mrf.mxu1  ;;  %5075 = vrot.lane.b32.xlu1 %v14839_v22, %s18622_s15  ;;  %v5225_v1 = vsel %vm19120_vm10, %v5201_v13, %v19119_v38  ;;  %v15306_v46 = vpop.permute.xlu0 %4014  ;;  %v5202_v22 = vsel %vm19126_vm9, %v5178_v9, %v19125_v18  ;;  %v19132_v9 = vrot.slane %v15195_v63, 3  ;;  %v19133_v18 = vrot.slane %v14980_v48, 3  ;;  %vm19137_vm9 = vmmov %vm19128_vm15 }
 0x79f   :  { %v5636_v28 = vadd.f32 %v7595_v54, %v15278_v59  ;;  %19121 = vst [vmem:[#allocation61_spill] sm:$0xff] %v15306_v46  ;;  %v4327_v54 = vrot.slane %v14968_v42, 6  ;;  %v5249_v49 = vsel %vm19128_vm15, %v5225_v1, %v19127_v32  ;;  %v19129_v46 = vld [vmem:[#allocation100_spill] sm:$0xff]  ;;  %vm19134_vm10 = vcmask 1044480  }
 0x7a0   :  { %v5630_v61 = vpop.f32.mrf.mxu1  ;;  %v15321_v38 = vpop.permute.xlu1 %4484  ;;  %v5226_v0 = vsel %vm19130_vm3, %v5202_v22, %v19129_v46  ;;  %v5273_v44 = vsel %vm19131_vm8, %v5249_v49, %v14787_v57  ;;  %5077 = vrot.lane.b32.xlu0 %v15015_v39, %s18622_s15  ;;  %v4446_v57 = vrot.slane %v14968_v42, 7  ;;  %v19136_v39 = vld [vmem:[#allocation158_spill] sm:$0xff]  ;;  %vm19138_vm15 = vcmask 220160  }
 0x7a1   :  { %v5750_v33 = vmax.f32 %v5636_v28, 0.0  ;;  %v5631_v13 = vadd.f32 %v15278_v59, %v5630_v61  ;;  %v15334_v28 = vsel %vm19134_vm10, %v19133_v18, %v19132_v9  ;;  %v5297_v1 = vsel %vm1687_vm14, %v5273_v44, %v14878_v60 }
 0x7a2   :  { %v7598_v23 = vpop.f32.mrf.mxu1  ;;  %3901 = vrot.lane.b32.xlu1 %v15313_v17, %s18559_s17  ;;  %v5250_v22 = vsel %vm19137_vm9, %v5226_v0, %v19136_v39  ;;  %v5321_v32 = vsel %vm19138_vm15, %v5297_v1, %v14927_v8  ;;  %v15347_v9 = vpop.permute.xlu0 %4486  ;;  %v19139_v60 = vrot.slane %v14638_v25, 6  ;;  %vm19140_vm3 = vcmask 1041408  }
 0x7a3   :  { %5774 = vst.msk [vmem:[#allocation2 + $0x8] sm:$0xff] %vm19135_vm1, %v5750_v33  ;;  %v5749_v46 = vmax.f32 %v5631_v13, 0.0  ;;  %v5646_v61 = vadd.f32 %v7598_v23, %v15278_v59  ;;  %v5274_v13 = vsel %vm19131_vm8, %v5250_v22, %v14811_v50  ;;  %vm19141_vm10 = vcmask 244736   ;;  %vm19144_vm8 = vmmov %vm19135_vm1 }
 0x7a4   :  { %v5640_v49 = vpop.f32.mrf.mxu1  ;;  %v15354_v33 = vsel %vm19140_vm3, %v19139_v60, %v4327_v54  ;;  %v5345_v44 = vsel %vm19141_vm10, %v5321_v32, %v14982_v37  ;;  %v15362_v23 = vpop.permute.xlu1 %4775  ;;  %v5298_v18 = vsel %vm1687_vm14, %v5274_v13, %v14889_v26  ;;  %vm19142_vm9 = vcmask 269312   ;;  %4020 = vrot.lane.b32.xlu0 %v15334_v28, %s18561_s18 }
 0x7a5   :  { %5773 = vst.msk [vmem:[#allocation2] sm:$0xff] %vm19135_vm1, %v5749_v46  ;;  %v5752_v0 = vmax.f32 %v5646_v61, 0.0  ;;  %v5641_v8 = vadd.f32 %v15278_v59, %v5640_v49  ;;  %v5369_v1 = vsel %vm19142_vm9, %v5345_v44, %v15074_v34  ;;  %v5322_v50 = vsel %vm19138_vm15, %v5298_v18, %v14933_v56 }
 0x7a6   :  { %vm19143_vm3 = vcmask 293888   ;;  %4373 = vrot.lane.b32.xlu1 %v15354_v33, %s18576_s13  ;;  %v19145_v26 = vrot.slane %v14638_v25, 7  ;;  %vm19146_vm10 = vcmask 1040384   ;;  %vm19147_vm1 = vcmask 244736  }
 0x7a7   :  { %v5393_v37 = vsel %vm19143_vm3, %v5369_v1, %v15141_v6  ;;  %5776 = vst.msk [vmem:[#allocation2 + $0x18] sm:$0xff] %vm19144_vm8, %v5752_v0  ;;  %v5751_v46 = vmax.f32 %v5641_v8, 0.0  ;;  %v5346_v61 = vsel %vm19147_vm1, %v5322_v50, %v14989_v7  ;;  %vm19148_vm9 = vcmask 318464   ;;  %v15388_v6 = vpop.permute.xlu0 %4777 }
 0x7a8   :  { %v15382_v34 = vsel %vm19146_vm10, %v19145_v26, %v4446_v57  ;;  %v5417_v56 = vsel %vm19148_vm9, %v5393_v37, %v15190_v51  ;;  %v17896_v39 = vrot.slane %v15207_v27, 2  ;;  %vm19149_vm15 = vcmask 269312   ;;  %v5068_v25 = vpop.permute.xlu1 %5067 }
 0x7a9   :  { %v5370_v22 = vsel %vm19149_vm15, %v5346_v61, %v15093_v40  ;;  %vm19150_vm3 = vcmask 343040   ;;  %5775 = vst.msk [vmem:[#allocation2 + $0x10] sm:$0xff] %vm19144_vm8, %v5751_v46  ;;  %vm19151_vm10 = vcmask 293888   ;;  %vm19152_vm1 = vcmask 367616   ;;  %4492 = vrot.lane.b32.xlu0 %v15382_v34, %s18581_s19 }
 0x7aa   :  { %v5441_v32 = vsel %vm19150_vm3, %v5417_v56, %v15262_v3  ;;  %v5394_v49 = vsel %vm19151_vm10, %v5370_v22, %v15152_v58  ;;  %4857 = vrot.lane.b32.xlu1 %v14912_v45, %s18600_s25  ;;  %vm19153_vm15 = vcmask 392192   ;;  %v4093_v40 = vrot.slane %v15195_v63, 4  ;;  %vm19156_vm10 = vmmov %vm19152_vm1 }
 0x7ab   :  { %v5465_v7 = vsel %vm19152_vm1, %v5441_v32, %v5068_v25  ;;  %v5418_v51 = vsel %vm19148_vm9, %v5394_v49, %v15201_v52  ;;  %v5070_v60 = vpop.permute.xlu0 %5069  ;;  %v19154_v58 = vrot.slane %v15195_v63, 2  ;;  %vm19155_vm8 = vcmask 1045504   ;;  %vm19157_vm1 = vmmov %vm19153_vm15 }
 0x7ac   :  { %7608 = vmatprep.mubr.msk.f32.mxu1 %vm19153_vm15, %v5465_v7  ;;  %v5442_v3 = vsel %vm19150_vm3, %v5418_v51, %v15273_v24  ;;  %v4329_v52 = vrot.slane %v14980_v48, 6  ;;  %v15418_v45 = vpop.permute.xlu1 %4131  ;;  %v19158_v24 = vrot.slane %v14980_v48, 4  ;;  %vm19159_vm9 = vcmask 1043456  }
 0x7ad   :  { %v15414_v13 = vsel %vm19155_vm8, %v19154_v58, %v17896_v39  ;;  %v5466_v44 = vsel %vm19156_vm10, %v5442_v3, %v5070_v60  ;;  %4931 = vrot.lane.b32.xlu0 %v14948_v21, %s18609_s27  ;;  %vm19160_vm15 = vcmask 1041408   ;;  %v17895_v50 = vrot.slane %v15207_v27, 3 }
 0x7ae   :  { %7609 = vmatmul.mubr.msk.f32.gmra.mxu1 %vm19157_vm1, %v5466_v44  ;;  %3903 = vrot.lane.b32.xlu1 %v15414_v13, %s18559_s17  ;;  %v15428_v0 = vsel %vm19159_vm9, %v19158_v24, %v4093_v40  ;;  %v15435_v18 = vsel %vm19160_vm15, %v4327_v54, %v4329_v52  ;;  %v4212_v54 = vrot.slane %v15195_v63, 5  ;;  %v19161_v26 = vrot.slane %v15195_v63, 3 }
 0x7af   :  { %v15430_v8 = vpop.permute.xlu0 %4250  ;;  %vm19162_vm3 = vcmask 1044480   ;;  %v17897_v56 = vrot.slane %v14980_v48, 7  ;;  %v19164_v25 = vrot.slane %v14980_v48, 5  ;;  %vm19165_vm8 = vcmask 1042432  }
 0x7b0   :  { %v15437_v1 = vpop.permute.xlu1 %4557  ;;  %v15460_v61 = vsel %vm19162_vm3, %v19161_v26, %v17895_v50  ;;  %vm19167_vm10 = vcmask 1040384   ;;  %vm19168_vm1 = vcmask 64512   ;;  %v4331_v26 = vrot.slane %v15195_v63, 6 }
 0x7b1   :  { %4139 = vrot.lane.b32.xlu0 %v15428_v0, %s18564_s26  ;;  %v15473_v49 = vsel %vm19165_vm8, %v19164_v25, %v4212_v54  ;;  %vm19169_vm9 = vmmov %vm19168_vm1  ;;  %vm19170_vm15 = vcmask 1043456   ;;  %vm19172_vm3 = vcmask 1041408  }
 0x7b2   :  { %4375 = vrot.lane.b32.xlu1 %v15435_v18, %s18576_s13  ;;  %vm19174_vm8 = vmmov %vm19172_vm3 }
 0x7b3   :  { %v15443_v21 = vpop.permute.xlu0 %4631 }
 0x7b4   :  { %v15446_v37 = vpop.permute.xlu1 %4849 }
 0x7b5   :  { %4565 = vrot.lane.b32.xlu0 %v14968_v42, %s8643_s24  ;;  %v17894_v42 = vrot.slane %v15207_v27, 4 }
 0x7b6   :  { %4859 = vrot.lane.b32.xlu1 %v15150_v55, %s18600_s25 }
 0x7b7   :  { %v15453_v46 = vpop.permute.xlu0 %4923  ;;  %v7601_v32 = vpop.f32.mrf.mxu1 }
 0x7b8   :  { %v15463_v22 = vpop.permute.xlu1 %4133  ;;  %v5656_v55 = vadd.f32 %v7601_v32, %v15278_v59 }
 0x7b9   :  { %19163 = vst [vmem:[#allocation66_spill] sm:$0xff] %v15463_v22  ;;  %5005 = vrot.lane.b32.xlu0 %v14959_v43, %s18617_s11  ;;  %v5650_v51 = vpop.f32.mrf.mxu1  ;;  %v15482_v43 = vsel %vm19167_vm10, %v4446_v57, %v17897_v56  ;;  %vm19176_vm10 = vcmask 23552   ;;  %v19178_v56 = vld [vmem:[#allocation15_spill] sm:$0xff]  ;;  %v19190_v22 = vld [vmem:[#allocation62_spill] sm:$0xff] }
 0x7ba   :  { %4022 = vrot.lane.b32.xlu1 %v15460_v61, %s18561_s18  ;;  %v5754_v3 = vmax.f32 %v5656_v55, 0.0  ;;  %v5651_v58 = vadd.f32 %v15278_v59, %v5650_v51  ;;  %v15508_v55 = vsel %vm19170_vm15, %v4093_v40, %v17894_v42  ;;  %v17898_v40 = vrot.slane %v15207_v27, 6  ;;  %v19175_v42 = vld [vmem:[#allocation175_spill] sm:$0xff] }
 0x7bb   :  { %v15475_v7 = vpop.permute.xlu0 %4369  ;;  %vm19182_vm15 = vcmask 72704  }
 0x7bc   :  { %19166 = vst [vmem:[#allocation37_spill] sm:$0xff] %v15475_v7  ;;  %v15484_v60 = vpop.permute.xlu1 %4559  ;;  %5778 = vst.msk [vmem:[#allocation2 + $0x28] sm:$0xff] %vm19168_vm1, %v5754_v3  ;;  %v5753_v44 = vmax.f32 %v5651_v58, 0.0  ;;  %vm19177_vm1 = vcmask 1042432  }
 0x7bd   :  { %4258 = vrot.lane.b32.xlu0 %v15473_v49, %s18571_s12 }
 0x7be   :  { %4494 = vrot.lane.b32.xlu1 %v15482_v43, %s18581_s19  ;;  %5777 = vst.msk [vmem:[#allocation2 + $0x20] sm:$0xff] %vm19169_vm9, %v5753_v44  ;;  %v8622_v44 = vld [vmem:[%s17641_s0 + $0x128] sm:$0xff]  ;;  %vm19179_vm9 = vcmask 48128  }
 0x7bf   :  { %v15492_v24 = vpop.permute.xlu0 %4705  ;;  %v5131_v50 = vsel %vm19176_vm10, %v8622_v44, %v19175_v42  ;;  %v8623_v42 = vld [vmem:[%s17641_s0 + $0x130] sm:$0xff]  ;;  %v19183_v44 = vld [vmem:[#allocation59_spill] sm:$0xff] }
 0x7c0   :  { %v15496_v57 = vpop.permute.xlu1 %4851 }
 0x7c1   :  { %4639 = vrot.lane.b32.xlu0 %v15004_v11, %s18586_s21  ;;  %v15517_v11 = vsel %vm19172_vm3, %v4329_v52, %v4331_v26  ;;  %v15538_v52 = vsel %vm19174_vm8, %v4331_v26, %v17898_v40  ;;  %v19181_v26 = vld [vmem:[#allocation18_spill] sm:$0xff]  ;;  %vm19184_vm3 = vmmov %vm19176_vm10  ;;  %vm19185_vm8 = vcmask 97280  }
 0x7c2   :  { %4933 = vrot.lane.b32.xlu1 %v15243_v12, %s18609_s27  ;;  %vm19187_vm10 = vmmov %vm19179_vm9 }
 0x7c3   :  { %v15503_v32 = vpop.permute.xlu0 %4997 }
 0x7c4   :  { %v15510_v25 = vpop.permute.xlu1 %4252 }
 0x7c5   :  { %19171 = vst [vmem:[#allocation107_spill] sm:$0xff] %v15510_v25  ;;  %5079 = vrot.lane.b32.xlu0 %v15037_v20, %s18622_s15  ;;  %v17899_v20 = vrot.slane %v15207_v27, 5  ;;  %v5132_v25 = vsel %vm19184_vm3, %v8623_v42, %v19183_v44  ;;  %v19193_v44 = vld [vmem:[#allocation103_spill] sm:$0xff]  ;;  %vm19194_vm3 = vmmov %vm19185_vm8 }
 0x7c6   :  { %4141 = vrot.lane.b32.xlu1 %v15508_v55, %s18564_s26 }
 0x7c7   :  { %v15519_v12 = vpop.permute.xlu0 %4371 }
 0x7c8   :  { %19173 = vst [vmem:[#allocation139_spill] sm:$0xff] %v15519_v12  ;;  %v15521_v51 = vpop.permute.xlu1 %4633 }
 0x7c9   :  { %4377 = vrot.lane.b32.xlu0 %v15517_v11, %s18576_s13 }
 0x7ca   :  { %4567 = vrot.lane.b32.xlu1 %v14980_v48, %s8643_s24 }
 0x7cb   :  { %v15528_v3 = vpop.permute.xlu0 %4707 }
 0x7cc   :  { %v4926_v58 = vpop.permute.xlu1 %4925 }
 0x7cd   :  { %4713 = vrot.lane.b32.xlu0 %v15139_v36, %s18591_s20  ;;  %v15548_v36 = vsel %vm19177_vm1, %v4212_v54, %v17899_v20  ;;  %vm19188_vm1 = vcmask 121856  }
 0x7ce   :  { %5007 = vrot.lane.b32.xlu1 %v15354_v33, %s18617_s11  ;;  %v5155_v33 = vsel %vm19179_vm9, %v5131_v50, %v19178_v56  ;;  %v4450_v50 = vrot.slane %v15195_v63, 7  ;;  %vm19191_vm9 = vmmov %vm19182_vm15 }
 0x7cf   :  { %v5000_v39 = vpop.permute.xlu0 %4999  ;;  %v5179_v40 = vsel %vm19182_vm15, %v5155_v33, %v19181_v26  ;;  %v19186_v33 = vld [vmem:[#allocation65_spill] sm:$0xff]  ;;  %vm19192_vm15 = vcmask 146432  }
 0x7d0   :  { %v15552_v12 = vpop.permute.xlu1 %3778  ;;  %v5203_v54 = vsel %vm19185_vm8, %v5179_v40, %v14863_v29  ;;  %v5156_v26 = vsel %vm19187_vm10, %v5132_v25, %v19186_v33  ;;  %vm19195_vm8 = vcmask 171008   ;;  %vm19197_vm10 = vmmov %vm19188_vm1 }
 0x7d1   :  { %19180 = vst [vmem:[#allocation159_spill] sm:$0xff] %v15552_v12  ;;  %4379 = vrot.lane.b32.xlu0 %v15538_v52, %s18576_s13  ;;  %v5227_v20 = vsel %vm19188_vm1, %v5203_v54, %v14914_v35  ;;  %v5180_v42 = vsel %vm19191_vm9, %v5156_v26, %v19190_v22  ;;  %v19196_v35 = vld [vmem:[#allocation178_spill] sm:$0xff]  ;;  %vm19199_vm1 = vcmask 1040384   ;;  %v19200_v54 = vld [vmem:[#allocation35_spill] sm:$0xff]  ;;  %vm19201_vm9 = vmmov %vm19192_vm15 }
 0x7d2   :  { %4260 = vrot.lane.b32.xlu1 %v15548_v36, %s18571_s12  ;;  %v5251_v29 = vsel %vm19192_vm15, %v5227_v20, %v14963_v31  ;;  %v5204_v7 = vsel %vm19194_vm3, %v5180_v42, %v19193_v44  ;;  %v19198_v31 = vrot.slane %v15207_v27, 7  ;;  %vm19202_vm15 = vcmask 220160   ;;  %vm19203_vm3 = vmmov %vm19195_vm8 }
 0x7d3   :  { %v15573_v12 = vpop.permute.xlu0 %3780  ;;  %v5275_v56 = vsel %vm19195_vm8, %v5251_v29, %v15049_v62  ;;  %v5228_v25 = vsel %vm19197_vm10, %v5204_v7, %v19196_v35  ;;  %vm19204_vm8 = vcmask 244736   ;;  %vm19205_vm10 = vcmask 269312  }
 0x7d4   :  { %19189 = vst [vmem:[#allocation180_spill] sm:$0xff] %v15573_v12  ;;  %v15579_v40 = vpop.permute.xlu1 %4488  ;;  %v5299_v22 = vsel %vm1687_vm14, %v5275_v56, %v15127_v19  ;;  %v15596_v20 = vsel %vm19199_vm1, %v4450_v50, %v19198_v31  ;;  %v5252_v62 = vsel %vm19201_vm9, %v5228_v25, %v19200_v54  ;;  %v15607_v19 = vld [vmem:[%s17641_s0 + $0x180] sm:$0xff]  ;;  %vm19206_vm1 = vmmov %vm19202_vm15  ;;  %vm19207_vm9 = vcmask 293888  }
 0x7d5   :  { %4715 = vrot.lane.b32.xlu0 %v15313_v17, %s18591_s20  ;;  %v5323_v17 = vsel %vm19202_vm15, %v5299_v22, %v15177_v10  ;;  %vm19208_vm15 = vmmov %vm19204_vm8  ;;  %v19210_v44 = vrot.slane %v14980_v48, 7 }
 0x7d6   :  { %4641 = vrot.lane.b32.xlu1 %v15223_v30, %s18586_s21  ;;  %v5276_v30 = vsel %vm19203_vm3, %v5252_v62, %v15067_v15  ;;  %v5347_v7 = vsel %vm19204_vm8, %v5323_v17, %v15249_v41  ;;  %v15628_v41 = vrot.slane %v15607_v19, 1  ;;  %vm19209_vm3 = vcmask 318464  }
 0x7d7   :  { %v15602_v33 = vpop.permute.xlu0 %4490  ;;  %v5300_v26 = vsel %vm1687_vm14, %v5276_v30, %v15134_v2  ;;  %v5371_v10 = vsel %vm19205_vm10, %v5347_v7, %v15362_v23  ;;  %vm19211_vm8 = vcmask 1040384  }
 0x7d8   :  { %v15613_v56 = vpop.permute.xlu1 %4779  ;;  %v5324_v42 = vsel %vm19206_vm1, %v5300_v26, %v15188_v4  ;;  %v5395_v15 = vsel %vm19207_vm9, %v5371_v10, %v15446_v37  ;;  %v15639_v4 = vsel %vm19211_vm8, %v19210_v44, %v4450_v50  ;;  %vm19212_vm1 = vcmask 343040   ;;  %v5798_v44 = vld [vmem:[#allocation2 + $0x10] ss:$2 sm:$0xff] }
 0x7d9   :  { %4498 = vrot.lane.b32.xlu0 %v15596_v20, %s18581_s19  ;;  %v5348_v2 = vsel %vm19208_vm15, %v5324_v42, %v15260_v47  ;;  %v5419_v23 = vsel %vm19209_vm3, %v5395_v15, %v15453_v46  ;;  %vm19213_vm15 = vcmask 367616   ;;  %vm19214_vm8 = vcmask 392192  }
 0x7da   :  { %5081 = vrot.lane.b32.xlu1 %v15382_v34, %s18622_s15  ;;  %v5372_v37 = vsel %vm19205_vm10, %v5348_v2, %v15388_v6  ;;  %v5443_v34 = vsel %vm19212_vm1, %v5419_v23, %v15503_v32  ;;  %v19215_v6 = vrot.slane %v15207_v27, 1  ;;  %vm19216_vm10 = vcmask 1046528  }
 0x7db   :  { %v15634_v29 = vpop.permute.xlu0 %4781  ;;  %v5396_v47 = vsel %vm19207_vm9, %v5372_v37, %v15496_v57  ;;  %vm19217_vm9 = vmmov %vm19213_vm15  ;;  %v5810_v37 = vld [vmem:[#allocation2 + $0x11] ss:$2 sm:$0xff] }
 0x7dc   :  { %v5072_v35 = vpop.permute.xlu1 %5071  ;;  %v5420_v48 = vsel %vm19209_vm3, %v5396_v47, %v4926_v58  ;;  %v3741_v46 = vsel %vm19216_vm10, %v19215_v6, %v15628_v41  ;;  %vm19221_vm3 = vcmask 1045504   ;;  %vm19228_vm10 = vcmask 23552  }
 0x7dd   :  { %v5467_v25 = vsel %vm19213_vm15, %v5443_v34, %v5072_v35  ;;  %4789 = vrot.lane.b32.xlu0 %v15334_v28, %s18596_s22  ;;  %v5444_v32 = vsel %vm19212_vm1, %v5420_v48, %v5000_v39  ;;  %vm19218_vm15 = vmmov %vm19214_vm8  ;;  %v15675_v39 = vrot.slane %v15607_v19, 2  ;;  %v8624_v34 = vld [vmem:[%s17641_s0 + $0x138] sm:$0xff]  ;;  %v5811_v48 = vld [vmem:[#allocation2 + $0x21] ss:$2 sm:$0xff]  ;;  %vm19229_vm1 = vcmask 64512  }
 0x7de   :  { %4496 = vrot.lane.b32.xlu1 %v15639_v4, %s18581_s19  ;;  %7611 = vmatprep.mubr.msk.f32.mxu1 %vm19214_vm8, %v5467_v25  ;;  %vm19225_vm8 = vcmask 1044480   ;;  %v19227_v35 = vld [vmem:[#allocation135_spill] sm:$0xff]  ;;  %v5799_v25 = vld [vmem:[#allocation2 + $0x20] ss:$2 sm:$0xff] }
 0x7df   :  { %v5074_v57 = vpop.permute.xlu0 %5073  ;;  %v5133_v47 = vsel %vm19228_vm10, %v8624_v34, %v19227_v35  ;;  %v19237_v34 = vld [vmem:[#allocation98_spill] sm:$0xff]  ;;  %v15758_v35 = vrot.slane %v15607_v19, 4 }
 0x7e0   :  { %v5468_v50 = vsel %vm19217_vm9, %v5444_v32, %v5074_v57  ;;  %v15660_v22 = vpop.permute.xlu1 %3897  ;;  %v8625_v32 = vld [vmem:[%s17641_s0 + $0x140] sm:$0xff]  ;;  %v19230_v57 = vld [vmem:[#allocation157_spill] sm:$0xff]  ;;  %vm19231_vm9 = vmmov %vm19228_vm10 }
 0x7e1   :  { %3786 = vrot.lane.b32.xlu0 %v3741_v46, %s8636_s23  ;;  %7612 = vmatmul.mubr.msk.f32.gmra.mxu1 %vm19218_vm15, %v5468_v50  ;;  %v5134_v50 = vsel %vm19231_vm9, %v8625_v32, %v19230_v57  ;;  %vm19233_vm15 = vcmask 48128   ;;  %vm19240_vm10 = vmmov %vm19229_vm1  ;;  %v19241_v32 = vld [vmem:[#allocation63_spill] sm:$0xff]  ;;  %v19243_v57 = vld [vmem:[#allocation17_spill] sm:$0xff]  ;;  %vm19244_vm9 = vcmask 97280  }
 0x7e2   :  { %4787 = vrot.lane.b32.xlu1 %v15175_v5, %s18596_s22  ;;  %v19220_v5 = vrot.slane %v15207_v27, 2 }
 0x7e3   :  { %v15666_v28 = vpop.permute.xlu0 %4016 }
 0x7e4   :  { %19219 = vst [vmem:[#allocation102_spill] sm:$0xff] %v15666_v28  ;;  %v15668_v58 = vpop.permute.xlu1 %4561 }
 0x7e5   :  { %4643 = vrot.lane.b32.xlu0 %v15235_v53, %s18586_s21  ;;  %v15689_v53 = vsel %vm19221_vm3, %v19220_v5, %v15675_v39  ;;  %v19232_v5 = vld [vmem:[#allocation32_spill] sm:$0xff]  ;;  %vm19236_vm3 = vmmov %vm19233_vm15 }
 0x7e6   :  { %4569 = vrot.lane.b32.xlu1 %v15195_v63, %s8643_s24 }
 0x7e7   :  { %v15677_v31 = vpop.permute.xlu0 %4635 }
 0x7e8   :  { %v15679_v54 = vpop.permute.xlu1 %4853 }
 0x7e9   :  { %4935 = vrot.lane.b32.xlu0 %v15258_v14, %s18609_s27 }
 0x7ea   :  { %4861 = vrot.lane.b32.xlu1 %v15186_v16, %s18600_s25  ;;  %v15708_v16 = vrot.slane %v15607_v19, 3 }
 0x7eb   :  { %v15691_v63 = vpop.permute.xlu0 %4927 }
 0x7ec   :  { %v15693_v62 = vpop.permute.xlu1 %3899 }
 0x7ed   :  { %19222 = vst [vmem:[#allocation67_spill] sm:$0xff] %v15693_v62  ;;  %3905 = vrot.lane.b32.xlu0 %v15689_v53, %s18559_s17 }
 0x7ee   :  { %4571 = vrot.lane.b32.xlu1 %v15207_v27, %s8643_s24 }
 0x7ef   :  { %v15699_v14 = vpop.permute.xlu0 %4135 }
 0x7f0   :  { %19223 = vst [vmem:[#allocation108_spill] sm:$0xff] %v15699_v14  ;;  %v15701_v17 = vpop.permute.xlu1 %4563 }
 0x7f1   :  { %4717 = vrot.lane.b32.xlu0 %v15414_v13, %s18591_s20  ;;  %v19224_v13 = vrot.slane %v15207_v27, 3 }
 0x7f2   :  { %4863 = vrot.lane.b32.xlu1 %v15428_v0, %s18600_s25 }
 0x7f3   :  { %v15710_v30 = vpop.permute.xlu0 %4709  ;;  %v7604_v26 = vpop.f32.mrf.mxu1  ;;  %v15723_v0 = vsel %vm19225_vm8, %v19224_v13, %v15708_v16  ;;  %v19235_v13 = vld [vmem:[#allocation57_spill] sm:$0xff]  ;;  %vm19238_vm8 = vcmask 72704  }
 0x7f4   :  { %v15712_v7 = vpop.permute.xlu1 %4855  ;;  %v5666_v10 = vadd.f32 %v7604_v26, %v15278_v59  ;;  %v5157_v26 = vsel %vm19233_vm15, %v5133_v47, %v19232_v5  ;;  %vm19247_vm15 = vmmov %vm19244_vm9 }
 0x7f5   :  { %5009 = vrot.lane.b32.xlu0 %v15435_v18, %s18617_s11  ;;  %v5660_v15 = vpop.f32.mrf.mxu1 }
 0x7f6   :  { %3788 = vrot.lane.b32.xlu1 %v15628_v41, %s8636_s23  ;;  %v5756_v2 = vmax.f32 %v5666_v10, 0.0  ;;  %v5661_v18 = vadd.f32 %v15278_v59, %v5660_v15  ;;  %v5158_v15 = vsel %vm19236_vm3, %v5134_v50, %v19235_v13  ;;  %vm19249_vm3 = vcmask 121856   ;;  %s19527_s23 = smov 72  }
 0x7f7   :  { %v15725_v42 = vpop.permute.xlu0 %5001 }
 0x7f8   :  { %v15727_v23 = vpop.permute.xlu1 %4018  ;;  %5780 = vst.msk [vmem:[#allocation2 + $0x38] sm:$0xff] %vm19229_vm1, %v5756_v2  ;;  %v5755_v6 = vmax.f32 %v5661_v18, 0.0  ;;  %v5181_v2 = vsel %vm19238_vm8, %v5157_v26, %v19237_v34  ;;  %v15752_v18 = vmax.f32 %v5798_v44, %v5810_v37  ;;  %vm19242_vm1 = vmmov %vm19238_vm8  ;;  %v19246_v44 = vld [vmem:[#allocation130_spill] sm:$0xff]  ;;  %v19250_v26 = vld [vmem:[#allocation68_spill] sm:$0xff] }
 0x7f9   :  { %19226 = vst [vmem:[#allocation134_spill] sm:$0xff] %v15727_v23  ;;  %4024 = vrot.lane.b32.xlu0 %v15723_v0, %s18561_s18  ;;  %v5182_v47 = vsel %vm19242_vm1, %v5158_v15, %v19241_v32  ;;  %v5205_v5 = vsel %vm19244_vm9, %v5181_v2, %v19243_v57  ;;  %vm19251_vm8 = vmmov %vm19249_vm3  ;;  %v19252_v15 = vld [vmem:[#allocation160_spill] sm:$0xff]  ;;  %vm19254_vm1 = vcmask 171008   ;;  %v19255_v2 = vrot.slane %v15207_v27, 4 }
 0x7fa   :  { %4645 = vrot.lane.b32.xlu1 %v3741_v46, %s18586_s21  ;;  %19239 = vst [vmem:[#allocation70_spill] sm:$0xff] %v15752_v18  ;;  %5779 = vst.msk [vmem:[#allocation2 + $0x30] sm:$0xff] %vm19240_vm10, %v5755_v6  ;;  %v5206_v37 = vsel %vm19247_vm15, %v5182_v47, %v19246_v44  ;;  %v19248_v6 = vld [vmem:[#allocation20_spill] sm:$0xff]  ;;  %vm19253_vm10 = vcmask 146432   ;;  %vm19256_vm9 = vcmask 1043456   ;;  %v19281_v28 = vrot.slane %v15752_v18, 6 }
 0x7fb   :  { %v15746_v10 = vpop.permute.xlu0 %4137  ;;  %v5229_v50 = vsel %vm19249_vm3, %v5205_v5, %v19248_v6  ;;  %v5230_v13 = vsel %vm19251_vm8, %v5206_v37, %v19250_v26  ;;  %v15788_v32 = vsel %vm19256_vm9, %v19255_v2, %v15758_v35  ;;  %vm19258_vm15 = vmmov %vm19253_vm10  ;;  %vm19259_vm3 = vcmask 220160  }
 0x7fc   :  { %19234 = vst [vmem:[#allocation140_spill] sm:$0xff] %v15746_v10  ;;  %v15755_v46 = vpop.permute.xlu1 %4637  ;;  %v15764_v10 = vmax.f32 %v5799_v25, %v5811_v48  ;;  %v5253_v34 = vsel %vm19253_vm10, %v5229_v50, %v19252_v15  ;;  %vm19262_vm8 = vcmask 1046528   ;;  %v19263_v37 = vrot.slane %v15752_v18, 3 }
 0x7fd   :  { %4791 = vrot.lane.b32.xlu0 %v15460_v61, %s18596_s22  ;;  %v5277_v61 = vsel %vm19254_vm1, %v5253_v34, %v15321_v38  ;;  %vm19264_vm10 = vcmask 1044480   ;;  %vm19267_vm1 = vcmask 1045504  }
 0x7fe   :  { %19245 = vst [vmem:[#allocation111_spill] sm:$0xff] %v15764_v10  ;;  %4937 = vrot.lane.b32.xlu1 %v15473_v49, %s18609_s27  ;;  %v5846_v57 = vrot.slane %v15764_v10, 1  ;;  %v5944_v5 = vrot.slane %v15764_v10, 3  ;;  %v5895_v38 = vrot.slane %v15764_v10, 2  ;;  %v5994_v44 = vrot.slane %v15764_v10, 4 }
 0x7ff   :  { %v15778_v25 = vpop.permute.xlu0 %4711  ;;  %v5301_v34 = vsel %vm1687_vm14, %v5277_v61, %v15437_v1  ;;  %v6045_v23 = vrot.slane %v15764_v10, 5  ;;  %v19261_v1 = vrot.slane %v15752_v18, 1 }
 0x800   :  { %v15782_v48 = vpop.permute.xlu1 %4929  ;;  %v5325_v6 = vsel %vm19259_vm3, %v5301_v34, %v15443_v21  ;;  %v15830_v21 = vsel %vm19264_vm10, %v19263_v37, %v5944_v5  ;;  %vm19276_vm3 = vmmov %vm19262_vm8 }
 0x801   :  { %5083 = vrot.lane.b32.xlu0 %v15482_v43, %s18622_s15  ;;  %v19257_v43 = vld [vmem:[#allocation136_spill] sm:$0xff]  ;;  %v5800_v2 = vld [vmem:[#allocation2 + $0x30] ss:$2 sm:$0xff]  ;;  %v5812_v47 = vld [vmem:[#allocation2 + $0x31] ss:$2 sm:$0xff]  ;;  %v15825_v61 = vsel %vm19262_vm8, %v19261_v1, %v5846_v57  ;;  %19265 = vst [vmem:[#allocation162_spill] sm:$0xff] %v15830_v21 }
 0x802   :  { %3907 = vrot.lane.b32.xlu1 %v15675_v39, %s18559_s17  ;;  %v5254_v15 = vsel %vm19258_vm15, %v5230_v13, %v19257_v43  ;;  %v15814_v50 = vmax.f32 %v5800_v2, %v5812_v47  ;;  %v6096_v13 = vrot.slane %v15764_v10, 6  ;;  %v6147_v43 = vrot.slane %v15764_v10, 7  ;;  %vm19278_vm8 = vmmov %vm19267_vm1  ;;  %s19567_s17 = smov 112  }
 0x803   :  { %v15808_v49 = vpop.permute.xlu0 %5003  ;;  %v19266_v47 = vrot.slane %v15752_v18, 2  ;;  %v19268_v2 = vrot.slane %v15752_v18, 4  ;;  %vm19272_vm15 = vcmask 1042432  }
 0x804   :  { %v15816_v26 = vpop.permute.xlu1 %3782  ;;  %v19275_v62 = vrot.slane %v15814_v50, 1  ;;  %v19277_v12 = vrot.slane %v15814_v50, 2 }
 0x805   :  { %19260 = vst [vmem:[#allocation143_spill] sm:$0xff] %v15816_v26  ;;  %4143 = vrot.lane.b32.xlu0 %v15788_v32, %s18564_s26  ;;  %v15835_v34 = vsel %vm19267_vm1, %v19266_v47, %v5895_v38  ;;  %v15840_v26 = vsel %vm19256_vm9, %v19268_v2, %v5994_v44  ;;  %v19271_v47 = vrot.slane %v15752_v18, 5  ;;  %vm19282_vm1 = vcmask 1041408  }
 0x806   :  { %19269 = vst [vmem:[#allocation184_spill] sm:$0xff] %v15840_v26  ;;  %4719 = vrot.lane.b32.xlu1 %v15689_v53, %s18591_s20  ;;  %v15863_v37 = vsel %vm19276_vm3, %v5846_v57, %v19275_v62  ;;  %v15878_v53 = vsel %vm19282_vm1, %v19281_v28, %v6096_v13  ;;  %v19284_v62 = vrot.slane %v15814_v50, 4  ;;  %vm19290_vm3 = vcmask 1042432  }
 0x807   :  { %v15848_v10 = vpop.permute.xlu0 %3784  ;;  %v15853_v14 = vsel %vm19272_vm15, %v19271_v47, %v6045_v23  ;;  %v19279_v47 = vrot.slane %v15814_v50, 3  ;;  %19283 = vst [vmem:[#allocation183_spill] sm:$0xff] %v15878_v53  ;;  %vm19287_vm15 = vcmask 1040384  }
 0x808   :  { %19270 = vst [vmem:[#allocation69_spill] sm:$0xff] %v15848_v10  ;;  %19273 = vst [vmem:[#allocation110_spill] sm:$0xff] %v15853_v14  ;;  %v15858_v1 = vpop.permute.xlu1 %4254  ;;  %v15868_v10 = vsel %vm19278_vm8, %v5895_v38, %v19277_v12  ;;  %v15885_v57 = vsel %vm19256_vm9, %v5994_v44, %v19284_v62  ;;  %v19286_v12 = vrot.slane %v15752_v18, 7  ;;  %v19292_v44 = vrot.slane %v15814_v50, 7 }
 0x809   :  { %19274 = vst [vmem:[#allocation142_spill] sm:$0xff] %v15858_v1  ;;  %v15873_v2 = vsel %vm19264_vm10, %v5944_v5, %v19279_v47  ;;  %4865 = vrot.lane.b32.xlu0 %v15508_v55, %s18600_s25  ;;  %19285 = vst [vmem:[#allocation19_spill] sm:$0xff] %v15885_v57  ;;  %v19289_v5 = vrot.slane %v15814_v50, 5  ;;  %vm19299_vm9 = vcmask 244736  }
 0x80a   :  { %19280 = vst [vmem:[#allocation161_spill] sm:$0xff] %v15873_v2  ;;  %v15890_v38 = vsel %vm19287_vm15, %v19286_v12, %v6147_v43  ;;  %5011 = vrot.lane.b32.xlu1 %v15517_v11, %s18617_s11  ;;  %vm19293_vm8 = vmmov %vm19287_vm15  ;;  %v19295_v12 = vrot.slane %v15814_v50, 6  ;;  %vm19300_vm15 = vcmask 269312  }
 0x80b   :  { %19288 = vst [vmem:[#allocation36_spill] sm:$0xff] %v15890_v38  ;;  %v15895_v47 = vsel %vm19290_vm3, %v6045_v23, %v19289_v5  ;;  %v15906_v62 = vsel %vm19293_vm8, %v6147_v43, %v19292_v44  ;;  %vm19296_vm10 = vmmov %vm19282_vm1  ;;  %v15915_v5 = vpop.permute.xlu0 %4256  ;;  %vm19298_vm1 = vcmask 171008   ;;  %vm19301_vm3 = vcmask 220160   ;;  %v19325_v43 = vld [vmem:[#allocation182_spill] sm:$0xff] }
 0x80c   :  { %19291 = vst [vmem:[#allocation64_spill] sm:$0xff] %v15895_v47  ;;  %19294 = vst [vmem:[#allocation105_spill] sm:$0xff] %v15906_v62  ;;  %v15911_v1 = vsel %vm19296_vm10, %v6096_v13, %v19295_v12  ;;  %v5278_v13 = vsel %vm19298_vm1, %v5254_v15, %v15347_v9  ;;  %v5349_v12 = vsel %vm19299_vm9, %v5325_v6, %v15492_v24  ;;  %v15929_v23 = vpop.permute.xlu1 %4783  ;;  %vm19302_vm8 = vcmask 293888  }
 0x80d   :  { %19297 = vst [vmem:[#allocation137_spill] sm:$0xff] %v15911_v1  ;;  %v5302_v11 = vsel %vm1687_vm14, %v5278_v13, %v15484_v60  ;;  %v5373_v55 = vsel %vm19300_vm15, %v5349_v12, %v15613_v56  ;;  %4145 = vrot.lane.b32.xlu0 %v15758_v35, %s18564_s26  ;;  %vm19303_vm10 = vmmov %vm19299_vm9  ;;  %vm19304_vm1 = vcmask 318464   ;;  %s19561_s26 = smov 104  }
 0x80e   :  { %v5326_v44 = vsel %vm19301_vm3, %v5302_v11, %v15521_v51  ;;  %v5397_v9 = vsel %vm19302_vm8, %v5373_v55, %v15679_v54  ;;  %4026 = vrot.lane.b32.xlu1 %v15708_v16, %s18561_s18  ;;  %vm19305_vm9 = vmmov %vm19300_vm15  ;;  %vm19306_vm15 = vcmask 343040  }
 0x80f   :  { %v5350_v24 = vsel %vm19303_vm10, %v5326_v44, %v15528_v3  ;;  %v5421_v60 = vsel %vm19304_vm1, %v5397_v9, %v15691_v63  ;;  %v15947_v6 = vpop.permute.xlu0 %4785  ;;  %vm19307_vm3 = vmmov %vm19302_vm8  ;;  %vm19308_vm8 = vcmask 367616   ;;  %v15959_v3 = vrot.slane %v15607_v19, 5 }
 0x810   :  { %v5374_v56 = vsel %vm19305_vm9, %v5350_v24, %v15634_v29  ;;  %v5445_v51 = vsel %vm19306_vm15, %v5421_v60, %v15725_v42  ;;  %v5076_v15 = vpop.permute.xlu1 %5075  ;;  %vm19309_vm10 = vmmov %vm19304_vm1  ;;  %vm19310_vm1 = vcmask 392192   ;;  %v15986_v44 = vrot.slane %v15607_v19, 6 }
 0x811   :  { %v5398_v54 = vsel %vm19307_vm3, %v5374_v56, %v15712_v7  ;;  %v5469_v55 = vsel %vm19308_vm8, %v5445_v51, %v5076_v15  ;;  %4867 = vrot.lane.b32.xlu0 %v15788_v32, %s18600_s25  ;;  %vm19311_vm9 = vmmov %vm19306_vm15  ;;  %v16003_v56 = vrot.slane %v15607_v19, 7 }
 0x812   :  { %v5422_v63 = vsel %vm19309_vm10, %v5398_v54, %v15782_v48  ;;  %4793 = vrot.lane.b32.xlu1 %v15723_v0, %s18596_s22  ;;  %7614 = vmatprep.mubr.msk.f32.mxu1 %vm19310_vm1, %v5469_v55  ;;  %vm19312_vm15 = vmmov %vm19308_vm8  ;;  %v19314_v0 = vrot.slane %v15207_v27, 5  ;;  %vm19315_vm8 = vcmask 1042432   ;;  %vm19317_vm10 = vcmask 1041408  }
 0x813   :  { %v5446_v29 = vsel %vm19311_vm9, %v5422_v63, %v15808_v49  ;;  %v5078_v7 = vpop.permute.xlu0 %5077  ;;  %vm19313_vm3 = vmmov %vm19310_vm1  ;;  %v19318_v54 = vrot.slane %v15207_v27, 7  ;;  %vm19319_vm1 = vcmask 1040384   ;;  %vm19321_vm9 = vcmask 23552  }
 0x814   :  { %v5470_v42 = vsel %vm19312_vm15, %v5446_v29, %v5078_v7  ;;  %v15969_v11 = vpop.permute.xlu1 %3901  ;;  %v4217_v48 = vsel %vm19315_vm8, %v19314_v0, %v15959_v3  ;;  %v19320_v0 = vld [vmem:[#allocation104_spill] sm:$0xff]  ;;  %vm19322_vm15 = vcmask 1046528   ;;  %vm19326_vm8 = vcmask 72704  }
 0x815   :  { %4264 = vrot.lane.b32.xlu0 %v15959_v3, %s18571_s12  ;;  %7615 = vmatmul.mubr.msk.f32.gmra.mxu1 %vm19313_vm3, %v5470_v42  ;;  %v4455_v55 = vsel %vm19319_vm1, %v19318_v54, %v16003_v56  ;;  %v8626_v42 = vld [vmem:[%s17641_s0 + $0x148] sm:$0xff]  ;;  %vm19324_vm3 = vcmask 48128   ;;  %vm19328_vm1 = vcmask 121856  }
 0x816   :  { %5085 = vrot.lane.b32.xlu1 %v15639_v4, %s18622_s15  ;;  %v19316_v4 = vrot.slane %v15207_v27, 6 }
 0x817   :  { %v15980_v32 = vpop.permute.xlu0 %4020 }
 0x818   :  { %v15982_v49 = vpop.permute.xlu1 %4373  ;;  %v4336_v9 = vsel %vm19317_vm10, %v19316_v4, %v15986_v44  ;;  %v19323_v4 = vld [vmem:[#allocation109_spill] sm:$0xff]  ;;  %vm19327_vm10 = vcmask 97280  }
 0x819   :  { %4941 = vrot.lane.b32.xlu0 %v4217_v48, %s18609_s27 }
 0x81a   :  { %4262 = vrot.lane.b32.xlu1 %v4217_v48, %s18571_s12 }
 0x81b   :  { %v15989_v13 = vpop.permute.xlu0 %4492 }
 0x81c   :  { %v4858_v12 = vpop.permute.xlu1 %4857 }
 0x81d   :  { %4383 = vrot.lane.b32.xlu0 %v15986_v44, %s18576_s13 }
 0x81e   :  { %4939 = vrot.lane.b32.xlu1 %v15548_v36, %s18609_s27  ;;  %v16011_v36 = vld [vmem:[%s17641_s0 + $0x188] sm:$0xff] }
 0x81f   :  { %v4932_v24 = vpop.permute.xlu0 %4931  ;;  %v4601_v63 = vrot.slane %v16011_v36, 1  ;;  %v4675_v48 = vrot.slane %v16011_v36, 2 }
 0x820   :  { %v15999_v60 = vpop.permute.xlu1 %3903 }
 0x821   :  { %5015 = vrot.lane.b32.xlu0 %v4336_v9, %s18617_s11  ;;  %v4602_v27 = vsel %vm19322_vm15, %v15628_v41, %v4601_v63  ;;  %vm19331_vm15 = vcmask 146432  }
 0x822   :  { %4381 = vrot.lane.b32.xlu1 %v4336_v9, %s18576_s13 }
 0x823   :  { %v16006_v51 = vpop.permute.xlu0 %4139 }
 0x824   :  { %v16013_v15 = vpop.permute.xlu1 %4375 }
 0x825   :  { %4502 = vrot.lane.b32.xlu0 %v16003_v56, %s18581_s19 }
 0x826   :  { %5013 = vrot.lane.b32.xlu1 %v15538_v52, %s18617_s11  ;;  %v5135_v52 = vsel %vm19321_vm9, %v8626_v42, %v19320_v0  ;;  %vm19329_vm9 = vcmask 1045504   ;;  %v4749_v42 = vrot.slane %v16011_v36, 3  ;;  %v19330_v0 = vld [vmem:[#allocation37_spill] sm:$0xff] }
 0x827   :  { %v16024_v29 = vpop.permute.xlu0 %4565  ;;  %v5159_v9 = vsel %vm19324_vm3, %v5135_v52, %v19323_v4  ;;  %v4676_v41 = vsel %vm19329_vm9, %v15675_v39, %v4675_v48  ;;  %vm19332_vm3 = vcmask 171008   ;;  %vm19336_vm9 = vcmask 269312  }
 0x828   :  { %v16026_v7 = vpop.permute.xlu1 %4859  ;;  %v5183_v28 = vsel %vm19326_vm8, %v5159_v9, %v19325_v43  ;;  %vm19333_vm8 = vcmask 220160  }
 0x829   :  { %5089 = vrot.lane.b32.xlu0 %v4455_v55, %s18622_s15  ;;  %v5207_v62 = vsel %vm19327_vm10, %v5183_v28, %v15418_v45  ;;  %vm19334_vm10 = vcmask 1044480  }
 0x82a   :  { %4500 = vrot.lane.b32.xlu1 %v4455_v55, %s18581_s19  ;;  %v5231_v55 = vsel %vm19328_vm1, %v5207_v62, %v15430_v8  ;;  %vm19335_vm1 = vcmask 244736  }
 0x82b   :  { %v5006_v54 = vpop.permute.xlu0 %5005  ;;  %v5255_v43 = vsel %vm19331_vm15, %v5231_v55, %v19330_v0  ;;  %vm19337_vm15 = vcmask 293888  }
 0x82c   :  { %v16042_v1 = vpop.permute.xlu1 %4022  ;;  %v5279_v45 = vsel %vm19332_vm3, %v5255_v43, %v15579_v40  ;;  %v4823_v40 = vrot.slane %v16011_v36, 4  ;;  %vm19338_vm3 = vcmask 318464   ;;  %v4897_v43 = vrot.slane %v16011_v36, 5 }
 0x82d   :  { %4647 = vrot.lane.b32.xlu0 %v4602_v27, %s18586_s21  ;;  %v5303_v8 = vsel %vm1687_vm14, %v5279_v45, %v15668_v58  ;;  %v4750_v27 = vsel %vm19334_vm10, %v15708_v16, %v4749_v42  ;;  %vm19340_vm10 = vcmask 1043456  }
 0x82e   :  { %5087 = vrot.lane.b32.xlu1 %v15596_v20, %s18622_s15  ;;  %v5327_v39 = vsel %vm19333_vm8, %v5303_v8, %v15677_v31  ;;  %vm19339_vm8 = vcmask 64512  }
 0x82f   :  { %v16056_v52 = vpop.permute.xlu0 %4258  ;;  %v5351_v4 = vsel %vm19335_vm1, %v5327_v39, %v15710_v30  ;;  %vm19341_vm1 = vcmask 343040   ;;  %v5797_v39 = vld [vmem:[#allocation2] ss:$2 sm:$0xff] }
 0x830   :  { %v16060_v28 = vpop.permute.xlu1 %4494  ;;  %v7607_v20 = vpop.f32.mrf.mxu1  ;;  %v5375_v55 = vsel %vm19336_vm9, %v5351_v4, %v15929_v23  ;;  %v4824_v23 = vsel %vm19340_vm10, %v15758_v35, %v4823_v40  ;;  %vm19342_vm9 = vmmov %vm19339_vm8  ;;  %vm19346_vm10 = vcmask 1041408   ;;  %v19347_v4 = vld [vmem:[#allocation34_spill] sm:$0xff] }
 0x831   :  { %4721 = vrot.lane.b32.xlu0 %v4676_v41, %s18591_s20  ;;  %v5676_v62 = vadd.f32 %v7607_v20, %v15278_v59  ;;  %v5399_v0 = vsel %vm19337_vm15, %v5375_v55, %v4858_v12  ;;  %vm19343_vm15 = vcmask 367616  }
 0x832   :  { %4573 = vrot.lane.b32.xlu1 %v15607_v19, %s8643_s24  ;;  %v5670_v9 = vpop.f32.mrf.mxu1  ;;  %v5423_v16 = vsel %vm19338_vm3, %v5399_v0, %v4932_v24  ;;  %vm19344_vm3 = vcmask 392192   ;;  %v4971_v24 = vrot.slane %v16011_v36, 6 }
 0x833   :  { %v16075_v58 = vpop.permute.xlu0 %4639  ;;  %v5758_v31 = vmax.f32 %v5676_v62, 0.0  ;;  %v5671_v19 = vadd.f32 %v15278_v59, %v5670_v9  ;;  %v5447_v45 = vsel %vm19341_vm1, %v5423_v16, %v5006_v54  ;;  %v5809_v62 = vld [vmem:[#allocation2 + $0x1] ss:$2 sm:$0xff]  ;;  %vm19348_vm1 = vcmask 23552  }
 0x834   :  { %v16079_v41 = vpop.permute.xlu1 %4933  ;;  %v16120_v16 = vmax.f32 %v5797_v39, %v5809_v62  ;;  %v19359_v62 = vld [vmem:[#allocation139_spill] sm:$0xff] }
 0x835   :  { %4795 = vrot.lane.b32.xlu0 %v4750_v27, %s18596_s22  ;;  %5782 = vst.msk [vmem:[#allocation2 + $0x48] sm:$0xff] %vm19339_vm8, %v5758_v31  ;;  %v5757_v30 = vmax.f32 %v5671_v19, 0.0  ;;  %vm19345_vm8 = vcmask 1042432   ;;  %v4972_v27 = vsel %vm19346_vm10, %v15986_v44, %v4971_v24  ;;  %v19349_v31 = vld [vmem:[#allocation141_spill] sm:$0xff]  ;;  %vm19358_vm10 = vcmask 121856  }
 0x836   :  { %4575 = vrot.lane.b32.xlu1 %v16011_v36, %s8643_s24  ;;  %v4898_v35 = vsel %vm19345_vm8, %v15959_v3, %v4897_v43  ;;  %v8627_v3 = vld [vmem:[%s17641_s0 + $0x150] sm:$0xff]  ;;  %19351 = vst [vmem:[#allocation72_spill] sm:$0xff] %v16120_v16  ;;  %vm19356_vm8 = vcmask 1040384  }
 0x837   :  { %v5080_v59 = vpop.permute.xlu0 %5079  ;;  %5781 = vst.msk [vmem:[#allocation2 + $0x40] sm:$0xff] %vm19342_vm9, %v5757_v30  ;;  %v5136_v9 = vsel %vm19348_vm1, %v8627_v3, %v19347_v4  ;;  %vm19350_vm9 = vcmask 48128   ;;  %vm19360_vm1 = vcmask 146432  }
 0x838   :  { %v5471_v12 = vsel %vm19343_vm15, %v5447_v45, %v5080_v59  ;;  %v16094_v8 = vpop.permute.xlu1 %4141  ;;  %v5160_v19 = vsel %vm19350_vm9, %v5136_v9, %v19349_v31  ;;  %vm19353_vm15 = vcmask 72704   ;;  %vm19362_vm9 = vcmask 171008  }
 0x839   :  { %4869 = vrot.lane.b32.xlu0 %v4824_v23, %s18600_s25  ;;  %7617 = vmatprep.mubr.msk.f32.mxu1 %vm19344_vm3, %v5471_v12  ;;  %v19354_v23 = vld [vmem:[#allocation66_spill] sm:$0xff]  ;;  %vm19355_vm3 = vcmask 97280   ;;  %v19357_v12 = vld [vmem:[#allocation107_spill] sm:$0xff]  ;;  %v19363_v31 = vrot.slane %v15752_v18, 1 }
 0x83a   :  { %4649 = vrot.lane.b32.xlu1 %v4601_v63, %s18586_s21  ;;  %v5045_v63 = vrot.slane %v16011_v36, 7  ;;  %s19386_s21 = smov 16  }
 0x83b   :  { %v16102_v20 = vpop.permute.xlu0 %4377 }
 0x83c   :  { %v16104_v54 = vpop.permute.xlu1 %4567  ;;  %v5046_v59 = vsel %vm19356_vm8, %v16003_v56, %v5045_v63  ;;  %vm19366_vm8 = vcmask 244736  }
 0x83d   :  { %4943 = vrot.lane.b32.xlu0 %v4898_v35, %s18609_s27 }
 0x83e   :  { %4723 = vrot.lane.b32.xlu1 %v4675_v48, %s18591_s20  ;;  %v19352_v48 = vld [vmem:[#allocation61_spill] sm:$0xff]  ;;  %s19392_s20 = smov 32  }
 0x83f   :  { %v16116_v55 = vpop.permute.xlu0 %4713  ;;  %v5184_v44 = vsel %vm19353_vm15, %v5160_v19, %v19352_v48  ;;  %v5801_v30 = vld [vmem:[#allocation2 + $0x40] ss:$2 sm:$0xff]  ;;  %v5813_v36 = vld [vmem:[#allocation2 + $0x41] ss:$2 sm:$0xff]  ;;  %vm19364_vm15 = vcmask 1046528  }
 0x840   :  { %v5008_v0 = vpop.permute.xlu1 %5007  ;;  %v5208_v45 = vsel %vm19355_vm3, %v5184_v44, %v19354_v23  ;;  %v16136_v4 = vmax.f32 %v5801_v30, %v5813_v36  ;;  %vm19365_vm3 = vcmask 220160  }
 0x841   :  { %5017 = vrot.lane.b32.xlu0 %v4972_v27, %s18617_s11  ;;  %v5232_v35 = vsel %vm19358_vm10, %v5208_v45, %v19357_v12  ;;  %v5843_v27 = vrot.slane %v16120_v16, 1  ;;  %vm19367_vm10 = vcmask 269312   ;;  %v19370_v45 = vrot.slane %v15752_v18, 3 }
 0x842   :  { %4797 = vrot.lane.b32.xlu1 %v4749_v42, %s18596_s22  ;;  %v5256_v3 = vsel %vm19360_vm1, %v5232_v35, %v19359_v62  ;;  %19361 = vst [vmem:[#allocation71_spill] sm:$0xff] %v16136_v4  ;;  %vm19369_vm1 = vcmask 293888   ;;  %s19395_s22 = smov 40  }
 0x843   :  { %v16132_v39 = vpop.permute.xlu0 %4379  ;;  %v5280_v42 = vsel %vm19362_vm9, %v5256_v3, %v15602_v33  ;;  %v5845_v19 = vsel %vm19364_vm15, %v5843_v27, %v19363_v31  ;;  %vm19371_vm9 = vcmask 1044480   ;;  %vm19372_vm15 = vcmask 318464  }
 0x844   :  { %v16138_v9 = vpop.permute.xlu1 %4260  ;;  %v5304_v56 = vsel %vm1687_vm14, %v5280_v42, %v15701_v17  ;;  %v8163_v30 = vpack.i.bf16 %v15825_v61, %v5845_v19  ;;  %v5941_v17 = vrot.slane %v16120_v16, 3  ;;  %v17909_v3 = vrot.slane %v16136_v4, 2 }
 0x845   :  { %5091 = vrot.lane.b32.xlu0 %v5046_v59, %s18622_s15  ;;  %v5328_v48 = vsel %vm19365_vm3, %v5304_v56, %v15755_v46  ;;  %vm19373_vm3 = vcmask 343040   ;;  %v19378_v56 = vrot.slane %v15814_v50, 2  ;;  %v17906_v19 = vrot.slane %v16136_v4, 3 }
 0x846   :  { %4871 = vrot.lane.b32.xlu1 %v4823_v40, %s18600_s25  ;;  %v5352_v33 = vsel %vm19366_vm8, %v5328_v48, %v15778_v25  ;;  %v17908_v40 = vrot.slane %v16136_v4, 1  ;;  %s19368_s25 = smov 8   ;;  %v5943_v25 = vsel %vm19371_vm9, %v5941_v17, %v19370_v45  ;;  %vm19375_vm8 = vcmask 1046528  }
 0x847   :  { %v16152_v44 = vpop.permute.xlu0 %4715  ;;  %v5376_v23 = vsel %vm19367_vm10, %v5352_v33, %v15947_v6  ;;  %v8173_v35 = vpack.i.bf16 %v15830_v21, %v5943_v25  ;;  %vm19376_vm10 = vcmask 367616   ;;  %vm19379_vm9 = vcmask 1045504   ;;  %v19409_v21 = vld [vmem:[#allocation142_spill] sm:$0xff] }
 0x848   :  { %v16157_v36 = vpop.permute.xlu1 %4641  ;;  %v5400_v46 = vsel %vm19369_vm1, %v5376_v23, %v16026_v7  ;;  %v19374_v7 = vrot.slane %v15814_v50, 1  ;;  %vm19377_vm1 = vcmask 392192   ;;  %v16199_v31 = vsel %vm19379_vm9, %v19378_v56, %v17909_v3 }
 0x849   :  { %8164 = vrot.lane.b32.xlu0 %v8163_v30, %s19368_s25  ;;  %v5424_v59 = vsel %vm19372_vm15, %v5400_v46, %v16079_v41  ;;  %19380 = vst [vmem:[#allocation113_spill] sm:$0xff] %v16199_v31  ;;  %v19381_v30 = vrot.slane %v15752_v18, 2  ;;  %vm19382_vm15 = vmmov %vm19379_vm9  ;;  %v8193_v17 = vpack.i.bf16 %v16199_v31, %v15868_v10  ;;  %v19383_v45 = vrot.slane %v15814_v50, 3 }
 0x84a   :  { %4945 = vrot.lane.b32.xlu1 %v4897_v43, %s18609_s27  ;;  %v5448_v6 = vsel %vm19373_vm3, %v5424_v59, %v5008_v0  ;;  %v16181_v43 = vsel %vm19375_vm8, %v19374_v7, %v17908_v40  ;;  %vm19384_vm3 = vcmask 1044480   ;;  %v5991_v59 = vrot.slane %v16120_v16, 4  ;;  %s19398_s27 = smov 48   ;;  %v19401_v40 = vld [vmem:[#allocation159_spill] sm:$0xff] }
 0x84b   :  { %v16172_v12 = vpop.permute.xlu0 %4498  ;;  %v8183_v0 = vpack.i.bf16 %v16181_v43, %v15863_v37  ;;  %v16218_v25 = vsel %vm19384_vm3, %v19383_v45, %v17906_v19  ;;  %vm19388_vm8 = vcmask 1043456   ;;  %v19389_v56 = vrot.slane %v15814_v50, 4 }
 0x84c   :  { %v5082_v62 = vpop.permute.xlu1 %5081  ;;  %19385 = vst [vmem:[#allocation145_spill] sm:$0xff] %v16218_v25  ;;  %v8203_v7 = vpack.i.bf16 %v16218_v25, %v15873_v2  ;;  %vm19397_vm9 = vcmask 1041408   ;;  %vm19402_vm3 = vcmask 23552   ;;  %v17915_v3 = vrot.slane %v16136_v4, 5 }
 0x84d   :  { %v5472_v27 = vsel %vm19376_vm10, %v5448_v6, %v5082_v62  ;;  %8174 = vrot.lane.b32.xlu0 %v8173_v35, %s8643_s24  ;;  %v19387_v6 = vrot.slane %v15752_v18, 4  ;;  %vm19390_vm10 = vmmov %vm19388_vm8  ;;  %v19448_v2 = vrot.slane %v16136_v4, 3 }
 0x84e   :  { %5019 = vrot.lane.b32.xlu1 %v4971_v24, %s18617_s11  ;;  %7618 = vmatmul.mubr.msk.f32.gmra.mxu1 %vm19377_vm1, %v5472_v27  ;;  %v5892_v24 = vrot.slane %v16120_v16, 2  ;;  %vm19394_vm1 = vcmask 1042432   ;;  %s19547_s11 = smov 96  }
 0x84f   :  { %v16188_v41 = vpop.permute.xlu0 %4789  ;;  %v5993_v62 = vsel %vm19388_vm8, %v5991_v59, %v19387_v6  ;;  %vm19403_vm8 = vcmask 48128  }
 0x850   :  { %v16192_v42 = vpop.permute.xlu1 %4496  ;;  %v5894_v33 = vsel %vm19382_vm15, %v5892_v24, %v19381_v30  ;;  %v6042_v30 = vrot.slane %v16120_v16, 5  ;;  %vm19400_vm15 = vcmask 1040384  }
 0x851   :  { %8184 = vrot.lane.b32.xlu0 %v8183_v0, %s19368_s25  ;;  %v8168_v46 = vpack.i.bf16 %v15835_v34, %v5894_v33  ;;  %v8178_v0 = vpack.i.bf16 %v15840_v26, %v5993_v62  ;;  %v6093_v62 = vrot.slane %v16120_v16, 6 }
 0x852   :  { %5093 = vrot.lane.b32.xlu1 %v5045_v63, %s18622_s15  ;;  %v17907_v63 = vrot.slane %v16136_v4, 4  ;;  %s19551_s15 = smov 88  }
 0x853   :  { %v16205_v48 = vpop.permute.xlu0 %3786 }
 0x854   :  { %v4788_v23 = vpop.permute.xlu1 %4787  ;;  %v16239_v24 = vsel %vm19390_vm10, %v19389_v56, %v17907_v63  ;;  %v8628_v63 = vld [vmem:[%s17641_s0 + $0x158] sm:$0xff]  ;;  %vm19405_vm10 = vcmask 72704  }
 0x855   :  { %8194 = vrot.lane.b32.xlu0 %v8193_v17, %s19386_s21  ;;  %19391 = vst [vmem:[#allocation112_spill] sm:$0xff] %v16239_v24  ;;  %v19393_v17 = vrot.slane %v15752_v18, 5  ;;  %v8213_v45 = vpack.i.bf16 %v16239_v24, %v15885_v57 }
 0x856   :  { %8169 = vrot.lane.b32.xlu1 %v8168_v46, %s19386_s21 }
 0x857   :  { %v16224_v35 = vpop.permute.xlu0 %4643  ;;  %v6044_v46 = vsel %vm19394_vm1, %v6042_v30, %v19393_v17  ;;  %v6144_v17 = vrot.slane %v16120_v16, 7  ;;  %v19404_v16 = vld [vmem:[#allocation102_spill] sm:$0xff]  ;;  %vm19408_vm1 = vcmask 97280  }
 0x858   :  { %v16231_v27 = vpop.permute.xlu1 %4569  ;;  %v8188_v6 = vpack.i.bf16 %v15853_v14, %v6044_v46 }
 0x859   :  { %8204 = vrot.lane.b32.xlu0 %v8203_v7, %s8643_s24 }
 0x85a   :  { %8179 = vrot.lane.b32.xlu1 %v8178_v0, %s19392_s20  ;;  %v19396_v0 = vrot.slane %v15752_v18, 6 }
 0x85b   :  { %v4936_v33 = vpop.permute.xlu0 %4935 }
 0x85c   :  { %v4862_v59 = vpop.permute.xlu1 %4861  ;;  %v6095_v56 = vsel %vm19397_vm9, %v6093_v62, %v19396_v0  ;;  %v5137_v62 = vsel %vm19402_vm3, %v8628_v63, %v19401_v40  ;;  %vm19410_vm9 = vcmask 121856   ;;  %vm19414_vm3 = vcmask 1042432  }
 0x85d   :  { %8214 = vrot.lane.b32.xlu0 %v8213_v45, %s19392_s20  ;;  %v8198_v30 = vpack.i.bf16 %v15878_v53, %v6095_v56  ;;  %v19399_v45 = vrot.slane %v15752_v18, 7 }
 0x85e   :  { %8189 = vrot.lane.b32.xlu1 %v8188_v6, %s19395_s22 }
 0x85f   :  { %v16253_v7 = vpop.permute.xlu0 %3905  ;;  %v6146_v6 = vsel %vm19400_vm15, %v6144_v17, %v19399_v45  ;;  %v19407_v17 = vld [vmem:[#allocation108_spill] sm:$0xff]  ;;  %vm19412_vm15 = vcmask 146432  }
 0x860   :  { %v16258_v19 = vpop.permute.xlu1 %4571  ;;  %v8208_v56 = vpack.i.bf16 %v15890_v38, %v6146_v6  ;;  %v19411_v6 = vld [vmem:[#allocation111_spill] sm:$0xff] }
 0x861   :  { %v8218_v38 = vpack.i.bf16 %v19411_v6, %v15752_v18 }
 0x862   :  { %8199 = vrot.lane.b32.xlu1 %v8198_v30, %s19398_s27  ;;  %v5161_v30 = vsel %vm19403_vm8, %v5137_v62, %v15660_v22  ;;  %vm19415_vm8 = vcmask 171008  }
 0x863   :  { %v16263_v46 = vpop.permute.xlu0 %4717  ;;  %v5185_v53 = vsel %vm19405_vm10, %v5161_v30, %v19404_v16  ;;  %v19413_v16 = vrot.slane %v15814_v50, 5  ;;  %vm19417_vm10 = vcmask 220160  }
 0x864   :  { %v16273_v0 = vpop.permute.xlu1 %4863  ;;  %v5209_v45 = vsel %vm19408_vm1, %v5185_v53, %v19407_v17  ;;  %vm19418_vm1 = vcmask 244736  }
 0x865   :  { %v5233_v40 = vsel %vm19410_vm9, %v5209_v45, %v19409_v21  ;;  %v16297_v62 = vsel %vm19414_vm3, %v19413_v16, %v17915_v3  ;;  %vm19419_vm9 = vcmask 269312   ;;  %vm19421_vm3 = vcmask 318464  }
 0x866   :  { %8209 = vrot.lane.b32.xlu1 %v8208_v56, %s19406_s10  ;;  %v5257_v22 = vsel %vm19412_vm15, %v5233_v40, %v15982_v49  ;;  %v8228_v17 = vpack.i.bf16 %v16297_v62, %v15895_v47  ;;  %vm19420_vm15 = vcmask 293888  }
 0x867   :  { %v5010_v14 = vpop.permute.xlu0 %5009  ;;  %v5281_v53 = vsel %vm19415_vm8, %v5257_v22, %v15989_v13  ;;  %vm19422_vm8 = vcmask 64512  }
 0x868   :  { %v16286_v63 = vpop.permute.xlu1 %3788  ;;  %v5305_v21 = vsel %vm1687_vm14, %v5281_v53, %v16024_v29 }
 0x869   :  { %v5329_v49 = vsel %vm19417_vm10, %v5305_v21, %v16075_v58  ;;  %vm19423_vm10 = vcmask 343040  }
 0x86a   :  { %8219 = vrot.lane.b32.xlu1 %v8218_v38, %s19416_s14  ;;  %v5353_v45 = vsel %vm19418_vm1, %v5329_v49, %v16116_v55  ;;  %v16318_v38 = vld [vmem:[%s17643_s2] ss:$0 sm:$0xff]  ;;  %vm19424_vm1 = vmmov %vm19422_vm8 }
 0x86b   :  { %v16304_v56 = vpop.permute.xlu0 %4024  ;;  %v5377_v13 = vsel %vm19419_vm9, %v5353_v45, %v4788_v23  ;;  %vm19425_vm9 = vcmask 367616  }
 0x86c   :  { %v16308_v30 = vpop.permute.xlu1 %4645  ;;  %v5401_v58 = vsel %vm19420_vm15, %v5377_v13, %v4862_v59  ;;  %vm19426_vm15 = vcmask 392192   ;;  %v19427_v13 = vld [vmem:[#allocation180_spill] sm:$0xff] }
 0x86d   :  { %v5425_v23 = vsel %vm19421_vm3, %v5401_v58, %v4936_v33  ;;  %vm19428_vm3 = vcmask 23552  }
 0x86e   :  { %v7610_v40 = vpop.f32.mrf.mxu1  ;;  %8229 = vrot.lane.b32.xlu1 %v8228_v17, %s19395_s22  ;;  %v5449_v45 = vsel %vm19423_vm10, %v5425_v23, %v5010_v14  ;;  %vm19432_vm10 = vcmask 72704  }
 0x86f   :  { %v5686_v29 = vadd.f32 %v16318_v38, %v7610_v40  ;;  %v16323_v22 = vpop.permute.xlu0 %4791  ;;  %v8630_v40 = vld [vmem:[%s17641_s0 + $0x160] sm:$0xff] }
 0x870   :  { %v5680_v16 = vpop.f32.mrf.mxu1  ;;  %v4938_v21 = vpop.permute.xlu1 %4937  ;;  %v5138_v33 = vsel %vm19428_vm3, %v8630_v40, %v19427_v13  ;;  %vm19437_vm3 = vcmask 171008  }
 0x871   :  { %v5760_v53 = vmax.f32 %v5686_v29, 0.0  ;;  %v5681_v55 = vadd.f32 %v16318_v38, %v5680_v16  ;;  %v19429_v29 = vld [vmem:[#allocation67_spill] sm:$0xff]  ;;  %v19431_v16 = vld [vmem:[#allocation134_spill] sm:$0xff] }
 0x873   :  { %5784 = vst.msk [vmem:[#allocation2 + $0x58] sm:$0xff] %vm19422_vm8, %v5760_v53  ;;  %v5759_v49 = vmax.f32 %v5681_v55, 0.0  ;;  %v5084_v3 = vpop.permute.xlu0 %5083  ;;  %vm19430_vm8 = vcmask 48128   ;;  %v19433_v55 = vld [vmem:[#allocation140_spill] sm:$0xff] }
 0x874   :  { %v5473_v17 = vsel %vm19425_vm9, %v5449_v45, %v5084_v3  ;;  %v16331_v59 = vpop.permute.xlu1 %3907  ;;  %v5162_v58 = vsel %vm19430_vm8, %v5138_v33, %v19429_v29  ;;  %vm19435_vm9 = vcmask 121856   ;;  %v6151_v33 = vrot.slane %v16136_v4, 7 }
 0x875   :  { %5783 = vst.msk [vmem:[#allocation2 + $0x50] sm:$0xff] %vm19424_vm1, %v5759_v49  ;;  %7620 = vmatprep.mubr.msk.f32.mxu1 %vm19426_vm15, %v5473_v17  ;;  %v5186_v53 = vsel %vm19432_vm10, %v5162_v58, %v19431_v16  ;;  %vm19434_vm1 = vcmask 97280   ;;  %vm19436_vm15 = vcmask 146432   ;;  %vm19439_vm8 = vcmask 1040384  }
 0x876   :  { %v5210_v23 = vsel %vm19434_vm1, %v5186_v53, %v19433_v55  ;;  %vm19441_vm10 = vcmask 1045504   ;;  %vm19443_vm1 = vcmask 1046528  }
 0x877   :  { %v16341_v14 = vpop.permute.xlu0 %4143  ;;  %v5234_v49 = vsel %vm19435_vm9, %v5210_v23, %v15915_v5  ;;  %v6100_v5 = vrot.slane %v16136_v4, 6  ;;  %v19440_v23 = vrot.slane %v16136_v4, 2  ;;  %vm19446_vm9 = vcmask 1043456  }
 0x878   :  { %v16345_v3 = vpop.permute.xlu1 %4719  ;;  %v5258_v45 = vsel %vm19436_vm15, %v5234_v49, %v16013_v15  ;;  %vm19449_vm15 = vcmask 1044480  }
 0x879   :  { %v5282_v29 = vsel %vm19437_vm3, %v5258_v45, %v16060_v28  ;;  %v19438_v28 = vrot.slane %v15814_v50, 7  ;;  %vm19450_vm3 = vcmask 220160  }
 0x87a   :  { %v5306_v53 = vsel %vm1687_vm14, %v5282_v29, %v16104_v54 }
 0x87b   :  { %v16353_v13 = vpop.permute.xlu0 %4865  ;;  %v16372_v45 = vsel %vm19439_vm8, %v19438_v28, %v6151_v33  ;;  %v19442_v28 = vrot.slane %v16136_v4, 1  ;;  %vm19453_vm8 = vcmask 1042432  }
 0x87c   :  { %v5802_v17 = vld [vmem:[#allocation2 + $0x50] ss:$2 sm:$0xff]  ;;  %v5814_v40 = vld [vmem:[#allocation2 + $0x51] ss:$2 sm:$0xff]  ;;  %v5012_v16 = vpop.permute.xlu1 %5011 }
 0x87d   :  { %v16358_v58 = vmax.f32 %v5802_v17, %v5814_v40  ;;  %v19445_v40 = vrot.slane %v16136_v4, 4 }
 0x87f   :  { %v17919_v55 = vrot.slane %v16358_v58, 2  ;;  %v17920_v15 = vrot.slane %v16358_v58, 1  ;;  %v16367_v18 = vpop.permute.xlu0 %4145  ;;  %v19444_v54 = vrot.slane %v16358_v58, 4  ;;  %v19447_v6 = vrot.slane %v16358_v58, 3 }
 0x880   :  { %v16377_v29 = vpop.permute.xlu1 %4026  ;;  %v19456_v57 = vrot.slane %v16358_v58, 7 }
 0x881   :  { %v16384_v49 = vsel %vm19441_vm10, %v19440_v23, %v17919_v55  ;;  %v16391_v47 = vsel %vm19443_vm1, %v19442_v28, %v17920_v15  ;;  %v16398_v17 = vsel %vm19446_vm9, %v19445_v40, %v19444_v54  ;;  %v16405_v23 = vsel %vm19449_vm15, %v19448_v2, %v19447_v6 }
 0x882   :  { %v5330_v55 = vsel %vm19450_vm3, %v5306_v53, %v16157_v36  ;;  %v19451_v28 = vrot.slane %v16358_v58, 5  ;;  %v19452_v15 = vrot.slane %v16136_v4, 5  ;;  %v19454_v54 = vrot.slane %v16358_v58, 6 }
 0x883   :  { %vm19455_vm10 = vcmask 1041408   ;;  %vm19457_vm1 = vcmask 1040384   ;;  %v19458_v6 = vrot.slane %v15814_v50, 6  ;;  %vm19460_vm15 = vcmask 244736  }
 0x884   :  { %v16414_v26 = vsel %vm19453_vm8, %v19452_v15, %v19451_v28  ;;  %v16419_v40 = vsel %vm19455_vm10, %v6100_v5, %v19454_v54  ;;  %v16424_v2 = vsel %vm19457_vm1, %v6151_v33, %v19456_v57  ;;  %vm19459_vm9 = vmmov %vm19455_vm10  ;;  %v4868_v54 = vpop.permute.xlu0 %4867  ;;  %v4794_v15 = vpop.permute.xlu1 %4793  ;;  %vm19461_vm3 = vcmask 269312  }
 0x885   :  { %v16429_v36 = vsel %vm19459_vm9, %v19458_v6, %v6100_v5  ;;  %v5354_v6 = vsel %vm19460_vm15, %v5330_v55, %v16152_v44  ;;  %vm19462_vm8 = vcmask 293888   ;;  %vm19463_vm10 = vcmask 318464  }
 0x886   :  { %v5378_v28 = vsel %vm19461_vm3, %v5354_v6, %v16188_v41  ;;  %vm19464_vm1 = vcmask 343040   ;;  %vm19465_vm9 = vcmask 367616   ;;  %v8631_v41 = vld [vmem:[%s17641_s0 + $0x170] sm:$0xff]  ;;  %vm19468_vm15 = vcmask 23552  }
 0x887   :  { %v5402_v53 = vsel %vm19462_vm8, %v5378_v28, %v16273_v0  ;;  %v19467_v0 = vld [vmem:[#allocation69_spill] sm:$0xff]  ;;  %vm19470_vm3 = vmmov %vm19468_vm15 }
 0x888   :  { %v5426_v4 = vsel %vm19463_vm10, %v5402_v53, %v4938_v21  ;;  %v16452_v31 = vpop.permute.xlu0 %4264  ;;  %v5086_v33 = vpop.permute.xlu1 %5085  ;;  %v5140_v21 = vsel %vm19468_vm15, %v8631_v41, %v19467_v0  ;;  %vm19473_vm10 = vcmask 72704  }
 0x889   :  { %v5450_v57 = vsel %vm19464_vm1, %v5426_v4, %v5012_v16  ;;  %v8632_v4 = vld [vmem:[%s17641_s0 + $0x168] sm:$0xff]  ;;  %v19469_v16 = vld [vmem:[#allocation143_spill] sm:$0xff]  ;;  %vm19474_vm1 = vmmov %vm19473_vm10 }
 0x88a   :  { %v5474_v24 = vsel %vm19465_vm9, %v5450_v57, %v5086_v33  ;;  %v5139_v28 = vsel %vm19470_vm3, %v8632_v4, %v19469_v16  ;;  %vm19475_vm9 = vcmask 97280   ;;  %vm19477_vm3 = vcmask 121856  }
 0x88b   :  { %7621 = vmatmul.mubr.msk.f32.gmra.mxu1 %vm19466_vm11, %v5474_v24  ;;  %vm19471_vm11 = vcmask 48128   ;;  %vm19476_vm15 = vmmov %vm19475_vm9 }
 0x88c   :  { %v4942_v5 = vpop.permute.xlu0 %4941  ;;  %v4263_v44 = vpop.permute.xlu1 %4262  ;;  %v5164_v24 = vsel %vm19471_vm11, %v5140_v21, %v15999_v60  ;;  %vm19472_vm8 = vmmov %vm19471_vm11 }
 0x88d   :  { %v5163_v57 = vsel %vm19472_vm8, %v5139_v28, %v15969_v11  ;;  %v5188_v33 = vsel %vm19473_vm10, %v5164_v24, %v16042_v1  ;;  %vm19478_vm11 = vmmov %vm19477_vm3  ;;  %vm19479_vm8 = vcmask 146432  }
 0x88e   :  { %v5187_v6 = vsel %vm19474_vm1, %v5163_v57, %v15980_v32  ;;  %v5212_v41 = vsel %vm19475_vm9, %v5188_v33, %v16094_v8  ;;  %vm19480_vm10 = vmmov %vm19479_vm8  ;;  %vm19481_vm1 = vcmask 171008  }
 0x88f   :  { %v5211_v25 = vsel %vm19476_vm15, %v5187_v6, %v16006_v51  ;;  %v5236_v4 = vsel %vm19477_vm3, %v5212_v41, %v16138_v9  ;;  %vm19482_vm9 = vmmov %vm19481_vm1  ;;  %vm19483_vm15 = vcmask 220160  }
 0x890   :  { %v16457_v55 = vpop.permute.xlu0 %4383  ;;  %v4940_v53 = vpop.permute.xlu1 %4939  ;;  %v5235_v11 = vsel %vm19478_vm11, %v5211_v25, %v16056_v52  ;;  %v5260_v32 = vsel %vm19480_vm10, %v5236_v4, %v16132_v39  ;;  %vm19484_vm3 = vmmov %vm19483_vm15  ;;  %vm19485_vm11 = vcmask 244736   ;;  %vm19487_vm10 = vcmask 269312  }
 0x891   :  { %v5259_v1 = vsel %vm19479_vm8, %v5235_v11, %v16102_v20  ;;  %v5284_v51 = vsel %vm19482_vm9, %v5260_v32, %v16172_v12  ;;  %vm19486_vm8 = vmmov %vm19485_vm11  ;;  %vm19489_vm9 = vcmask 293888  }
 0x892   :  { %v5283_v8 = vsel %vm19481_vm1, %v5259_v1, %v16192_v42  ;;  %v5308_v52 = vsel %vm1687_vm14, %v5284_v51, %v16258_v19  ;;  %vm19488_vm1 = vmmov %vm19487_vm10 }
 0x893   :  { %v5307_v9 = vsel %vm1687_vm14, %v5283_v8, %v16231_v27  ;;  %v5332_v20 = vsel %vm19483_vm15, %v5308_v52, %v16308_v30  ;;  %vm19490_vm15 = vmmov %vm19489_vm9 }
 0x894   :  { %v5016_v0 = vpop.permute.xlu0 %5015  ;;  %v4382_v60 = vpop.permute.xlu1 %4381  ;;  %v5331_v39 = vsel %vm19484_vm3, %v5307_v9, %v16224_v35  ;;  %v5356_v42 = vsel %vm19485_vm11, %v5332_v20, %v16345_v3  ;;  %vm19492_vm3 = vmmov %vm19491_vm4  ;;  %vm19493_vm11 = vcmask 343040  }
 0x895   :  { %v5355_v12 = vsel %vm19486_vm8, %v5331_v39, %v16263_v46  ;;  %v5380_v28 = vsel %vm19487_vm10, %v5356_v42, %v4794_v15  ;;  %vm19494_vm8 = vmmov %vm19493_vm11  ;;  %vm19495_vm10 = vcmask 367616  }
 0x896   :  { %v5379_v24 = vsel %vm19488_vm1, %v5355_v12, %v16323_v22  ;;  %v5404_v30 = vsel %vm19490_vm15, %v5380_v28, %v4868_v54  ;;  %v8633_v22 = vld [vmem:[%s17641_s0 + $0x178] sm:$0xff]  ;;  %vm19496_vm1 = vcmask 23552  }
 0x897   :  { %v5403_v19 = vsel %vm19489_vm9, %v5379_v24, %v16353_v13  ;;  %v5428_v3 = vsel %vm19492_vm3, %v5404_v30, %v4942_v5  ;;  %v5141_v13 = vsel %vm19496_vm1, %v8633_v22, %v16205_v48  ;;  %vm19497_vm9 = vmmov %vm19495_vm10  ;;  %vm19500_vm3 = vcmask 48128  }
 0x898   :  { %v16491_v21 = vpop.permute.xlu0 %4502  ;;  %v5014_v16 = vpop.permute.xlu1 %5013  ;;  %v5427_v35 = vsel %vm19491_vm4, %v5403_v19, %v4940_v53  ;;  %v5452_v46 = vsel %vm19494_vm8, %v5428_v3, %v5016_v0  ;;  %vm19498_vm4 = vcmask 392192   ;;  %v5165_v32 = vsel %vm19500_vm3, %v5141_v13, %v16253_v7 }
 0x899   :  { %v5451_v33 = vsel %vm19493_vm11, %v5427_v35, %v5014_v16  ;;  %vm19499_vm15 = vmmov %vm19498_vm4  ;;  %vm19501_vm11 = vcmask 72704   ;;  %vm19502_vm8 = vcmask 64512   ;;  %vm19504_vm1 = vcmask 121856  }
 0x89a   :  { %v5189_v48 = vsel %vm19501_vm11, %v5165_v32, %v16304_v56  ;;  %vm19508_vm3 = vcmask 220160   ;;  %vm19509_vm11 = vcmask 244736   ;;  %v6615_v32 = vld [vmem:[%s17644_s3 + $0x78] sm:$0xff] }
 0x89b   :  { %7629 = vmatprep.subr.mxu0 %v6615_v32 }
 0x89c   :  { %v5090_v25 = vpop.permute.xlu0 %5089  ;;  %v4501_v27 = vpop.permute.xlu1 %4500  ;;  %7630 = vmatpush3.msra.mxu0 %v6615_v32  ;;  %v19549_v32 = vld [vmem:[#allocation184_spill] sm:$0xff] }
 0x89d   :  { %v5476_v54 = vsel %vm19497_vm9, %v5452_v46, %v5090_v25  ;;  %vm19505_vm9 = vmmov %vm19502_vm8 }
 0x8a0   :  { %v4648_v57 = vpop.permute.xlu0 %4647  ;;  %v5088_v6 = vpop.permute.xlu1 %5087 }
 0x8a1   :  { %v5475_v15 = vsel %vm19495_vm10, %v5451_v33, %v5088_v6  ;;  %v7613_v41 = vpop.f32.mrf.mxu1  ;;  %vm19503_vm10 = vcmask 97280   ;;  %v19513_v6 = vrot.slane %v16358_v58, 1 }
 0x8a2   :  { %v5696_v53 = vadd.f32 %v16318_v38, %v7613_v41  ;;  %7623 = vmatprep.mubr.msk.f32.mxu1 %vm19498_vm4, %v5475_v15  ;;  %v5213_v51 = vsel %vm19503_vm10, %v5189_v48, %v16341_v14  ;;  %vm19506_vm4 = vcmask 146432   ;;  %vm19512_vm10 = vcmask 1045504   ;;  %v8634_v15 = vld [vmem:[%s17641_s0 + $0x180] sm:$0xff]  ;;  %s19573_s0 = smov 120  }
 0x8a3   :  { %7624 = vmatmul.mubr.msk.f32.gmra.mxu1 %vm19499_vm15, %v5476_v54  ;;  %v5690_v0 = vpop.f32.mrf.mxu1  ;;  %v5237_v16 = vsel %vm19504_vm1, %v5213_v51, %v4263_v44  ;;  %vm19507_vm15 = vcmask 171008   ;;  %vm19514_vm1 = vcmask 1046528  }
 0x8a4   :  { %v4722_v5 = vpop.permute.xlu0 %4721  ;;  %v5762_v4 = vmax.f32 %v5696_v53, 0.0  ;;  %v4574_v11 = vpop.permute.xlu1 %4573  ;;  %v5691_v1 = vadd.f32 %v16318_v38, %v5690_v0  ;;  %v5261_v20 = vsel %vm19506_vm4, %v5237_v16, %v4382_v60  ;;  %vm19516_vm4 = vcmask 293888  }
 0x8a5   :  { %v5285_v39 = vsel %vm19507_vm15, %v5261_v20, %v4501_v27  ;;  %vm19517_vm15 = vcmask 48128   ;;  %v19528_v16 = vpack.i.bf16 %v15863_v37, %v15825_v61 }
 0x8a6   :  { %5786 = vst.msk [vmem:[#allocation2 + $0x68] sm:$0xff] %vm19502_vm8, %v5762_v4  ;;  %v5761_v8 = vmax.f32 %v5691_v1, 0.0  ;;  %v5309_v7 = vsel %vm1687_vm14, %v5285_v39, %v4574_v11  ;;  %vm19510_vm8 = vcmask 269312  }
 0x8a7   :  { %v5333_v25 = vsel %vm19508_vm3, %v5309_v7, %v4648_v57  ;;  %v19511_v57 = vrot.slane %v16358_v58, 2  ;;  %vm19518_vm3 = vcmask 318464  }
 0x8a8   :  { %v4796_v9 = vpop.permute.xlu0 %4795  ;;  %5785 = vst.msk [vmem:[#allocation2 + $0x60] sm:$0xff] %vm19505_vm9, %v5761_v8  ;;  %v4576_v52 = vpop.permute.xlu1 %4575  ;;  %v5357_v44 = vsel %vm19509_vm11, %v5333_v25, %v4722_v5  ;;  %vm19515_vm9 = vcmask 23552   ;;  %vm19519_vm11 = vcmask 72704  }
 0x8a9   :  { %v5381_v27 = vsel %vm19510_vm8, %v5357_v44, %v4796_v9  ;;  %v5142_v41 = vsel %vm19515_vm9, %v8634_v15, %v16286_v63  ;;  %vm19520_vm8 = vcmask 343040   ;;  %vm19523_vm9 = vcmask 97280  }
 0x8aa   :  { %v5166_v53 = vsel %vm19517_vm15, %v5142_v41, %v16331_v59  ;;  %v6614_v59 = vld [vmem:[%s17644_s3 + $0x70] sm:$0xff]  ;;  %v19526_v9 = vpack.i.bf16 %v15868_v10, %v15835_v34  ;;  %vm19529_vm15 = vcmask 146432   ;;  %v19531_v34 = vld [vmem:[#allocation105_spill] sm:$0xff] }
 0x8ab   :  { %v5190_v0 = vsel %vm19519_vm11, %v5166_v53, %v16377_v29  ;;  %7631 = vmatprep.subr.mxu0 %v6614_v59  ;;  %v8258_v7 = vpack.i.bf16 %v16372_v45, %v19531_v34  ;;  %vm19534_vm11 = vcmask 1043456  }
 0x8ac   :  { %v4870_v42 = vpop.permute.xlu0 %4869  ;;  %v4650_v56 = vpop.permute.xlu1 %4649  ;;  %v5214_v29 = vsel %vm19523_vm9, %v5190_v0, %v16367_v18  ;;  %7632 = vmatpush3.msra.mxu0 %v6614_v59  ;;  %vm19539_vm9 = vcmask 269312  }
 0x8ad   :  { %v5405_v22 = vsel %vm19516_vm4, %v5381_v27, %v4870_v42  ;;  %vm19524_vm4 = vcmask 121856   ;;  %v19532_v42 = vld [vmem:[#allocation137_spill] sm:$0xff] }
 0x8ae   :  { %v5238_v51 = vsel %vm19524_vm4, %v5214_v29, %v16452_v31  ;;  %v6613_v31 = vld [vmem:[%s17644_s3 + $0x68] sm:$0xff]  ;;  %v8243_v61 = vpack.i.bf16 %v16429_v36, %v19532_v42  ;;  %vm19540_vm4 = vcmask 293888  }
 0x8af   :  { %v5803_v12 = vld [vmem:[#allocation2 + $0x60] ss:$2 sm:$0xff]  ;;  %v5815_v28 = vld [vmem:[#allocation2 + $0x61] ss:$2 sm:$0xff]  ;;  %v5262_v18 = vsel %vm19529_vm15, %v5238_v51, %v16457_v55  ;;  %v19533_v55 = vrot.slane %v16358_v58, 4  ;;  %7633 = vmatprep.subr.mxu0 %v6613_v31  ;;  %vm19541_vm15 = vcmask 318464  }
 0x8b0   :  { %v4944_v24 = vpop.permute.xlu0 %4943  ;;  %v16541_v14 = vmax.f32 %v5803_v12, %v5815_v28  ;;  %v4724_v19 = vpop.permute.xlu1 %4723  ;;  %v6612_v28 = vld [vmem:[%s17644_s3 + $0x60] sm:$0xff]  ;;  %7634 = vmatpush3.msra.mxu0 %v6613_v31  ;;  %v19552_v29 = vld [vmem:[#allocation161_spill] sm:$0xff]  ;;  %v19553_v51 = vld [vmem:[#allocation162_spill] sm:$0xff] }
 0x8b1   :  { %v5429_v5 = vsel %vm19518_vm3, %v5405_v22, %v4944_v24  ;;  %vm19530_vm3 = vcmask 171008   ;;  %7635 = vmatprep.subr.mxu0 %v6612_v28  ;;  %v6610_v22 = vld [vmem:[%s17644_s3 + $0x50] sm:$0xff] }
 0x8b2   :  { %v5903_v30 = vrot.slane %v16541_v14, 2  ;;  %v5854_v60 = vrot.slane %v16541_v14, 1  ;;  %v6002_v48 = vrot.slane %v16541_v14, 4  ;;  %v5952_v8 = vrot.slane %v16541_v14, 3  ;;  %7636 = vmatpush3.msra.mxu0 %v6612_v28 }
 0x8b3   :  { %v5286_v10 = vsel %vm19530_vm3, %v5262_v18, %v16491_v21  ;;  %v19535_v21 = vrot.slane %v16358_v58, 3  ;;  %v6053_v41 = vrot.slane %v16541_v14, 5  ;;  %vm19542_vm3 = vcmask 343040  }
 0x8b4   :  { %v5018_v35 = vpop.permute.xlu0 %5017  ;;  %v4798_v3 = vpop.permute.xlu1 %4797  ;;  %v16552_v33 = vsel %vm19512_vm10, %v19511_v57, %v5903_v30  ;;  %v16559_v46 = vsel %vm19514_vm1, %v19513_v6, %v5854_v60  ;;  %vm19521_vm10 = vcmask 367616   ;;  %vm19522_vm1 = vcmask 392192  }
 0x8b5   :  { %v8238_v13 = vpack.i.bf16 %v16552_v33, %v16384_v49  ;;  %v8223_v54 = vpack.i.bf16 %v16559_v46, %v16391_v47  ;;  %v5453_v4 = vsel %vm19520_vm8, %v5429_v5, %v5018_v35  ;;  %v5310_v37 = vsel %vm1687_vm14, %v5286_v10, %v4576_v52  ;;  %v19556_v10 = vld [vmem:[#allocation111_spill] sm:$0xff] }
 0x8b6   :  { %v16620_v25 = vsel %vm19534_vm11, %v19533_v55, %v6002_v48  ;;  %vm19536_vm8 = vcmask 1044480   ;;  %vm19543_vm11 = vcmask 367616  }
 0x8b7   :  { %8239 = vrot.lane.b32.xlu1 %v8238_v13, %s19386_s21  ;;  %8224 = vrot.lane.b32.xlu0 %v8223_v54, %s19368_s25  ;;  %v16627_v12 = vsel %vm19536_vm8, %v19535_v21, %v5952_v8  ;;  %v8268_v57 = vpack.i.bf16 %v16620_v25, %v16398_v17  ;;  %vm19544_vm8 = vcmask 392192   ;;  %v6608_v21 = vld [vmem:[%s17644_s3 + $0x40] sm:$0xff] }
 0x8b8   :  { %v5092_v11 = vpop.permute.xlu0 %5091  ;;  %v4872_v1 = vpop.permute.xlu1 %4871  ;;  %v8253_v6 = vpack.i.bf16 %v16627_v12, %v16405_v23 }
 0x8b9   :  { %v5477_v63 = vsel %vm19521_vm10, %v5453_v4, %v5092_v11  ;;  %vm19537_vm10 = vcmask 220160   ;;  %v19545_v4 = vrot.slane %v16358_v58, 5 }
 0x8ba   :  { %7626 = vmatprep.mubr.msk.f32.mxu1 %vm19522_vm1, %v5477_v63  ;;  %v5334_v52 = vsel %vm19537_vm10, %v5310_v37, %v4650_v56  ;;  %vm19538_vm1 = vcmask 244736   ;;  %v6611_v56 = vld [vmem:[%s17644_s3 + $0x58] sm:$0xff]  ;;  %vm19546_vm10 = vcmask 1042432   ;;  %v6609_v63 = vld [vmem:[%s17644_s3 + $0x48] sm:$0xff] }
 0x8bb   :  { %8249 = vrot.lane.b32.xlu1 %v19526_v9, %s19525_s30  ;;  %8234 = vrot.lane.b32.xlu0 %v19528_v16, %s19527_s23  ;;  %v5358_v44 = vsel %vm19538_vm1, %v5334_v52, %v4724_v19  ;;  %v16662_v11 = vsel %vm19546_vm10, %v19545_v4, %v6053_v41  ;;  %v19554_v9 = vpack.i.bf16 %v19552_v29, %v19553_v51  ;;  %vm19555_vm1 = vcmask 64512   ;;  %v19558_v37 = vld [vmem:[#allocation71_spill] sm:$0xff]  ;;  %v6604_v4 = vld [vmem:[%s17644_s3 + $0x20] sm:$0xff]  ;;  %v6602_v51 = vld [vmem:[%s17644_s3 + $0x10] sm:$0xff] }
 0x8bc   :  { %v16601_v20 = vpop.permute.xlu0 %8164  ;;  %v4946_v39 = vpop.permute.xlu1 %4945  ;;  %v5382_v27 = vsel %vm19539_vm9, %v5358_v44, %v4798_v3  ;;  %7637 = vmatprep.subr.mxu0 %v6611_v56  ;;  %vm19557_vm9 = vmmov %vm19555_vm1  ;;  %v8273_v55 = vpack.i.bf16 %v19558_v37, %v15814_v50  ;;  %v6104_v44 = vrot.slane %v16541_v14, 6 }
 0x8bd   :  { %v5406_v15 = vsel %vm19540_vm4, %v5382_v27, %v4872_v1  ;;  %7638 = vmatpush3.msra.mxu0 %v6611_v56  ;;  %v19548_v1 = vld [vmem:[#allocation19_spill] sm:$0xff]  ;;  %vm19560_vm4 = vcmask 1041408  }
 0x8be   :  { %v5430_v19 = vsel %vm19541_vm15, %v5406_v15, %v4946_v39  ;;  %7639 = vmatprep.subr.mxu0 %v6610_v22  ;;  %v19550_v59 = vpack.i.bf16 %v19548_v1, %v19549_v32  ;;  %vm19566_vm15 = vcmask 1040384  }
 0x8bf   :  { %8259 = vrot.lane.b32.xlu1 %v8258_v7, %s19406_s10  ;;  %8244 = vrot.lane.b32.xlu0 %v8243_v61, %s19398_s27  ;;  %v8288_v61 = vpack.i.bf16 %v16662_v11, %v16414_v26 }
 0x8c0   :  { %v16635_v24 = vpop.permute.xlu0 %8174  ;;  %v5020_v35 = vpop.permute.xlu1 %5019  ;;  %7640 = vmatpush3.msra.mxu0 %v6610_v22  ;;  %v19562_v22 = vld [vmem:[#allocation64_spill] sm:$0xff] }
 0x8c1   :  { %v5454_v13 = vsel %vm19542_vm3, %v5430_v19, %v5020_v35  ;;  %7641 = vmatprep.subr.mxu0 %v6609_v63  ;;  %v19559_v19 = vrot.slane %v16358_v58, 6  ;;  %vm19570_vm3 = vmmov %vm19555_vm1 }
 0x8c2   :  { %7642 = vmatpush3.msra.mxu0 %v6609_v63  ;;  %v6603_v63 = vld [vmem:[%s17644_s3 + $0x18] sm:$0xff] }
 0x8c3   :  { %8269 = vrot.lane.b32.xlu1 %v8268_v57, %s19392_s20  ;;  %8254 = vrot.lane.b32.xlu0 %v8253_v6, %s8643_s24  ;;  %v6606_v6 = vld [vmem:[%s17644_s3 + $0x30] sm:$0xff] }
 0x8c4   :  { %v8185_v3 = vpop.permute.xlu0 %8184  ;;  %v5094_v54 = vpop.permute.xlu1 %5093  ;;  %7643 = vmatprep.subr.mxu0 %v6608_v21 }
 0x8c5   :  { %v5478_v53 = vsel %vm19543_vm11, %v5454_v13, %v5094_v54  ;;  %v8187_v5 = vunpack.i.h.bf16 %v8185_v3  ;;  %v8186_v0 = vunpack.i.l.bf16 %v8185_v3  ;;  %7644 = vmatpush3.msra.mxu0 %v6608_v21  ;;  %v16708_v3 = vsel %vm19560_vm4, %v19559_v19, %v6104_v44  ;;  %v19563_v13 = vld [vmem:[#allocation110_spill] sm:$0xff]  ;;  %vm19571_vm11 = vmmov %vm19555_vm1  ;;  %v19574_v21 = vld [vmem:[#allocation36_spill] sm:$0xff] }
 0x8c6   :  { %7627 = vmatmul.mubr.msk.f32.gmra.mxu1 %vm19544_vm8, %v5478_v53  ;;  %v19564_v54 = vpack.i.bf16 %v19562_v22, %v19563_v13  ;;  %v6605_v53 = vld [vmem:[%s17644_s3 + $0x28] sm:$0xff]  ;;  %vm19576_vm8 = vmmov %vm19546_vm10  ;;  %vm19577_vm10 = vcmask 1046528   ;;  %vm19580_vm4 = vcmask 1044480  }
 0x8c7   :  { %8279 = vrot.lane.b32.xlu1 %v19550_v59, %s19547_s11  ;;  %8264 = vrot.lane.b32.xlu0 %v19554_v9, %s19551_s15  ;;  %v6453_v31 = vsel %vm19555_vm1, %v15814_v50, %v8187_v5  ;;  %v6452_v7 = vsel %vm19557_vm9, %v19556_v10, %v8186_v0  ;;  %v6607_v50 = vld [vmem:[%s17644_s3 + $0x38] sm:$0xff]  ;;  %v8308_v5 = vpack.i.bf16 %v16708_v3, %v16419_v40  ;;  %v6155_v0 = vrot.slane %v16541_v14, 7  ;;  %v6601_v10 = vld [vmem:[%s17644_s3 + $0x8] sm:$0xff]  ;;  %vm19579_vm9 = vmmov %vm19566_vm15 }
 0x8c8   :  { %v8195_v16 = vpop.permute.xlu0 %8194  ;;  %7645 = vmatprep.subr.mxu0 %v6607_v50  ;;  %v19565_v59 = vrot.slane %v16358_v58, 7  ;;  %vm19578_vm1 = vcmask 1045504  }
 0x8c9   :  { %v8197_v18 = vunpack.i.h.bf16 %v8195_v16  ;;  %v8196_v39 = vunpack.i.l.bf16 %v8195_v16  ;;  %7646 = vmatpush3.msra.mxu0 %v6607_v50  ;;  %v19568_v16 = vld [vmem:[#allocation183_spill] sm:$0xff] }
 0x8ca   :  { %7647 = vmatprep.subr.mxu0 %v6606_v6  ;;  %v16731_v29 = vsel %vm19566_vm15, %v19565_v59, %v6155_v0  ;;  %vm19581_vm15 = vcmask 1043456   ;;  %v19587_v59 = vpack.i.bf16 %v16414_v26, %v16297_v62 }
 0x8cb   :  { %v6462_v28 = vsel %vm2894_vm7, %v6452_v7, %v8196_v39  ;;  %v6463_v52 = vsel %vm2894_vm7, %v6453_v31, %v8197_v18  ;;  %8289 = vrot.lane.b32.xlu1 %v8288_v61, %s19395_s22  ;;  %8274 = vrot.lane.b32.xlu0 %v8273_v55, %s19416_s14  ;;  %v19569_v18 = vpack.i.bf16 %v19532_v42, %v19568_v16  ;;  %v6600_v61 = vld [vmem:[%s17644_s3] sm:$0xff]  ;;  %v19572_v55 = vmov 0.0  }
 0x8cc   :  { %v8205_v35 = vpop.permute.xlu0 %8204  ;;  %7648 = vmatpush3.msra.mxu0 %v6606_v6  ;;  %v8328_v7 = vpack.i.bf16 %v16731_v29, %v16424_v2 }
 0x8cd   :  { %v8207_v27 = vunpack.i.h.bf16 %v8205_v35  ;;  %v8206_v57 = vunpack.i.l.bf16 %v8205_v35  ;;  %7649 = vmatprep.subr.mxu0 %v6605_v53 }
 0x8ce   :  { %7650 = vmatpush3.msra.mxu0 %v6605_v53 }
 0x8cf   :  { %v16698_v56 = vsel %vm1687_vm14, %v6462_v28, %v8206_v57  ;;  %v16701_v15 = vsel %vm1687_vm14, %v6463_v52, %v8207_v27  ;;  %8299 = vrot.lane.b32.xlu1 %v19564_v54, %s19561_s26  ;;  %7651 = vmatprep.subr.mxu0 %v6604_v4  ;;  %v19575_v28 = vpack.i.bf16 %v19531_v34, %v19574_v21 }
 0x8d0   :  { %7652 = vmatpush3.msra.mxu0 %v6604_v4  ;;  %v8348_v52 = vpack.i.bf16 %v16541_v14, %v16358_v58 }
 0x8d1   :  { %7653 = vmatprep.subr.mxu0 %v6603_v63 }
 0x8d2   :  { %7654 = vmatpush3.msra.mxu0 %v6603_v63 }
 0x8d3   :  { %8309 = vrot.lane.b32.xlu1 %v8308_v5, %s19398_s27  ;;  %7655 = vmatprep.subr.mxu0 %v6602_v51 }
 0x8d4   :  { %7656 = vmatpush3.msra.mxu0 %v6602_v51  ;;  %v16819_v51 = vpop.permute.xlu1 %8169 }
 0x8d5   :  { %v7616_v1 = vpop.f32.mrf.mxu1  ;;  %7657 = vmatprep.subr.mxu0 %v6601_v10 }
 0x8d6   :  { %v5706_v32 = vadd.f32 %v16318_v38, %v7616_v1  ;;  %7658 = vmatpush3.msra.mxu0 %v6601_v10 }
 0x8d7   :  { %v5700_v9 = vpop.f32.mrf.mxu1  ;;  %8319 = vrot.lane.b32.xlu1 %v19569_v18, %s19567_s17  ;;  %7659 = vmatprep.subr.mxu0 %v6600_v61 }
 0x8d8   :  { %v5764_v39 = vmax.f32 %v5706_v32, 0.0  ;;  %v5701_v31 = vadd.f32 %v16318_v38, %v5700_v9  ;;  %7660 = vmatpush3.msra.mxu0 %v6600_v61  ;;  %v16821_v9 = vpop.permute.xlu1 %8179 }
 0x8d9   :  { %7676 = vmatprep.subr.mxu0 %v19572_v55 }
 0x8da   :  { %5788 = vst.msk [vmem:[#allocation2 + $0x78] sm:$0xff] %vm19570_vm3, %v5764_v39  ;;  %v5763_v42 = vmax.f32 %v5701_v31, 0.0  ;;  %vm19582_vm3 = vcmask 1041408  }
 0x8db   :  { %8329 = vrot.lane.b32.xlu1 %v8328_v7, %s19406_s10 }
 0x8dc   :  { %5787 = vst.msk [vmem:[#allocation2 + $0x70] sm:$0xff] %vm19571_vm11, %v5763_v42 }
 0x8df   :  { %8339 = vrot.lane.b32.xlu1 %v19575_v28, %s19573_s0 }
 0x8e3   :  { %v5804_v35 = vld [vmem:[#allocation2 + $0x70] ss:$2 sm:$0xff]  ;;  %v5816_v50 = vld [vmem:[#allocation2 + $0x71] ss:$2 sm:$0xff]  ;;  %8349 = vrot.lane.b32.xlu1 %v8348_v52, %s19416_s14 }
 0x8e4   :  { %v16760_v27 = vmax.f32 %v5804_v35, %v5816_v50 }
 0x8e6   :  { %v6055_v57 = vrot.slane %v16760_v27, 5  ;;  %v5856_v6 = vrot.slane %v16760_v27, 1  ;;  %v5905_v19 = vrot.slane %v16760_v27, 2  ;;  %v6157_v22 = vrot.slane %v16760_v27, 7 }
 0x8e7   :  { %v5954_v34 = vrot.slane %v16760_v27, 3  ;;  %v6004_v13 = vrot.slane %v16760_v27, 4  ;;  %v6106_v54 = vrot.slane %v16760_v27, 6 }
 0x8e8   :  { %v16772_v53 = vsel %vm19576_vm8, %v6053_v41, %v6055_v57  ;;  %v16777_v5 = vsel %vm19577_vm10, %v5854_v60, %v5856_v6  ;;  %v5906_v4 = vsel %vm19578_vm1, %v5903_v30, %v5905_v19  ;;  %v16783_v63 = vsel %vm19579_vm9, %v6155_v0, %v6157_v22  ;;  %vm19583_vm8 = vmmov %vm19571_vm11 }
 0x8e9   :  { %v8378_v1 = vpack.i.bf16 %v5906_v4, %v16552_v33  ;;  %v16791_v41 = vsel %vm19580_vm4, %v5952_v8, %v5954_v34  ;;  %v16798_v60 = vsel %vm19581_vm15, %v6002_v48, %v6004_v13  ;;  %v8363_v30 = vpack.i.bf16 %v16777_v5, %v16559_v46  ;;  %vm19590_vm15 = vmmov %vm19583_vm8 }
 0x8ea   :  { %v16807_v33 = vsel %vm19582_vm3, %v6104_v44, %v6106_v54  ;;  %v8393_v8 = vpack.i.bf16 %v16791_v41, %v16627_v12  ;;  %v16823_v44 = vpop.permute.xlu1 %8189  ;;  %vm19584_vm10 = vcmask 1042432   ;;  %vm19585_vm1 = vcmask 1046528   ;;  %vm19591_vm3 = vmmov %vm19583_vm8 }
 0x8eb   :  { %vm19586_vm9 = vcmask 1045504   ;;  %vm19589_vm4 = vcmask 1040384  }
 0x8ee   :  { %v16827_v7 = vpop.permute.xlu1 %8199 }
 0x8f2   :  { %v16831_v42 = vpop.permute.xlu1 %8209 }
 0x8f6   :  { %v16835_v35 = vpop.permute.xlu1 %8219 }
 0x90e   :  { %v7619_v16 = vpop.f32.mrf.mxu1 }
 0x90f   :  { %v5716_v18 = vadd.f32 %v16318_v38, %v7619_v16 }
 0x910   :  { %v5710_v39 = vpop.f32.mrf.mxu1 }
 0x911   :  { %v5766_v31 = vmax.f32 %v5716_v18, 0.0  ;;  %v5711_v10 = vadd.f32 %v16318_v38, %v5710_v39 }
 0x913   :  { %5790 = vst.msk [vmem:[#allocation2 + $0x88] sm:$0xff] %vm19571_vm11, %v5766_v31  ;;  %v5765_v61 = vmax.f32 %v5711_v10, 0.0  ;;  %vm19592_vm11 = vcmask 1044480  }
 0x915   :  { %5789 = vst.msk [vmem:[#allocation2 + $0x80] sm:$0xff] %vm19583_vm8, %v5765_v61  ;;  %vm19595_vm8 = vcmask 392192  }
 0x91c   :  { %v5805_v21 = vld [vmem:[#allocation2 + $0x80] ss:$2 sm:$0xff]  ;;  %v5817_v28 = vld [vmem:[#allocation2 + $0x81] ss:$2 sm:$0xff] }
 0x91d   :  { %v16833_v52 = vmax.f32 %v5805_v21, %v5817_v28  ;;  %v8215_v21 = vpop.permute.xlu0 %8214 }
 0x91f   :  { %v17930_v50 = vrot.slane %v16833_v52, 5  ;;  %v17931_v16 = vrot.slane %v16833_v52, 1  ;;  %v17932_v61 = vrot.slane %v16833_v52, 2  ;;  %v17933_v0 = vrot.slane %v16833_v52, 3 }
 0x921   :  { %v16842_v18 = vsel %vm19584_vm10, %v6055_v57, %v17930_v50  ;;  %v16847_v39 = vsel %vm19585_vm1, %v5856_v6, %v17931_v16  ;;  %v8230_v57 = vpop.permute.xlu1 %8229  ;;  %v16859_v28 = vsel %vm19586_vm9, %v5905_v19, %v17932_v61  ;;  %v6159_v6 = vrot.slane %v16833_v52, 7  ;;  %vm19596_vm10 = vmmov %vm19595_vm8 }
 0x922   :  { %v8358_v31 = vpack.i.bf16 %v16842_v18, %v16772_v53  ;;  %v8283_v10 = vpack.i.bf16 %v16847_v39, %v16777_v5  ;;  %v8303_v48 = vpack.i.bf16 %v16859_v28, %v5906_v4  ;;  %v8216_v4 = vunpack.i.l.bf16 %v8215_v21  ;;  %vm19602_vm9 = vmmov %vm19591_vm3 }
 0x923   :  { %v16875_v26 = vsel %vm19589_vm4, %v6157_v22, %v6159_v6  ;;  %vm19598_vm1 = vcmask 1043456   ;;  %vm19604_vm4 = vmmov %vm19591_vm3 }
 0x924   :  { %8359 = vrot.lane.b32.xlu1 %v8358_v31, %s19395_s22  ;;  %8284 = vrot.lane.b32.xlu0 %v8283_v10, %s19368_s25  ;;  %v19588_v31 = vpack.i.bf16 %v16391_v47, %v16181_v43  ;;  %v8217_v43 = vunpack.i.h.bf16 %v8215_v21 }
 0x926   :  { %v6483_v21 = vsel %vm2915_vm12, %v16701_v15, %v8217_v43  ;;  %v19597_v15 = vpack.i.bf16 %v16424_v2, %v16372_v45  ;;  %v8167_v2 = vunpack.i.h.bf16 %v16601_v20 }
 0x928   :  { %8369 = vrot.lane.b32.xlu1 %v19587_v59, %s19561_s26  ;;  %8294 = vrot.lane.b32.xlu0 %v19588_v31, %s19527_s23 }
 0x929   :  { %v8240_v10 = vpop.permute.xlu1 %8239  ;;  %v8225_v32 = vpop.permute.xlu0 %8224 }
 0x92a   :  { %v8242_v19 = vunpack.i.h.bf16 %v8240_v10  ;;  %v8241_v50 = vunpack.i.l.bf16 %v8240_v10  ;;  %v8227_v16 = vunpack.i.h.bf16 %v8225_v32  ;;  %v8226_v61 = vunpack.i.l.bf16 %v8225_v32 }
 0x92c   :  { %v6455_v62 = vsel %vm19590_vm15, %v16358_v58, %v8227_v16  ;;  %v6454_v47 = vsel %vm19591_vm3, %v19558_v37, %v8226_v61  ;;  %8379 = vrot.lane.b32.xlu1 %v8378_v1, %s19525_s30  ;;  %8304 = vrot.lane.b32.xlu0 %v8303_v48, %s19386_s21  ;;  %v8388_v58 = vpack.i.bf16 %v16875_v26, %v16783_v63  ;;  %v8232_v1 = vunpack.i.h.bf16 %v8230_v57  ;;  %v19593_v16 = vld [vmem:[#allocation113_spill] sm:$0xff]  ;;  %vm19608_vm3 = vmmov %vm19595_vm8 }
 0x92d   :  { %v16883_v59 = vpop.permute.xlu1 %8249  ;;  %v16885_v32 = vpop.permute.xlu0 %8234  ;;  %v6464_v31 = vsel %vm2894_vm7, %v6454_v47, %v8241_v50  ;;  %v6465_v22 = vsel %vm2894_vm7, %v6455_v62, %v8242_v19  ;;  %v16896_v37 = vsel %vm19592_vm11, %v5954_v34, %v17933_v0  ;;  %v8231_v48 = vunpack.i.l.bf16 %v8230_v57  ;;  %vm19609_vm11 = vmmov %vm19608_vm3 }
 0x92e   :  { %v19594_v50 = vpack.i.bf16 %v16384_v49, %v19593_v16  ;;  %v6482_v61 = vsel %vm2915_vm12, %v16698_v56, %v8216_v4  ;;  %v8323_v34 = vpack.i.bf16 %v16896_v37, %v16791_v41  ;;  %v6493_v49 = vsel %vm2926_vm2, %v6483_v21, %v8232_v1 }
 0x92f   :  { %v6492_v0 = vsel %vm2926_vm2, %v6482_v61, %v8231_v48  ;;  %v6006_v16 = vrot.slane %v16833_v52, 4  ;;  %v8408_v48 = vpack.i.bf16 %v16833_v52, %v16760_v27  ;;  %vm19607_vm15 = vcmask 1041408  }
 0x930   :  { %8389 = vrot.lane.b32.xlu1 %v8388_v58, %s19406_s10  ;;  %8314 = vrot.lane.b32.xlu0 %v19594_v50, %s19525_s30 }
 0x931   :  { %v8260_v10 = vpop.permute.xlu1 %8259  ;;  %v8245_v19 = vpop.permute.xlu0 %8244  ;;  %v16932_v45 = vsel %vm19598_vm1, %v6004_v13, %v6006_v16  ;;  %v8171_v13 = vunpack.i.l.bf16 %v16819_v51  ;;  %vm19613_vm1 = vcmask 719872  }
 0x932   :  { %v8262_v62 = vunpack.i.h.bf16 %v8260_v10  ;;  %v8261_v57 = vunpack.i.l.bf16 %v8260_v10  ;;  %v8247_v47 = vunpack.i.h.bf16 %v8245_v19  ;;  %v8246_v58 = vunpack.i.l.bf16 %v8245_v19 }
 0x934   :  { %v6502_v56 = vsel %vm19595_vm8, %v6492_v0, %v8246_v58  ;;  %v6503_v4 = vsel %vm19596_vm10, %v6493_v49, %v8247_v47  ;;  %8399 = vrot.lane.b32.xlu1 %v19597_v15, %s19573_s0  ;;  %8324 = vrot.lane.b32.xlu0 %v8323_v34, %s8643_s24  ;;  %v8166_v34 = vunpack.i.l.bf16 %v16601_v20  ;;  %v19599_v47 = vld [vmem:[#allocation145_spill] sm:$0xff]  ;;  %v8172_v49 = vunpack.i.h.bf16 %v16819_v51  ;;  %vm19610_vm8 = vmmov %vm19608_vm3 }
 0x935   :  { %v8270_v43 = vpop.permute.xlu1 %8269  ;;  %v8255_v50 = vpop.permute.xlu0 %8254  ;;  %v16922_v1 = vsel %vm17934_vm6, %v6502_v56, %v8261_v57  ;;  %v16925_v61 = vsel %vm17934_vm6, %v6503_v4, %v8262_v62  ;;  %v19600_v58 = vpack.i.bf16 %v16405_v23, %v19599_v47  ;;  %v8192_v47 = vunpack.i.h.bf16 %v16823_v44  ;;  %vm19611_vm10 = vmmov %vm19608_vm3 }
 0x936   :  { %v8272_v0 = vunpack.i.h.bf16 %v8270_v43  ;;  %v8271_v21 = vunpack.i.l.bf16 %v8270_v43  ;;  %v8257_v10 = vunpack.i.h.bf16 %v8255_v50  ;;  %v8256_v19 = vunpack.i.l.bf16 %v8255_v50  ;;  %v19603_v43 = vld [vmem:[#allocation72_spill] sm:$0xff] }
 0x937   :  { %v6450_v23 = vsel %vm19604_vm4, %v19603_v43, %v8166_v34  ;;  %v6108_v34 = vrot.slane %v16833_v52, 6  ;;  %v8211_v43 = vunpack.i.l.bf16 %v16831_v42 }
 0x938   :  { %v6474_v57 = vsel %vm1687_vm14, %v6464_v31, %v8256_v19  ;;  %v6475_v62 = vsel %vm1687_vm14, %v6465_v22, %v8257_v10  ;;  %8409 = vrot.lane.b32.xlu1 %v8408_v48, %s19416_s14  ;;  %8334 = vrot.lane.b32.xlu0 %v19600_v58, %s19551_s15  ;;  %v8343_v31 = vpack.i.bf16 %v16932_v45, %v16798_v60  ;;  %v19601_v22 = vld [vmem:[#allocation70_spill] sm:$0xff]  ;;  %v8201_v58 = vunpack.i.l.bf16 %v16827_v7 }
 0x939   :  { %v16945_v56 = vpop.permute.xlu1 %8279  ;;  %v6484_v4 = vsel %vm2915_vm12, %v6474_v57, %v8271_v21  ;;  %v6485_v20 = vsel %vm2915_vm12, %v6475_v62, %v8272_v0  ;;  %v6451_v15 = vsel %vm19602_vm9, %v19601_v22, %v8167_v2  ;;  %v6460_v50 = vsel %vm2894_vm7, %v6450_v23, %v8171_v13  ;;  %vm19614_vm9 = vmmov %vm19613_vm1 }
 0x93a   :  { %v6461_v51 = vsel %vm2894_vm7, %v6451_v15, %v8172_v49  ;;  %v8182_v21 = vunpack.i.h.bf16 %v16821_v9  ;;  %v8181_v0 = vunpack.i.l.bf16 %v16821_v9  ;;  %v8177_v57 = vunpack.i.h.bf16 %v16635_v24  ;;  %v19605_v9 = vld [vmem:[#allocation112_spill] sm:$0xff] }
 0x93b   :  { %v8176_v2 = vunpack.i.l.bf16 %v16635_v24  ;;  %v8191_v62 = vunpack.i.l.bf16 %v16823_v44  ;;  %v8202_v15 = vunpack.i.h.bf16 %v16827_v7  ;;  %v16989_v7 = vsel %vm19607_vm15, %v6106_v54, %v6108_v34 }
 0x93c   :  { %8344 = vrot.lane.b32.xlu0 %v8343_v31, %s19392_s20  ;;  %v19606_v31 = vpack.i.bf16 %v16398_v17, %v19605_v9  ;;  %v6471_v24 = vsel %vm1687_vm14, %v6461_v51, %v8177_v57  ;;  %v8222_v17 = vunpack.i.h.bf16 %v16835_v35  ;;  %v8265_v57 = vpop.permute.xlu0 %8264  ;;  %vm19615_vm15 = vcmask 785408  }
 0x93d   :  { %v8290_v48 = vpop.permute.xlu1 %8289  ;;  %v6470_v22 = vsel %vm1687_vm14, %v6460_v50, %v8176_v2  ;;  %v8221_v50 = vunpack.i.l.bf16 %v16835_v35 }
 0x93e   :  { %v8292_v10 = vunpack.i.h.bf16 %v8290_v48  ;;  %v8291_v19 = vunpack.i.l.bf16 %v8290_v48  ;;  %v6480_v23 = vsel %vm2915_vm12, %v6470_v22, %v8181_v0 }
 0x93f   :  { %v6490_v48 = vsel %vm2926_vm2, %v6480_v23, %v8191_v62 }
 0x940   :  { %v6494_v49 = vsel %vm2926_vm2, %v6484_v4, %v8291_v19  ;;  %v6495_v13 = vsel %vm2926_vm2, %v6485_v20, %v8292_v10  ;;  %8354 = vrot.lane.b32.xlu0 %v19606_v31, %s19547_s11  ;;  %v6481_v4 = vsel %vm2915_vm12, %v6471_v24, %v8182_v21  ;;  %v8212_v20 = vunpack.i.h.bf16 %v16831_v42 }
 0x941   :  { %v16976_v44 = vpop.permute.xlu1 %8299  ;;  %v6491_v51 = vsel %vm2926_vm2, %v6481_v4, %v8192_v47  ;;  %v6500_v0 = vsel %vm19608_vm3, %v6490_v48, %v8201_v58  ;;  %v8237_v21 = vunpack.i.h.bf16 %v16885_v32  ;;  %v8236_v10 = vunpack.i.l.bf16 %v16885_v32  ;;  %vm19616_vm3 = vmmov %vm19604_vm4 }
 0x942   :  { %v6501_v42 = vsel %vm19609_vm11, %v6491_v51, %v8202_v15  ;;  %v6510_v35 = vsel %vm17934_vm6, %v6500_v0, %v8211_v43  ;;  %v8373_v47 = vpack.i.bf16 %v16989_v7, %v16807_v33  ;;  %v8251_v58 = vunpack.i.l.bf16 %v16883_v59  ;;  %vm19617_vm11 = vmmov %vm19615_vm15 }
 0x943   :  { %v6511_v54 = vsel %vm17934_vm6, %v6501_v42, %v8212_v20  ;;  %v6520_v46 = vsel %vm2958_vm13, %v6510_v35, %v8221_v50  ;;  %v8267_v24 = vunpack.i.h.bf16 %v8265_v57  ;;  %v8266_v15 = vunpack.i.l.bf16 %v8265_v57 }
 0x944   :  { %8364 = vrot.lane.b32.xlu0 %v8363_v30, %s19527_s23  ;;  %v6521_v5 = vsel %vm2958_vm13, %v6511_v54, %v8222_v17  ;;  %v8252_v30 = vunpack.i.h.bf16 %v16883_v59  ;;  %v6530_v31 = vsel %vm2969_vm5, %v6520_v46, %v8236_v10  ;;  %v8282_v20 = vunpack.i.h.bf16 %v16945_v56 }
 0x945   :  { %v8310_v19 = vpop.permute.xlu1 %8309  ;;  %v6531_v22 = vsel %vm2969_vm5, %v6521_v5, %v8237_v21  ;;  %v8281_v59 = vunpack.i.l.bf16 %v16945_v56  ;;  %v19612_v17 = vpack.i.bf16 %v16419_v40, %v16429_v36  ;;  %v8302_v56 = vunpack.i.h.bf16 %v16976_v44 }
 0x946   :  { %v8312_v2 = vunpack.i.h.bf16 %v8310_v19  ;;  %v8311_v62 = vunpack.i.l.bf16 %v8310_v19  ;;  %v8301_v21 = vunpack.i.l.bf16 %v16976_v44 }
 0x948   :  { %v6504_v9 = vsel %vm19610_vm8, %v6494_v49, %v8311_v62  ;;  %v6505_v32 = vsel %vm19611_vm10, %v6495_v13, %v8312_v2  ;;  %8374 = vrot.lane.b32.xlu0 %v8373_v47, %s19398_s27  ;;  %v6540_v49 = vsel %vm2980_vm0, %v6530_v31, %v8251_v58  ;;  %v6541_v13 = vsel %vm2980_vm0, %v6531_v22, %v8252_v30 }
 0x949   :  { %v8320_v43 = vpop.permute.xlu1 %8319  ;;  %v6550_v50 = vsel %vm19613_vm1, %v6540_v49, %v8266_v15  ;;  %v6551_v51 = vsel %vm19614_vm9, %v6541_v13, %v8267_v24  ;;  %vm19618_vm8 = vcmask 850944   ;;  %vm19620_vm1 = vcmask 916480  }
 0x94a   :  { %v8322_v54 = vunpack.i.h.bf16 %v8320_v43  ;;  %v8321_v57 = vunpack.i.l.bf16 %v8320_v43  ;;  %v6560_v62 = vsel %vm19617_vm11, %v6550_v50, %v8281_v59  ;;  %vm19619_vm10 = vmmov %vm19618_vm8  ;;  %vm19630_vm11 = vcmask 1040384  }
 0x94b   :  { %v7622_v23 = vpop.f32.mrf.mxu1  ;;  %v6570_v30 = vsel %vm19619_vm10, %v6560_v62, %v8301_v21  ;;  %vm19621_vm9 = vmmov %vm19620_vm1  ;;  %vm19635_vm10 = vcmask 64512  }
 0x94c   :  { %v5726_v4 = vadd.f32 %v16318_v38, %v7622_v23  ;;  %8384 = vrot.lane.b32.xlu0 %v19612_v17, %s19567_s17  ;;  %v19624_v23 = vrot.slane %v16833_v52, 2 }
 0x94d   :  { %v5720_v48 = vpop.f32.mrf.mxu1  ;;  %v8330_v35 = vpop.permute.xlu1 %8329 }
 0x94e   :  { %v5768_v0 = vmax.f32 %v5726_v4, 0.0  ;;  %v5721_v42 = vadd.f32 %v16318_v38, %v5720_v48  ;;  %v8332_v10 = vunpack.i.h.bf16 %v8330_v35  ;;  %v8331_v19 = vunpack.i.l.bf16 %v8330_v35 }
 0x94f   :  { %v6561_v38 = vsel %vm19615_vm15, %v6551_v51, %v8282_v20  ;;  %v19626_v20 = vrot.slane %v16833_v52, 1  ;;  %vm19627_vm15 = vcmask 1046528   ;;  %v19628_v48 = vrot.slane %v16833_v52, 5 }
 0x950   :  { %5792 = vst.msk [vmem:[#allocation2 + $0x98] sm:$0xff] %vm19604_vm4, %v5768_v0  ;;  %v5767_v40 = vmax.f32 %v5721_v42, 0.0  ;;  %v17029_v36 = vsel %vm17934_vm6, %v6504_v9, %v8331_v19  ;;  %v17032_v2 = vsel %vm17934_vm6, %v6505_v32, %v8332_v10  ;;  %8394 = vrot.lane.b32.xlu0 %v8393_v8, %s19551_s15  ;;  %v6571_v47 = vsel %vm19618_vm8, %v6561_v38, %v8302_v56  ;;  %v8635_v56 = vld [vmem:[%s17643_s2] ss:$0 sm:$0xff] }
 0x951   :  { %v8340_v44 = vpop.permute.xlu1 %8339  ;;  %v6581_v58 = vsel %vm19620_vm1, %v6571_v47, %v8322_v54  ;;  %v6580_v9 = vsel %vm19621_vm9, %v6570_v30, %v8321_v57  ;;  %vm19622_vm4 = vcmask 982016   ;;  %v19631_v10 = vpack.i.bf16 %v16772_v53, %v16662_v11  ;;  %vm19636_vm1 = vmmov %vm19635_vm10 }
 0x952   :  { %5791 = vst.msk [vmem:[#allocation2 + $0x90] sm:$0xff] %vm19616_vm3, %v5767_v40  ;;  %v8342_v46 = vunpack.i.h.bf16 %v8340_v44  ;;  %v8341_v5 = vunpack.i.l.bf16 %v8340_v44  ;;  %vm19623_vm6 = vmmov %vm19622_vm4  ;;  %vm19629_vm3 = vcmask 1042432   ;;  %v19633_v38 = vrot.slane %v16833_v52, 3 }
 0x953   :  { %vm19634_vm8 = vcmask 1044480   ;;  %v19637_v53 = vpack.i.bf16 %v16807_v33, %v16708_v3  ;;  %vm19638_vm9 = vcmask 1043456  }
 0x954   :  { %v6590_v12 = vsel %vm19622_vm4, %v6580_v9, %v8341_v5  ;;  %v6591_v41 = vsel %vm19623_vm6, %v6581_v58, %v8342_v46  ;;  %vm19625_vm6 = vcmask 1045504   ;;  %vm19639_vm4 = vmmov %vm19638_vm9 }
 0x955   :  { %7661 = vmatprep.mubr.f32.mxu0 %v6590_v12 }
 0x956   :  { %7662 = vmatmul.mubr.f32.vlgmr.msra.gmra.mxu0 %v6591_v41 }
 0x959   :  { %v5806_v8 = vld [vmem:[#allocation2 + $0x90] ss:$2 sm:$0xff]  ;;  %v5818_v32 = vld [vmem:[#allocation2 + $0x91] ss:$2 sm:$0xff] }
 0x95a   :  { %v17047_v31 = vmax.f32 %v5806_v8, %v5818_v32 }
 0x95c   :  { %v17050_v22 = vrot.slane %v17047_v31, 2  ;;  %v17053_v24 = vrot.slane %v17047_v31, 1  ;;  %v6059_v15 = vrot.slane %v17047_v31, 5  ;;  %v6161_v43 = vrot.slane %v17047_v31, 7 }
 0x95d   :  { %v5958_v35 = vrot.slane %v17047_v31, 3  ;;  %v6008_v47 = vrot.slane %v17047_v31, 4  ;;  %v6110_v58 = vrot.slane %v17047_v31, 6 }
 0x95e   :  { %v5910_v4 = vsel %vm19625_vm6, %v19624_v23, %v17050_v22  ;;  %v5861_v59 = vsel %vm19627_vm15, %v19626_v20, %v17053_v24  ;;  %v6060_v17 = vsel %vm19629_vm3, %v19628_v48, %v6059_v15  ;;  %v17075_v50 = vsel %vm19630_vm11, %v6159_v6, %v6161_v43  ;;  %vm19640_vm6 = vmmov %vm19629_vm3 }
 0x95f   :  { %v8418_v49 = vpack.i.bf16 %v17050_v22, %v5910_v4  ;;  %v8403_v13 = vpack.i.bf16 %v17053_v24, %v5861_v59  ;;  %v8478_v51 = vpack.i.bf16 %v6060_v17, %v16842_v18  ;;  %v8498_v0 = vpack.i.bf16 %v17075_v50, %v16875_v26 }
 0x960   :  { %v19632_v18 = vpack.i.bf16 %v16798_v60, %v16620_v25  ;;  %v8438_v57 = vpack.i.bf16 %v5910_v4, %v16859_v28  ;;  %v8423_v40 = vpack.i.bf16 %v5861_v59, %v16847_v39  ;;  %v5959_v44 = vsel %vm19634_vm8, %v19633_v38, %v5958_v35 }
 0x961   :  { %8419 = vrot.lane.b32.xlu1 %v8418_v49, %s19386_s21  ;;  %8404 = vrot.lane.b32.xlu0 %v8403_v13, %s19368_s25  ;;  %v8433_v25 = vpack.i.bf16 %v5958_v35, %v5959_v44  ;;  %v8453_v28 = vpack.i.bf16 %v5959_v44, %v16896_v37  ;;  %v6009_v3 = vsel %vm19638_vm9, %v6006_v16, %v6008_v47  ;;  %vm19641_vm15 = vcmask 1041408  }
 0x962   :  { %vm19642_vm3 = vmmov %vm19641_vm15  ;;  %v19643_v23 = vpack.i.bf16 %v16783_v63, %v16731_v29  ;;  %v8468_v4 = vpack.i.bf16 %v6009_v3, %v16932_v45  ;;  %vm19644_vm8 = vcmask 1046528   ;;  %vm19647_vm9 = vcmask 64512  }
 0x963   :  { %v7625_v42 = vpop.f32.mrf.mxu1  ;;  %v6111_v16 = vsel %vm19642_vm3, %v6108_v34, %v6110_v58 }
 0x964   :  { %v5736_v21 = vadd.f32 %v8635_v56, %v7625_v42  ;;  %v8488_v45 = vpack.i.bf16 %v6111_v16, %v16989_v7 }
 0x965   :  { %8429 = vrot.lane.b32.xlu1 %v19631_v10, %s19561_s26  ;;  %8414 = vrot.lane.b32.xlu0 %v19632_v18, %s19547_s11  ;;  %v5730_v6 = vpop.f32.mrf.mxu1 }
 0x966   :  { %v5770_v19 = vmax.f32 %v5736_v21, 0.0  ;;  %v5731_v54 = vadd.f32 %v8635_v56, %v5730_v6 }
 0x968   :  { %5794 = vst.msk [vmem:[#allocation2 + $0xa8] sm:$0xff] %vm19635_vm10, %v5770_v19  ;;  %v5769_v11 = vmax.f32 %v5731_v54, 0.0  ;;  %vm19645_vm10 = vcmask 1044480  }
 0x969   :  { %8439 = vrot.lane.b32.xlu1 %v8438_v57, %s19525_s30  ;;  %8424 = vrot.lane.b32.xlu0 %v8423_v40, %s19527_s23 }
 0x96a   :  { %5793 = vst.msk [vmem:[#allocation2 + $0xa0] sm:$0xff] %vm19636_vm1, %v5769_v11  ;;  %vm19646_vm1 = vcmask 1045504  }
 0x96d   :  { %8434 = vrot.lane.b32.xlu0 %v8433_v25, %s8643_s24 }
 0x971   :  { %8444 = vrot.lane.b32.xlu0 %v19637_v53, %s19567_s17  ;;  %v5807_v60 = vld [vmem:[#allocation2 + $0xa0] ss:$2 sm:$0xff]  ;;  %v5819_v39 = vld [vmem:[#allocation2 + $0xa1] ss:$2 sm:$0xff] }
 0x972   :  { %v17107_v62 = vmax.f32 %v5807_v60, %v5819_v39 }
 0x974   :  { %v6010_v46 = vrot.slane %v17107_v62, 4  ;;  %v6061_v5 = vrot.slane %v17107_v62, 5  ;;  %v6112_v30 = vrot.slane %v17107_v62, 6  ;;  %v6163_v8 = vrot.slane %v17107_v62, 7 }
 0x975   :  { %8454 = vrot.lane.b32.xlu0 %v8453_v28, %s19551_s15  ;;  %v6225_v59 = vrot.slane %v17107_v62, 1  ;;  %v8493_v34 = vpack.i.bf16 %v17107_v62, %v17047_v31  ;;  %v6289_v29 = vrot.slane %v17107_v62, 3 }
 0x976   :  { %v6011_v33 = vsel %vm19639_vm4, %v6008_v47, %v6010_v46  ;;  %v6062_v37 = vsel %vm19640_vm6, %v6059_v15, %v6061_v5  ;;  %v17121_v41 = vsel %vm19641_vm15, %v6110_v58, %v6112_v30  ;;  %v6164_v15 = vsel %vm19630_vm11, %v6161_v43, %v6163_v8  ;;  %vm19648_vm15 = vmmov %vm19642_vm3 }
 0x977   :  { %v8448_v9 = vpack.i.bf16 %v6011_v33, %v6009_v3  ;;  %v8463_v12 = vpack.i.bf16 %v6062_v37, %v6060_v17  ;;  %v8473_v32 = vpack.i.bf16 %v17121_v41, %v6111_v16  ;;  %v8483_v20 = vpack.i.bf16 %v6164_v15, %v17075_v50  ;;  %vm19649_vm3 = vmmov %vm19630_vm11  ;;  %v17175_v3 = vpop.permute.xlu1 %8349 }
 0x978   :  { %v6226_v43 = vsel %vm19644_vm8, %v17053_v24, %v6225_v59  ;;  %v6290_v48 = vsel %vm19645_vm10, %v5958_v35, %v6289_v29  ;;  %v6257_v17 = vrot.slane %v17107_v62, 2  ;;  %v17162_v35 = vpop.permute.xlu0 %8274  ;;  %vm19650_vm11 = vmmov %vm19647_vm9  ;;  %vm19652_vm10 = vcmask 719872  }
 0x979   :  { %8449 = vrot.lane.b32.xlu1 %v8448_v9, %s19392_s20  ;;  %8464 = vrot.lane.b32.xlu0 %v8463_v12, %s19395_s22  ;;  %v8503_v49 = vpack.i.bf16 %v6225_v59, %v6226_v43  ;;  %v8513_v21 = vpack.i.bf16 %v6289_v29, %v6290_v48  ;;  %vm19651_vm8 = vmmov %vm19647_vm9 }
 0x97d   :  { %8459 = vrot.lane.b32.xlu1 %v19643_v23, %s19573_s0  ;;  %8474 = vrot.lane.b32.xlu0 %v8473_v32, %s19398_s27 }
 0x981   :  { %8469 = vrot.lane.b32.xlu1 %v8468_v4, %s19547_s11  ;;  %8484 = vrot.lane.b32.xlu0 %v8483_v20, %s19406_s10 }
 0x985   :  { %8479 = vrot.lane.b32.xlu1 %v8478_v51, %s19561_s26  ;;  %8494 = vrot.lane.b32.xlu0 %v8493_v34, %s19416_s14  ;;  %v6258_v51 = vsel %vm19646_vm1, %v17050_v22, %v6257_v17  ;;  %vm19653_vm1 = vmmov %vm19652_vm10 }
 0x986   :  { %v7628_v63 = vpop.f32.mrf.mxu1  ;;  %v8508_v7 = vpack.i.bf16 %v6257_v17, %v6258_v51 }
 0x988   :  { %v5740_v13 = vpop.f32.mrf.mxu1 }
 0x989   :  { %v5741_v42 = vadd.f32 %v8635_v56, %v5740_v13  ;;  %8489 = vrot.lane.b32.xlu1 %v8488_v45, %s19567_s17  ;;  %8504 = vrot.lane.b32.xlu0 %v8503_v49, %s19527_s23  ;;  %v8277_v49 = vunpack.i.h.bf16 %v17162_v35  ;;  %v8276_v13 = vunpack.i.l.bf16 %v17162_v35 }
 0x98b   :  { %v5771_v24 = vmax.f32 %v5741_v42, 0.0 }
 0x98d   :  { %5795 = vst.msk [vmem:[#allocation2 + $0xb0] sm:$0xff] %vm19647_vm9, %v5771_v24  ;;  %8499 = vrot.lane.b32.xlu1 %v8498_v0, %s19573_s0  ;;  %8514 = vrot.lane.b32.xlu0 %v8513_v21, %s19551_s15  ;;  %vm19654_vm9 = vcmask 785408  }
 0x991   :  { %8509 = vrot.lane.b32.xlu1 %v8508_v7, %s19525_s30 }
 0x994   :  { %v5808_v56 = vld [vmem:[#allocation2 + $0xb0] ss:$2 sm:$0xf]  ;;  %v5820_v10 = vld [vmem:[#allocation2 + $0xb1] ss:$2 sm:$0xf] }
 0x995   :  { %v5832_v18 = vmax.f32 %v5808_v56, %v5820_v10  ;;  %v6522_v10 = vsel %vm2958_vm13, %v16922_v1, %v8276_v13 }
 0x996   :  { %v8285_v6 = vpop.permute.xlu0 %8284  ;;  %v8360_v58 = vpop.permute.xlu1 %8359 }
 0x997   :  { %v6322_v19 = vrot.slane %v5832_v18, 4  ;;  %v6354_v22 = vrot.slane %v5832_v18, 5  ;;  %v6386_v54 = vrot.slane %v5832_v18, 6  ;;  %v6418_v57 = vrot.slane %v5832_v18, 7 }
 0x998   :  { %v8287_v50 = vunpack.i.h.bf16 %v8285_v6  ;;  %v8286_v0 = vunpack.i.l.bf16 %v8285_v6  ;;  %v8362_v4 = vunpack.i.h.bf16 %v8360_v58  ;;  %v8361_v20 = vunpack.i.l.bf16 %v8360_v58 }
 0x999   :  { %v6323_v38 = vsel %vm19639_vm4, %v6010_v46, %v6322_v19  ;;  %v6355_v26 = vsel %vm19640_vm6, %v6061_v5, %v6354_v22  ;;  %v6387_v25 = vsel %vm19648_vm15, %v6112_v30, %v6386_v54  ;;  %v6419_v53 = vsel %vm19649_vm3, %v6163_v8, %v6418_v57  ;;  %vm19655_vm4 = vmmov %vm19654_vm9 }
 0x99a   :  { %v8295_v40 = vpop.permute.xlu0 %8294  ;;  %v8518_v44 = vpack.i.bf16 %v6323_v38, %v6011_v33  ;;  %v8523_v11 = vpack.i.bf16 %v6355_v26, %v6062_v37  ;;  %v6457_v62 = vsel %vm19650_vm11, %v16760_v27, %v8287_v50  ;;  %v6456_v47 = vsel %vm19651_vm8, %v16541_v14, %v8286_v0  ;;  %v8370_v16 = vpop.permute.xlu1 %8369 }
 0x99b   :  { %v8528_v46 = vpack.i.bf16 %v6387_v25, %v17121_v41  ;;  %v8533_v5 = vpack.i.bf16 %v6419_v53, %v6164_v15  ;;  %v8297_v48 = vunpack.i.h.bf16 %v8295_v40  ;;  %v8296_v17 = vunpack.i.l.bf16 %v8295_v40 }
 0x99c   :  { %8519 = vrot.lane.b32.xlu1 %v8518_v44, %s19547_s11  ;;  %8524 = vrot.lane.b32.xlu0 %v8523_v11, %s19561_s26  ;;  %v6523_v18 = vsel %vm2958_vm13, %v16925_v61, %v8277_v49  ;;  %v8372_v0 = vunpack.i.h.bf16 %v8370_v16  ;;  %v8371_v44 = vunpack.i.l.bf16 %v8370_v16  ;;  %vm19656_vm6 = vcmask 850944  }
 0x99d   :  { %v6532_v22 = vsel %vm2969_vm5, %v6522_v10, %v8296_v17  ;;  %v6533_v35 = vsel %vm2969_vm5, %v6523_v18, %v8297_v48  ;;  %vm19657_vm15 = vmmov %vm19656_vm6  ;;  %vm19658_vm3 = vcmask 916480   ;;  %vm19660_vm8 = vcmask 982016  }
 0x99e   :  { %v8305_v60 = vpop.permute.xlu0 %8304  ;;  %v17183_v59 = vpop.permute.xlu1 %8379  ;;  %vm19659_vm11 = vmmov %vm19658_vm3  ;;  %v8352_v16 = vunpack.i.h.bf16 %v17175_v3 }
 0x99f   :  { %v8307_v39 = vunpack.i.h.bf16 %v8305_v60  ;;  %v8306_v28 = vunpack.i.l.bf16 %v8305_v60  ;;  %v8381_v17 = vunpack.i.l.bf16 %v17183_v59 }
 0x9a0   :  { %8529 = vrot.lane.b32.xlu1 %v8528_v46, %s19567_s17  ;;  %8534 = vrot.lane.b32.xlu0 %v8533_v5, %s19573_s0 }
 0x9a1   :  { %v6466_v30 = vsel %vm2894_vm7, %v6456_v47, %v8306_v28  ;;  %v6467_v33 = vsel %vm2894_vm7, %v6457_v62, %v8307_v39 }
 0x9a2   :  { %v8315_v37 = vpop.permute.xlu0 %8314  ;;  %v17195_v24 = vpop.permute.xlu1 %8389 }
 0x9a3   :  { %v8317_v21 = vunpack.i.h.bf16 %v8315_v37  ;;  %v8316_v51 = vunpack.i.l.bf16 %v8315_v37 }
 0x9a5   :  { %v6542_v57 = vsel %vm2980_vm0, %v6532_v22, %v8316_v51  ;;  %v6543_v40 = vsel %vm2980_vm0, %v6533_v35, %v8317_v21 }
 0x9a6   :  { %v8325_v9 = vpop.permute.xlu0 %8324  ;;  %v8400_v1 = vpop.permute.xlu1 %8399 }
 0x9a7   :  { %v8327_v27 = vunpack.i.h.bf16 %v8325_v9  ;;  %v8326_v12 = vunpack.i.l.bf16 %v8325_v9  ;;  %v8402_v60 = vunpack.i.h.bf16 %v8400_v1  ;;  %v8401_v39 = vunpack.i.l.bf16 %v8400_v1 }
 0x9a9   :  { %v6476_v14 = vsel %vm1687_vm14, %v6466_v30, %v8326_v12  ;;  %v6477_v41 = vsel %vm1687_vm14, %v6467_v33, %v8327_v27 }
 0x9aa   :  { %v8335_v8 = vpop.permute.xlu0 %8334  ;;  %v17219_v9 = vpop.permute.xlu1 %8409 }
 0x9ab   :  { %v8337_v7 = vunpack.i.h.bf16 %v8335_v8  ;;  %v8336_v56 = vunpack.i.l.bf16 %v8335_v8 }
 0x9ad   :  { %v6552_v38 = vsel %vm19652_vm10, %v6542_v57, %v8336_v56  ;;  %v6553_v26 = vsel %vm19653_vm1, %v6543_v40, %v8337_v7  ;;  %vm19661_vm10 = vmmov %vm19660_vm8 }
 0x9ae   :  { %v8345_v32 = vpop.permute.xlu0 %8344 }
 0x9af   :  { %v8347_v15 = vunpack.i.h.bf16 %v8345_v32  ;;  %v8346_v23 = vunpack.i.l.bf16 %v8345_v32  ;;  %v8351_v32 = vunpack.i.l.bf16 %v17175_v3  ;;  %v8382_v3 = vunpack.i.h.bf16 %v17183_v59 }
 0x9b1   :  { %v6486_v34 = vsel %vm2915_vm12, %v6476_v14, %v8346_v23  ;;  %v6487_v43 = vsel %vm2915_vm12, %v6477_v41, %v8347_v15 }
 0x9b2   :  { %v8355_v29 = vpop.permute.xlu0 %8354  ;;  %v17188_v63 = vsel %vm2926_vm2, %v6486_v34, %v8361_v20  ;;  %v17191_v45 = vsel %vm2926_vm2, %v6487_v43, %v8362_v4  ;;  %v6524_v4 = vsel %vm2958_vm13, %v17029_v36, %v8351_v32  ;;  %v6525_v20 = vsel %vm2958_vm13, %v17032_v2, %v8352_v16 }
 0x9b3   :  { %v8357_v6 = vunpack.i.h.bf16 %v8355_v29  ;;  %v8356_v19 = vunpack.i.l.bf16 %v8355_v29 }
 0x9b5   :  { %v6562_v50 = vsel %vm19654_vm9, %v6552_v38, %v8356_v19  ;;  %v6563_v61 = vsel %vm19655_vm4, %v6553_v26, %v8357_v6  ;;  %vm19662_vm9 = vmmov %vm19653_vm1 }
 0x9b6   :  { %v8365_v42 = vpop.permute.xlu0 %8364  ;;  %v6572_v28 = vsel %vm19656_vm6, %v6562_v50, %v8371_v44  ;;  %v6573_v62 = vsel %vm19657_vm15, %v6563_v61, %v8372_v0  ;;  %vm19663_vm6 = vmmov %vm19655_vm4 }
 0x9b7   :  { %v8367_v15 = vunpack.i.h.bf16 %v8365_v42  ;;  %v8366_v23 = vunpack.i.l.bf16 %v8365_v42 }
 0x9b9   :  { %v6534_v43 = vsel %vm2969_vm5, %v6524_v4, %v8366_v23  ;;  %v6535_v29 = vsel %vm2969_vm5, %v6525_v20, %v8367_v15 }
 0x9ba   :  { %v17203_v54 = vpop.permute.xlu0 %8374  ;;  %v6544_v36 = vsel %vm2980_vm0, %v6534_v43, %v8381_v17  ;;  %v6545_v2 = vsel %vm2980_vm0, %v6535_v29, %v8382_v3 }
 0x9bb   :  { %v8377_v57 = vunpack.i.h.bf16 %v17203_v54  ;;  %v8376_v40 = vunpack.i.l.bf16 %v17203_v54 }
 0x9be   :  { %v8385_v11 = vpop.permute.xlu0 %8384 }
 0x9bf   :  { %v8387_v25 = vunpack.i.h.bf16 %v8385_v11  ;;  %v8386_v53 = vunpack.i.l.bf16 %v8385_v11 }
 0x9c1   :  { %v6582_v47 = vsel %vm19658_vm3, %v6572_v28, %v8386_v53  ;;  %v6583_v46 = vsel %vm19659_vm11, %v6573_v62, %v8387_v25  ;;  %vm19664_vm3 = vmmov %vm19657_vm15  ;;  %v8391_v28 = vunpack.i.l.bf16 %v17195_v24 }
 0x9c2   :  { %v6592_v5 = vsel %vm19660_vm8, %v6582_v47, %v8401_v39  ;;  %v6593_v30 = vsel %vm19661_vm10, %v6583_v46, %v8402_v60  ;;  %v8395_v33 = vpop.permute.xlu0 %8394  ;;  %vm19665_vm8 = vmmov %vm19659_vm11  ;;  %v8392_v39 = vunpack.i.h.bf16 %v17195_v24 }
 0x9c3   :  { %7664 = vmatprep.mubr.f32.mxu0 %v6592_v5  ;;  %v8397_v49 = vunpack.i.h.bf16 %v8395_v33  ;;  %v8396_v13 = vunpack.i.l.bf16 %v8395_v33 }
 0x9c4   :  { %7665 = vmatmul.mubr.f32.gmra.mxu0 %v6593_v30  ;;  %v8412_v30 = vunpack.i.h.bf16 %v17219_v9 }
 0x9c5   :  { %v6554_v7 = vsel %vm19653_vm1, %v6544_v36, %v8396_v13  ;;  %v6555_v56 = vsel %vm19662_vm9, %v6545_v2, %v8397_v49  ;;  %vm19666_vm1 = vmmov %vm19661_vm10  ;;  %vm19667_vm9 = vcmask 392192  }
 0x9c6   :  { %v6506_v53 = vsel %vm19667_vm9, %v17188_v63, %v8376_v40 }
 0x9d3   :  { %v17217_v37 = vpop.permute.xlu0 %8404  ;;  %v17223_v12 = vpop.permute.xlu1 %8419 }
 0x9d4   :  { %v8407_v43 = vunpack.i.h.bf16 %v17217_v37  ;;  %v8422_v36 = vunpack.i.h.bf16 %v17223_v12  ;;  %v8421_v2 = vunpack.i.l.bf16 %v17223_v12 }
 0x9d7   :  { %v8415_v58 = vpop.permute.xlu0 %8414  ;;  %v8430_v41 = vpop.permute.xlu1 %8429 }
 0x9d8   :  { %v8417_v42 = vunpack.i.h.bf16 %v8415_v58  ;;  %v8416_v21 = vunpack.i.l.bf16 %v8415_v58  ;;  %v8432_v10 = vunpack.i.h.bf16 %v8430_v41  ;;  %v8431_v18 = vunpack.i.l.bf16 %v8430_v41 }
 0x9da   :  { %v6564_v6 = vsel %vm19655_vm4, %v6554_v7, %v8416_v21  ;;  %v6565_v19 = vsel %vm19663_vm6, %v6555_v56, %v8417_v42  ;;  %vm19668_vm4 = vmmov %vm19667_vm9  ;;  %vm19669_vm6 = vcmask 457728  }
 0x9db   :  { %v17221_v27 = vpop.permute.xlu0 %8424  ;;  %v17233_v34 = vpop.permute.xlu1 %8439  ;;  %v6574_v50 = vsel %vm19657_vm15, %v6564_v6, %v8431_v18  ;;  %v6575_v61 = vsel %vm19664_vm3, %v6565_v19, %v8432_v10  ;;  %v6507_v54 = vsel %vm19668_vm4, %v17191_v45, %v8377_v57  ;;  %v6516_v47 = vsel %vm19669_vm6, %v6506_v53, %v8391_v28  ;;  %vm19670_vm15 = vmmov %vm19669_vm6 }
 0x9dc   :  { %v6517_v46 = vsel %vm19670_vm15, %v6507_v54, %v8392_v39  ;;  %v8427_v5 = vunpack.i.h.bf16 %v17221_v27  ;;  %v8426_v63 = vunpack.i.l.bf16 %v17221_v27  ;;  %v8411_v45 = vunpack.i.l.bf16 %v17219_v9 }
 0x9dd   :  { %v8442_v58 = vunpack.i.h.bf16 %v17233_v34  ;;  %v8441_v24 = vunpack.i.l.bf16 %v17233_v34  ;;  %v8406_v34 = vunpack.i.l.bf16 %v17217_v37  ;;  %vm19671_vm3 = vcmask 719872  }
 0x9de   :  { %v6526_v41 = vsel %vm2958_vm13, %v6516_v47, %v8411_v45  ;;  %vm19677_vm4 = vcmask 64512   ;;  %vm19679_vm15 = vcmask 916480  }
 0x9df   :  { %v17225_v14 = vpop.permute.xlu0 %8434  ;;  %v6536_v16 = vsel %vm2969_vm5, %v6526_v41, %v8426_v63  ;;  %vm19678_vm6 = vmmov %vm19677_vm4 }
 0x9e0   :  { %v6546_v13 = vsel %vm2980_vm0, %v6536_v16, %v8441_v24  ;;  %v6458_v57 = vsel %vm19678_vm6, %v16833_v52, %v8406_v34  ;;  %vm19689_vm6 = vcmask 785408  }
 0x9e1   :  { %v6468_v52 = vsel %vm2894_vm7, %v6458_v57, %v8421_v2 }
 0x9e3   :  { %v8445_v8 = vpop.permute.xlu0 %8444 }
 0x9e4   :  { %v8447_v22 = vunpack.i.h.bf16 %v8445_v8  ;;  %v8446_v59 = vunpack.i.l.bf16 %v8445_v8  ;;  %v6527_v8 = vsel %vm2958_vm13, %v6517_v46, %v8412_v30 }
 0x9e5   :  { %v6537_v32 = vsel %vm2969_vm5, %v6527_v8, %v8427_v5 }
 0x9e6   :  { %v6584_v0 = vsel %vm19659_vm11, %v6574_v50, %v8446_v59  ;;  %v6585_v44 = vsel %vm19665_vm8, %v6575_v61, %v8447_v22  ;;  %v6547_v3 = vsel %vm2980_vm0, %v6537_v32, %v8442_v58  ;;  %vm19672_vm11 = vmmov %vm19671_vm3  ;;  %vm19673_vm8 = vcmask 785408  }
 0x9e7   :  { %v17237_v48 = vpop.permute.xlu0 %8454  ;;  %v6459_v59 = vsel %vm19677_vm4, %v17047_v31, %v8407_v43 }
 0x9e8   :  { %v8457_v15 = vunpack.i.h.bf16 %v17237_v48  ;;  %v8456_v27 = vunpack.i.l.bf16 %v17237_v48  ;;  %v6469_v31 = vsel %vm2894_vm7, %v6459_v59, %v8422_v36 }
 0x9ea   :  { %v6556_v21 = vsel %vm19671_vm3, %v6546_v13, %v8456_v27  ;;  %v6557_v48 = vsel %vm19672_vm11, %v6547_v3, %v8457_v15  ;;  %vm19680_vm3 = vmmov %vm19679_vm15  ;;  %vm19681_vm11 = vcmask 982016  }
 0x9eb   :  { %v17243_v51 = vpop.permute.xlu1 %8449  ;;  %v17249_v35 = vpop.permute.xlu0 %8464 }
 0x9ec   :  { %v8452_v61 = vunpack.i.h.bf16 %v17243_v51 }
 0x9ef   :  { %v8460_v38 = vpop.permute.xlu1 %8459  ;;  %v17265_v62 = vpop.permute.xlu0 %8474 }
 0x9f0   :  { %v8462_v26 = vunpack.i.h.bf16 %v8460_v38  ;;  %v8461_v1 = vunpack.i.l.bf16 %v8460_v38  ;;  %v8437_v38 = vunpack.i.h.bf16 %v17225_v14  ;;  %v8476_v39 = vunpack.i.l.bf16 %v17265_v62 }
 0x9f2   :  { %v6594_v11 = vsel %vm19661_vm10, %v6584_v0, %v8461_v1  ;;  %v6595_v25 = vsel %vm19666_vm1, %v6585_v44, %v8462_v26  ;;  %vm19674_vm10 = vmmov %vm19673_vm8  ;;  %vm19675_vm1 = vcmask 850944   ;;  %v8436_v26 = vunpack.i.l.bf16 %v17225_v14 }
 0x9f3   :  { %v8470_v60 = vpop.permute.xlu1 %8469  ;;  %7667 = vmatprep.mubr.f32.mxu0 %v6594_v11  ;;  %v17281_v23 = vpop.permute.xlu0 %8484  ;;  %vm19676_vm9 = vmmov %vm19675_vm1  ;;  %v8451_v0 = vunpack.i.l.bf16 %v17243_v51  ;;  %v6479_v11 = vsel %vm1687_vm14, %v6469_v31, %v8437_v38  ;;  %v8467_v14 = vunpack.i.h.bf16 %v17249_v35  ;;  %v8477_v51 = vunpack.i.h.bf16 %v17265_v62 }
 0x9f4   :  { %7668 = vmatmul.mubr.f32.gmra.mxu0 %v6595_v25  ;;  %v8472_v9 = vunpack.i.h.bf16 %v8470_v60  ;;  %v8471_v4 = vunpack.i.l.bf16 %v8470_v60  ;;  %v6478_v44 = vsel %vm1687_vm14, %v6468_v52, %v8436_v26  ;;  %v8466_v25 = vunpack.i.l.bf16 %v17249_v35 }
 0x9f5   :  { %v6488_v54 = vsel %vm2915_vm12, %v6478_v44, %v8451_v0  ;;  %v6489_v60 = vsel %vm2915_vm12, %v6479_v11, %v8452_v61  ;;  %v8487_v28 = vunpack.i.h.bf16 %v17281_v23  ;;  %v8486_v47 = vunpack.i.l.bf16 %v17281_v23 }
 0x9f6   :  { %v6566_v7 = vsel %vm19673_vm8, %v6556_v21, %v8471_v4  ;;  %v6567_v37 = vsel %vm19674_vm10, %v6557_v48, %v8472_v9  ;;  %vm19682_vm8 = vmmov %vm19681_vm11  ;;  %v6498_v30 = vsel %vm2926_vm2, %v6488_v54, %v8466_v25  ;;  %v6499_v35 = vsel %vm2926_vm2, %v6489_v60, %v8467_v14  ;;  %v6976_v54 = vld [vmem:[%s17646_s5 + $0x78] sm:$0xff]  ;;  %v6991_v60 = vld [vmem:[%s17646_s5 + $0xf0] sm:$0xff] }
 0x9f7   :  { %v8480_v33 = vpop.permute.xlu1 %8479  ;;  %v8495_v10 = vpop.permute.xlu0 %8494  ;;  %vm19683_vm14 = vcmask 392192   ;;  %vm19687_vm2 = vcmask 719872  }
 0x9f8   :  { %v8482_v29 = vunpack.i.h.bf16 %v8480_v33  ;;  %v8481_v49 = vunpack.i.l.bf16 %v8480_v33  ;;  %v8497_v5 = vunpack.i.h.bf16 %v8495_v10  ;;  %v8496_v63 = vunpack.i.l.bf16 %v8495_v10  ;;  %vm19684_vm10 = vmmov %vm19683_vm14 }
 0x9f9   :  { %v6508_v58 = vsel %vm19683_vm14, %v6498_v30, %v8476_v39  ;;  %v6509_v24 = vsel %vm19684_vm10, %v6499_v35, %v8477_v51  ;;  %vm19688_vm4 = vmmov %vm19687_vm2  ;;  %vm19695_vm14 = vcmask 982016   ;;  %v6975_v39 = vld [vmem:[%s17646_s5 + $0x70] sm:$0xff] }
 0x9fa   :  { %v6576_v19 = vsel %vm19675_vm1, %v6566_v7, %v8481_v49  ;;  %v6577_v22 = vsel %vm19676_vm9, %v6567_v37, %v8482_v29  ;;  %vm19685_vm1 = vcmask 457728   ;;  %vm19696_vm10 = vmmov %vm19695_vm14 }
 0x9fb   :  { %v8490_v20 = vpop.permute.xlu1 %8489  ;;  %v8505_v53 = vpop.permute.xlu0 %8504  ;;  %v6518_v62 = vsel %vm19685_vm1, %v6508_v58, %v8486_v47  ;;  %vm19686_vm9 = vmmov %vm19685_vm1  ;;  %vm19697_vm1 = vmmov 0  }
 0x9fc   :  { %v8492_v17 = vunpack.i.h.bf16 %v8490_v20  ;;  %v8491_v42 = vunpack.i.l.bf16 %v8490_v20  ;;  %v8507_v45 = vunpack.i.h.bf16 %v8505_v53  ;;  %v8506_v33 = vunpack.i.l.bf16 %v8505_v53  ;;  %v6992_v53 = vld [vmem:[%s17646_s5 + $0xf8] sm:$0xff] }
 0x9fd   :  { %v6519_v16 = vsel %vm19686_vm9, %v6509_v24, %v8487_v28  ;;  %v6528_v15 = vsel %vm2958_vm13, %v6518_v62, %v8496_v63  ;;  %7429 = vmatprep.subr.mxu1 %v6992_v53  ;;  %v6989_v62 = vld [vmem:[%s17646_s5 + $0xe0] sm:$0xff]  ;;  %vm19698_vm9 = vcmask 1045504  }
 0x9fe   :  { %v6586_v12 = vsel %vm19679_vm15, %v6576_v19, %v8491_v42  ;;  %v6587_v40 = vsel %vm19680_vm3, %v6577_v22, %v8492_v17  ;;  %v6529_v27 = vsel %vm2958_vm13, %v6519_v16, %v8497_v5  ;;  %v6538_v23 = vsel %vm2969_vm5, %v6528_v15, %v8506_v33  ;;  %vm19690_vm15 = vmmov %vm19689_vm6  ;;  %7430 = vmatpush3.msra.mxu1 %v6976_v54 }
 0x9ff   :  { %v8500_v56 = vpop.permute.xlu1 %8499  ;;  %v8515_v32 = vpop.permute.xlu0 %8514  ;;  %v6539_v9 = vsel %vm2969_vm5, %v6529_v27, %v8507_v45  ;;  %vm19691_vm5 = vcmask 850944   ;;  %7431 = vmatprep.subr.mxu1 %v6991_v60 }
 0xa00   :  { %v8502_v18 = vunpack.i.h.bf16 %v8500_v56  ;;  %v8501_v6 = vunpack.i.l.bf16 %v8500_v56  ;;  %v8517_v43 = vunpack.i.h.bf16 %v8515_v32  ;;  %v8516_v34 = vunpack.i.l.bf16 %v8515_v32  ;;  %v17338_v56 = vld [vmem:[%s17645_s4] ss:$0 sm:$0xff]  ;;  %vm19692_vm3 = vmmov %vm19691_vm5  ;;  %7432 = vmatpush3.msra.mxu1 %v6975_v39 }
 0xa01   :  { %v6973_v32 = vld [vmem:[%s17646_s5 + $0x60] sm:$0xff] }
 0xa02   :  { %v6596_v1 = vsel %vm19681_vm11, %v6586_v12, %v8501_v6  ;;  %v6597_v50 = vsel %vm19682_vm8, %v6587_v40, %v8502_v18  ;;  %vm19693_vm11 = vcmask 916480  }
 0xa03   :  { %7670 = vmatprep.mubr.f32.mxu0 %v6596_v1  ;;  %v8510_v46 = vpop.permute.xlu1 %8509  ;;  %vm19694_vm8 = vmmov %vm19693_vm11 }
 0xa04   :  { %7671 = vmatmul.mubr.f32.gmra.mxu0 %v6597_v50  ;;  %v8512_v41 = vunpack.i.h.bf16 %v8510_v46  ;;  %v8511_v8 = vunpack.i.l.bf16 %v8510_v46 }
 0xa06   :  { %v6548_v4 = vsel %vm2980_vm0, %v6538_v23, %v8511_v8  ;;  %v6549_v20 = vsel %vm2980_vm0, %v6539_v9, %v8512_v41  ;;  %v6990_v41 = vld [vmem:[%s17646_s5 + $0xe8] sm:$0xff] }
 0xa07   :  { %v6558_v17 = vsel %vm19687_vm2, %v6548_v4, %v8516_v34  ;;  %v6559_v42 = vsel %vm19688_vm4, %v6549_v20, %v8517_v43  ;;  %v6974_v8 = vld [vmem:[%s17646_s5 + $0x68] sm:$0xff]  ;;  %7433 = vmatprep.subr.mxu1 %v6990_v41  ;;  %v6988_v20 = vld [vmem:[%s17646_s5 + $0xd8] sm:$0xff]  ;;  %v6987_v34 = vld [vmem:[%s17646_s5 + $0xd0] sm:$0xff]  ;;  %vm19699_vm2 = vcmask 1046528  }
 0xa08   :  { %7434 = vmatpush3.msra.mxu1 %v6974_v8  ;;  %v6972_v43 = vld [vmem:[%s17646_s5 + $0x58] sm:$0xff]  ;;  %vm19700_vm4 = vmmov %vm19698_vm9  ;;  %v6965_v41 = vld [vmem:[%s17646_s5 + $0x20] sm:$0xff] }
 0xa09   :  { %7435 = vmatprep.subr.mxu1 %v6989_v62  ;;  %v6980_v62 = vld [vmem:[%s17646_s5 + $0x98] sm:$0xff] }
 0xa0a   :  { %7436 = vmatpush3.msra.mxu1 %v6973_v32  ;;  %v6964_v32 = vld [vmem:[%s17646_s5 + $0x18] sm:$0xff] }
 0xa0b   :  { %7437 = vmatprep.subr.mxu1 %v6988_v20 }
 0xa0c   :  { %7438 = vmatpush3.msra.mxu1 %v6972_v43 }
 0xa0d   :  { %7439 = vmatprep.subr.mxu1 %v6987_v34  ;;  %v6978_v34 = vld [vmem:[%s17646_s5 + $0x88] sm:$0xff] }
 0xa0e   :  { %v8520_v29 = vpop.permute.xlu1 %8519  ;;  %v8525_v49 = vpop.permute.xlu0 %8524 }
 0xa0f   :  { %v8522_v13 = vunpack.i.h.bf16 %v8520_v29  ;;  %v8521_v3 = vunpack.i.l.bf16 %v8520_v29  ;;  %v8527_v21 = vunpack.i.h.bf16 %v8525_v49  ;;  %v8526_v48 = vunpack.i.l.bf16 %v8525_v49 }
 0xa11   :  { %v6568_v36 = vsel %vm19689_vm6, %v6558_v17, %v8521_v3  ;;  %v6569_v2 = vsel %vm19690_vm15, %v6559_v42, %v8522_v13  ;;  %v6971_v17 = vld [vmem:[%s17646_s5 + $0x50] sm:$0xff]  ;;  %vm19701_vm6 = vmmov %vm19699_vm2  ;;  %vm19702_vm15 = vcmask 1043456  }
 0xa12   :  { %v8530_v7 = vpop.permute.xlu1 %8529  ;;  %v8535_v37 = vpop.permute.xlu0 %8534  ;;  %v6578_v59 = vsel %vm19691_vm5, %v6568_v36, %v8526_v48  ;;  %v6579_v57 = vsel %vm19692_vm3, %v6569_v2, %v8527_v21  ;;  %7440 = vmatpush3.msra.mxu1 %v6971_v17  ;;  %vm19703_vm5 = vcmask 1044480   ;;  %vm19704_vm3 = vmmov %vm19702_vm15 }
 0xa13   :  { %v8532_v10 = vunpack.i.h.bf16 %v8530_v7  ;;  %v8531_v18 = vunpack.i.l.bf16 %v8530_v7  ;;  %v8537_v6 = vunpack.i.h.bf16 %v8535_v37  ;;  %v8536_v19 = vunpack.i.l.bf16 %v8535_v37 }
 0xa15   :  { %v6588_v40 = vsel %vm19693_vm11, %v6578_v59, %v8531_v18  ;;  %v6589_v38 = vsel %vm19694_vm8, %v6579_v57, %v8532_v10  ;;  %v6986_v57 = vld [vmem:[%s17646_s5 + $0xc8] sm:$0xff]  ;;  %vm19705_vm11 = vmmov %vm19703_vm5  ;;  %vm19706_vm8 = vcmask 1042432  }
 0xa16   :  { %v7663_v22 = vpop.f32.mrf.mxu0  ;;  %v6598_v26 = vsel %vm19695_vm14, %v6588_v40, %v8536_v19  ;;  %v6599_v1 = vsel %vm19696_vm10, %v6589_v38, %v8537_v6  ;;  %7441 = vmatprep.subr.mxu1 %v6986_v57  ;;  %vm19707_vm14 = vmmov %vm19706_vm8 }
 0xa17   :  { %v6695_v12 = vadd.f32 %v7663_v22, %v17338_v56  ;;  %7673 = vmatprep.mubr.f32.mxu0 %v6598_v26  ;;  %vm19708_vm10 = vmmov %vm19699_vm2 }
 0xa18   :  { %v6689_v50 = vpop.f32.mrf.mxu0  ;;  %7674 = vmatmul.mubr.f32.gmra.mxu0 %v6599_v1 }
 0xa19   :  { %v6739_v61 = vmax.f32 %v6695_v12, 0.0  ;;  %v6690_v0 = vadd.f32 %v17338_v56, %v6689_v50  ;;  %7684 = vmatprep.mubr.msk.f32.mxu0 %vm19697_vm1, %v19572_v55  ;;  %v6970_v12 = vld [vmem:[%s17646_s5 + $0x48] sm:$0xff]  ;;  %v6985_v50 = vld [vmem:[%s17646_s5 + $0xc0] sm:$0xff]  ;;  %vm19709_vm1 = vcmask 1041408  }
 0xa1a   :  { %7442 = vmatpush3.msra.mxu1 %v6970_v12 }
 0xa1b   :  { %6749 = vst.msk [vmem:[#allocation3 + $0x8] sm:$0xff] %vm2894_vm7, %v6739_v61  ;;  %v6738_v52 = vmax.f32 %v6690_v0, 0.0  ;;  %7443 = vmatprep.subr.mxu1 %v6985_v50 }
 0xa1d   :  { %6748 = vst.msk [vmem:[#allocation3] sm:$0xff] %vm2894_vm7, %v6738_v52 }
 0xa24   :  { %v6758_v33 = vld [vmem:[#allocation3] ss:$2 sm:$0xff]  ;;  %v6763_v58 = vld [vmem:[#allocation3 + $0x1] ss:$2 sm:$0xff] }
 0xa25   :  { %v17383_v16 = vmax.f32 %v6758_v33, %v6763_v58 }
 0xa27   :  { %v6791_v49 = vrot.slane %v17383_v16, 2  ;;  %v6776_v13 = vrot.slane %v17383_v16, 1  ;;  %v6823_v26 = vrot.slane %v17383_v16, 4  ;;  %v6807_v1 = vrot.slane %v17383_v16, 3 }
 0xa28   :  { %v6839_v39 = vrot.slane %v17383_v16, 5  ;;  %v6871_v12 = vrot.slane %v17383_v16, 7 }
 0xa84   :  { %v7666_v31 = vpop.f32.mrf.mxu0 }
 0xa85   :  { %v6705_v44 = vadd.f32 %v7666_v31, %v17338_v56 }
 0xa86   :  { %v6699_v11 = vpop.f32.mrf.mxu0 }
 0xa87   :  { %v6741_v14 = vmax.f32 %v6705_v44, 0.0  ;;  %v6700_v25 = vadd.f32 %v17338_v56, %v6699_v11  ;;  %v6969_v44 = vld [vmem:[%s17646_s5 + $0x40] sm:$0xff]  ;;  %v6984_v11 = vld [vmem:[%s17646_s5 + $0xb8] sm:$0xff] }
 0xa88   :  { %7444 = vmatpush3.msra.mxu1 %v6969_v44 }
 0xa89   :  { %6751 = vst.msk [vmem:[#allocation3 + $0x18] sm:$0xff] %vm2894_vm7, %v6741_v14  ;;  %v6740_v51 = vmax.f32 %v6700_v25, 0.0  ;;  %7445 = vmatprep.subr.mxu1 %v6984_v11 }
 0xa8b   :  { %6750 = vst.msk [vmem:[#allocation3 + $0x10] sm:$0xff] %vm2894_vm7, %v6740_v51  ;;  %v6968_v51 = vld [vmem:[%s17646_s5 + $0x38] sm:$0xff] }
 0xa8c   :  { %7446 = vmatpush3.msra.mxu1 %v6968_v51 }
 0xa92   :  { %v6759_v35 = vld [vmem:[#allocation3 + $0x10] ss:$2 sm:$0xff]  ;;  %v6764_v45 = vld [vmem:[#allocation3 + $0x11] ss:$2 sm:$0xff] }
 0xa93   :  { %v17372_v24 = vmax.f32 %v6759_v35, %v6764_v45  ;;  %v6966_v35 = vld [vmem:[%s17646_s5 + $0x28] sm:$0xff]  ;;  %v6981_v45 = vld [vmem:[%s17646_s5 + $0xa0] sm:$0xff] }
 0xa95   :  { %v6792_v23 = vrot.slane %v17372_v24, 2  ;;  %v6777_v9 = vrot.slane %v17372_v24, 1  ;;  %v6824_v3 = vrot.slane %v17372_v24, 4  ;;  %v6808_v10 = vrot.slane %v17372_v24, 3 }
 0xa96   :  { %v6840_v53 = vrot.slane %v17372_v24, 5  ;;  %v6856_v43 = vrot.slane %v17372_v24, 6 }
 0xa97   :  { %v6793_v7 = vsel %vm19698_vm9, %v6791_v49, %v6792_v23  ;;  %v6778_v37 = vsel %vm19699_vm2, %v6776_v13, %v6777_v9  ;;  %v6825_v14 = vsel %vm19704_vm3, %v6823_v26, %v6824_v3  ;;  %v6809_v25 = vsel %vm19705_vm11, %v6807_v1, %v6808_v10  ;;  %v6962_v49 = vld [vmem:[%s17646_s5 + $0x8] sm:$0xff]  ;;  %vm19710_vm9 = vmmov %vm19709_vm1 }
 0xa98   :  { %v6855_v13 = vrot.slane %v17383_v16, 6  ;;  %vm19711_vm2 = vcmask 1040384   ;;  %vm19716_vm3 = vmmov %vm19705_vm11  ;;  %vm19717_vm11 = vcmask 1045504  }
 0xab4   :  { %v7669_v28 = vpop.f32.mrf.mxu0 }
 0xab5   :  { %v6715_v47 = vadd.f32 %v7669_v28, %v17338_v56 }
 0xab6   :  { %v6709_v46 = vpop.f32.mrf.mxu0 }
 0xab7   :  { %v6743_v5 = vmax.f32 %v6715_v47, 0.0  ;;  %v6710_v63 = vadd.f32 %v17338_v56, %v6709_v46  ;;  %v6983_v47 = vld [vmem:[%s17646_s5 + $0xb0] sm:$0xff] }
 0xab8   :  { %v6967_v46 = vld [vmem:[%s17646_s5 + $0x30] sm:$0xff]  ;;  %7447 = vmatprep.subr.mxu1 %v6983_v47 }
 0xab9   :  { %6753 = vst.msk [vmem:[#allocation3 + $0x28] sm:$0xff] %vm2894_vm7, %v6743_v5  ;;  %v6742_v30 = vmax.f32 %v6710_v63, 0.0  ;;  %v6841_v5 = vsel %vm19707_vm14, %v6839_v39, %v6840_v53  ;;  %v6982_v63 = vld [vmem:[%s17646_s5 + $0xa8] sm:$0xff]  ;;  %7448 = vmatpush3.msra.mxu1 %v6967_v46 }
 0xaba   :  { %7449 = vmatprep.subr.mxu1 %v6982_v63 }
 0xabb   :  { %6752 = vst.msk [vmem:[#allocation3 + $0x20] sm:$0xff] %vm2894_vm7, %v6742_v30  ;;  %7450 = vmatpush3.msra.mxu1 %v6966_v35 }
 0xabc   :  { %7451 = vmatprep.subr.mxu1 %v6981_v45 }
 0xabd   :  { %7452 = vmatpush3.msra.mxu1 %v6965_v41 }
 0xabe   :  { %7453 = vmatprep.subr.mxu1 %v6980_v62 }
 0xabf   :  { %7454 = vmatpush3.msra.mxu1 %v6964_v32 }
 0xac2   :  { %v6760_v15 = vld [vmem:[#allocation3 + $0x20] ss:$2 sm:$0xff]  ;;  %v6765_v27 = vld [vmem:[#allocation3 + $0x21] ss:$2 sm:$0xff] }
 0xac3   :  { %v17390_v4 = vmax.f32 %v6760_v15, %v6765_v27 }
 0xac4   :  { %v7672_v29 = vpop.f32.mrf.mxu0 }
 0xac5   :  { %v6725_v42 = vadd.f32 %v7672_v29, %v17338_v56  ;;  %v6794_v21 = vrot.slane %v17390_v4, 2  ;;  %v17410_v48 = vrot.slane %v17390_v4, 1  ;;  %v6826_v36 = vrot.slane %v17390_v4, 4 }
 0xac6   :  { %v6719_v2 = vpop.f32.mrf.mxu0  ;;  %v6810_v18 = vrot.slane %v17390_v4, 3  ;;  %v6842_v31 = vrot.slane %v17390_v4, 5  ;;  %v6858_v27 = vrot.slane %v17390_v4, 6  ;;  %v6874_v17 = vrot.slane %v17390_v4, 7 }
 0xac7   :  { %v6745_v6 = vmax.f32 %v6725_v42, 0.0  ;;  %v6720_v19 = vadd.f32 %v17338_v56, %v6719_v2  ;;  %v6795_v22 = vsel %vm19700_vm4, %v6792_v23, %v6794_v21  ;;  %v6780_v59 = vsel %vm19701_vm6, %v6777_v9, %v17410_v48  ;;  %v6979_v23 = vld [vmem:[%s17646_s5 + $0x90] sm:$0xff]  ;;  %v6977_v42 = vld [vmem:[%s17646_s5 + $0x80] sm:$0xff]  ;;  %vm19713_vm6 = vmmov %vm19711_vm2 }
 0xac8   :  { %v8543_v40 = vpack.i.bf16 %v6793_v7, %v6795_v22  ;;  %v8538_v38 = vpack.i.bf16 %v6778_v37, %v6780_v59  ;;  %v6827_v0 = vsel %vm19702_vm15, %v6824_v3, %v6826_v36  ;;  %v6811_v52 = vsel %vm19703_vm5, %v6808_v10, %v6810_v18  ;;  %v6963_v9 = vld [vmem:[%s17646_s5 + $0x10] sm:$0xff]  ;;  %7455 = vmatprep.subr.mxu1 %v6979_v23  ;;  %v6961_v7 = vld [vmem:[%s17646_s5] sm:$0xff]  ;;  %vm19714_vm15 = vmmov %vm19706_vm8 }
 0xac9   :  { %6755 = vst.msk [vmem:[#allocation3 + $0x38] sm:$0xff] %vm2894_vm7, %v6745_v6  ;;  %v6744_v61 = vmax.f32 %v6720_v19, 0.0  ;;  %v8553_v54 = vpack.i.bf16 %v6825_v14, %v6827_v0  ;;  %v8548_v60 = vpack.i.bf16 %v6809_v25, %v6811_v52  ;;  %v6843_v28 = vsel %vm19706_vm8, %v6840_v53, %v6842_v31  ;;  %7456 = vmatpush3.msra.mxu1 %v6963_v9  ;;  %vm19715_vm5 = vmmov %vm19711_vm2 }
 0xaca   :  { %8544 = vrot.lane.b32.xlu0 %v8543_v40, %s19392_s20  ;;  %8539 = vrot.lane.b32.xlu1 %v8538_v38, %s19386_s21  ;;  %v8558_v30 = vpack.i.bf16 %v6841_v5, %v6843_v28  ;;  %v6859_v3 = vsel %vm19709_vm1, %v6856_v43, %v6858_v27  ;;  %v6857_v10 = vsel %vm19710_vm9, %v6855_v13, %v6856_v43  ;;  %v6872_v6 = vrot.slane %v17372_v24, 7  ;;  %vm19718_vm8 = vmmov %vm19717_vm11 }
 0xacb   :  { %6754 = vst.msk [vmem:[#allocation3 + $0x30] sm:$0xff] %vm2894_vm7, %v6744_v61  ;;  %7457 = vmatprep.subr.mxu1 %v6978_v34  ;;  %v8573_v22 = vpack.i.bf16 %v6857_v10, %v6859_v3  ;;  %vm19712_vm4 = vcmask 126976   ;;  %vm19720_vm1 = vmmov %vm19711_vm2  ;;  %vm19721_vm9 = vcmask 1043456  }
 0xacc   :  { %7458 = vmatpush3.msra.mxu1 %v6962_v49  ;;  %v6875_v40 = vsel %vm19711_vm2, %v6872_v6, %v6874_v17  ;;  %v6873_v26 = vsel %vm19713_vm6, %v6871_v12, %v6872_v6  ;;  %vm19722_vm2 = vcmask 1041408  }
 0xacd   :  { %7459 = vmatprep.subr.mxu1 %v6977_v42  ;;  %v8578_v1 = vpack.i.bf16 %v6873_v26, %v6875_v40  ;;  %vm19724_vm6 = vmmov %vm19722_vm2 }
 0xace   :  { %8554 = vrot.lane.b32.xlu0 %v8553_v54, %s19416_s14  ;;  %8549 = vrot.lane.b32.xlu1 %v8548_v60, %s19398_s27 }
 0xacf   :  { %7460 = vmatpush3.msra.mxu1 %v6961_v7 }
 0xad2   :  { %8559 = vrot.lane.b32.xlu1 %v8558_v30, %s19525_s30  ;;  %v6761_v33 = vld [vmem:[#allocation3 + $0x30] ss:$2 sm:$0xff]  ;;  %v6766_v58 = vld [vmem:[#allocation3 + $0x31] ss:$2 sm:$0xff] }
 0xad3   :  { %v17483_v8 = vmax.f32 %v6761_v33, %v6766_v58 }
 0xad5   :  { %v6887_v15 = vrot.slane %v17483_v8, 1  ;;  %v6844_v50 = vrot.slane %v17483_v8, 5  ;;  %v6876_v61 = vrot.slane %v17483_v8, 7  ;;  %v6796_v14 = vrot.slane %v17483_v8, 2 }
 0xad6   :  { %v6812_v25 = vrot.slane %v17483_v8, 3  ;;  %v6828_v63 = vrot.slane %v17483_v8, 4  ;;  %v6860_v35 = vrot.slane %v17483_v8, 6 }
 0xad7   :  { %v6888_v20 = vsel %vm19708_vm10, %v17410_v48, %v6887_v15  ;;  %v6877_v44 = vsel %vm19715_vm5, %v6874_v17, %v6876_v61  ;;  %vm19719_vm10 = vmmov %vm19716_vm3 }
 0xad8   :  { %v8563_v29 = vpack.i.bf16 %v6887_v15, %v6888_v20  ;;  %v7675_v2 = vpop.f32.mrf.mxu0  ;;  %v6813_v5 = vsel %vm19719_vm10, %v6810_v18, %v6812_v25  ;;  %v6829_v30 = vsel %vm19721_vm9, %v6826_v36, %v6828_v63  ;;  %v6861_v18 = vsel %vm19722_vm2, %v6858_v27, %v6860_v35 }
 0xad9   :  { %v6735_v37 = vadd.f32 %v7675_v2, %v17338_v56 }
 0xada   :  { %8564 = vrot.lane.b32.xlu0 %v8563_v29, %s19386_s21  ;;  %v6729_v19 = vpop.f32.mrf.mxu0 }
 0xadb   :  { %v6747_v59 = vmax.f32 %v6735_v37, 0.0  ;;  %v6730_v57 = vadd.f32 %v17338_v56, %v6729_v19  ;;  %v6845_v56 = vsel %vm19714_vm15, %v6842_v31, %v6844_v50  ;;  %v6797_v31 = vsel %vm19717_vm11, %v6794_v21, %v6796_v14 }
 0xadc   :  { %vm19725_vm15 = vcmask 392192  }
 0xadd   :  { %6757 = vst.msk [vmem:[#allocation3 + $0x48] sm:$0x1f] %vm19712_vm4, %v6747_v59  ;;  %v6746_v38 = vmax.f32 %v6730_v57, 0.0  ;;  %vm19723_vm4 = vmmov %vm19721_vm9 }
 0xade   :  { %8574 = vrot.lane.b32.xlu0 %v8573_v22, %s19547_s11  ;;  %vm19726_vm5 = vmmov %vm19725_vm15 }
 0xadf   :  { %6756 = vst.msk [vmem:[#allocation3 + $0x40] sm:$0xff] %vm2894_vm7, %v6746_v38  ;;  %vm19731_vm10 = vmmov %vm19726_vm5 }
 0xae0   :  { %vm19734_vm2 = vmmov %vm19726_vm5 }
 0xae2   :  { %8579 = vrot.lane.b32.xlu0 %v8578_v1, %s19567_s17 }
 0xae6   :  { %6850 = vrot.lane.b32.xlu0 %v6845_v56, %s19525_s30  ;;  %v6762_v0 = vld [vmem:[#allocation3 + $0x40] ss:$2 sm:$0x3f]  ;;  %v6767_v52 = vld [vmem:[#allocation3 + $0x41] ss:$2 sm:$0x3f] }
 0xae7   :  { %v6772_v11 = vmax.f32 %v6762_v0, %v6767_v52 }
 0xae9   :  { %v6901_v53 = vrot.slane %v6772_v11, 3  ;;  %v6896_v54 = vrot.slane %v6772_v11, 2  ;;  %v6911_v39 = vrot.slane %v6772_v11, 5  ;;  %v6921_v46 = vrot.slane %v6772_v11, 7 }
 0xaea   :  { %6882 = vrot.lane.b32.xlu0 %v6877_v44, %s19567_s17  ;;  %v6906_v45 = vrot.slane %v6772_v11, 4  ;;  %v6916_v58 = vrot.slane %v6772_v11, 6 }
 0xaeb   :  { %v6902_v60 = vsel %vm19716_vm3, %v6812_v25, %v6901_v53  ;;  %v6897_v51 = vsel %vm19718_vm8, %v6796_v14, %v6896_v54  ;;  %v6912_v47 = vsel %vm19707_vm14, %v6844_v50, %v6911_v39  ;;  %v6922_v21 = vsel %vm19720_vm1, %v6876_v61, %v6921_v46 }
 0xaec   :  { %v8568_v28 = vpack.i.bf16 %v6897_v51, %v6797_v31  ;;  %v6907_v33 = vsel %vm19723_vm4, %v6828_v63, %v6906_v45  ;;  %v6917_v36 = vsel %vm19724_vm6, %v6860_v35, %v6916_v58  ;;  %vm19727_vm3 = vcmask 785408   ;;  %vm19735_vm4 = vmmov %vm19734_vm2 }
 0xaed   :  { %vm19728_vm11 = vmmov %vm19727_vm3  ;;  %vm19729_vm8 = vcmask 916480  }
 0xaee   :  { %6903 = vrot.lane.b32.xlu0 %v6902_v60, %s19398_s27  ;;  %8569 = vrot.lane.b32.xlu1 %v8568_v28, %s19392_s20  ;;  %vm19730_vm14 = vmmov %vm19729_vm8 }
 0xaef   :  { %vm19732_vm1 = vmmov %vm19727_vm3 }
 0xaf0   :  { %vm19733_vm9 = vmmov %vm19729_vm8 }
 0xaf1   :  { %vm19737_vm6 = vmmov %vm19732_vm1 }
 0xaf2   :  { %6913 = vrot.lane.b32.xlu0 %v6912_v47, %s19525_s30  ;;  %6818 = vrot.lane.b32.xlu1 %v6813_v5, %s19398_s27 }
 0xaf6   :  { %6923 = vrot.lane.b32.xlu0 %v6922_v21, %s19567_s17  ;;  %6834 = vrot.lane.b32.xlu1 %v6829_v30, %s19416_s14 }
 0xafa   :  { %6866 = vrot.lane.b32.xlu1 %v6861_v18, %s19547_s11 }
 0xafe   :  { %6785 = vrot.lane.b32.xlu1 %v17410_v48, %s19386_s21 }
 0xb02   :  { %6908 = vrot.lane.b32.xlu1 %v6907_v33, %s19416_s14 }
 0xb06   :  { %6918 = vrot.lane.b32.xlu1 %v6917_v36, %s19547_s11 }
 0xb3c   :  { %v8545_v41 = vpop.permute.xlu0 %8544  ;;  %v8540_v62 = vpop.permute.xlu1 %8539 }
 0xb3d   :  { %v8542_v27 = vunpack.i.h.bf16 %v8540_v62  ;;  %v8541_v23 = vunpack.i.l.bf16 %v8540_v62  ;;  %v8547_v9 = vunpack.i.h.bf16 %v8545_v41  ;;  %v8546_v20 = vunpack.i.l.bf16 %v8545_v41 }
 0xb3f   :  { %v6926_v48 = vsel %vm2894_vm7, %v17383_v16, %v8542_v27  ;;  %v6927_v34 = vsel %vm2894_vm7, %v17372_v24, %v8541_v23 }
 0xb40   :  { %v8555_v32 = vpop.permute.xlu0 %8554  ;;  %v8550_v15 = vpop.permute.xlu1 %8549  ;;  %v6929_v42 = vsel %vm2915_vm12, %v6926_v48, %v8547_v9  ;;  %v6930_v2 = vsel %vm2915_vm12, %v6927_v34, %v8546_v20  ;;  %v7100_v34 = vld [vmem:[%s17647_s7 + $0x18] sm:$0xff] }
 0xb41   :  { %v8552_v29 = vunpack.i.h.bf16 %v8550_v15  ;;  %v8551_v49 = vunpack.i.l.bf16 %v8550_v15  ;;  %v8557_v3 = vunpack.i.h.bf16 %v8555_v32  ;;  %v8556_v17 = vunpack.i.l.bf16 %v8555_v32  ;;  %7677 = vmatpush3.msra.mxu0 %v7100_v34 }
 0xb42   :  { %7678 = vmatprep.subr.mxu0 %v19572_v55 }
 0xb43   :  { %v6932_v37 = vsel %vm19725_vm15, %v6929_v42, %v8552_v29  ;;  %v6933_v10 = vsel %vm19726_vm5, %v6930_v2, %v8551_v49  ;;  %vm19738_vm15 = vmmov %vm19729_vm8  ;;  %v7099_v29 = vld [vmem:[%s17647_s7 + $0x10] sm:$0xff]  ;;  %v7098_v49 = vld [vmem:[%s17647_s7 + $0x8] sm:$0xff] }
 0xb44   :  { %v8560_v13 = vpop.permute.xlu1 %8559  ;;  %v6935_v24 = vsel %vm2958_vm13, %v6932_v37, %v8557_v3  ;;  %v6936_v57 = vsel %vm2958_vm13, %v6933_v10, %v8556_v17  ;;  %vm19739_vm5 = vmmov %vm19729_vm8  ;;  %7679 = vmatpush3.msra.mxu0 %v7099_v29  ;;  %v7267_v17 = vld [vmem:[%s17648_s6] ss:$0 sm:$0xff] }
 0xb45   :  { %v8562_v6 = vunpack.i.h.bf16 %v8560_v13  ;;  %v8561_v19 = vunpack.i.l.bf16 %v8560_v13  ;;  %7680 = vmatprep.subr.mxu0 %v19572_v55  ;;  %v7097_v13 = vld [vmem:[%s17647_s7] sm:$0xff] }
 0xb46   :  { %7681 = vmatpush3.msra.mxu0 %v7098_v49 }
 0xb47   :  { %v6938_v12 = vsel %vm2980_vm0, %v6935_v24, %v8562_v6  ;;  %v6939_v26 = vsel %vm2980_vm0, %v6936_v57, %v8561_v19  ;;  %7682 = vmatprep.subr.mxu0 %v19572_v55 }
 0xb48   :  { %7683 = vmatpush3.msra.mxu0 %v7097_v13 }
 0xb4c   :  { %v8565_v43 = vpop.permute.xlu0 %8564 }
 0xb4d   :  { %v8566_v0 = vunpack.i.l.bf16 %v8565_v43  ;;  %v8567_v39 = vunpack.i.h.bf16 %v8565_v43 }
 0xb4f   :  { %v6947_v14 = vsel %vm2894_vm7, %v17390_v4, %v8566_v0  ;;  %v6948_v30 = vsel %vm2894_vm7, %v17483_v8, %v8567_v39 }
 0xb50   :  { %v8575_v7 = vpop.permute.xlu0 %8574 }
 0xb51   :  { %v8577_v16 = vunpack.i.h.bf16 %v8575_v7  ;;  %v8576_v22 = vunpack.i.l.bf16 %v8575_v7 }
 0xb53   :  { %v6941_v1 = vsel %vm19727_vm3, %v6938_v12, %v8577_v16  ;;  %v6942_v50 = vsel %vm19728_vm11, %v6939_v26, %v8576_v22 }
 0xb54   :  { %v8580_v59 = vpop.permute.xlu0 %8579 }
 0xb55   :  { %v8582_v40 = vunpack.i.h.bf16 %v8580_v59  ;;  %v8581_v38 = vunpack.i.l.bf16 %v8580_v59 }
 0xb57   :  { %v6945_v56 = vsel %vm19729_vm8, %v6942_v50, %v8581_v38  ;;  %v6944_v61 = vsel %vm19730_vm14, %v6941_v1, %v8582_v40 }
 0xb58   :  { %7064 = vmatprep.mubr.f32.mxu1 %v6945_v56  ;;  %v6851_v44 = vpop.permute.xlu0 %6850 }
 0xb59   :  { %7065 = vmatmul.mubr.f32.vlgmr.msra.gmra.mxu1 %v6944_v61 }
 0xb5c   :  { %v6883_v54 = vpop.permute.xlu0 %6882 }
 0xb60   :  { %v8570_v52 = vpop.permute.xlu1 %8569  ;;  %v6904_v46 = vpop.permute.xlu0 %6903 }
 0xb61   :  { %v8571_v11 = vunpack.i.l.bf16 %v8570_v52  ;;  %v8572_v5 = vunpack.i.h.bf16 %v8570_v52 }
 0xb63   :  { %v6949_v53 = vsel %vm2915_vm12, %v6947_v14, %v8571_v11  ;;  %v6950_v45 = vsel %vm2915_vm12, %v6948_v30, %v8572_v5  ;;  %v7268_v14 = vld [vmem:[%s17649_s8] ss:$0 sm:$0xff] }
 0xb64   :  { %v6819_v25 = vpop.permute.xlu1 %6818  ;;  %v6914_v58 = vpop.permute.xlu0 %6913  ;;  %v6952_v62 = vsel %vm19735_vm4, %v6950_v45, %v6904_v46 }
 0xb65   :  { %v6951_v60 = vsel %vm19731_vm10, %v6949_v53, %v6819_v25 }
 0xb68   :  { %v6835_v31 = vpop.permute.xlu1 %6834  ;;  %v6924_v9 = vpop.permute.xlu0 %6923 }
 0xb69   :  { %v6953_v51 = vsel %vm2958_vm13, %v6951_v60, %v6835_v31 }
 0xb6a   :  { %v6955_v47 = vsel %vm2980_vm0, %v6953_v51, %v6851_v44 }
 0xb6c   :  { %v6867_v28 = vpop.permute.xlu1 %6866 }
 0xb6d   :  { %v6957_v63 = vsel %vm19732_vm1, %v6955_v47, %v6867_v28 }
 0xb6e   :  { %v6959_v21 = vsel %vm19733_vm9, %v6957_v63, %v6883_v54 }
 0xb6f   :  { %7069 = vmatprep.mubr.f32.mxu1 %v6959_v21 }
 0xb70   :  { %v6786_v35 = vpop.permute.xlu1 %6785  ;;  %7070 = vmatmul.mubr.f32.gmra.mxu1 %v6945_v56 }
 0xb71   :  { %v6928_v18 = vsel %vm2894_vm7, %v17390_v4, %v6786_v35  ;;  %vm19736_vm7 = vmmov %vm19732_vm1 }
 0xb72   :  { %v6931_v33 = vsel %vm2915_vm12, %v6928_v18, %v8571_v11 }
 0xb73   :  { %v6934_v36 = vsel %vm19734_vm2, %v6931_v33, %v6819_v25 }
 0xb74   :  { %v6909_v41 = vpop.permute.xlu1 %6908  ;;  %v6937_v32 = vsel %vm2958_vm13, %v6934_v36, %v6835_v31 }
 0xb75   :  { %v6954_v15 = vsel %vm2958_vm13, %v6952_v62, %v6909_v41  ;;  %v6940_v8 = vsel %vm2980_vm0, %v6937_v32, %v6851_v44  ;;  %vm19740_vm13 = vcmask 260096  }
 0xb76   :  { %v6956_v23 = vsel %vm2980_vm0, %v6954_v15, %v6914_v58  ;;  %v6943_v4 = vsel %vm19736_vm7, %v6940_v8, %v6867_v28  ;;  %vm19741_vm0 = vcmask 124928  }
 0xb77   :  { %v6946_v48 = vsel %vm19739_vm5, %v6943_v4, %v6883_v54 }
 0xb78   :  { %v6919_v27 = vpop.permute.xlu1 %6918 }
 0xb79   :  { %v6958_v20 = vsel %vm19737_vm6, %v6956_v23, %v6919_v27 }
 0xb7a   :  { %v6960_v43 = vsel %vm19738_vm15, %v6958_v20, %v6924_v9 }
 0xb7b   :  { %7074 = vmatprep.mubr.f32.mxu1 %v6960_v43 }
 0xb7c   :  { %7075 = vmatmul.mubr.f32.gmra.mxu1 %v6946_v48 }
 0xc19   :  { %v7461_v3 = vpop.f32.mrf.mxu1 }
 0xc1b   :  { %v7462_v42 = vpop.f32.mrf.mxu1 }
 0xc1c   :  { %v7463_v2 = vadd.f32 %v7462_v42, %v7461_v3 }
 0xc1e   :  { %v7067_v7 = vadd.f32 %v7463_v2, %v7267_v17 }
 0xc20   :  { %v7080_v37 = vmax.f32 %v7067_v7, 0.0 }
 0xc22   :  { %7083 = vst.msk [vmem:[#allocation4] sm:$0xff] %vm2915_vm12, %v7080_v37 }
 0xc30   :  { %v7464_v10 = vpop.f32.mrf.mxu1 }
 0xc32   :  { %v7465_v6 = vpop.f32.mrf.mxu1 }
 0xc33   :  { %v7466_v19 = vadd.f32 %v7465_v6, %v7464_v10 }
 0xc35   :  { %v7072_v16 = vadd.f32 %v7466_v19, %v7267_v17 }
 0xc37   :  { %v7081_v22 = vmax.f32 %v7072_v16, 0.0 }
 0xc39   :  { %7084 = vst.msk [vmem:[#allocation4 + $0x8] sm:$0xff] %vm2915_vm12, %v7081_v22 }
 0xc3c   :  { %v7467_v55 = vpop.f32.mrf.mxu1 }
 0xc3e   :  { %v7468_v24 = vpop.f32.mrf.mxu1 }
 0xc3f   :  { %v7469_v59 = vadd.f32 %v7468_v24, %v7467_v55 }
 0xc40   :  { %v7086_v57 = vld [vmem:[#allocation4] ss:$6 sm:$0x7]  ;;  %v7087_v12 = vld [vmem:[#allocation4 + $0x1] ss:$6 sm:$0x7] }
 0xc41   :  { %v7077_v40 = vadd.f32 %v7469_v59, %v7267_v17  ;;  %v7088_v26 = vmax.f32 %v7086_v57, %v7087_v12  ;;  %v7089_v1 = vld [vmem:[#allocation4 + $0x2] ss:$6 sm:$0x7]  ;;  %v7091_v56 = vld [vmem:[#allocation4 + $0x3] ss:$6 sm:$0x7] }
 0xc43   :  { %v7082_v38 = vmax.f32 %v7077_v40, 0.0  ;;  %v7090_v50 = vmax.f32 %v7088_v26, %v7089_v1 }
 0xc45   :  { %7085 = vst.msk [vmem:[#allocation4 + $0x10] sm:$0x7f] %vm19740_vm13, %v7082_v38  ;;  %v7092_v61 = vmax.f32 %v7090_v50, %v7091_v56 }
 0xc4c   :  { %v7093_v0 = vld [vmem:[#allocation4 + $0x4] ss:$6 sm:$0x7]  ;;  %v7095_v44 = vld [vmem:[#allocation4 + $0x5] ss:$6 sm:$0x7] }
 0xc4d   :  { %v7094_v52 = vmax.f32 %v7092_v61, %v7093_v0 }
 0xc4f   :  { %v7096_v11 = vmax.f32 %v7094_v52, %v7095_v44 }
 0xc51   :  { %7685 = vmatmul.mubr.msk.f32.vlgmr.msra.gmra.mxu0 %vm2915_vm12, %v7096_v11 }
 0xd11   :  { %v7177_v25 = vpop.f32.mrf.mxu0 }
 0xd12   :  { %v7178_v53 = vadd.f32 %v7268_v14, %v7177_v25 }
 0xd13   :  { %v7686_v54 = vpop.f32.mrf.mxu0 }
 0xd14   :  { %7270 = vst.msk [vmem:[%s17650_s9 + $0x4] sm:$0x7] %vm19741_vm0, %v7178_v53 }

</bundles_post_ra>
